<compile_context>
chip_gen: v5e
topology: v5e:2x2
jax: 0.10.0
libtpu: 0.0.40
codegen_flags: <defaults>
</compile_context>

<pallas_src>
import functools

import jax
import jax.numpy as jnp
from jax.experimental import pallas as pl
from jax.experimental.pallas import tpu as pltpu


def _cdiv(a, b):
    return -(-a // b)


def _round_up(x, a):
    return _cdiv(x, a) * a


def _vmem_capacity_bytes(default_bytes=64 * 1024 * 1024):
    """Per-core VMEM capacity; conservative fallback if the query is unavailable."""
    try:
        info = pltpu.get_tpu_info()
        cap = getattr(info, "vmem_capacity_bytes", None)
        if cap:
            return int(cap)
    except Exception:
        pass
    return default_bytes


def _vmem_limit_bytes():
    cap = _vmem_capacity_bytes()
    # 48 MiB clamp keeps the limit safely below v7x's 64 MiB per-TC VMEM (even if the
    # query reports a per-chip figure) and leaves headroom for compiler scratch and
    # semaphores; a ~1024-row tile (the measured pipelining sweet spot) still fits.
    return min(int(cap * 0.6), 48 * 1024 * 1024)


def _pick_tile_m(M, ff, c, oc, in_bytes, out_bytes, vmem_budget):
    """tile_m with honest VMEM accounting; >= 8 grid steps when M allows; 128/16 aligned."""
    c_v = _round_up(c, 128)          # VMEM tiles pad the minor (lane) dim to 128
    oc_v = _round_up(oc, 128)
    # Single-buffered constant operands (Buffered(1)): bf16 weights + gamma/beta/bias.
    const_bytes = ff * c_v * oc_v * 2 + 2 * c_v * 4 + oc_v * 4
    budget = max(vmem_budget - const_bytes, vmem_budget // 4)
    # Per-output-row bytes: double-buffered input patches + double-buffered output tile
    # + per-patch f32 LN intermediates (x, xc, xn + bf16 copy) + f32 accumulator.
    per_row = (2 * ff * c_v * in_bytes
               + 2 * oc_v * out_bytes
               + 4 * c_v * 4 + c_v * 2
               + oc_v * 4)
    tm_max = max(16, min(int(budget // per_row), 1024))
    g = max(1, _cdiv(M, tm_max))
    # Target >= 8 grid steps (>= 4 per v7x TensorCore) once tiles reach 128 rows:
    # restores DMA/compute overlap and megacore balance at ~0.35 us/step overhead.
    g = max(g, min(8, _cdiv(M, 128)))
    tm = _cdiv(M, g)
    tm = _round_up(tm, 128) if tm >= 128 else _round_up(tm, 16)
    return int(max(16, min(tm, _round_up(tm_max, 16))))


def _downsample_kernel(x_ref, gamma_ref, beta_ref, w_ref, b_ref, o_ref, *, eps):
    # x_ref:     (FF, TM, C)   patch-major input pixels (FF = f*f)
    # gamma_ref: (1, C) f32, beta_ref: (1, C) f32
    # w_ref:     (FF, C, OC)   bf16, w_ref[p, c, oc] = W[oc, c, 0, kh, kw], p = kh*f + kw
    # b_ref:     (1, OC) f32
    # o_ref:     (TM, OC)
    gamma = gamma_ref[...]
    beta = beta_ref[...]
    acc = jnp.broadcast_to(b_ref[...].astype(jnp.float32), o_ref.shape)
    ff = x_ref.shape[0]
    # Per-patch LayerNorm + matmul: f32 intermediates live for one (TM, C) patch at a time
    # (FFx smaller peak scratch than normalizing the whole tile up front), and the LLO
    # scheduler can overlap VPU LN of patch p+1 with the MXU matmul of patch p.
    for p in range(ff):                               # static unroll; xn/w[p] are views
        x = x_ref[p].astype(jnp.float32)              # (TM, C)
        u = jnp.mean(x, axis=-1, keepdims=True)       # channels_first LN: stats over C
        xc = x - u
        s = jnp.mean(xc * xc, axis=-1, keepdims=True)
        xn = xc * jax.lax.rsqrt(s + eps)
        xn = xn * gamma + beta                        # (1, C) broadcasts over (TM, C)
        acc = acc + jnp.dot(xn.astype(w_ref.dtype), w_ref[p],
                            preferred_element_type=jnp.float32)
    o_ref[...] = acc.astype(o_ref.dtype)


def _in_specs(FF, tile_m, C, OC, single_buffer_consts):
    kw = dict(pipeline_mode=pl.Buffered(1)) if single_buffer_consts else {}
    return [
        pl.BlockSpec((FF, tile_m, C), lambda i: (0, i, 0)),
        pl.BlockSpec((1, C), lambda i: (0, 0), **kw),
        pl.BlockSpec((1, C), lambda i: (0, 0), **kw),
        pl.BlockSpec((FF, C, OC), lambda i: (0, 0, 0), **kw),
        pl.BlockSpec((1, OC), lambda i: (0, 0), **kw),
    ]


def downsample(x, gamma, beta, w, b, downsample_factor, *, eps=1e-6, tile_m=None,
               matmul_dtype=jnp.bfloat16, input_dtype=None, channels_last_out=False):
    """x: (N, C, D, H, W), w: (OC, C, 1, f, f), b: (OC,). Returns (N, OC, D, H//f, W//f).

    input_dtype=jnp.bfloat16 halves the patch-transpose write and kernel DMA bytes (the
    dominant HBM traffic at real widths) at the cost of LayerNorm statistics on
    bf16-rounded inputs; input_dtype=None keeps x's dtype (f32 numerics-parity path).
    channels_last_out=True returns (N, D, Ho, Wo, OC) and skips the trailing transpose.
    """
    N, C, D, H, W = x.shape
    f = downsample_factor
    assert H % f == 0 and W % f == 0, "spatial dims must be divisible by downsample_factor"
    OC = w.shape[0]
    Ho, Wo = H // f, W // f
    M = N * D * Ho * Wo
    FF = f * f
    out_dtype = x.dtype

    if input_dtype is not None and x.dtype != input_dtype:
        x = x.astype(input_dtype)     # cast before the transpose: halves its write bytes

    # Single XLA rearrangement pass: (N,C,D,H,W) -> (kh,kw,N,D,Ho,Wo,C) -> (FF, M, C).
    # TODO(synk): fuse the f x f patch gather into the kernel (memory_space=pl.ANY +
    # strided make_async_copy) when C >= 128 so this standalone pass disappears.
    x7 = x.reshape(N, C, D, Ho, f, Wo, f)
    x_p = jnp.transpose(x7, (4, 6, 0, 2, 3, 5, 1)).reshape(FF, M, C)

    # Conv weight (OC, C, 1, f, f) -> (FF, C, OC) bf16, p = kh*f + kw.
    w_r = jnp.transpose(w[:, :, 0, :, :], (2, 3, 1, 0)).reshape(FF, C, OC).astype(matmul_dtype)
    gamma2 = gamma.reshape(1, C).astype(jnp.float32)
    beta2 = beta.reshape(1, C).astype(jnp.float32)
    b2 = b.reshape(1, OC).astype(jnp.float32)

    vmem_limit = _vmem_limit_bytes()
    if tile_m is None:
        tile_m = _pick_tile_m(M, FF, C, OC,
                              in_bytes=x_p.dtype.itemsize,
                              out_bytes=jnp.dtype(out_dtype).itemsize,
                              vmem_budget=int(vmem_limit * 0.85))

    # Pad M so any shape works; padded rows are finite junk and sliced off afterwards.
    M_pad = _cdiv(M, tile_m) * tile_m
    if M_pad != M:
        x_p = jnp.pad(x_p, ((0, 0), (0, M_pad - M), (0, 0)))
    grid = (M_pad // tile_m,)

    def call(single_buffer_consts):
        return pl.pallas_call(
            functools.partial(_downsample_kernel, eps=eps),
            out_shape=jax.ShapeDtypeStruct((M_pad, OC), out_dtype),
            grid=grid,
            in_specs=_in_specs(FF, tile_m, C, OC, single_buffer_consts),
            out_specs=pl.BlockSpec((tile_m, OC), lambda i: (i, 0)),
            compiler_params=pltpu.CompilerParams(
                dimension_semantics=("parallel",),
                vmem_limit_bytes=vmem_limit),
        )(x_p, gamma2, beta2, w_r, b2)

    try:
        out = call(True)   # Buffered(1) on constant-index operands: no wasted double-buffer
    except Exception:
        # TODO(synk): drop fallback once pl.Buffered(1) on constant operands is confirmed
        # available across deployed jax versions.
        out = call(False)

    out = out[:M].reshape(N, D, Ho, Wo, OC)
    if channels_last_out:
        return out          # lets the caller consume channels-last (one fewer HBM pass)
    return jnp.transpose(out, (0, 4, 1, 2, 3))                  # (N, OC, D, Ho, Wo)


def _reference(x, gamma, beta, w, b, f, eps=1e-6):
    """Pure-JAX f32 reference matching the PyTorch module semantics."""
    u = jnp.mean(x, axis=1, keepdims=True)
    s = jnp.mean((x - u) ** 2, axis=1, keepdims=True)
    xn = (x - u) / jnp.sqrt(s + eps)
    xn = gamma[None, :, None, None, None] * xn + beta[None, :, None, None, None]
    out = jax.lax.conv_general_dilated(
        xn, w, window_strides=(1, f, f), padding="VALID",
        dimension_numbers=("NCDHW", "OIDHW", "NCDHW"))
    return out + b[None, :, None, None, None]


if __name__ == "__main__":
    key = jax.random.PRNGKey(0)
    k1, k2, k3 = jax.random.split(key, 3)

    # Small shapes consistent with the module: Conv3d input is NCDHW.
    N, C, D, H, W = 2, 4, 4, 16, 16
    OC, f = 8, 2

    x = jax.random.normal(k1, (N, C, D, H, W), jnp.float32)

    # Deterministic params (LayerNorm: ones/zeros; Conv3d: uniform(+/-1/sqrt(fan_in))).
    gamma = jnp.ones((C,), jnp.float32)
    beta = jnp.zeros((C,), jnp.float32)
    fan_in = C * 1 * f * f
    bound = 1.0 / (fan_in ** 0.5)
    w = jax.random.uniform(k2, (OC, C, 1, f, f), jnp.float32, minval=-bound, maxval=bound)
    b = jax.random.uniform(k3, (OC,), jnp.float32, minval=-bound, maxval=bound)

    # Parity path: f32 input keeps LayerNorm statistics exactly matching the f32 reference;
    # only the bf16 matmul operands deviate.
    out = jax.block_until_ready(downsample(x, gamma, beta, w, b, f))
    ref = _reference(x, gamma, beta, w, b, f)
    assert out.shape == (N, OC, D, H // f, W // f)
    err = float(jnp.max(jnp.abs(out - ref)))
    assert jnp.allclose(out, ref, atol=5e-2, rtol=5e-2), \
        f"f32-input path mismatch vs reference, max err {err}"

    # Fast path: bf16 input halves transpose-write + kernel-DMA bytes. Compare against the
    # reference fed the same bf16-rounded input so the check stays deterministic.
    out_fast = jax.block_until_ready(
        downsample(x, gamma, beta, w, b, f, input_dtype=jnp.bfloat16))
    ref_fast = _reference(x.astype(jnp.bfloat16).astype(jnp.float32), gamma, beta, w, b, f)
    err_fast = float(jnp.max(jnp.abs(out_fast - ref_fast)))
    assert out_fast.shape == (N, OC, D, H // f, W // f)
    assert jnp.allclose(out_fast, ref_fast, atol=5e-2, rtol=5e-2), \
        f"bf16-input path mismatch vs reference, max err {err_fast}"

    print("KERNEL_OK")
</pallas_src>

<mosaic_0001>
module attributes {stable_mosaic.version = 11 : i64} {
  func.func @_downsample_kernel(%arg0: i32, %arg1: memref<4x128x4xf32, #tpu.memory_space<vmem>>, %arg2: memref<1x4xf32, #tpu.memory_space<vmem>>, %arg3: memref<1x4xf32, #tpu.memory_space<vmem>>, %arg4: memref<4x4x8xbf16, #tpu.memory_space<vmem>>, %arg5: memref<1x8xf32, #tpu.memory_space<vmem>>, %arg6: memref<128x8xf32, #tpu.memory_space<vmem>>) attributes {dimension_semantics = [#tpu.dimension_semantics<parallel>], iteration_bounds = array<i64: 4>, scalar_prefetch = 0 : i64, scratch_operands = 0 : i64, tpu.core_type = #tpu.core_type<tc>, window_params = [{transform_indices = @transform_0, window_bounds = array<i64: 4, 128, 4>}, {pipeline_mode = #tpu.pipeline_mode<synchronous>, transform_indices = @transform_1, window_bounds = array<i64: 1, 4>}, {pipeline_mode = #tpu.pipeline_mode<synchronous>, transform_indices = @transform_2, window_bounds = array<i64: 1, 4>}, {pipeline_mode = #tpu.pipeline_mode<synchronous>, transform_indices = @transform_3, window_bounds = array<i64: 4, 4, 8>}, {pipeline_mode = #tpu.pipeline_mode<synchronous>, transform_indices = @transform_4, window_bounds = array<i64: 1, 8>}, {transform_indices = @transform_5, window_bounds = array<i64: 128, 8>}]} {
    %c0 = arith.constant 0 : index
    %c0_0 = arith.constant 0 : index
    %0 = vector.load %arg2[%c0, %c0_0] : memref<1x4xf32, #tpu.memory_space<vmem>>, vector<1x4xf32>
    %c0_1 = arith.constant 0 : index
    %c0_2 = arith.constant 0 : index
    %1 = vector.load %arg3[%c0_1, %c0_2] : memref<1x4xf32, #tpu.memory_space<vmem>>, vector<1x4xf32>
    %c0_3 = arith.constant 0 : index
    %c0_4 = arith.constant 0 : index
    %2 = vector.load %arg5[%c0_3, %c0_4] : memref<1x8xf32, #tpu.memory_space<vmem>>, vector<1x8xf32>
    %3 = vector.shape_cast %2 : vector<1x8xf32> to vector<1x8xf32>
    %4 = vector.broadcast %3 : vector<1x8xf32> to vector<128x8xf32>
    %c0_5 = arith.constant 0 : index
    %c0_6 = arith.constant 0 : index
    %c0_7 = arith.constant 0 : index
    %5 = vector.load %arg1[%c0_5, %c0_6, %c0_7] : memref<4x128x4xf32, #tpu.memory_space<vmem>>, vector<1x128x4xf32>
    %6 = vector.shape_cast %5 : vector<1x128x4xf32> to vector<128x4xf32>
    %cst = arith.constant dense<0.000000e+00> : vector<128xf32>
    %7 = vector.multi_reduction <add>, %6, %cst [1] : vector<128x4xf32> to vector<128xf32>
    %8 = vector.shape_cast %7 : vector<128xf32> to vector<128x1xf32>
    %cst_8 = arith.constant 4.000000e+00 : f32
    %9 = vector.broadcast %cst_8 : f32 to vector<128x1xf32>
    %10 = arith.divf %8, %9 : vector<128x1xf32>
    %11 = vector.broadcast %10 : vector<128x1xf32> to vector<128x4xf32>
    %12 = arith.subf %6, %11 : vector<128x4xf32>
    %13 = arith.mulf %12, %12 : vector<128x4xf32>
    %cst_9 = arith.constant dense<0.000000e+00> : vector<128xf32>
    %14 = vector.multi_reduction <add>, %13, %cst_9 [1] : vector<128x4xf32> to vector<128xf32>
    %15 = vector.shape_cast %14 : vector<128xf32> to vector<128x1xf32>
    %cst_10 = arith.constant 4.000000e+00 : f32
    %16 = vector.broadcast %cst_10 : f32 to vector<128x1xf32>
    %17 = arith.divf %15, %16 : vector<128x1xf32>
    %cst_11 = arith.constant 9.99999997E-7 : f32
    %18 = vector.broadcast %cst_11 : f32 to vector<128x1xf32>
    %19 = arith.addf %17, %18 : vector<128x1xf32>
    %20 = math.rsqrt %19 : vector<128x1xf32>
    %21 = vector.broadcast %20 : vector<128x1xf32> to vector<128x4xf32>
    %22 = arith.mulf %12, %21 : vector<128x4xf32>
    %23 = vector.broadcast %0 : vector<1x4xf32> to vector<128x4xf32>
    %24 = arith.mulf %22, %23 : vector<128x4xf32>
    %25 = vector.broadcast %1 : vector<1x4xf32> to vector<128x4xf32>
    %26 = arith.addf %24, %25 : vector<128x4xf32>
    %27 = arith.truncf %26 : vector<128x4xf32> to vector<128x4xbf16>
    %c0_12 = arith.constant 0 : index
    %c0_13 = arith.constant 0 : index
    %c0_14 = arith.constant 0 : index
    %28 = vector.load %arg4[%c0_12, %c0_13, %c0_14] : memref<4x4x8xbf16, #tpu.memory_space<vmem>>, vector<1x4x8xbf16>
    %29 = vector.shape_cast %28 : vector<1x4x8xbf16> to vector<4x8xbf16>
    %cst_15 = arith.constant dense<0.000000e+00> : vector<128x8xf32>
    %30 = tpu.matmul %27, %29, %cst_15 {dimension_numbers = #tpu.dot_dimension_numbers<[1], [0], [0], [1], [0, 0, 1, 1], [], []>} : vector<128x4xbf16>, vector<4x8xbf16>, vector<128x8xf32> -> vector<128x8xf32>
    %31 = arith.addf %4, %30 : vector<128x8xf32>
    %c1 = arith.constant 1 : index
    %c0_16 = arith.constant 0 : index
    %c0_17 = arith.constant 0 : index
    %32 = vector.load %arg1[%c1, %c0_16, %c0_17] : memref<4x128x4xf32, #tpu.memory_space<vmem>>, vector<1x128x4xf32>
    %33 = vector.shape_cast %32 : vector<1x128x4xf32> to vector<128x4xf32>
    %cst_18 = arith.constant dense<0.000000e+00> : vector<128xf32>
    %34 = vector.multi_reduction <add>, %33, %cst_18 [1] : vector<128x4xf32> to vector<128xf32>
    %35 = vector.shape_cast %34 : vector<128xf32> to vector<128x1xf32>
    %cst_19 = arith.constant 4.000000e+00 : f32
    %36 = vector.broadcast %cst_19 : f32 to vector<128x1xf32>
    %37 = arith.divf %35, %36 : vector<128x1xf32>
    %38 = vector.broadcast %37 : vector<128x1xf32> to vector<128x4xf32>
    %39 = arith.subf %33, %38 : vector<128x4xf32>
    %40 = arith.mulf %39, %39 : vector<128x4xf32>
    %cst_20 = arith.constant dense<0.000000e+00> : vector<128xf32>
    %41 = vector.multi_reduction <add>, %40, %cst_20 [1] : vector<128x4xf32> to vector<128xf32>
    %42 = vector.shape_cast %41 : vector<128xf32> to vector<128x1xf32>
    %cst_21 = arith.constant 4.000000e+00 : f32
    %43 = vector.broadcast %cst_21 : f32 to vector<128x1xf32>
    %44 = arith.divf %42, %43 : vector<128x1xf32>
    %cst_22 = arith.constant 9.99999997E-7 : f32
    %45 = vector.broadcast %cst_22 : f32 to vector<128x1xf32>
    %46 = arith.addf %44, %45 : vector<128x1xf32>
    %47 = math.rsqrt %46 : vector<128x1xf32>
    %48 = vector.broadcast %47 : vector<128x1xf32> to vector<128x4xf32>
    %49 = arith.mulf %39, %48 : vector<128x4xf32>
    %50 = vector.broadcast %0 : vector<1x4xf32> to vector<128x4xf32>
    %51 = arith.mulf %49, %50 : vector<128x4xf32>
    %52 = vector.broadcast %1 : vector<1x4xf32> to vector<128x4xf32>
    %53 = arith.addf %51, %52 : vector<128x4xf32>
    %54 = arith.truncf %53 : vector<128x4xf32> to vector<128x4xbf16>
    %c1_23 = arith.constant 1 : index
    %c0_24 = arith.constant 0 : index
    %c0_25 = arith.constant 0 : index
    %55 = vector.load %arg4[%c1_23, %c0_24, %c0_25] : memref<4x4x8xbf16, #tpu.memory_space<vmem>>, vector<1x4x8xbf16>
    %56 = vector.shape_cast %55 : vector<1x4x8xbf16> to vector<4x8xbf16>
    %cst_26 = arith.constant dense<0.000000e+00> : vector<128x8xf32>
    %57 = tpu.matmul %54, %56, %cst_26 {dimension_numbers = #tpu.dot_dimension_numbers<[1], [0], [0], [1], [0, 0, 1, 1], [], []>} : vector<128x4xbf16>, vector<4x8xbf16>, vector<128x8xf32> -> vector<128x8xf32>
    %58 = arith.addf %31, %57 : vector<128x8xf32>
    %c2 = arith.constant 2 : index
    %c0_27 = arith.constant 0 : index
    %c0_28 = arith.constant 0 : index
    %59 = vector.load %arg1[%c2, %c0_27, %c0_28] : memref<4x128x4xf32, #tpu.memory_space<vmem>>, vector<1x128x4xf32>
    %60 = vector.shape_cast %59 : vector<1x128x4xf32> to vector<128x4xf32>
    %cst_29 = arith.constant dense<0.000000e+00> : vector<128xf32>
    %61 = vector.multi_reduction <add>, %60, %cst_29 [1] : vector<128x4xf32> to vector<128xf32>
    %62 = vector.shape_cast %61 : vector<128xf32> to vector<128x1xf32>
    %cst_30 = arith.constant 4.000000e+00 : f32
    %63 = vector.broadcast %cst_30 : f32 to vector<128x1xf32>
    %64 = arith.divf %62, %63 : vector<128x1xf32>
    %65 = vector.broadcast %64 : vector<128x1xf32> to vector<128x4xf32>
    %66 = arith.subf %60, %65 : vector<128x4xf32>
    %67 = arith.mulf %66, %66 : vector<128x4xf32>
    %cst_31 = arith.constant dense<0.000000e+00> : vector<128xf32>
    %68 = vector.multi_reduction <add>, %67, %cst_31 [1] : vector<128x4xf32> to vector<128xf32>
    %69 = vector.shape_cast %68 : vector<128xf32> to vector<128x1xf32>
    %cst_32 = arith.constant 4.000000e+00 : f32
    %70 = vector.broadcast %cst_32 : f32 to vector<128x1xf32>
    %71 = arith.divf %69, %70 : vector<128x1xf32>
    %cst_33 = arith.constant 9.99999997E-7 : f32
    %72 = vector.broadcast %cst_33 : f32 to vector<128x1xf32>
    %73 = arith.addf %71, %72 : vector<128x1xf32>
    %74 = math.rsqrt %73 : vector<128x1xf32>
    %75 = vector.broadcast %74 : vector<128x1xf32> to vector<128x4xf32>
    %76 = arith.mulf %66, %75 : vector<128x4xf32>
    %77 = vector.broadcast %0 : vector<1x4xf32> to vector<128x4xf32>
    %78 = arith.mulf %76, %77 : vector<128x4xf32>
    %79 = vector.broadcast %1 : vector<1x4xf32> to vector<128x4xf32>
    %80 = arith.addf %78, %79 : vector<128x4xf32>
    %81 = arith.truncf %80 : vector<128x4xf32> to vector<128x4xbf16>
    %c2_34 = arith.constant 2 : index
    %c0_35 = arith.constant 0 : index
    %c0_36 = arith.constant 0 : index
    %82 = vector.load %arg4[%c2_34, %c0_35, %c0_36] : memref<4x4x8xbf16, #tpu.memory_space<vmem>>, vector<1x4x8xbf16>
    %83 = vector.shape_cast %82 : vector<1x4x8xbf16> to vector<4x8xbf16>
    %cst_37 = arith.constant dense<0.000000e+00> : vector<128x8xf32>
    %84 = tpu.matmul %81, %83, %cst_37 {dimension_numbers = #tpu.dot_dimension_numbers<[1], [0], [0], [1], [0, 0, 1, 1], [], []>} : vector<128x4xbf16>, vector<4x8xbf16>, vector<128x8xf32> -> vector<128x8xf32>
    %85 = arith.addf %58, %84 : vector<128x8xf32>
    %c3 = arith.constant 3 : index
    %c0_38 = arith.constant 0 : index
    %c0_39 = arith.constant 0 : index
    %86 = vector.load %arg1[%c3, %c0_38, %c0_39] : memref<4x128x4xf32, #tpu.memory_space<vmem>>, vector<1x128x4xf32>
    %87 = vector.shape_cast %86 : vector<1x128x4xf32> to vector<128x4xf32>
    %cst_40 = arith.constant dense<0.000000e+00> : vector<128xf32>
    %88 = vector.multi_reduction <add>, %87, %cst_40 [1] : vector<128x4xf32> to vector<128xf32>
    %89 = vector.shape_cast %88 : vector<128xf32> to vector<128x1xf32>
    %cst_41 = arith.constant 4.000000e+00 : f32
    %90 = vector.broadcast %cst_41 : f32 to vector<128x1xf32>
    %91 = arith.divf %89, %90 : vector<128x1xf32>
    %92 = vector.broadcast %91 : vector<128x1xf32> to vector<128x4xf32>
    %93 = arith.subf %87, %92 : vector<128x4xf32>
    %94 = arith.mulf %93, %93 : vector<128x4xf32>
    %cst_42 = arith.constant dense<0.000000e+00> : vector<128xf32>
    %95 = vector.multi_reduction <add>, %94, %cst_42 [1] : vector<128x4xf32> to vector<128xf32>
    %96 = vector.shape_cast %95 : vector<128xf32> to vector<128x1xf32>
    %cst_43 = arith.constant 4.000000e+00 : f32
    %97 = vector.broadcast %cst_43 : f32 to vector<128x1xf32>
    %98 = arith.divf %96, %97 : vector<128x1xf32>
    %cst_44 = arith.constant 9.99999997E-7 : f32
    %99 = vector.broadcast %cst_44 : f32 to vector<128x1xf32>
    %100 = arith.addf %98, %99 : vector<128x1xf32>
    %101 = math.rsqrt %100 : vector<128x1xf32>
    %102 = vector.broadcast %101 : vector<128x1xf32> to vector<128x4xf32>
    %103 = arith.mulf %93, %102 : vector<128x4xf32>
    %104 = vector.broadcast %0 : vector<1x4xf32> to vector<128x4xf32>
    %105 = arith.mulf %103, %104 : vector<128x4xf32>
    %106 = vector.broadcast %1 : vector<1x4xf32> to vector<128x4xf32>
    %107 = arith.addf %105, %106 : vector<128x4xf32>
    %108 = arith.truncf %107 : vector<128x4xf32> to vector<128x4xbf16>
    %c3_45 = arith.constant 3 : index
    %c0_46 = arith.constant 0 : index
    %c0_47 = arith.constant 0 : index
    %109 = vector.load %arg4[%c3_45, %c0_46, %c0_47] : memref<4x4x8xbf16, #tpu.memory_space<vmem>>, vector<1x4x8xbf16>
    %110 = vector.shape_cast %109 : vector<1x4x8xbf16> to vector<4x8xbf16>
    %cst_48 = arith.constant dense<0.000000e+00> : vector<128x8xf32>
    %111 = tpu.matmul %108, %110, %cst_48 {dimension_numbers = #tpu.dot_dimension_numbers<[1], [0], [0], [1], [0, 0, 1, 1], [], []>} : vector<128x4xbf16>, vector<4x8xbf16>, vector<128x8xf32> -> vector<128x8xf32>
    %112 = arith.addf %85, %111 : vector<128x8xf32>
    %c0_49 = arith.constant 0 : index
    %c0_50 = arith.constant 0 : index
    %113 = vector.load %arg6[%c0_49, %c0_50] : memref<128x8xf32, #tpu.memory_space<vmem>>, vector<128x8xf32>
    tpu.vector_store %arg6[%c0_49, %c0_50], %112 {strides = array<i32>} : memref<128x8xf32, #tpu.memory_space<vmem>>, vector<128x8xf32>,
    return
  }
  func.func @transform_0(%arg0: i32) -> (i32, i32, i32) {
    %c0_i32 = arith.constant 0 : i32
    %c0_i32_0 = arith.constant 0 : i32
    %c0_i32_1 = arith.constant 0 : i32
    return %c0_i32, %arg0, %c0_i32_0 : i32, i32, i32
  }
  func.func @transform_1(%arg0: i32) -> (i32, i32) {
    %c0_i32 = arith.constant 0 : i32
    %c0_i32_0 = arith.constant 0 : i32
    %c0_i32_1 = arith.constant 0 : i32
    return %c0_i32, %c0_i32_0 : i32, i32
  }
  func.func @transform_2(%arg0: i32) -> (i32, i32) {
    %c0_i32 = arith.constant 0 : i32
    %c0_i32_0 = arith.constant 0 : i32
    %c0_i32_1 = arith.constant 0 : i32
    return %c0_i32, %c0_i32_0 : i32, i32
  }
  func.func @transform_3(%arg0: i32) -> (i32, i32, i32) {
    %c0_i32 = arith.constant 0 : i32
    %c0_i32_0 = arith.constant 0 : i32
    %c0_i32_1 = arith.constant 0 : i32
    %c0_i32_2 = arith.constant 0 : i32
    return %c0_i32, %c0_i32_0, %c0_i32_1 : i32, i32, i32
  }
  func.func @transform_4(%arg0: i32) -> (i32, i32) {
    %c0_i32 = arith.constant 0 : i32
    %c0_i32_0 = arith.constant 0 : i32
    %c0_i32_1 = arith.constant 0 : i32
    return %c0_i32, %c0_i32_0 : i32, i32
  }
  func.func @transform_5(%arg0: i32) -> (i32, i32) {
    %c0_i32 = arith.constant 0 : i32
    %c0_i32_0 = arith.constant 0 : i32
    return %arg0, %c0_i32 : i32, i32
  }
}

module attributes {stable_mosaic.version = 11 : i64} {
  func.func @_downsample_kernel(%arg0: i32, %arg1: memref<4x128x4xf32, #tpu.memory_space<vmem>>, %arg2: memref<1x4xf32, #tpu.memory_space<vmem>>, %arg3: memref<1x4xf32, #tpu.memory_space<vmem>>, %arg4: memref<4x4x8xbf16, #tpu.memory_space<vmem>>, %arg5: memref<1x8xf32, #tpu.memory_space<vmem>>, %arg6: memref<128x8xf32, #tpu.memory_space<vmem>>) attributes {dimension_semantics = [#tpu.dimension_semantics<parallel>], iteration_bounds = array<i64: 4>, scalar_prefetch = 0 : i64, scratch_operands = 0 : i64, tpu.core_type = #tpu.core_type<tc>, window_params = [{transform_indices = @transform_0, window_bounds = array<i64: 4, 128, 4>}, {pipeline_mode = #tpu.pipeline_mode<synchronous>, transform_indices = @transform_1, window_bounds = array<i64: 1, 4>}, {pipeline_mode = #tpu.pipeline_mode<synchronous>, transform_indices = @transform_2, window_bounds = array<i64: 1, 4>}, {pipeline_mode = #tpu.pipeline_mode<synchronous>, transform_indices = @transform_3, window_bounds = array<i64: 4, 4, 8>}, {pipeline_mode = #tpu.pipeline_mode<synchronous>, transform_indices = @transform_4, window_bounds = array<i64: 1, 8>}, {transform_indices = @transform_5, window_bounds = array<i64: 128, 8>}]} {
    %c0 = arith.constant 0 : index
    %c0_0 = arith.constant 0 : index
    %0 = vector.load %arg2[%c0, %c0_0] : memref<1x4xf32, #tpu.memory_space<vmem>>, vector<1x4xf32>
    %c0_1 = arith.constant 0 : index
    %c0_2 = arith.constant 0 : index
    %1 = vector.load %arg3[%c0_1, %c0_2] : memref<1x4xf32, #tpu.memory_space<vmem>>, vector<1x4xf32>
    %c0_3 = arith.constant 0 : index
    %c0_4 = arith.constant 0 : index
    %2 = vector.load %arg5[%c0_3, %c0_4] : memref<1x8xf32, #tpu.memory_space<vmem>>, vector<1x8xf32>
    %3 = vector.shape_cast %2 : vector<1x8xf32> to vector<1x8xf32>
    %4 = vector.broadcast %3 : vector<1x8xf32> to vector<128x8xf32>
    %c0_5 = arith.constant 0 : index
    %c0_6 = arith.constant 0 : index
    %c0_7 = arith.constant 0 : index
    %5 = vector.load %arg1[%c0_5, %c0_6, %c0_7] : memref<4x128x4xf32, #tpu.memory_space<vmem>>, vector<1x128x4xf32>
    %6 = vector.shape_cast %5 : vector<1x128x4xf32> to vector<128x4xf32>
    %cst = arith.constant dense<0.000000e+00> : vector<128xf32>
    %7 = vector.multi_reduction <add>, %6, %cst [1] : vector<128x4xf32> to vector<128xf32>
    %8 = vector.shape_cast %7 : vector<128xf32> to vector<128x1xf32>
    %cst_8 = arith.constant 4.000000e+00 : f32
    %9 = vector.broadcast %cst_8 : f32 to vector<128x1xf32>
    %10 = arith.divf %8, %9 : vector<128x1xf32>
    %11 = vector.broadcast %10 : vector<128x1xf32> to vector<128x4xf32>
    %12 = arith.subf %6, %11 : vector<128x4xf32>
    %13 = arith.mulf %12, %12 : vector<128x4xf32>
    %cst_9 = arith.constant dense<0.000000e+00> : vector<128xf32>
    %14 = vector.multi_reduction <add>, %13, %cst_9 [1] : vector<128x4xf32> to vector<128xf32>
    %15 = vector.shape_cast %14 : vector<128xf32> to vector<128x1xf32>
    %cst_10 = arith.constant 4.000000e+00 : f32
    %16 = vector.broadcast %cst_10 : f32 to vector<128x1xf32>
    %17 = arith.divf %15, %16 : vector<128x1xf32>
    %cst_11 = arith.constant 9.99999997E-7 : f32
    %18 = vector.broadcast %cst_11 : f32 to vector<128x1xf32>
    %19 = arith.addf %17, %18 : vector<128x1xf32>
    %20 = math.rsqrt %19 : vector<128x1xf32>
    %21 = vector.broadcast %20 : vector<128x1xf32> to vector<128x4xf32>
    %22 = arith.mulf %12, %21 : vector<128x4xf32>
    %23 = vector.broadcast %0 : vector<1x4xf32> to vector<128x4xf32>
    %24 = arith.mulf %22, %23 : vector<128x4xf32>
    %25 = vector.broadcast %1 : vector<1x4xf32> to vector<128x4xf32>
    %26 = arith.addf %24, %25 : vector<128x4xf32>
    %27 = arith.truncf %26 : vector<128x4xf32> to vector<128x4xbf16>
    %c0_12 = arith.constant 0 : index
    %c0_13 = arith.constant 0 : index
    %c0_14 = arith.constant 0 : index
    %28 = vector.load %arg4[%c0_12, %c0_13, %c0_14] : memref<4x4x8xbf16, #tpu.memory_space<vmem>>, vector<1x4x8xbf16>
    %29 = vector.shape_cast %28 : vector<1x4x8xbf16> to vector<4x8xbf16>
    %cst_15 = arith.constant dense<0.000000e+00> : vector<128x8xf32>
    %30 = tpu.matmul %27, %29, %cst_15 {dimension_numbers = #tpu.dot_dimension_numbers<[1], [0], [0], [1], [0, 0, 1, 1], [], []>} : vector<128x4xbf16>, vector<4x8xbf16>, vector<128x8xf32> -> vector<128x8xf32>
    %31 = arith.addf %4, %30 : vector<128x8xf32>
    %c1 = arith.constant 1 : index
    %c0_16 = arith.constant 0 : index
    %c0_17 = arith.constant 0 : index
    %32 = vector.load %arg1[%c1, %c0_16, %c0_17] : memref<4x128x4xf32, #tpu.memory_space<vmem>>, vector<1x128x4xf32>
    %33 = vector.shape_cast %32 : vector<1x128x4xf32> to vector<128x4xf32>
    %cst_18 = arith.constant dense<0.000000e+00> : vector<128xf32>
    %34 = vector.multi_reduction <add>, %33, %cst_18 [1] : vector<128x4xf32> to vector<128xf32>
    %35 = vector.shape_cast %34 : vector<128xf32> to vector<128x1xf32>
    %cst_19 = arith.constant 4.000000e+00 : f32
    %36 = vector.broadcast %cst_19 : f32 to vector<128x1xf32>
    %37 = arith.divf %35, %36 : vector<128x1xf32>
    %38 = vector.broadcast %37 : vector<128x1xf32> to vector<128x4xf32>
    %39 = arith.subf %33, %38 : vector<128x4xf32>
    %40 = arith.mulf %39, %39 : vector<128x4xf32>
    %cst_20 = arith.constant dense<0.000000e+00> : vector<128xf32>
    %41 = vector.multi_reduction <add>, %40, %cst_20 [1] : vector<128x4xf32> to vector<128xf32>
    %42 = vector.shape_cast %41 : vector<128xf32> to vector<128x1xf32>
    %cst_21 = arith.constant 4.000000e+00 : f32
    %43 = vector.broadcast %cst_21 : f32 to vector<128x1xf32>
    %44 = arith.divf %42, %43 : vector<128x1xf32>
    %cst_22 = arith.constant 9.99999997E-7 : f32
    %45 = vector.broadcast %cst_22 : f32 to vector<128x1xf32>
    %46 = arith.addf %44, %45 : vector<128x1xf32>
    %47 = math.rsqrt %46 : vector<128x1xf32>
    %48 = vector.broadcast %47 : vector<128x1xf32> to vector<128x4xf32>
    %49 = arith.mulf %39, %48 : vector<128x4xf32>
    %50 = vector.broadcast %0 : vector<1x4xf32> to vector<128x4xf32>
    %51 = arith.mulf %49, %50 : vector<128x4xf32>
    %52 = vector.broadcast %1 : vector<1x4xf32> to vector<128x4xf32>
    %53 = arith.addf %51, %52 : vector<128x4xf32>
    %54 = arith.truncf %53 : vector<128x4xf32> to vector<128x4xbf16>
    %c1_23 = arith.constant 1 : index
    %c0_24 = arith.constant 0 : index
    %c0_25 = arith.constant 0 : index
    %55 = vector.load %arg4[%c1_23, %c0_24, %c0_25] : memref<4x4x8xbf16, #tpu.memory_space<vmem>>, vector<1x4x8xbf16>
    %56 = vector.shape_cast %55 : vector<1x4x8xbf16> to vector<4x8xbf16>
    %cst_26 = arith.constant dense<0.000000e+00> : vector<128x8xf32>
    %57 = tpu.matmul %54, %56, %cst_26 {dimension_numbers = #tpu.dot_dimension_numbers<[1], [0], [0], [1], [0, 0, 1, 1], [], []>} : vector<128x4xbf16>, vector<4x8xbf16>, vector<128x8xf32> -> vector<128x8xf32>
    %58 = arith.addf %31, %57 : vector<128x8xf32>
    %c2 = arith.constant 2 : index
    %c0_27 = arith.constant 0 : index
    %c0_28 = arith.constant 0 : index
    %59 = vector.load %arg1[%c2, %c0_27, %c0_28] : memref<4x128x4xf32, #tpu.memory_space<vmem>>, vector<1x128x4xf32>
    %60 = vector.shape_cast %59 : vector<1x128x4xf32> to vector<128x4xf32>
    %cst_29 = arith.constant dense<0.000000e+00> : vector<128xf32>
    %61 = vector.multi_reduction <add>, %60, %cst_29 [1] : vector<128x4xf32> to vector<128xf32>
    %62 = vector.shape_cast %61 : vector<128xf32> to vector<128x1xf32>
    %cst_30 = arith.constant 4.000000e+00 : f32
    %63 = vector.broadcast %cst_30 : f32 to vector<128x1xf32>
    %64 = arith.divf %62, %63 : vector<128x1xf32>
    %65 = vector.broadcast %64 : vector<128x1xf32> to vector<128x4xf32>
    %66 = arith.subf %60, %65 : vector<128x4xf32>
    %67 = arith.mulf %66, %66 : vector<128x4xf32>
    %cst_31 = arith.constant dense<0.000000e+00> : vector<128xf32>
    %68 = vector.multi_reduction <add>, %67, %cst_31 [1] : vector<128x4xf32> to vector<128xf32>
    %69 = vector.shape_cast %68 : vector<128xf32> to vector<128x1xf32>
    %cst_32 = arith.constant 4.000000e+00 : f32
    %70 = vector.broadcast %cst_32 : f32 to vector<128x1xf32>
    %71 = arith.divf %69, %70 : vector<128x1xf32>
    %cst_33 = arith.constant 9.99999997E-7 : f32
    %72 = vector.broadcast %cst_33 : f32 to vector<128x1xf32>
    %73 = arith.addf %71, %72 : vector<128x1xf32>
    %74 = math.rsqrt %73 : vector<128x1xf32>
    %75 = vector.broadcast %74 : vector<128x1xf32> to vector<128x4xf32>
    %76 = arith.mulf %66, %75 : vector<128x4xf32>
    %77 = vector.broadcast %0 : vector<1x4xf32> to vector<128x4xf32>
    %78 = arith.mulf %76, %77 : vector<128x4xf32>
    %79 = vector.broadcast %1 : vector<1x4xf32> to vector<128x4xf32>
    %80 = arith.addf %78, %79 : vector<128x4xf32>
    %81 = arith.truncf %80 : vector<128x4xf32> to vector<128x4xbf16>
    %c2_34 = arith.constant 2 : index
    %c0_35 = arith.constant 0 : index
    %c0_36 = arith.constant 0 : index
    %82 = vector.load %arg4[%c2_34, %c0_35, %c0_36] : memref<4x4x8xbf16, #tpu.memory_space<vmem>>, vector<1x4x8xbf16>
    %83 = vector.shape_cast %82 : vector<1x4x8xbf16> to vector<4x8xbf16>
    %cst_37 = arith.constant dense<0.000000e+00> : vector<128x8xf32>
    %84 = tpu.matmul %81, %83, %cst_37 {dimension_numbers = #tpu.dot_dimension_numbers<[1], [0], [0], [1], [0, 0, 1, 1], [], []>} : vector<128x4xbf16>, vector<4x8xbf16>, vector<128x8xf32> -> vector<128x8xf32>
    %85 = arith.addf %58, %84 : vector<128x8xf32>
    %c3 = arith.constant 3 : index
    %c0_38 = arith.constant 0 : index
    %c0_39 = arith.constant 0 : index
    %86 = vector.load %arg1[%c3, %c0_38, %c0_39] : memref<4x128x4xf32, #tpu.memory_space<vmem>>, vector<1x128x4xf32>
    %87 = vector.shape_cast %86 : vector<1x128x4xf32> to vector<128x4xf32>
    %cst_40 = arith.constant dense<0.000000e+00> : vector<128xf32>
    %88 = vector.multi_reduction <add>, %87, %cst_40 [1] : vector<128x4xf32> to vector<128xf32>
    %89 = vector.shape_cast %88 : vector<128xf32> to vector<128x1xf32>
    %cst_41 = arith.constant 4.000000e+00 : f32
    %90 = vector.broadcast %cst_41 : f32 to vector<128x1xf32>
    %91 = arith.divf %89, %90 : vector<128x1xf32>
    %92 = vector.broadcast %91 : vector<128x1xf32> to vector<128x4xf32>
    %93 = arith.subf %87, %92 : vector<128x4xf32>
    %94 = arith.mulf %93, %93 : vector<128x4xf32>
    %cst_42 = arith.constant dense<0.000000e+00> : vector<128xf32>
    %95 = vector.multi_reduction <add>, %94, %cst_42 [1] : vector<128x4xf32> to vector<128xf32>
    %96 = vector.shape_cast %95 : vector<128xf32> to vector<128x1xf32>
    %cst_43 = arith.constant 4.000000e+00 : f32
    %97 = vector.broadcast %cst_43 : f32 to vector<128x1xf32>
    %98 = arith.divf %96, %97 : vector<128x1xf32>
    %cst_44 = arith.constant 9.99999997E-7 : f32
    %99 = vector.broadcast %cst_44 : f32 to vector<128x1xf32>
    %100 = arith.addf %98, %99 : vector<128x1xf32>
    %101 = math.rsqrt %100 : vector<128x1xf32>
    %102 = vector.broadcast %101 : vector<128x1xf32> to vector<128x4xf32>
    %103 = arith.mulf %93, %102 : vector<128x4xf32>
    %104 = vector.broadcast %0 : vector<1x4xf32> to vector<128x4xf32>
    %105 = arith.mulf %103, %104 : vector<128x4xf32>
    %106 = vector.broadcast %1 : vector<1x4xf32> to vector<128x4xf32>
    %107 = arith.addf %105, %106 : vector<128x4xf32>
    %108 = arith.truncf %107 : vector<128x4xf32> to vector<128x4xbf16>
    %c3_45 = arith.constant 3 : index
    %c0_46 = arith.constant 0 : index
    %c0_47 = arith.constant 0 : index
    %109 = vector.load %arg4[%c3_45, %c0_46, %c0_47] : memref<4x4x8xbf16, #tpu.memory_space<vmem>>, vector<1x4x8xbf16>
    %110 = vector.shape_cast %109 : vector<1x4x8xbf16> to vector<4x8xbf16>
    %cst_48 = arith.constant dense<0.000000e+00> : vector<128x8xf32>
    %111 = tpu.matmul %108, %110, %cst_48 {dimension_numbers = #tpu.dot_dimension_numbers<[1], [0], [0], [1], [0, 0, 1, 1], [], []>} : vector<128x4xbf16>, vector<4x8xbf16>, vector<128x8xf32> -> vector<128x8xf32>
    %112 = arith.addf %85, %111 : vector<128x8xf32>
    %c0_49 = arith.constant 0 : index
    %c0_50 = arith.constant 0 : index
    %113 = vector.load %arg6[%c0_49, %c0_50] : memref<128x8xf32, #tpu.memory_space<vmem>>, vector<128x8xf32>
    tpu.vector_store %arg6[%c0_49, %c0_50], %112 {strides = array<i32>} : memref<128x8xf32, #tpu.memory_space<vmem>>, vector<128x8xf32>,
    return
  }
  func.func @transform_0(%arg0: i32) -> (i32, i32, i32) {
    %c0_i32 = arith.constant 0 : i32
    %c0_i32_0 = arith.constant 0 : i32
    %c0_i32_1 = arith.constant 0 : i32
    return %c0_i32, %arg0, %c0_i32_0 : i32, i32, i32
  }
  func.func @transform_1(%arg0: i32) -> (i32, i32) {
    %c0_i32 = arith.constant 0 : i32
    %c0_i32_0 = arith.constant 0 : i32
    %c0_i32_1 = arith.constant 0 : i32
    return %c0_i32, %c0_i32_0 : i32, i32
  }
  func.func @transform_2(%arg0: i32) -> (i32, i32) {
    %c0_i32 = arith.constant 0 : i32
    %c0_i32_0 = arith.constant 0 : i32
    %c0_i32_1 = arith.constant 0 : i32
    return %c0_i32, %c0_i32_0 : i32, i32
  }
  func.func @transform_3(%arg0: i32) -> (i32, i32, i32) {
    %c0_i32 = arith.constant 0 : i32
    %c0_i32_0 = arith.constant 0 : i32
    %c0_i32_1 = arith.constant 0 : i32
    %c0_i32_2 = arith.constant 0 : i32
    return %c0_i32, %c0_i32_0, %c0_i32_1 : i32, i32, i32
  }
  func.func @transform_4(%arg0: i32) -> (i32, i32) {
    %c0_i32 = arith.constant 0 : i32
    %c0_i32_0 = arith.constant 0 : i32
    %c0_i32_1 = arith.constant 0 : i32
    return %c0_i32, %c0_i32_0 : i32, i32
  }
  func.func @transform_5(%arg0: i32) -> (i32, i32) {
    %c0_i32 = arith.constant 0 : i32
    %c0_i32_0 = arith.constant 0 : i32
    return %arg0, %c0_i32 : i32, i32
  }
}

</mosaic_0001>

<bundles_post_ra>
// kernel: tpu_custom_call.1
= control target key start
LH: loop header
LB: loop body
LE: loop exit
PB: predicated region body
PF: predicated region fallthrough
CT: control target
= control target key end

     0   :  { %s2964_s18 = smov 0   ;;  %s2966_s19 = smov 0   ;;  %s5197_s0 = inlined_call_operand.vmem [shape: f32[4,512,4], index: 0, kind: input, shape index: {}]   ;;  %s5198_s1 = inlined_call_operand.vmem [shape: f32[1,4], index: 1, kind: input, shape index: {}]   ;;  %s5199_s2 = inlined_call_operand.vmem [shape: f32[1,4], index: 2, kind: input, shape index: {}]   ;;  %s5200_s3 = inlined_call_operand.vmem [shape: bf16[4,4,8], index: 3, kind: input, shape index: {}]   ;;  %s5201_s4 = inlined_call_operand.vmem [shape: f32[1,8], index: 4, kind: input, shape index: {}]   ;;  %s5202_s5 = inlined_call_operand.vmem [shape: f32[512,8], index: 5, kind: output, shape index: {}]  }
   0x1   :  { %s2968_s20 = smov 0  }
   0x2 LB: > { %s2626_s21 = sadd.s32 4294967295, %s2931_s20   ;;  %s2981_s22 = sadd.s32 1, %s2931_s20   ;;  %s2931_s20 = sphi %s2968_s20, %s5305_s20   ;;  %s2927_s19 = sphi %s2966_s19, %s5304_s19   ;;  %s2923_s18 = sphi %s2964_s18, %s5303_s18  }
   0x3   : > { %s19_s23 = ssub.s32 %s2931_s20, %s2981_s22  ;;  %s22_s24 = sadd.s32 1, %s2927_s19 }
   0x4   : > { %p20_p0 = scmp.eq.s32.totalorder %s19_s23, 0  ;;  %p29_p1 = scmp.ne.s32.totalorder %s2927_s19, %s2923_s18 }
   0x5   : > { %p30_p2 = scmp.eq.s32.totalorder %s2931_s20, 0  ;;  %p2629_p4 = scmp.ge.s32.totalorder %s2931_s20, 4 }
   0x6   : > { %s2990_s25 = scalar_select %p20_p0, %s2927_s19, %s22_s24  }
   0x7   : > { %p31_p3 = por %p30_p2, %p29_p1  ;;  %177 = sbr.rel (%p2629_p4) target bundleno = 80 (0x50), region = 32 }
   0xc   : > { %180 = sbr.rel (!%p31_p3) target bundleno = 80 (0x50), region = 36  ;;  %s182_s26 = sand.u32 (%p31_p3), 1, %s2927_s19  }
   0xd   : > { %s2722_s27 = sshll.u32 (%p31_p3), %s2931_s20, 7  ;;  %s2630_s28 = sshll.u32 (%p31_p3), %s182_s26, 9 }
   0xe   : > { %s2998_s6 = scalar_lea.vmem (%p31_p3), %s5197_s0, %s2722_s27  ;;  %s3003_s7 = scalar_lea.vmem (%p31_p3), [#allocation2], %s2630_s28 }
   0xf   : > { %v342_v0 = vld [vmem:[%s2998_s6] sm:$0xff] (%p31_p3)  ;;  %v344_v1 = vld [vmem:[%s2998_s6 + $0x8] sm:$0xff] (%p31_p3)  ;;  %v346_v2 = vld [vmem:[%s2998_s6 + $0x10] sm:$0xff] (%p31_p3) }
  0x10   : > { %343 = vst [vmem:[%s3003_s7] sm:$0xff] (%p31_p3), %v342_v0  ;;  %v348_v3 = vld [vmem:[%s2998_s6 + $0x18] sm:$0xff] (%p31_p3)  ;;  %v350_v4 = vld [vmem:[%s2998_s6 + $0x20] sm:$0xff] (%p31_p3)  ;;  %v352_v5 = vld [vmem:[%s2998_s6 + $0x28] sm:$0xff] (%p31_p3) }
  0x11   : > { %345 = vst [vmem:[%s3003_s7 + $0x8] sm:$0xff] %v344_v1  ;;  %v354_v6 = vld [vmem:[%s2998_s6 + $0x30] sm:$0xff]  ;;  %v356_v7 = vld [vmem:[%s2998_s6 + $0x38] sm:$0xff]  ;;  %v358_v8 = vld [vmem:[%s2998_s6 + $0x40] sm:$0xff] }
  0x12   : > { %347 = vst [vmem:[%s3003_s7 + $0x10] sm:$0xff] %v346_v2  ;;  %v360_v9 = vld [vmem:[%s2998_s6 + $0x48] sm:$0xff]  ;;  %v362_v10 = vld [vmem:[%s2998_s6 + $0x50] sm:$0xff]  ;;  %v364_v11 = vld [vmem:[%s2998_s6 + $0x58] sm:$0xff] }
  0x13   : > { %349 = vst [vmem:[%s3003_s7 + $0x18] sm:$0xff] %v348_v3  ;;  %v366_v12 = vld [vmem:[%s2998_s6 + $0x60] sm:$0xff]  ;;  %v368_v13 = vld [vmem:[%s2998_s6 + $0x68] sm:$0xff]  ;;  %v370_v14 = vld [vmem:[%s2998_s6 + $0x70] sm:$0xff] }
  0x14   : > { %351 = vst [vmem:[%s3003_s7 + $0x20] sm:$0xff] %v350_v4  ;;  %v372_v15 = vld [vmem:[%s2998_s6 + $0x78] sm:$0xff]  ;;  %v374_v16 = vld [vmem:[%s2998_s6 + $0x200] sm:$0xff]  ;;  %v376_v17 = vld [vmem:[%s2998_s6 + $0x208] sm:$0xff] }
  0x15   : > { %353 = vst [vmem:[%s3003_s7 + $0x28] sm:$0xff] %v352_v5  ;;  %v378_v18 = vld [vmem:[%s2998_s6 + $0x210] sm:$0xff]  ;;  %v380_v19 = vld [vmem:[%s2998_s6 + $0x218] sm:$0xff]  ;;  %v382_v20 = vld [vmem:[%s2998_s6 + $0x220] sm:$0xff] }
  0x16   : > { %355 = vst [vmem:[%s3003_s7 + $0x30] sm:$0xff] %v354_v6  ;;  %v384_v21 = vld [vmem:[%s2998_s6 + $0x228] sm:$0xff]  ;;  %v386_v22 = vld [vmem:[%s2998_s6 + $0x230] sm:$0xff]  ;;  %v388_v23 = vld [vmem:[%s2998_s6 + $0x238] sm:$0xff] }
  0x17   : > { %357 = vst [vmem:[%s3003_s7 + $0x38] sm:$0xff] %v356_v7  ;;  %v390_v24 = vld [vmem:[%s2998_s6 + $0x240] sm:$0xff]  ;;  %v392_v25 = vld [vmem:[%s2998_s6 + $0x248] sm:$0xff]  ;;  %v394_v26 = vld [vmem:[%s2998_s6 + $0x250] sm:$0xff] }
  0x18   : > { %359 = vst [vmem:[%s3003_s7 + $0x40] sm:$0xff] %v358_v8  ;;  %v396_v27 = vld [vmem:[%s2998_s6 + $0x258] sm:$0xff]  ;;  %v398_v28 = vld [vmem:[%s2998_s6 + $0x260] sm:$0xff]  ;;  %v400_v29 = vld [vmem:[%s2998_s6 + $0x268] sm:$0xff] }
  0x19   : > { %361 = vst [vmem:[%s3003_s7 + $0x48] sm:$0xff] %v360_v9  ;;  %v402_v30 = vld [vmem:[%s2998_s6 + $0x270] sm:$0xff]  ;;  %v404_v31 = vld [vmem:[%s2998_s6 + $0x278] sm:$0xff]  ;;  %v406_v32 = vld [vmem:[%s2998_s6 + $0x400] sm:$0xff] }
  0x1a   : > { %363 = vst [vmem:[%s3003_s7 + $0x50] sm:$0xff] %v362_v10  ;;  %v408_v33 = vld [vmem:[%s2998_s6 + $0x408] sm:$0xff]  ;;  %v410_v34 = vld [vmem:[%s2998_s6 + $0x410] sm:$0xff]  ;;  %v412_v35 = vld [vmem:[%s2998_s6 + $0x418] sm:$0xff] }
  0x1b   : > { %365 = vst [vmem:[%s3003_s7 + $0x58] sm:$0xff] %v364_v11  ;;  %v414_v36 = vld [vmem:[%s2998_s6 + $0x420] sm:$0xff]  ;;  %v416_v37 = vld [vmem:[%s2998_s6 + $0x428] sm:$0xff]  ;;  %v418_v38 = vld [vmem:[%s2998_s6 + $0x430] sm:$0xff] }
  0x1c   : > { %367 = vst [vmem:[%s3003_s7 + $0x60] sm:$0xff] %v366_v12  ;;  %v420_v39 = vld [vmem:[%s2998_s6 + $0x438] sm:$0xff]  ;;  %v422_v40 = vld [vmem:[%s2998_s6 + $0x440] sm:$0xff]  ;;  %v424_v41 = vld [vmem:[%s2998_s6 + $0x448] sm:$0xff] }
  0x1d   : > { %369 = vst [vmem:[%s3003_s7 + $0x68] sm:$0xff] %v368_v13  ;;  %v426_v42 = vld [vmem:[%s2998_s6 + $0x450] sm:$0xff]  ;;  %v428_v43 = vld [vmem:[%s2998_s6 + $0x458] sm:$0xff]  ;;  %v430_v44 = vld [vmem:[%s2998_s6 + $0x460] sm:$0xff] }
  0x1e   : > { %371 = vst [vmem:[%s3003_s7 + $0x70] sm:$0xff] %v370_v14  ;;  %v432_v45 = vld [vmem:[%s2998_s6 + $0x468] sm:$0xff]  ;;  %v434_v46 = vld [vmem:[%s2998_s6 + $0x470] sm:$0xff]  ;;  %v436_v47 = vld [vmem:[%s2998_s6 + $0x478] sm:$0xff] }
  0x1f   : > { %373 = vst [vmem:[%s3003_s7 + $0x78] sm:$0xff] %v372_v15  ;;  %v438_v48 = vld [vmem:[%s2998_s6 + $0x600] sm:$0xff]  ;;  %v440_v49 = vld [vmem:[%s2998_s6 + $0x608] sm:$0xff]  ;;  %v442_v50 = vld [vmem:[%s2998_s6 + $0x610] sm:$0xff] }
  0x20   : > { %375 = vst [vmem:[%s3003_s7 + $0x80] sm:$0xff] %v374_v16  ;;  %v444_v51 = vld [vmem:[%s2998_s6 + $0x618] sm:$0xff]  ;;  %v446_v52 = vld [vmem:[%s2998_s6 + $0x620] sm:$0xff]  ;;  %v448_v53 = vld [vmem:[%s2998_s6 + $0x628] sm:$0xff] }
  0x21   : > { %377 = vst [vmem:[%s3003_s7 + $0x88] sm:$0xff] %v376_v17  ;;  %v450_v54 = vld [vmem:[%s2998_s6 + $0x630] sm:$0xff]  ;;  %v452_v55 = vld [vmem:[%s2998_s6 + $0x638] sm:$0xff]  ;;  %v454_v56 = vld [vmem:[%s2998_s6 + $0x640] sm:$0xff] }
  0x22   : > { %379 = vst [vmem:[%s3003_s7 + $0x90] sm:$0xff] %v378_v18  ;;  %v456_v57 = vld [vmem:[%s2998_s6 + $0x648] sm:$0xff]  ;;  %v458_v58 = vld [vmem:[%s2998_s6 + $0x650] sm:$0xff]  ;;  %v460_v59 = vld [vmem:[%s2998_s6 + $0x658] sm:$0xff] }
  0x23   : > { %381 = vst [vmem:[%s3003_s7 + $0x98] sm:$0xff] %v380_v19  ;;  %v462_v60 = vld [vmem:[%s2998_s6 + $0x660] sm:$0xff]  ;;  %v464_v61 = vld [vmem:[%s2998_s6 + $0x668] sm:$0xff]  ;;  %v466_v62 = vld [vmem:[%s2998_s6 + $0x670] sm:$0xff] }
  0x24   : > { %383 = vst [vmem:[%s3003_s7 + $0xa0] sm:$0xff] %v382_v20  ;;  %v468_v63 = vld [vmem:[%s2998_s6 + $0x678] sm:$0xff] }
  0x25   : > { %385 = vst [vmem:[%s3003_s7 + $0xa8] sm:$0xff] %v384_v21 }
  0x26   : > { %387 = vst [vmem:[%s3003_s7 + $0xb0] sm:$0xff] %v386_v22 }
  0x27   : > { %389 = vst [vmem:[%s3003_s7 + $0xb8] sm:$0xff] %v388_v23 }
  0x28   : > { %391 = vst [vmem:[%s3003_s7 + $0xc0] sm:$0xff] %v390_v24 }
  0x29   : > { %393 = vst [vmem:[%s3003_s7 + $0xc8] sm:$0xff] %v392_v25 }
  0x2a   : > { %395 = vst [vmem:[%s3003_s7 + $0xd0] sm:$0xff] %v394_v26 }
  0x2b   : > { %397 = vst [vmem:[%s3003_s7 + $0xd8] sm:$0xff] %v396_v27 }
  0x2c   : > { %399 = vst [vmem:[%s3003_s7 + $0xe0] sm:$0xff] %v398_v28 }
  0x2d   : > { %401 = vst [vmem:[%s3003_s7 + $0xe8] sm:$0xff] %v400_v29 }
  0x2e   : > { %403 = vst [vmem:[%s3003_s7 + $0xf0] sm:$0xff] %v402_v30 }
  0x2f   : > { %405 = vst [vmem:[%s3003_s7 + $0xf8] sm:$0xff] %v404_v31 }
  0x30   : > { %407 = vst [vmem:[%s3003_s7 + $0x100] sm:$0xff] %v406_v32 }
  0x31   : > { %409 = vst [vmem:[%s3003_s7 + $0x108] sm:$0xff] %v408_v33 }
  0x32   : > { %411 = vst [vmem:[%s3003_s7 + $0x110] sm:$0xff] %v410_v34 }
  0x33   : > { %413 = vst [vmem:[%s3003_s7 + $0x118] sm:$0xff] %v412_v35 }
  0x34   : > { %415 = vst [vmem:[%s3003_s7 + $0x120] sm:$0xff] %v414_v36 }
  0x35   : > { %417 = vst [vmem:[%s3003_s7 + $0x128] sm:$0xff] %v416_v37 }
  0x36   : > { %419 = vst [vmem:[%s3003_s7 + $0x130] sm:$0xff] %v418_v38 }
  0x37   : > { %421 = vst [vmem:[%s3003_s7 + $0x138] sm:$0xff] %v420_v39 }
  0x38   : > { %423 = vst [vmem:[%s3003_s7 + $0x140] sm:$0xff] %v422_v40 }
  0x39   : > { %425 = vst [vmem:[%s3003_s7 + $0x148] sm:$0xff] %v424_v41 }
  0x3a   : > { %427 = vst [vmem:[%s3003_s7 + $0x150] sm:$0xff] %v426_v42 }
  0x3b   : > { %429 = vst [vmem:[%s3003_s7 + $0x158] sm:$0xff] %v428_v43 }
  0x3c   : > { %431 = vst [vmem:[%s3003_s7 + $0x160] sm:$0xff] %v430_v44 }
  0x3d   : > { %433 = vst [vmem:[%s3003_s7 + $0x168] sm:$0xff] %v432_v45 }
  0x3e   : > { %435 = vst [vmem:[%s3003_s7 + $0x170] sm:$0xff] %v434_v46 }
  0x3f   : > { %437 = vst [vmem:[%s3003_s7 + $0x178] sm:$0xff] %v436_v47 }
  0x40   : > { %439 = vst [vmem:[%s3003_s7 + $0x180] sm:$0xff] %v438_v48 }
  0x41   : > { %441 = vst [vmem:[%s3003_s7 + $0x188] sm:$0xff] %v440_v49 }
  0x42   : > { %443 = vst [vmem:[%s3003_s7 + $0x190] sm:$0xff] %v442_v50 }
  0x43   : > { %445 = vst [vmem:[%s3003_s7 + $0x198] sm:$0xff] %v444_v51 }
  0x44   : > { %447 = vst [vmem:[%s3003_s7 + $0x1a0] sm:$0xff] %v446_v52 }
  0x45   : > { %449 = vst [vmem:[%s3003_s7 + $0x1a8] sm:$0xff] %v448_v53 }
  0x46   : > { %451 = vst [vmem:[%s3003_s7 + $0x1b0] sm:$0xff] %v450_v54 }
  0x47   : > { %453 = vst [vmem:[%s3003_s7 + $0x1b8] sm:$0xff] %v452_v55 }
  0x48   : > { %455 = vst [vmem:[%s3003_s7 + $0x1c0] sm:$0xff] %v454_v56 }
  0x49   : > { %457 = vst [vmem:[%s3003_s7 + $0x1c8] sm:$0xff] %v456_v57 }
  0x4a   : > { %459 = vst [vmem:[%s3003_s7 + $0x1d0] sm:$0xff] %v458_v58 }
  0x4b   : > { %461 = vst [vmem:[%s3003_s7 + $0x1d8] sm:$0xff] %v460_v59 }
  0x4c   : > { %463 = vst [vmem:[%s3003_s7 + $0x1e0] sm:$0xff] %v462_v60 }
  0x4d   : > { %465 = vst [vmem:[%s3003_s7 + $0x1e8] sm:$0xff] %v464_v61 }
  0x4e   : > { %467 = vst [vmem:[%s3003_s7 + $0x1f0] sm:$0xff] %v466_v62 }
  0x4f   : > { %469 = vst [vmem:[%s3003_s7 + $0x1f8] sm:$0xff] %v468_v63 }
  0x50 PF: > { %p2633_p5 = scmp.ge.s32.totalorder %s2931_s20, 1  ;;  %p474_p6 = scmp.lt.s32.totalorder %s2931_s20, 5 }
  0x52   : > { %p475_p7 = pnand %p2633_p5, %p474_p6 }
  0x54   : > { %478 = sbr.rel (%p475_p7) target bundleno = 830 (0x33e), region = 74 }
  0x59   : > { %s481_s8 = sand.u32 1, %s2923_s18   ;;  %vm538_vm0 = vcmask 31744   ;;  %vm969_vm2 = vcmask 1041408   ;;  %s2635_s7 = sshll.u32 %s2626_s21, 4 }
  0x5a   : > { %s2634_s9 = sshll.u32 %s481_s8, 9  ;;  %p510_p8 = scmp.lt.s32.totalorder %s2635_s7, 63 }
  0x5b   : > { %s3133_s10 = scalar_lea.vmem [#allocation2], %s2634_s9 }
  0x5c   : > { %v3136_v0 = vld [vmem:[%s3133_s10 + $0x100] sm:$0xff]  ;;  %v3146_v4 = vld [vmem:[%s3133_s10 + $0x10] sm:$0xff]  ;;  %v3151_v6 = vld [vmem:[%s3133_s10 + $0x108] sm:$0xff]  ;;  %s5307_s7 = smov (!%p510_p8, %s2635_s7), 63 }
  0x5d   : > { %v3139_v1 = vld [vmem:[%s3133_s10] sm:$0xff]  ;;  %v1558_v2 = vsel %vm538_vm0, %v3136_v0, 0.0  ;;  %v545_v5 = vsel %vm538_vm0, %v3146_v4, 0.0  ;;  %v3154_v7 = vld [vmem:[%s3133_s10 + $0x8] sm:$0xff]  ;;  %v3157_v8 = vld [vmem:[%s3133_s10 + $0x18] sm:$0xff]  ;;  %v1561_v9 = vsel %vm538_vm0, %v3151_v6, 0.0 }
  0x5e   : > { %v539_v3 = vsel %vm538_vm0, %v3139_v1, 0.0  ;;  %1559 = vadd.xlane.f32.xlu2 %v1558_v2  ;;  %546 = vadd.xlane.f32.xlu1 %v545_v5  ;;  %v542_v10 = vsel %vm538_vm0, %v3154_v7, 0.0  ;;  %v548_v11 = vsel %vm538_vm0, %v3157_v8, 0.0  ;;  %v3166_v12 = vld [vmem:[%s3133_s10 + $0x80] sm:$0xff]  ;;  %v3172_v14 = vld [vmem:[%s3133_s10 + $0x188] sm:$0xff]  ;;  %v3181_v18 = vld [vmem:[%s3133_s10 + $0x118] sm:$0xff] }
  0x5f   : > { %540 = vadd.xlane.f32.xlu0 %v539_v3  ;;  %v3169_v13 = vld [vmem:[%s3133_s10 + $0x180] sm:$0xff]  ;;  %v1055_v15 = vsel %vm538_vm0, %v3166_v12, 0.0  ;;  %v2064_v17 = vsel %vm538_vm0, %v3172_v14, 0.0  ;;  %v3184_v19 = vld [vmem:[%s3133_s10 + $0x88] sm:$0xff]  ;;  %v3187_v20 = vld [vmem:[%s3133_s10 + $0x110] sm:$0xff]  ;;  %v1567_v21 = vsel %vm538_vm0, %v3181_v18, 0.0 }
  0x60   : > { %v2061_v16 = vsel %vm538_vm0, %v3169_v13, 0.0  ;;  %v1058_v22 = vsel %vm538_vm0, %v3184_v19, 0.0  ;;  %v1564_v23 = vsel %vm538_vm0, %v3187_v20, 0.0  ;;  %v3196_v24 = vld [vmem:[%s3133_s10 + $0x190] sm:$0xff]  ;;  %v3202_v26 = vld [vmem:[%s3133_s10 + $0x198] sm:$0xff]  ;;  %v3214_v31 = vld [vmem:[%s3133_s10 + $0x128] sm:$0xff] }
  0x61   : > { %v3199_v25 = vld [vmem:[%s3133_s10 + $0x90] sm:$0xff]  ;;  %v2067_v27 = vsel %vm538_vm0, %v3196_v24, 0.0  ;;  %v2070_v29 = vsel %vm538_vm0, %v3202_v26, 0.0  ;;  %v3211_v30 = vld [vmem:[%s3133_s10 + $0x98] sm:$0xff]  ;;  %v3217_v32 = vld [vmem:[%s3133_s10 + $0x120] sm:$0xff]  ;;  %v1573_v34 = vsel %vm538_vm0, %v3214_v31, 0.0 }
  0x62   : > { %v1061_v28 = vsel %vm538_vm0, %v3199_v25, 0.0  ;;  %v1064_v33 = vsel %vm538_vm0, %v3211_v30, 0.0  ;;  %v1570_v35 = vsel %vm538_vm0, %v3217_v32, 0.0  ;;  %v3226_v36 = vld [vmem:[%s3133_s10 + $0x20] sm:$0xff]  ;;  %v3232_v38 = vld [vmem:[%s3133_s10 + $0x28] sm:$0xff]  ;;  %v3256_v48 = vld [vmem:[%s3133_s10 + $0x138] sm:$0xff] }
  0x63   : > { %v3229_v37 = vld [vmem:[%s3133_s10 + $0x1a0] sm:$0xff]  ;;  %v551_v39 = vsel %vm538_vm0, %v3226_v36, 0.0  ;;  %v554_v41 = vsel %vm538_vm0, %v3232_v38, 0.0  ;;  %v3241_v42 = vld [vmem:[%s3133_s10 + $0x1a8] sm:$0xff]  ;;  %v3259_v49 = vld [vmem:[%s3133_s10 + $0x130] sm:$0xff]  ;;  %v1579_v51 = vsel %vm538_vm0, %v3256_v48, 0.0 }
  0x64   : > { %v2073_v40 = vsel %vm538_vm0, %v3229_v37, 0.0  ;;  %v3244_v43 = vld [vmem:[%s3133_s10 + $0xa8] sm:$0xff]  ;;  %v3247_v44 = vld [vmem:[%s3133_s10 + $0xa0] sm:$0xff]  ;;  %v2076_v45 = vsel %vm538_vm0, %v3241_v42, 0.0  ;;  %v3262_v50 = vld [vmem:[%s3133_s10 + $0x1b0] sm:$0xff]  ;;  %v1576_v52 = vsel %vm538_vm0, %v3259_v49, 0.0 }
  0x65   : > { %v1070_v46 = vsel %vm538_vm0, %v3244_v43, 0.0  ;;  %v1067_v47 = vsel %vm538_vm0, %v3247_v44, 0.0  ;;  %v2079_v53 = vsel %vm538_vm0, %v3262_v50, 0.0  ;;  %v3271_v54 = vld [vmem:[%s3133_s10 + $0x38] sm:$0xff]  ;;  %v3274_v55 = vld [vmem:[%s3133_s10 + $0x30] sm:$0xff]  ;;  %v3291_v62 = vld [vmem:[%s3133_s10 + $0x148] sm:$0xff] }
  0x66   : > { %1562 = vadd.xlane.f32.xlu2 %v1561_v9  ;;  %549 = vadd.xlane.f32.xlu1 %v548_v11  ;;  %v560_v56 = vsel %vm538_vm0, %v3271_v54, 0.0  ;;  %v557_v57 = vsel %vm538_vm0, %v3274_v55, 0.0  ;;  %v3281_v58 = vld [vmem:[%s3133_s10 + $0xb8] sm:$0xff]  ;;  %v3294_v63 = vld [vmem:[%s3133_s10 + $0x140] sm:$0xff]  ;;  %v3297_v2 = vld [vmem:[%s3133_s10 + $0xb0] sm:$0xff]  ;;  %v1585_v3 = vsel %vm538_vm0, %v3291_v62, 0.0 }
  0x67   : > { %543 = vadd.xlane.f32.xlu0 %v542_v10  ;;  %v3284_v59 = vld [vmem:[%s3133_s10 + $0x1b8] sm:$0xff]  ;;  %v1076_v60 = vsel %vm538_vm0, %v3281_v58, 0.0  ;;  %v1582_v5 = vsel %vm538_vm0, %v3294_v63, 0.0  ;;  %v1073_v9 = vsel %vm538_vm0, %v3297_v2, 0.0  ;;  %v2933_v10 = vmov 4.0   ;;  %v3306_v11 = vld [vmem:[%s3133_s10 + $0x48] sm:$0xff] }
  0x68   : > { %v2082_v61 = vsel %vm538_vm0, %v3284_v59, 0.0  ;;  %2751 = vrcp.f32 %v2933_v10  ;;  %s2636_s20 = sshll.u32 %s5307_s7, 3 }
  0x69   : > { %s4750_s12 = scalar_lea.vmem %s5202_s5, %s2636_s20 }
  0x6e   : > { %1056 = vadd.xlane.f32.xlu2 %v1055_v15  ;;  %2065 = vadd.xlane.f32.xlu1 %v2064_v17  ;;  %v3309_v15 = vld [vmem:[%s3133_s10 + $0x40] sm:$0xff]  ;;  %v566_v17 = vsel %vm538_vm0, %v3306_v11, 0.0 }
  0x6f   : > { %2062 = vadd.xlane.f32.xlu0 %v2061_v16  ;;  %v3312_v16 = vld [vmem:[%s3133_s10 + $0x1c0] sm:$0xff] }
  0x76   : > { %1568 = vadd.xlane.f32.xlu2 %v1567_v21  ;;  %1565 = vadd.xlane.f32.xlu1 %v1564_v23  ;;  %v563_v21 = vsel %vm538_vm0, %v3309_v15, 0.0  ;;  %v2752_v23 = vpop.eup %2751 }
  0x77   : > { %1059 = vadd.xlane.f32.xlu0 %v1058_v22  ;;  %v2085_v22 = vsel %vm538_vm0, %v3312_v16, 0.0  ;;  %vm592_vm1 = vweird.f32 %v2752_v23 }
  0x7e   : > { %1062 = vadd.xlane.f32.xlu2 %v1061_v28  ;;  %2071 = vadd.xlane.f32.xlu1 %v2070_v29 }
  0x7f   : > { %2068 = vadd.xlane.f32.xlu0 %v2067_v27  ;;  %v588_v27 = vmul.f32 4.0, %v2752_v23 }
  0x81   : > { %v589_v28 = vsub.f32 1.0, %v588_v27 }
  0x83   : > { %v590_v29 = vmul.f32 %v2752_v23, %v589_v28 }
  0x86   : > { %1574 = vadd.xlane.f32.xlu2 %v1573_v34  ;;  %1571 = vadd.xlane.f32.xlu1 %v1570_v35 }
  0x87   : > { %1065 = vadd.xlane.f32.xlu0 %v1064_v33  ;;  %v591_v33 = vadd.f32 %v2752_v23, %v590_v29 }
  0x89   : > { %v3320_v34 = vsel %vm592_vm1, %v2752_v23, %v591_v33 }
  0x8e   : > { %2074 = vadd.xlane.f32.xlu2 %v2073_v40  ;;  %555 = vadd.xlane.f32.xlu1 %v554_v41 }
  0x8f   : > { %552 = vadd.xlane.f32.xlu0 %v551_v39 }
  0x96   : > { %1071 = vadd.xlane.f32.xlu2 %v1070_v46  ;;  %1068 = vadd.xlane.f32.xlu1 %v1067_v47 }
  0x97   : > { %2077 = vadd.xlane.f32.xlu0 %v2076_v45 }
  0x9e   : > { %1577 = vadd.xlane.f32.xlu2 %v1576_v52  ;;  %2080 = vadd.xlane.f32.xlu1 %v2079_v53 }
  0x9f   : > { %1580 = vadd.xlane.f32.xlu0 %v1579_v51 }
  0xa6   : > { %558 = vadd.xlane.f32.xlu2 %v557_v57  ;;  %1586 = vadd.xlane.f32.xlu1 %v1585_v3 }
  0xa7   : > { %561 = vadd.xlane.f32.xlu0 %v560_v56 }
  0xae   : > { %2083 = vadd.xlane.f32.xlu2 %v2082_v61  ;;  %567 = vadd.xlane.f32.xlu1 %v566_v17 }
  0xaf   : > { %1077 = vadd.xlane.f32.xlu0 %v1076_v60 }
  0xb6   : > { %1074 = vadd.xlane.f32.xlu2 %v1073_v9 }
  0xb7   : > { %1583 = vadd.xlane.f32.xlu0 %v1582_v5 }
  0xbe   : > { %2086 = vadd.xlane.f32.xlu2 %v2085_v22 }
  0xbf   : > { %564 = vadd.xlane.f32.xlu0 %v563_v21 }
  0xd1   : > { %v1560_v35 = vpop.xlane.xlu2 %1559  ;;  %v547_v41 = vpop.xlane.xlu1 %546 }
  0xd2   : > { %v541_v39 = vpop.xlane.xlu0 %540  ;;  %v1606_v40 = vmul.f32 %v1560_v35, %v3320_v34 }
  0xd3   : > { %v594_v60 = vmul.f32 %v3320_v34, %v541_v39 }
  0xd4   : > { %v3324_v45 = vsub.f32 %v3136_v0, %v1606_v40 }
  0xd5   : > { %v3343_v9 = vsub.f32 %v3139_v1, %v594_v60 }
  0xd6   : > { %v1638_v46 = vmul.f32 %v3324_v45, %v3324_v45 }
  0xd7   : > { %v626_v1 = vmul.f32 %v3343_v9, %v3343_v9 }
  0xd8   : > { %v1654_v47 = vsel %vm538_vm0, %v1638_v46, 0.0 }
  0xd9   : > { %v1563_v51 = vpop.xlane.xlu2 %1562  ;;  %1655 = vadd.xlane.f32.xlu0 %v1654_v47  ;;  %v550_v57 = vpop.xlane.xlu1 %549  ;;  %v642_v39 = vsel %vm538_vm0, %v626_v1, 0.0 }
  0xda   : > { %v544_v52 = vpop.xlane.xlu0 %543  ;;  %v1607_v53 = vmul.f32 %v1563_v51, %v3320_v34  ;;  %v597_v60 = vmul.f32 %v3320_v34, %v550_v57 }
  0xdb   : > { %v595_v56 = vmul.f32 %v3320_v34, %v544_v52 }
  0xdc   : > { %v3333_v61 = vsub.f32 %v3151_v6, %v1607_v53  ;;  %v596_v53 = vmul.f32 %v3320_v34, %v547_v41 }
  0xdd   : > { %v3336_v0 = vsub.f32 %v3154_v7, %v595_v56 }
  0xde   : > { %v1639_v3 = vmul.f32 %v3333_v61, %v3333_v61 }
  0xdf   : > { %v627_v5 = vmul.f32 %v3336_v0, %v3336_v0 }
  0xe0   : > { %v1657_v10 = vsel %vm538_vm0, %v1639_v3, 0.0 }
  0xe1   : > { %v645_v17 = vsel %vm538_vm0, %v627_v5, 0.0  ;;  %v1057_v21 = vpop.xlane.xlu2 %1056  ;;  %1658 = vadd.xlane.f32.xlu1 %v1657_v10  ;;  %v2066_v22 = vpop.xlane.xlu1 %2065 }
  0xe2   : > { %646 = vadd.xlane.f32.xlu2 %v645_v17  ;;  %v2063_v6 = vpop.xlane.xlu0 %2062  ;;  %v1103_v23 = vmul.f32 %v1057_v21, %v3320_v34  ;;  %v2110_v27 = vmul.f32 %v2066_v22, %v3320_v34  ;;  %v3384_v21 = vsub.f32 %v3146_v4, %v596_v53 }
  0xe3   : > { %v2109_v7 = vmul.f32 %v2063_v6, %v3320_v34 }
  0xe4   : > { %v3356_v29 = vsub.f32 %v3172_v14, %v2110_v27  ;;  %v3361_v35 = vsub.f32 %v3166_v12, %v1103_v23  ;;  %v628_v4 = vmul.f32 %v3384_v21, %v3384_v21 }
  0xe5   : > { %v3351_v28 = vsub.f32 %v3169_v13, %v2109_v7 }
  0xe6   : > { %v2142_v14 = vmul.f32 %v3356_v29, %v3356_v29  ;;  %v1135_v12 = vmul.f32 %v3361_v35, %v3361_v35 }
  0xe7   : > { %v2141_v33 = vmul.f32 %v3351_v28, %v3351_v28 }
  0xe8   : > { %v2160_v3 = vsel %vm538_vm0, %v2142_v14, 0.0  ;;  %v1151_v17 = vsel %vm538_vm0, %v1135_v12, 0.0 }
  0xe9   : > { %v2157_v40 = vsel %vm538_vm0, %v2141_v33, 0.0  ;;  %v1569_v46 = vpop.xlane.xlu2 %1568  ;;  %643 = vadd.xlane.f32.xlu1 %v642_v39  ;;  %v1566_v51 = vpop.xlane.xlu1 %1565  ;;  %v648_v39 = vsel %vm538_vm0, %v628_v4, 0.0 }
  0xea   : > { %2158 = vadd.xlane.f32.xlu0 %v2157_v40  ;;  %v1060_v13 = vpop.xlane.xlu0 %1059  ;;  %v1609_v47 = vmul.f32 %v1569_v46, %v3320_v34  ;;  %v1608_v6 = vmul.f32 %v1566_v51, %v3320_v34  ;;  %v3414_v51 = vld [vmem:[%s3133_s10 + $0x1c8] sm:$0xff] }
  0xeb   : > { %v1104_v52 = vmul.f32 %v1060_v13, %v3320_v34 }
  0xec   : > { %v3373_v56 = vsub.f32 %v3181_v18, %v1609_v47  ;;  %v3388_v18 = vsub.f32 %v3157_v8, %v597_v60  ;;  %v3399_v23 = vsub.f32 %v3187_v20, %v1608_v6  ;;  %v2088_v60 = vsel %vm538_vm0, %v3414_v51, 0.0  ;;  %v3434_v6 = vld [vmem:[%s3133_s10 + $0xc0] sm:$0xff] }
  0xed   : > { %v3380_v10 = vsub.f32 %v3184_v19, %v1104_v52 }
  0xee   : > { %v1641_v5 = vmul.f32 %v3373_v56, %v3373_v56  ;;  %v629_v8 = vmul.f32 %v3388_v18, %v3388_v18 }
  0xef   : > { %v1136_v19 = vmul.f32 %v3380_v10, %v3380_v10 }
  0xf0   : > { %v1663_v41 = vsel %vm538_vm0, %v1641_v5, 0.0  ;;  %v651_v40 = vsel %vm538_vm0, %v629_v8, 0.0 }
  0xf1   : > { %2161 = vadd.xlane.f32.xlu1 %v2160_v3  ;;  %1664 = vadd.xlane.f32.xlu2 %v1663_v41  ;;  %v2072_v7 = vpop.xlane.xlu1 %2071  ;;  %v1154_v1 = vsel %vm538_vm0, %v1136_v19, 0.0  ;;  %v1063_v33 = vpop.xlane.xlu2 %1062 }
  0xf2   : > { %v2069_v57 = vpop.xlane.xlu0 %2068  ;;  %1152 = vadd.xlane.f32.xlu0 %v1151_v17  ;;  %v2112_v22 = vmul.f32 %v2072_v7, %v3320_v34  ;;  %v1105_v17 = vmul.f32 %v1063_v33, %v3320_v34  ;;  %v1079_v33 = vsel %vm538_vm0, %v3434_v6, 0.0 }
  0xf3   : > { %v2111_v13 = vmul.f32 %v2069_v57, %v3320_v34 }
  0xf4   : > { %v3402_v27 = vsub.f32 %v3202_v26, %v2112_v22  ;;  %v1640_v26 = vmul.f32 %v3399_v23, %v3399_v23  ;;  %v3437_v7 = vsub.f32 %v3199_v25, %v1105_v17 }
  0xf5   : > { %v3417_v14 = vsub.f32 %v3196_v24, %v2111_v13 }
  0xf6   : > { %v2144_v20 = vmul.f32 %v3402_v27, %v3402_v27  ;;  %v1660_v12 = vsel %vm538_vm0, %v1640_v26, 0.0  ;;  %v1137_v25 = vmul.f32 %v3437_v7, %v3437_v7 }
  0xf7   : > { %v2143_v41 = vmul.f32 %v3417_v14, %v3417_v14 }
  0xf8   : > { %v2166_v52 = vsel %vm538_vm0, %v2144_v20, 0.0 }
  0xf9   : > { %649 = vadd.xlane.f32.xlu2 %v648_v39  ;;  %1155 = vadd.xlane.f32.xlu1 %v1154_v1  ;;  %v1572_v3 = vpop.xlane.xlu1 %1571  ;;  %v1575_v5 = vpop.xlane.xlu2 %1574  ;;  %v2163_v22 = vsel %vm538_vm0, %v2143_v41, 0.0 }
  0xfa   : > { %v1066_v46 = vpop.xlane.xlu0 %1065  ;;  %652 = vadd.xlane.f32.xlu0 %v651_v40  ;;  %v1610_v24 = vmul.f32 %v1572_v3, %v3320_v34  ;;  %v1157_v40 = vsel %vm538_vm0, %v1137_v25, 0.0 }
  0xfb   : > { %v1106_v47 = vmul.f32 %v1066_v46, %v3320_v34 }
  0xfc   : > { %v3440_v19 = vsub.f32 %v3217_v32, %v1610_v24 }
  0xfd   : > { %v3422_v53 = vsub.f32 %v3211_v30, %v1106_v47  ;;  %v1611_v30 = vmul.f32 %v1575_v5, %v3320_v34 }
  0xfe   : > { %v1642_v32 = vmul.f32 %v3440_v19, %v3440_v19 }
  0xff   : > { %v1138_v57 = vmul.f32 %v3422_v53, %v3422_v53  ;;  %v3445_v1 = vsub.f32 %v3214_v31, %v1611_v30 }
 0x100   : > { %v1666_v46 = vsel %vm538_vm0, %v1642_v32, 0.0 }
 0x101   : > { %2167 = vadd.xlane.f32.xlu2 %v2166_v52  ;;  %1661 = vadd.xlane.f32.xlu1 %v1660_v12  ;;  %v1160_v4 = vsel %vm538_vm0, %v1138_v57, 0.0  ;;  %v1643_v39 = vmul.f32 %v3445_v1, %v3445_v1  ;;  %v2075_v26 = vpop.xlane.xlu2 %2074  ;;  %v3464_v12 = vld [vmem:[%s3133_s10 + $0xc8] sm:$0xff]  ;;  %v556_v17 = vpop.xlane.xlu1 %555 }
 0x102   : > { %2089 = vadd.xlane.f32.xlu0 %v2088_v60  ;;  %v553_v8 = vpop.xlane.xlu0 %552  ;;  %v2113_v52 = vmul.f32 %v2075_v26, %v3320_v34  ;;  %v3467_v60 = vld [vmem:[%s3133_s10 + $0x158] sm:$0xff]  ;;  %v1082_v24 = vsel %vm538_vm0, %v3464_v12, 0.0 }
 0x103   : > { %v598_v31 = vmul.f32 %v3320_v34, %v553_v8  ;;  %v1669_v13 = vsel %vm538_vm0, %v1643_v39, 0.0  ;;  %v1591_v41 = vsel %vm538_vm0, %v3467_v60, 0.0 }
 0x105   : > { %v3460_v20 = vsub.f32 %v3226_v36, %v598_v31  ;;  %v3473_v36 = vsub.f32 %v3229_v37, %v2113_v52  ;;  %v2705_v52 = vld [vmem:[%s3133_s10 + $0x1d0] sm:$0xff] }
 0x107   : > { %v630_v3 = vmul.f32 %v3460_v20, %v3460_v20  ;;  %v2145_v37 = vmul.f32 %v3473_v36, %v3473_v36 }
 0x109   : > { %2164 = vadd.xlane.f32.xlu1 %v2163_v22  ;;  %1161 = vadd.xlane.f32.xlu2 %v1160_v4  ;;  %v654_v57 = vsel %vm538_vm0, %v630_v3, 0.0  ;;  %v1072_v22 = vpop.xlane.xlu2 %1071  ;;  %v599_v4 = vmul.f32 %v3320_v34, %v556_v17  ;;  %v2169_v39 = vsel %vm538_vm0, %v2145_v37, 0.0 }
 0x10a   : > { %1080 = vadd.xlane.f32.xlu0 %v1079_v33  ;;  %v2078_v47 = vpop.xlane.xlu0 %2077  ;;  %v2680_v33 = vld [vmem:[%s3133_s10 + $0x150] sm:$0xff] }
 0x10b   : > { %v2114_v5 = vmul.f32 %v2078_v47, %v3320_v34  ;;  %v3490_v32 = vsub.f32 %v3232_v38, %v599_v4  ;;  %v1108_v38 = vmul.f32 %v1072_v22, %v3320_v34  ;;  %v533_v47 = vld [vmem:[%s3133_s10 + $0x58] sm:$0xff]  ;;  %v532_v4 = vld [vmem:[%s3133_s10 + $0x50] sm:$0xff] }
 0x10d   : > { %v3481_v30 = vsub.f32 %v3241_v42, %v2114_v5  ;;  %v1588_v42 = vsel %vm538_vm0, %v2680_v33, 0.0 }
 0x10f   : > { %v2146_v25 = vmul.f32 %v3481_v30, %v3481_v30 }
 0x111   : > { %1158 = vadd.xlane.f32.xlu1 %v1157_v40  ;;  %1667 = vadd.xlane.f32.xlu2 %v1666_v46  ;;  %v2172_v31 = vsel %vm538_vm0, %v2146_v25, 0.0  ;;  %v1069_v40 = vpop.xlane.xlu1 %1068  ;;  %v1578_v26 = vpop.xlane.xlu2 %1577 }
 0x112   : > { %1670 = vadd.xlane.f32.xlu0 %v1669_v13  ;;  %v1581_v8 = vpop.xlane.xlu0 %1580  ;;  %v1107_v46 = vmul.f32 %v1069_v40, %v3320_v34  ;;  %v631_v13 = vmul.f32 %v3490_v32, %v3490_v32  ;;  %v2706_v40 = vld [vmem:[%s3133_s10 + $0x1d8] sm:$0xff] }
 0x114   : > { %v3502_v5 = vsub.f32 %v3247_v44, %v1107_v46  ;;  %v657_v17 = vsel %vm538_vm0, %v631_v13, 0.0  ;;  %v1612_v44 = vmul.f32 %v1578_v26, %v3320_v34  ;;  %v2656_v46 = vld [vmem:[%s3133_s10 + $0xd8] sm:$0xff]  ;;  %v2094_v26 = vsel %vm538_vm0, %v2706_v40, 0.0 }
 0x116   : > { %v1139_v22 = vmul.f32 %v3502_v5, %v3502_v5 }
 0x118   : > { %v1163_v25 = vsel %vm538_vm0, %v1139_v22, 0.0  ;;  %v2682_v22 = vld [vmem:[%s3133_s10 + $0x160] sm:$0xff] }
 0x119   : > { %1083 = vadd.xlane.f32.xlu1 %v1082_v24  ;;  %1592 = vadd.xlane.f32.xlu2 %v1591_v41  ;;  %v572_v24 = vsel %vm538_vm0, %v533_v47, 0.0  ;;  %v3507_v41 = vsub.f32 %v3244_v43, %v1108_v38  ;;  %v559_v33 = vpop.xlane.xlu2 %558  ;;  %v569_v43 = vsel %vm538_vm0, %v532_v4, 0.0  ;;  %v1088_v38 = vsel %vm538_vm0, %v2656_v46, 0.0  ;;  %v2683_v4 = vld [vmem:[%s3133_s10 + $0x168] sm:$0xff] }
 0x11a   : > { %655 = vadd.xlane.f32.xlu0 %v654_v57  ;;  %v562_v3 = vpop.xlane.xlu0 %561  ;;  %v2091_v57 = vsel %vm538_vm0, %v2705_v52, 0.0  ;;  %v1597_v40 = vsel %vm538_vm0, %v2683_v4, 0.0 }
 0x11b   : > { %v1140_v37 = vmul.f32 %v3507_v41, %v3507_v41 }
 0x121   : > { %1589 = vadd.xlane.f32.xlu1 %v1588_v42  ;;  %2170 = vadd.xlane.f32.xlu2 %v2169_v39  ;;  %v3521_v39 = vsub.f32 %v3259_v49, %v1612_v44  ;;  %v2084_v47 = vpop.xlane.xlu2 %2083  ;;  %v2081_v49 = vpop.xlane.xlu1 %2080  ;;  %v1613_v44 = vmul.f32 %v1581_v8, %v3320_v34  ;;  %v600_v8 = vmul.f32 %v3320_v34, %v559_v33 }
 0x122   : > { %2173 = vadd.xlane.f32.xlu0 %v2172_v31  ;;  %v3518_v42 = vpop.xlane.xlu0 %1077  ;;  %v1166_v31 = vsel %vm538_vm0, %v1140_v37, 0.0  ;;  %v2115_v37 = vmul.f32 %v2081_v49, %v3320_v34 }
 0x123   : > { %v1644_v13 = vmul.f32 %v3521_v39, %v3521_v39  ;;  %v3546_v46 = vsub.f32 %v3256_v48, %v1613_v44 }
 0x125   : > { %v1672_v52 = vsel %vm538_vm0, %v1644_v13, 0.0  ;;  %v1645_v49 = vmul.f32 %v3546_v46, %v3546_v46 }
 0x127   : > { %v1675_v33 = vsel %vm538_vm0, %v1645_v49, 0.0 }
 0x129   : > { %658 = vadd.xlane.f32.xlu1 %v657_v17  ;;  %573 = vadd.xlane.f32.xlu2 %v572_v24  ;;  %v601_v24 = vmul.f32 %v3320_v34, %v562_v3  ;;  %v1075_v3 = vpop.xlane.xlu2 %1074  ;;  %v1587_v13 = vpop.xlane.xlu1 %1586 }
 0x12a   : > { %2092 = vadd.xlane.f32.xlu0 %v2091_v57  ;;  %v3531_v17 = vpop.xlane.xlu0 %1583  ;;  %v2655_v57 = vld [vmem:[%s3133_s10 + $0xd0] sm:$0xff] }
 0x131   : > { %570 = vadd.xlane.f32.xlu1 %v569_v43  ;;  %1164 = vadd.xlane.f32.xlu2 %v1163_v25  ;;  %v3540_v43 = vsub.f32 %v3271_v54, %v601_v24  ;;  %v1085_v25 = vsel %vm538_vm0, %v2655_v57, 0.0  ;;  %v2116_v57 = vmul.f32 %v2084_v47, %v3320_v34  ;;  %v568_v44 = vpop.xlane.xlu1 %567 }
 0x132   : > { %1167 = vadd.xlane.f32.xlu0 %v1166_v31  ;;  %v1594_v31 = vsel %vm538_vm0, %v2682_v22, 0.0  ;;  %v565_v54 = vpop.xlane.xlu0 %564  ;;  %v2087_v22 = vpop.xlane.xlu2 %2086 }
 0x139   : > { %2095 = vadd.xlane.f32.xlu1 %v2094_v26  ;;  %1089 = vadd.xlane.f32.xlu2 %v1088_v38  ;;  %v3549_v26 = vsub.f32 %v3262_v50, %v2115_v37  ;;  %v633_v38 = vmul.f32 %v3540_v43, %v3540_v43  ;;  %v3559_v50 = vsub.f32 %v3274_v55, %v600_v8  ;;  %v534_v55 = vld [vmem:[%s3133_s10 + $0x60] sm:$0xff] }
 0x13a   : > { %1673 = vadd.xlane.f32.xlu0 %v1672_v52  ;;  %v1109_v37 = vmul.f32 %v1075_v3, %v3320_v34  ;;  %v3572_v8 = vsub.f32 %v3284_v59, %v2116_v57  ;;  %v575_v47 = vsel %vm538_vm0, %v534_v55, 0.0  ;;  %v1615_v57 = vmul.f32 %v1587_v13, %v3320_v34 }
 0x13b   : > { %5213 = vst [vmem:[#allocation3_spill] sm:$0xff] %v3549_v26  ;;  %v2147_v48 = vmul.f32 %v3549_v26, %v3549_v26  ;;  %v663_v52 = vsel %vm538_vm0, %v633_v38, 0.0  ;;  %v632_v4 = vmul.f32 %v3559_v50, %v3559_v50 }
 0x13c   : > { %5214 = vst [vmem:[#allocation4_spill] sm:$0xff] %v3559_v50  ;;  %v3577_v49 = vsub.f32 %v3297_v2, %v1109_v37  ;;  %v2148_v59 = vmul.f32 %v3572_v8, %v3572_v8 }
 0x13d   : > { %v2175_v24 = vsel %vm538_vm0, %v2147_v48, 0.0  ;;  %5215 = vst [vmem:[#allocation5_spill] sm:$0xff] %v3572_v8  ;;  %v660_v38 = vsel %vm538_vm0, %v632_v4, 0.0 }
 0x13e   : > { %5216 = vst [vmem:[#allocation6_spill] sm:$0xff] %v3577_v49  ;;  %v1141_v2 = vmul.f32 %v3577_v49, %v3577_v49  ;;  %v536_v49 = vld [vmem:[%s3133_s10 + $0x70] sm:$0xff] }
 0x141   : > { %1086 = vadd.xlane.f32.xlu1 %v1085_v25  ;;  %1595 = vadd.xlane.f32.xlu2 %v1594_v31  ;;  %v535_v31 = vld [vmem:[%s3133_s10 + $0x68] sm:$0xff] }
 0x142   : > { %1598 = vadd.xlane.f32.xlu0 %v1597_v40  ;;  %v578_v3 = vsel %vm538_vm0, %v535_v31, 0.0  ;;  %v1110_v31 = vmul.f32 %v3518_v42, %v3320_v34  ;;  %v3610_v42 = vsub.f32 %v3291_v62, %v1615_v57  ;;  %v2707_v62 = vld [vmem:[%s3133_s10 + $0x1e0] sm:$0xff] }
 0x144   : > { %5217 = vst [vmem:[#allocation7_spill] sm:$0xff] %v3610_v42 }
 0x149   : > { %1676 = vadd.xlane.f32.xlu1 %v1675_v33  ;;  %664 = vadd.xlane.f32.xlu2 %v663_v52  ;;  %v2686_v52 = vld [vmem:[%s5200_s3 + $0x4] sm:$0x3]  ;;  %v2708_v33 = vld [vmem:[%s3133_s10 + $0x1e8] sm:$0xff] }
 0x14a   : > { %2176 = vadd.xlane.f32.xlu0 %v2175_v24  ;;  %v1977_v24 = vsel %vm969_vm2, %v2686_v52, 0 }
 0x14b   : > { %1986 = vmatpush.bf16.msra.mxu2 %v1977_v24  ;;  %v1169_v24 = vsel %vm538_vm0, %v1141_v2, 0.0 }
 0x14c   : > { %v1656_v25 = vpop.xlane.xlu0 %1655 }
 0x14d   : > { %v1702_v40 = vmul.f32 %v1656_v25, %v3320_v34 }
 0x14f   : > { %v3579_v48 = vadd.f32 1e-06, %v1702_v40  ;;  %v603_v40 = vmul.f32 %v3320_v34, %v568_v44  ;;  %v602_v44 = vmul.f32 %v3320_v34, %v565_v54  ;;  %v2657_v54 = vld [vmem:[%s3133_s10 + $0xe0] sm:$0xff] }
 0x151   : > { %2753 = vrsqrt.f32 %v3579_v48  ;;  %661 = vadd.xlane.f32.xlu1 %v660_v38  ;;  %576 = vadd.xlane.f32.xlu2 %v575_v47  ;;  %v2178_v38 = vsel %vm538_vm0, %v2148_v59, 0.0  ;;  %v2100_v47 = vsel %vm538_vm0, %v2708_v33, 0.0  ;;  %v3617_v33 = vsub.f32 %v3281_v58, %v1110_v31  ;;  %v2658_v31 = vld [vmem:[%s3133_s10 + $0xe8] sm:$0xff] }
 0x152   : > { %579 = vadd.xlane.f32.xlu0 %v578_v3  ;;  %v3620_v2 = vsub.f32 %v3306_v11, %v603_v40  ;;  %v1647_v11 = vmul.f32 %v3610_v42, %v3610_v42  ;;  %v944_v40 = vld [vmem:[%s5200_s3] sm:$0x3]  ;;  %vm1740_vm4 = vweird.f32 %v3579_v48 }
 0x153   : > { %5218 = vst [vmem:[#allocation8_spill] sm:$0xff] %v3617_v33 }
 0x154   : > { %v1659_v4 = vpop.xlane.xlu1 %1658  ;;  %5219 = vst [vmem:[#allocation9_spill] sm:$0xff] %v3620_v2 }
 0x155   : > { %v647_v37 = vpop.xlane.xlu2 %646  ;;  %v1703_v55 = vmul.f32 %v1659_v4, %v3320_v34  ;;  %v1614_v4 = vmul.f32 %v3531_v17, %v3320_v34 }
 0x156   : > { %v691_v25 = vmul.f32 %v647_v37, %v3320_v34  ;;  %v3630_v37 = vsub.f32 %v3309_v15, %v602_v44  ;;  %v971_v15 = vsel %vm969_vm2, %v944_v40, 0  ;;  %v1142_v44 = vmul.f32 %v3617_v33, %v3617_v33 }
 0x157   : > { %v3600_v3 = vpop.eup %2753  ;;  %v3602_v13 = vadd.f32 1e-06, %v1703_v55  ;;  %v3627_v57 = vsub.f32 %v3294_v63, %v1614_v4  ;;  %v1091_v4 = vsel %vm538_vm0, %v2657_v54, 0.0  ;;  %980 = vmatpush.bf16.msra.mxu0 %v971_v15 }
 0x158   : > { %v3604_v52 = vadd.f32 1e-06, %v691_v25  ;;  %v1735_v59 = vmul.f32 %v3600_v3, %v3579_v48  ;;  %5221 = vst [vmem:[#allocation11_spill] sm:$0xff] %v3630_v37  ;;  %v634_v15 = vmul.f32 %v3630_v37, %v3630_v37  ;;  %vm1741_vm3 = vweird.f32 %v3600_v3 }
 0x159   : > { %2755 = vrsqrt.f32 %v3602_v13  ;;  %2179 = vadd.xlane.f32.xlu1 %v2178_v38  ;;  %2101 = vadd.xlane.f32.xlu2 %v2100_v47  ;;  %5220 = vst [vmem:[#allocation10_spill] sm:$0xff] %v3627_v57  ;;  %v2117_v38 = vmul.f32 %v2087_v22, %v3320_v34  ;;  %v1646_v54 = vmul.f32 %v3627_v57, %v3627_v57  ;;  %vm3693_vm5 = vmor %vm1740_vm4, %vm1741_vm3  ;;  %vm1750_vm7 = vweird.f32 %v3602_v13 }
 0x15a   : > { %v1736_v17 = vmul.f32 %v3600_v3, %v1735_v59  ;;  %2757 = vrsqrt.f32 %v3604_v52  ;;  %1170 = vadd.xlane.f32.xlu0 %v1169_v24  ;;  %v2097_v24 = vsel %vm538_vm0, %v2707_v62, 0.0  ;;  %v635_v59 = vmul.f32 %v3620_v2, %v3620_v2 }
 0x15b   : > { %v1172_v2 = vsel %vm538_vm0, %v1142_v44, 0.0  ;;  %vm738_vm9 = vweird.f32 %v3604_v52 }
 0x15c   : > { %v1737_v55 = vmul.f32 0.5, %v1736_v17  ;;  %v644_v25 = vpop.xlane.xlu1 %643  ;;  %v3678_v57 = vsel %vm538_vm0, %v635_v59, 0.0 }
 0x15d   : > { %v2159_v58 = vpop.xlane.xlu0 %2158  ;;  %v690_v47 = vmul.f32 %v644_v25, %v3320_v34 }
 0x15e   : > { %v2205_v63 = vmul.f32 %v2159_v58, %v3320_v34  ;;  %v1738_v22 = vsub.f32 1.5, %v1737_v55  ;;  %v1094_v58 = vsel %vm538_vm0, %v2658_v31, 0.0  ;;  %v3664_v55 = vsub.f32 %v3312_v16, %v2117_v38  ;;  %v2684_v38 = vld [vmem:[%s3133_s10 + $0x170] sm:$0xff] }
 0x15f   : > { %v3648_v17 = vpop.eup %2755  ;;  %v3650_v42 = vadd.f32 1e-06, %v690_v47 }
 0x160   : > { %v3652_v25 = vadd.f32 1e-06, %v2205_v63  ;;  %v3655_v40 = vpop.eup %2757  ;;  %v1745_v62 = vmul.f32 %v3648_v17, %v3602_v13  ;;  %5222 = vst [vmem:[#allocation12_spill] sm:$0xff] %v3664_v55  ;;  %v1681_v63 = vsel %vm538_vm0, %v1647_v11, 0.0  ;;  %v1739_v37 = vmul.f32 %v3600_v3, %v1738_v22 }
 0x161   : > { %v733_v47 = vmul.f32 %v3655_v40, %v3604_v52  ;;  %2759 = vrsqrt.f32 %v3650_v42  ;;  %2098 = vadd.xlane.f32.xlu1 %v2097_v24  ;;  %1092 = vadd.xlane.f32.xlu2 %v1091_v4  ;;  %v3685_v11 = vsel %vm538_vm0, %v634_v15, 0.0  ;;  %v2149_v59 = vmul.f32 %v3664_v55, %v3664_v55 }
 0x162   : > { %v1746_v31 = vmul.f32 %v3648_v17, %v1745_v62  ;;  %2761 = vrsqrt.f32 %v3652_v25  ;;  %1095 = vadd.xlane.f32.xlu0 %v1094_v58  ;;  %v3682_v58 = vsel %vm538_vm0, %v1646_v54, 0.0  ;;  %vm1751_vm6 = vweird.f32 %v3648_v17 }
 0x163   : > { %v734_v16 = vmul.f32 %v3655_v40, %v733_v47  ;;  %vm1752_vm8 = vmor %vm1750_vm7, %vm1751_vm6  ;;  %v3723_v13 = vsel %vm538_vm0, %v2149_v59, 0.0  ;;  %vm739_vm10 = vweird.f32 %v3655_v40  ;;  %vm728_vm11 = vweird.f32 %v3650_v42 }
 0x164   : > { %v1747_v24 = vmul.f32 0.5, %v1746_v31  ;;  %v2162_v4 = vpop.xlane.xlu1 %2161  ;;  %v1665_v62 = vpop.xlane.xlu2 %1664  ;;  %v1600_v31 = vsel %vm538_vm0, %v2684_v38, 0.0  ;;  %vm2243_vm13 = vweird.f32 %v3652_v25  ;;  %vm3760_vm14 = vmor %vm738_vm9, %vm739_vm10 }
 0x165   : > { %v735_v44 = vmul.f32 0.5, %v734_v16  ;;  %v2206_v22 = vmul.f32 %v2162_v4, %v3320_v34  ;;  %v1705_v47 = vmul.f32 %v1665_v62, %v3320_v34  ;;  %v1153_v33 = vpop.xlane.xlu0 %1152  ;;  %v1743_v4 = vsel %vm3693_vm5, %v3600_v3, %v1739_v37 }
 0x166   : > { %v1748_v54 = vsub.f32 1.5, %v1747_v24  ;;  %v1199_v15 = vmul.f32 %v1153_v33, %v3320_v34 }
 0x167   : > { %v3700_v16 = vpop.eup %2759  ;;  %v3706_v62 = vadd.f32 1e-06, %v2206_v22  ;;  %v3708_v55 = vadd.f32 1e-06, %v1705_v47  ;;  %v736_v33 = vsub.f32 1.5, %v735_v44  ;;  %v3729_v22 = vsel %vm538_vm0, %v536_v49, 0.0 }
 0x168   : > { %v3711_v24 = vpop.eup %2761  ;;  %v1749_v8 = vmul.f32 %v3648_v17, %v1748_v54  ;;  %v723_v38 = vmul.f32 %v3700_v16, %v3650_v42  ;;  %v3716_v26 = vadd.f32 1e-06, %v1199_v15  ;;  %v1894_v47 = vmul.f32 %v1743_v4, %v3324_v45 }
 0x169   : > { %v2238_v3 = vmul.f32 %v3711_v24, %v3652_v25  ;;  %2763 = vrsqrt.f32 %v3706_v62  ;;  %1682 = vadd.xlane.f32.xlu2 %v1681_v63  ;;  %1173 = vadd.xlane.f32.xlu1 %v1172_v2  ;;  %vm729_vm12 = vweird.f32 %v3700_v16  ;;  %vm2244_vm15 = vweird.f32 %v3711_v24 }
 0x16a   : > { %v1753_v37 = vsel %vm1752_vm8, %v3648_v17, %v1749_v8  ;;  %v724_v44 = vmul.f32 %v3700_v16, %v723_v38  ;;  %2765 = vrsqrt.f32 %v3708_v55  ;;  %1601 = vadd.xlane.f32.xlu0 %v1600_v31  ;;  %v3738_v8 = vld [vmem:[%s5198_s1] ss:$0 sm:$0xff]  ;;  %v737_v17 = vmul.f32 %v3655_v40, %v736_v33  ;;  %vm3783_vm1 = vmor %vm728_vm11, %vm729_vm12 }
 0x16b   : > { %v1895_v48 = vmul.f32 %v1753_v37, %v3333_v61  ;;  %v2239_v2 = vmul.f32 %v3711_v24, %v2238_v3  ;;  %2767 = vrsqrt.f32 %v3716_v26  ;;  %v3752_v38 = vld [vmem:[%s5199_s2] ss:$0 sm:$0xff]  ;;  %vm2253_vm3 = vweird.f32 %v3706_v62  ;;  %vm3817_vm5 = vmor %vm2243_vm13, %vm2244_vm15 }
 0x16c   : > { %v725_v63 = vmul.f32 0.5, %v724_v44  ;;  %v650_v49 = vpop.xlane.xlu2 %649  ;;  %v1156_v45 = vpop.xlane.xlu1 %1155  ;;  %vm1770_vm4 = vweird.f32 %v3708_v55  ;;  %vm1237_vm7 = vweird.f32 %v3716_v26 }
 0x16d   : > { %v2240_v59 = vmul.f32 0.5, %v2239_v2  ;;  %v692_v61 = vmul.f32 %v650_v49, %v3320_v34  ;;  %v1200_v54 = vmul.f32 %v1156_v45, %v3320_v34  ;;  %v653_v15 = vpop.xlane.xlu0 %652  ;;  %v1911_v31 = vmul.f32 %v3738_v8, %v1895_v48 }
 0x16e   : > { %v726_v4 = vsub.f32 1.5, %v725_v63  ;;  %v693_v33 = vmul.f32 %v653_v15, %v3320_v34  ;;  %v1910_v63 = vmul.f32 %v3738_v8, %v1894_v47  ;;  %v741_v45 = vsel %vm3760_vm14, %v3655_v40, %v737_v17 }
 0x16f   : > { %v3754_v3 = vpop.eup %2763  ;;  %v2241_v44 = vsub.f32 1.5, %v2240_v59  ;;  %v3764_v48 = vadd.f32 1e-06, %v692_v61  ;;  %v3766_v2 = vadd.f32 1e-06, %v1200_v54  ;;  %v2685_v59 = vld [vmem:[%s3133_s10 + $0x178] sm:$0xff]  ;;  %v1927_v17 = vadd.f32 %v3752_v38, %v1911_v31 }
 0x170   : > { %v3769_v49 = vpop.eup %2765  ;;  %v727_v15 = vmul.f32 %v3700_v16, %v726_v4  ;;  %v2248_v52 = vmul.f32 %v3754_v3, %v3706_v62  ;;  %v3790_v40 = vadd.f32 1e-06, %v693_v33  ;;  %v1603_v33 = vsel %vm538_vm0, %v2685_v59, 0.0 }
 0x171   : > { %v1765_v61 = vmul.f32 %v3769_v49, %v3708_v55  ;;  %2769 = vrsqrt.f32 %v3764_v48  ;;  %1679 = vadd.xlane.f32.xlu1 %v3682_v58  ;;  %667 = vadd.xlane.f32.xlu2 %v3685_v11  ;;  %v3795_v54 = vpop.eup %2767  ;;  %v2242_v4 = vmul.f32 %v3711_v24, %v2241_v44  ;;  %v883_v58 = vmul.f32 %v741_v45, %v3336_v0 }
 0x172   : > { %v731_v42 = vsel %vm3783_vm1, %v3700_v16, %v727_v15  ;;  %v2249_v37 = vmul.f32 %v3754_v3, %v2248_v52  ;;  %2771 = vrsqrt.f32 %v3766_v2  ;;  %670 = vadd.xlane.f32.xlu0 %v3678_v57  ;;  %v1232_v31 = vmul.f32 %v3795_v54, %v3716_v26 }
 0x173   : > { %v1766_v11 = vmul.f32 %v3769_v49, %v1765_v61  ;;  %v1926_v16 = vadd.f32 %v3752_v38, %v1910_v63  ;;  %v882_v57 = vmul.f32 %v731_v42, %v3343_v9  ;;  %2773 = vrsqrt.f32 %v3790_v40 }
 0x174   : > { %v2250_v50 = vmul.f32 0.5, %v2249_v37  ;;  %v2168_v44 = vpop.xlane.xlu2 %2167  ;;  %v1662_v15 = vpop.xlane.xlu1 %1661  ;;  %v1233_v52 = vmul.f32 %v3795_v54, %v1232_v31  ;;  %v2246_v63 = vsel %vm3817_vm5, %v3711_v24, %v2242_v4  ;;  %vm2254_vm6 = vweird.f32 %v3754_v3 }
 0x175   : > { %v1767_v45 = vmul.f32 0.5, %v1766_v11  ;;  %v2090_v59 = vpop.xlane.xlu0 %2089  ;;  %v1942_v9 = vpack.c.bf16 %v1927_v17, %v1926_v16  ;;  %v2208_v61 = vmul.f32 %v2168_v44, %v3320_v34  ;;  %v902_v37 = vmul.f32 %v3738_v8, %v883_v58  ;;  %vm3862_vm12 = vmor %vm2253_vm3, %vm2254_vm6 }
 0x176   : > { %v2251_v47 = vsub.f32 1.5, %v2250_v50  ;;  %v1234_v25 = vmul.f32 0.5, %v1233_v52  ;;  %vm1771_vm8 = vweird.f32 %v3769_v49  ;;  %v3841_v17 = vmul.f32 %v2246_v63, %v3351_v28 }
 0x177   : > { %v3827_v42 = vpop.eup %2769  ;;  %v1768_v31 = vsub.f32 1.5, %v1767_v45  ;;  %2687 = vmatmul.msk.bf16.vlgmr.msra.gmra.mxu2 %vm538_vm0, %v1942_v9  ;;  %v3838_v24 = vadd.f32 1e-06, %v2208_v61  ;;  %vm748_vm9 = vweird.f32 %v3764_v48  ;;  %v1704_v16 = vmul.f32 %v1662_v15, %v3320_v34  ;;  %vm3887_vm3 = vmor %vm1770_vm4, %vm1771_vm8 }
 0x178   : > { %v3832_v11 = vpop.eup %2771  ;;  %v743_v50 = vmul.f32 %v3827_v42, %v3764_v48  ;;  %v2252_v4 = vmul.f32 %v3754_v3, %v2251_v47  ;;  %v1235_v44 = vsub.f32 1.5, %v1234_v25  ;;  %v901_v28 = vmul.f32 %v3738_v8, %v882_v57 }
 0x179   : > { %v1242_v58 = vmul.f32 %v3832_v11, %v3766_v2  ;;  %1604 = vadd.xlane.f32.xlu1 %v1603_v33  ;;  %2775 = vrsqrt.f32 %v3838_v24  ;;  %v3852_v45 = vpop.eup %2773  ;;  %vm1238_vm10 = vweird.f32 %v3795_v54  ;;  %vm1247_vm11 = vweird.f32 %v3766_v2  ;;  %v2711_v2 = vld [vmem:[%s5200_s3 + $0x6] sm:$0x3] }
 0x17a   : > { %v744_v0 = vmul.f32 %v3827_v42, %v743_v50  ;;  %582 = vadd.xlane.f32.xlu0 %v3729_v22  ;;  %v2118_v15 = vmul.f32 %v2090_v59, %v3320_v34  ;;  %v1769_v22 = vmul.f32 %v3769_v49, %v1768_v31  ;;  %vm749_vm13 = vweird.f32 %v3827_v42  ;;  %vm3906_vm4 = vmor %vm1237_vm7, %vm1238_vm10 }
 0x17b   : > { %v1243_v52 = vmul.f32 %v3832_v11, %v1242_v58  ;;  %v753_v63 = vmul.f32 %v3852_v45, %v3790_v40  ;;  %v2256_v59 = vsel %vm3862_vm12, %v3754_v3, %v2252_v4  ;;  %vm1248_vm14 = vweird.f32 %v3832_v11  ;;  %vm3921_vm5 = vmor %vm748_vm9, %vm749_vm13 }
 0x17c   : > { %v745_v57 = vmul.f32 0.5, %v744_v0  ;;  %v2165_v47 = vpop.xlane.xlu1 %2164  ;;  %v1162_v9 = vpop.xlane.xlu2 %1161  ;;  %v3874_v62 = vadd.f32 1e-06, %v1704_v16  ;;  %v1236_v31 = vmul.f32 %v3795_v54, %v1235_v44  ;;  %vm758_vm15 = vweird.f32 %v3790_v40  ;;  %vm3939_vm6 = vmor %vm1247_vm11, %vm1248_vm14 }
 0x17d   : > { %v1244_v61 = vmul.f32 0.5, %v1243_v52  ;;  %v3876_v25 = vpop.xlane.xlu0 %1080  ;;  %v754_v58 = vmul.f32 %v3852_v45, %v753_v63  ;;  %vm2273_vm1 = vweird.f32 %v3838_v24  ;;  %v920_v0 = vadd.f32 %v3752_v38, %v901_v28 }
 0x17e   : > { %v746_v50 = vsub.f32 1.5, %v745_v57  ;;  %2777 = vrsqrt.f32 %v3874_v62  ;;  %v3893_v16 = vsub.f32 %v3414_v51, %v2118_v15  ;;  %v921_v44 = vadd.f32 %v3752_v38, %v902_v37 }
 0x17f   : > { %v1245_v4 = vsub.f32 1.5, %v1244_v61  ;;  %v3896_v52 = vpop.eup %2775  ;;  %v755_v33 = vmul.f32 0.5, %v754_v58  ;;  %v2207_v57 = vmul.f32 %v2165_v47, %v3320_v34  ;;  %v1202_v55 = vmul.f32 %v1162_v9, %v3320_v34 }
 0x180   : > { %v747_v28 = vmul.f32 %v3827_v42, %v746_v50  ;;  %v2398_v63 = vmul.f32 %v2256_v59, %v3356_v29  ;;  %v2268_v15 = vmul.f32 %v3896_v52, %v3838_v24  ;;  %v936_v61 = vpack.c.bf16 %v921_v44, %v920_v0 }
 0x181   : > { %v1246_v37 = vmul.f32 %v3832_v11, %v1245_v4  ;;  %2182 = vadd.xlane.f32.xlu1 %v3723_v13  ;;  %v1773_v29 = vsel %vm3887_vm3, %v3769_v49, %v1769_v22  ;;  %v756_v47 = vsub.f32 1.5, %v755_v33  ;;  %v3925_v9 = vadd.f32 1e-06, %v2207_v57 }
 0x182   : > { %v3927_v59 = vadd.f32 1e-06, %v1202_v55  ;;  %v1240_v13 = vsel %vm3906_vm4, %v3795_v54, %v1236_v31  ;;  %v751_v49 = vsel %vm3921_vm5, %v3827_v42, %v747_v28  ;;  %v2269_v22 = vmul.f32 %v3896_v52, %v2268_v15  ;;  %2637 = vmatmul.msk.bf16.vlgmr.msra.gmra.mxu0 %vm538_vm0, %v936_v61  ;;  %v2710_v31 = vld [vmem:[%s3133_s10 + $0x1f8] sm:$0xff] }
 0x183   : > { %v2150_v50 = vmul.f32 %v3893_v16, %v3893_v16  ;;  %v1250_v54 = vsel %vm3939_vm6, %v3832_v11, %v1246_v37  ;;  %v757_v42 = vmul.f32 %v3852_v45, %v756_v47  ;;  %vm759_vm7 = vweird.f32 %v3852_v45 }
 0x184   : > { %2779 = vrsqrt.f32 %v3925_v9  ;;  %v1159_v58 = vpop.xlane.xlu1 %1158  ;;  %v1668_v0 = vpop.xlane.xlu2 %1667  ;;  %v3960_v4 = vmul.f32 %v1773_v29, %v3373_v56  ;;  %v2270_v44 = vmul.f32 0.5, %v2269_v22  ;;  %v3965_v33 = vmul.f32 %v1240_v13, %v3361_v35  ;;  %vm3980_vm9 = vmor %vm758_vm15, %vm759_vm7  ;;  %v2709_v29 = vld [vmem:[%s3133_s10 + $0x1f0] sm:$0xff] }
 0x185   : > { %v3957_v3 = vpop.eup %2777  ;;  %2781 = vrsqrt.f32 %v3927_v59  ;;  %v2184_v11 = vsel %vm538_vm0, %v2150_v50, 0.0  ;;  %v1671_v28 = vpop.xlane.xlu0 %1670  ;;  %v3968_v57 = vmul.f32 %v751_v49, %v3384_v21  ;;  %vm2274_vm8 = vweird.f32 %v3896_v52 }
 0x186   : > { %v1755_v55 = vmul.f32 %v3957_v3, %v3874_v62  ;;  %2185 = vadd.xlane.f32.xlu2 %v2184_v11  ;;  %v3974_v56 = vmul.f32 %v1250_v54, %v3380_v10  ;;  %v2271_v21 = vsub.f32 1.5, %v2270_v44  ;;  %vm1760_vm10 = vweird.f32 %v3874_v62  ;;  %v2661_v10 = vld [vmem:[%s5200_s3 + $0x2] sm:$0x3]  ;;  %vm4003_vm12 = vmor %vm2273_vm1, %vm2274_vm8 }
 0x187   : > { %v2480_v51 = vsel %vm969_vm2, %v2711_v2, 0  ;;  %v2106_v37 = vsel %vm538_vm0, %v2710_v31, 0.0  ;;  %v761_v15 = vsel %vm3980_vm9, %v3852_v45, %v757_v42  ;;  %vm1761_vm11 = vweird.f32 %v3957_v3 }
 0x188   : > { %v1756_v40 = vmul.f32 %v3957_v3, %v1755_v55  ;;  %2489 = vmatpush.bf16.msra.mxu3 %v2480_v51  ;;  %2107 = vadd.xlane.f32.xlu0 %v2106_v37  ;;  %v2413_v61 = vmul.f32 %v3738_v8, %v3841_v17  ;;  %v2272_v26 = vmul.f32 %v3896_v52, %v2271_v21  ;;  %vm1267_vm13 = vweird.f32 %v3927_v59  ;;  %vm4055_vm15 = vmor %vm1760_vm10, %vm1761_vm11 }
 0x189   : > { %v2414_v45 = vmul.f32 %v3738_v8, %v2398_v63  ;;  %v1201_v13 = vmul.f32 %v1159_v58, %v3320_v34  ;;  %v1706_v17 = vmul.f32 %v1668_v0, %v3320_v34  ;;  %vm2263_vm14 = vweird.f32 %v3925_v9  ;;  %v537_v58 = vld [vmem:[%s3133_s10 + $0x78] sm:$0xff] }
 0x18a   : > { %v4011_v49 = vpop.eup %2779  ;;  %v1757_v48 = vmul.f32 0.5, %v1756_v40  ;;  %v1111_v24 = vmul.f32 %v3876_v25, %v3320_v34  ;;  %v1707_v22 = vmul.f32 %v1671_v28, %v3320_v34  ;;  %v1474_v50 = vsel %vm969_vm2, %v2661_v10, 0 }
 0x18b   : > { %v4018_v54 = vpop.eup %2781  ;;  %v2258_v63 = vmul.f32 %v4011_v49, %v3925_v9  ;;  %v2429_v42 = vadd.f32 %v3752_v38, %v2413_v61  ;;  %v2430_v2 = vadd.f32 %v3752_v38, %v2414_v45  ;;  %v2103_v31 = vsel %vm538_vm0, %v2709_v29, 0.0  ;;  %1483 = vmatpush.bf16.msra.mxu1 %v1474_v50 }
 0x18c   : > { %v885_v0 = vmul.f32 %v761_v15, %v3388_v18  ;;  %v2276_v25 = vsel %vm4003_vm12, %v3896_v52, %v2272_v26  ;;  %v1758_v44 = vsub.f32 1.5, %v1757_v48  ;;  %v1262_v11 = vmul.f32 %v4018_v54, %v3927_v59  ;;  %v1084_v28 = vpop.xlane.xlu1 %1083  ;;  %v1593_v55 = vpop.xlane.xlu2 %1592 }
 0x18d   : > { %v2259_v35 = vmul.f32 %v4011_v49, %v2258_v63  ;;  %v2445_v21 = vpack.c.bf16 %v2430_v2, %v2429_v42  ;;  %v4033_v51 = vadd.f32 1e-06, %v1201_v13  ;;  %v4035_v37 = vadd.f32 1e-06, %v1706_v17  ;;  %v656_v10 = vpop.xlane.xlu0 %655 }
 0x18e   : > { %v1759_v18 = vmul.f32 %v3957_v3, %v1758_v44  ;;  %v1263_v15 = vmul.f32 %v4018_v54, %v1262_v11  ;;  %2104 = vadd.xlane.f32.xlu2 %v2103_v31  ;;  %v4039_v52 = vadd.f32 1e-06, %v1707_v22  ;;  %v584_v40 = vsel %vm538_vm0, %v537_v58, 0.0  ;;  %v2659_v22 = vld [vmem:[%s3133_s10 + $0xf0] sm:$0xff] }
 0x18f   : > { %v2260_v61 = vmul.f32 0.5, %v2259_v35  ;;  %vm2264_vm2 = vweird.f32 %v4011_v49  ;;  %v4044_v29 = vsub.f32 %v3434_v6, %v1111_v24  ;;  %2712 = vmatmul.msk.bf16.vlgmr.msra.gmra.mxu3 %vm538_vm0, %v2445_v21  ;;  %2783 = vrsqrt.f32 %v4033_v51  ;;  %585 = vadd.xlane.f32.xlu1 %v584_v40 }
 0x190   : > { %v4049_v26 = vmul.f32 %v2276_v25, %v3402_v27  ;;  %v1264_v45 = vmul.f32 0.5, %v1263_v15  ;;  %vm1268_vm1 = vweird.f32 %v4018_v54  ;;  %2785 = vrsqrt.f32 %v4035_v37  ;;  %vm4078_vm3 = vmor %vm2263_vm14, %vm2264_vm2 }
 0x191   : > { %v1763_v6 = vsel %vm4055_vm15, %v3957_v3, %v1759_v18  ;;  %v2261_v13 = vsub.f32 1.5, %v2260_v61  ;;  %2787 = vrsqrt.f32 %v4039_v52  ;;  %v903_v27 = vmul.f32 %v3738_v8, %v3968_v57  ;;  %vm4092_vm4 = vmor %vm1267_vm13, %vm1268_vm1 }
 0x192   : > { %v1265_v62 = vsub.f32 1.5, %v1264_v45  ;;  %v904_v17 = vmul.f32 %v3738_v8, %v885_v0  ;;  %v1407_v48 = vmul.f32 %v3738_v8, %v3965_v33  ;;  %v1408_v24 = vmul.f32 %v3738_v8, %v3974_v56 }
 0x193   : > { %v2262_v50 = vmul.f32 %v4011_v49, %v2261_v13  ;;  %v922_v57 = vadd.f32 %v3752_v38, %v903_v27  ;;  %v1112_v63 = vmul.f32 %v1084_v28, %v3320_v34  ;;  %v1617_v33 = vmul.f32 %v1593_v55, %v3320_v34 }
 0x194   : > { %v4086_v42 = vmul.f32 %v4018_v54, %v1265_v62  ;;  %vm1780_vm5 = vweird.f32 %v4035_v37  ;;  %v923_v9 = vadd.f32 %v3752_v38, %v904_v17  ;;  %v1424_v2 = vadd.f32 %v3752_v38, %v1408_v24  ;;  %v1590_v31 = vpop.xlane.xlu1 %1589  ;;  %v2171_v58 = vpop.xlane.xlu2 %2170 }
 0x195   : > { %v4099_v0 = vpop.eup %2783  ;;  %v1896_v25 = vmul.f32 %v1763_v6, %v3399_v23  ;;  %v2266_v59 = vsel %vm4078_vm3, %v4011_v49, %v2262_v50  ;;  %vm1790_vm6 = vweird.f32 %v4039_v52  ;;  %v1097_v44 = vsel %vm538_vm0, %v2659_v22, 0.0  ;;  %v2174_v11 = vpop.xlane.xlu0 %2173 }
 0x196   : > { %v4107_v28 = vpop.eup %2785  ;;  %v1252_v55 = vmul.f32 %v4099_v0, %v4033_v51  ;;  %vm1257_vm7 = vweird.f32 %v4033_v51  ;;  %v1423_v35 = vadd.f32 %v3752_v38, %v1407_v48  ;;  %v4114_v23 = vsub.f32 %v3464_v12, %v1112_v63  ;;  %1098 = vadd.xlane.f32.xlu0 %v1097_v44 }
 0x197   : > { %v4117_v21 = vsub.f32 %v3467_v60, %v1617_v33  ;;  %v4119_v49 = vpop.eup %2787  ;;  %v4122_v18 = vmul.f32 %v2266_v59, %v3417_v14  ;;  %v1270_v15 = vsel %vm4092_vm4, %v4018_v54, %v4086_v42  ;;  %v1775_v40 = vmul.f32 %v4107_v28, %v4035_v37 }
 0x198   : > { %v937_v61 = vpack.c.bf16 %v923_v9, %v922_v57  ;;  %v1253_v12 = vmul.f32 %v4099_v0, %v1252_v55  ;;  %vm1258_vm8 = vweird.f32 %v4099_v0  ;;  %v1785_v60 = vmul.f32 %v4119_v49, %v4039_v52 }
 0x199   : > { %v1439_v47 = vpack.c.bf16 %v1424_v2, %v1423_v35  ;;  %v1776_v14 = vmul.f32 %v4107_v28, %v1775_v40  ;;  %v694_v45 = vmul.f32 %v656_v10, %v3320_v34  ;;  %v1143_v54 = vmul.f32 %v4044_v29, %v4044_v29  ;;  %vm4170_vm12 = vmor %vm1257_vm7, %vm1258_vm8  ;;  %v2882_v2 = vld [vmem:[%s3133_s10 + $0x58] sm:$0xff] }
 0x19a   : > { %2638 = vmatmul.msk.bf16.gmra.mxu0 %vm538_vm0, %v937_v61  ;;  %v1912_v6 = vmul.f32 %v3738_v8, %v1896_v25  ;;  %v1254_v13 = vmul.f32 0.5, %v1253_v12  ;;  %vm1781_vm9 = vweird.f32 %v4107_v28  ;;  %v1786_v27 = vmul.f32 %v4119_v49, %v1785_v60 }
 0x19b   : > { %2662 = vmatmul.msk.bf16.vlgmr.msra.gmra.mxu1 %vm538_vm0, %v1439_v47  ;;  %v1913_v62 = vmul.f32 %v3738_v8, %v3960_v4  ;;  %v1777_v17 = vmul.f32 0.5, %v1776_v14  ;;  %v4145_v48 = vadd.f32 1e-06, %v694_v45  ;;  %v1175_v10 = vsel %vm538_vm0, %v1143_v54, 0.0  ;;  %vm4159_vm11 = vmor %vm1780_vm5, %vm1781_vm9 }
 0x19c   : > { %v1928_v24 = vadd.f32 %v3752_v38, %v1912_v6  ;;  %v1255_v22 = vsub.f32 1.5, %v1254_v13  ;;  %v1787_v50 = vmul.f32 0.5, %v1786_v27  ;;  %vm1791_vm10 = vweird.f32 %v4119_v49  ;;  %1176 = vadd.xlane.f32.xlu1 %v1175_v10  ;;  %v659_v57 = vpop.xlane.xlu1 %658  ;;  %v574_v63 = vpop.xlane.xlu2 %573 }
 0x19d   : > { %v1929_v3 = vadd.f32 %v3752_v38, %v1913_v62  ;;  %v1778_v33 = vsub.f32 1.5, %v1777_v17  ;;  %2789 = vrsqrt.f32 %v4145_v48  ;;  %v1616_v4 = vmul.f32 %v1590_v31, %v3320_v34  ;;  %v2093_v56 = vpop.xlane.xlu0 %2092  ;;  %v2660_v31 = vld [vmem:[%s3133_s10 + $0xf8] sm:$0xff]  ;;  %vm4189_vm13 = vmor %vm1790_vm6, %vm1791_vm10 }
 0x19e   : > { %v2209_v42 = vmul.f32 %v2171_v58, %v3320_v34  ;;  %v1256_v9 = vmul.f32 %v4099_v0, %v1255_v22  ;;  %v1788_v25 = vsub.f32 1.5, %v1787_v50  ;;  %v1649_v44 = vmul.f32 %v4117_v21, %v4117_v21 }
 0x19f   : > { %v1943_v59 = vpack.c.bf16 %v1929_v3, %v1928_v24  ;;  %v1779_v37 = vmul.f32 %v4107_v28, %v1778_v33  ;;  %v1144_v35 = vmul.f32 %v4114_v23, %v4114_v23  ;;  %v2210_v40 = vmul.f32 %v2174_v11, %v3320_v34 }
 0x1a0   : > { %v4175_v55 = vadd.f32 1e-06, %v2209_v42  ;;  %v1394_v61 = vmul.f32 %v1270_v15, %v3422_v53  ;;  %v1260_v12 = vsel %vm4170_vm12, %v4099_v0, %v1256_v9  ;;  %v1789_v51 = vmul.f32 %v4119_v49, %v1788_v25  ;;  %v2881_v15 = vld [vmem:[%s3133_s10 + $0x150] sm:$0xff] }
 0x1a1   : > { %2688 = vmatmul.msk.bf16.gmra.mxu2 %vm538_vm0, %v1943_v59  ;;  %v1687_v11 = vsel %vm538_vm0, %v1649_v44, 0.0  ;;  %v1783_v53 = vsel %vm4159_vm11, %v4107_v28, %v1779_v37  ;;  %v4199_v0 = vsub.f32 %v2881_v15, %v1616_v4  ;;  %v1100_v52 = vsel %vm538_vm0, %v2660_v31, 0.0  ;;  %v2883_v15 = vld [vmem:[%s3133_s10 + $0x1d0] sm:$0xff] }
 0x1a2   : > { %2791 = vrsqrt.f32 %v4175_v55  ;;  %1688 = vadd.xlane.f32.xlu0 %v1687_v11  ;;  %v1393_v47 = vmul.f32 %v1260_v12, %v3437_v7  ;;  %vm768_vm14 = vweird.f32 %v4145_v48  ;;  %v1178_v14 = vsel %vm538_vm0, %v1144_v35, 0.0 }
 0x1a3   : > { %v4206_v45 = vadd.f32 1e-06, %v2210_v40  ;;  %v4208_v54 = vpop.eup %2789  ;;  %v1793_v28 = vsel %vm4189_vm13, %v4119_v49, %v1789_v51  ;;  %1179 = vadd.xlane.f32.xlu2 %v1178_v14  ;;  %v2415_v6 = vmul.f32 %v3738_v8, %v4122_v18  ;;  %v2416_v13 = vmul.f32 %v3738_v8, %v4049_v26 }
 0x1a4   : > { %v695_v7 = vmul.f32 %v659_v57, %v3320_v34  ;;  %v1898_v27 = vmul.f32 %v1783_v53, %v3440_v19  ;;  %v763_v62 = vmul.f32 %v4208_v54, %v4145_v48  ;;  %vm2283_vm2 = vweird.f32 %v4175_v55  ;;  %1101 = vadd.xlane.f32.xlu1 %v1100_v52  ;;  %v571_v49 = vpop.xlane.xlu1 %570  ;;  %v1165_v17 = vpop.xlane.xlu2 %1164 }
 0x1a5   : > { %2793 = vrsqrt.f32 %v4206_v45  ;;  %v2431_v10 = vadd.f32 %v3752_v38, %v2415_v6  ;;  %v2432_v18 = vadd.f32 %v3752_v38, %v2416_v13  ;;  %v605_v26 = vmul.f32 %v3320_v34, %v574_v63  ;;  %v4228_v19 = vpop.xlane.xlu0 %1167 }
 0x1a6   : > { %v4225_v24 = vadd.f32 1e-06, %v695_v7  ;;  %v1899_v22 = vmul.f32 %v1793_v28, %v3445_v1  ;;  %v764_v50 = vmul.f32 %v4208_v54, %v763_v62  ;;  %v1648_v3 = vmul.f32 %v4199_v0, %v4199_v0 }
 0x1a7   : > { %v1409_v57 = vmul.f32 %v3738_v8, %v1393_v47  ;;  %vm769_vm15 = vweird.f32 %v4208_v54  ;;  %vm2293_vm1 = vweird.f32 %v4206_v45  ;;  %v2446_v4 = vpack.c.bf16 %v2432_v18, %v2431_v10  ;;  %v2884_v18 = vld [vmem:[%s3133_s10 + $0x50] sm:$0xff] }
 0x1a8   : > { %v4235_v33 = vpop.eup %2791  ;;  %2795 = vrsqrt.f32 %v4225_v24  ;;  %v765_v63 = vmul.f32 0.5, %v764_v50  ;;  %v1684_v42 = vsel %vm538_vm0, %v1648_v3, 0.0  ;;  %v2119_v9 = vmul.f32 %v2093_v56, %v3320_v34  ;;  %vm4266_vm4 = vmor %vm768_vm14, %vm769_vm15 }
 0x1a9   : > { %v2278_v1 = vmul.f32 %v4235_v33, %v4175_v55  ;;  %2713 = vmatmul.msk.bf16.gmra.mxu3 %vm538_vm0, %v2446_v4  ;;  %v4246_v25 = vsub.f32 %v2882_v2, %v605_v26  ;;  %v1410_v59 = vmul.f32 %v3738_v8, %v1394_v61  ;;  %v1425_v44 = vadd.f32 %v3752_v38, %v1409_v57 }
 0x1aa   : > { %v1914_v31 = vmul.f32 %v3738_v8, %v1898_v27  ;;  %v766_v37 = vsub.f32 1.5, %v765_v63  ;;  %v1915_v40 = vmul.f32 %v3738_v8, %v1899_v22  ;;  %v604_v56 = vmul.f32 %v3320_v34, %v571_v49 }
 0x1ab   : > { %v4251_v58 = vpop.eup %2793  ;;  %v2279_v35 = vmul.f32 %v4235_v33, %v2278_v1  ;;  %vm2284_vm3 = vweird.f32 %v4235_v33  ;;  %1685 = vadd.xlane.f32.xlu2 %v1684_v42  ;;  %v1426_v61 = vadd.f32 %v3752_v38, %v1410_v59  ;;  %v4271_v52 = vsub.f32 %v2883_v15, %v2119_v9 }
 0x1ac   : > { %v2288_v12 = vmul.f32 %v4251_v58, %v4206_v45  ;;  %v1930_v51 = vadd.f32 %v3752_v38, %v1914_v31  ;;  %v767_v60 = vmul.f32 %v4208_v54, %v766_v37  ;;  %v1931_v47 = vadd.f32 %v3752_v38, %v1915_v40  ;;  %v2096_v14 = vpop.xlane.xlu1 %2095  ;;  %v1090_v28 = vpop.xlane.xlu2 %1089  ;;  %vm4293_vm6 = vmor %vm2283_vm2, %vm2284_vm3  ;;  %v2885_v40 = vld [vmem:[%s3133_s10 + $0x1d8] sm:$0xff] }
 0x1ad   : > { %v2280_v53 = vmul.f32 0.5, %v2279_v35  ;;  %v1440_v7 = vpack.c.bf16 %v1426_v61, %v1425_v44  ;;  %v1203_v48 = vmul.f32 %v1165_v17, %v3320_v34  ;;  %v637_v27 = vmul.f32 %v4246_v25, %v4246_v25  ;;  %v1674_v62 = vpop.xlane.xlu0 %1673 }
 0x1ae   : > { %v4274_v6 = vpop.eup %2795  ;;  %v2289_v13 = vmul.f32 %v4251_v58, %v2288_v12  ;;  %vm2294_vm5 = vweird.f32 %v4251_v58  ;;  %v4284_v26 = vsub.f32 %v2884_v18, %v604_v56  ;;  %v771_v22 = vsel %vm4266_vm4, %v4208_v54, %v767_v60 }
 0x1af   : > { %v2281_v49 = vsub.f32 1.5, %v2280_v53  ;;  %v773_v10 = vmul.f32 %v4274_v6, %v4225_v24  ;;  %2663 = vmatmul.msk.bf16.gmra.mxu1 %vm538_vm0, %v1440_v7  ;;  %v1944_v3 = vpack.c.bf16 %v1931_v47, %v1930_v51  ;;  %v4298_v57 = vadd.f32 1e-06, %v1203_v48  ;;  %vm4317_vm8 = vmor %vm2293_vm1, %vm2294_vm5 }
 0x1b0   : > { %v2290_v50 = vmul.f32 0.5, %v2289_v13  ;;  %v675_v54 = vsel %vm538_vm0, %v637_v27, 0.0  ;;  %v2151_v1 = vmul.f32 %v4271_v52, %v4271_v52  ;;  %vm779_vm7 = vweird.f32 %v4274_v6 }
 0x1b1   : > { %v2282_v4 = vmul.f32 %v4235_v33, %v2281_v49  ;;  %v774_v63 = vmul.f32 %v4274_v6, %v773_v10  ;;  %2689 = vmatmul.msk.bf16.gmra.mxu2 %vm538_vm0, %v1944_v3  ;;  %2797 = vrsqrt.f32 %v4298_v57  ;;  %v1204_v42 = vmul.f32 %v4228_v19, %v3320_v34 }
 0x1b2   : > { %v2291_v55 = vsub.f32 1.5, %v2290_v50  ;;  %v2187_v44 = vsel %vm538_vm0, %v2151_v1, 0.0  ;;  %v2120_v31 = vmul.f32 %v2096_v14, %v3320_v34  ;;  %v1114_v35 = vmul.f32 %v1090_v28, %v3320_v34  ;;  %v2888_v50 = vld [vmem:[%s3133_s10 + $0x160] sm:$0xff] }
 0x1b3   : > { %v2286_v9 = vsel %vm4293_vm6, %v4235_v33, %v2282_v4  ;;  %v775_v59 = vmul.f32 0.5, %v774_v63  ;;  %676 = vadd.xlane.f32.xlu2 %v675_v54  ;;  %2188 = vadd.xlane.f32.xlu0 %v2187_v44  ;;  %v4325_v33 = vadd.f32 1e-06, %v1204_v42  ;;  %v636_v12 = vmul.f32 %v4284_v26, %v4284_v26 }
 0x1b4   : > { %v2401_v37 = vmul.f32 %v2286_v9, %v3473_v36  ;;  %v2292_v19 = vmul.f32 %v4251_v58, %v2291_v55  ;;  %v4329_v56 = vsub.f32 %v2885_v40, %v2120_v31  ;;  %v1708_v61 = vmul.f32 %v1674_v62, %v3320_v34  ;;  %v1087_v51 = vpop.xlane.xlu1 %1086  ;;  %v1596_v36 = vpop.xlane.xlu2 %1595 }
 0x1b5   : > { %v776_v45 = vsub.f32 1.5, %v775_v59  ;;  %v886_v60 = vmul.f32 %v771_v22, %v3460_v20  ;;  %vm778_vm9 = vweird.f32 %v4225_v24  ;;  %2799 = vrsqrt.f32 %v4325_v33  ;;  %v1599_v53 = vpop.xlane.xlu0 %1598 }
 0x1b6   : > { %v2296_v11 = vsel %vm4317_vm8, %v4251_v58, %v2292_v19  ;;  %vm1277_vm10 = vweird.f32 %v4298_v57  ;;  %v672_v14 = vsel %vm538_vm0, %v636_v12, 0.0  ;;  %v4344_v28 = vadd.f32 1e-06, %v1708_v61  ;;  %vm780_vm11 = vmor %vm778_vm9, %vm779_vm7  ;;  %v2886_v58 = vld [vmem:[%s3133_s10 + $0xd8] sm:$0xff]  ;;  %v2889_v19 = vld [vmem:[%s3133_s10 + $0x168] sm:$0xff] }
 0x1b7   : > { %v2402_v15 = vmul.f32 %v2296_v11, %v3481_v30  ;;  %v777_v47 = vmul.f32 %v4274_v6, %v776_v45  ;;  %v4346_v20 = vpop.eup %2797  ;;  %v4351_v24 = vsub.f32 %v2886_v58, %v1114_v35  ;;  %673 = vadd.xlane.f32.xlu1 %v672_v14  ;;  %v2417_v30 = vmul.f32 %v3738_v8, %v2401_v37 }
 0x1b8   : > { %v1113_v13 = vmul.f32 %v1087_v51, %v3320_v34  ;;  %v1618_v7 = vmul.f32 %v1596_v36, %v3320_v34  ;;  %v1272_v27 = vmul.f32 %v4346_v20, %v4298_v57  ;;  %2801 = vrsqrt.f32 %v4344_v28 }
 0x1b9   : > { %v781_v48 = vsel %vm780_vm11, %v4274_v6, %v777_v47  ;;  %v2152_v62 = vmul.f32 %v4329_v56, %v4329_v56  ;;  %vm1287_vm12 = vweird.f32 %v4325_v33  ;;  %v2418_v10 = vmul.f32 %v3738_v8, %v2402_v15  ;;  %v2887_v6 = vld [vmem:[%s3133_s10 + $0xd0] sm:$0xff] }
 0x1ba   : > { %v887_v49 = vmul.f32 %v781_v48, %v3490_v32  ;;  %v2433_v18 = vadd.f32 %v3752_v38, %v2417_v30  ;;  %v1273_v22 = vmul.f32 %v4346_v20, %v1272_v27  ;;  %vm1278_vm13 = vweird.f32 %v4346_v20 }
 0x1bb   : > { %v4369_v17 = vsub.f32 %v2887_v6, %v1113_v13  ;;  %v4372_v3 = vsub.f32 %v2888_v50, %v1618_v7  ;;  %v4374_v4 = vpop.eup %2799  ;;  %v2434_v32 = vadd.f32 %v3752_v38, %v2418_v10  ;;  %v1146_v63 = vmul.f32 %v4351_v24, %v4351_v24  ;;  %vm1279_vm2 = vmor %vm1277_vm10, %vm1278_vm13 }
 0x1bc   : > { %v1619_v54 = vmul.f32 %v1599_v53, %v3320_v34  ;;  %v905_v1 = vmul.f32 %v3738_v8, %v886_v60  ;;  %v1274_v55 = vmul.f32 0.5, %v1273_v22  ;;  %v1282_v42 = vmul.f32 %v4374_v4, %v4325_v33  ;;  %v1677_v59 = vpop.xlane.xlu1 %1676  ;;  %v665_v44 = vpop.xlane.xlu2 %664 }
 0x1bd   : > { %v2190_v9 = vsel %vm538_vm0, %v2152_v62, 0.0  ;;  %v906_v2 = vmul.f32 %v3738_v8, %v887_v49  ;;  %v2447_v31 = vpack.c.bf16 %v2434_v32, %v2433_v18  ;;  %v1184_v37 = vsel %vm538_vm0, %v1146_v63, 0.0  ;;  %v2177_v40 = vpop.xlane.xlu0 %2176 }
 0x1be   : > { %v4387_v35 = vsub.f32 %v2889_v19, %v1619_v54  ;;  %v924_v45 = vadd.f32 %v3752_v38, %v905_v1  ;;  %v4390_v12 = vpop.eup %2801  ;;  %v1275_v61 = vsub.f32 1.5, %v1274_v55  ;;  %v1283_v51 = vmul.f32 %v4374_v4, %v1282_v42  ;;  %1185 = vadd.xlane.f32.xlu0 %v1184_v37 }
 0x1bf   : > { %v925_v36 = vadd.f32 %v3752_v38, %v906_v2  ;;  %v1709_v60 = vmul.f32 %v1677_v59, %v3320_v34  ;;  %vm1288_vm14 = vweird.f32 %v4374_v4  ;;  %v1795_v11 = vmul.f32 %v4390_v12, %v4344_v28  ;;  %2714 = vmatmul.msk.bf16.gmra.mxu3 %vm538_vm0, %v2447_v31  ;;  %2191 = vadd.xlane.f32.xlu1 %v2190_v9 }
 0x1c0   : > { %v697_v53 = vmul.f32 %v665_v44, %v3320_v34  ;;  %v1145_v15 = vmul.f32 %v4369_v17, %v4369_v17  ;;  %v1276_v47 = vmul.f32 %v4346_v20, %v1275_v61  ;;  %v1284_v14 = vmul.f32 0.5, %v1283_v51  ;;  %vm4423_vm15 = vmor %vm1287_vm12, %vm1288_vm14 }
 0x1c1   : > { %v938_v58 = vpack.c.bf16 %v925_v36, %v924_v45  ;;  %v4403_v30 = vadd.f32 1e-06, %v1709_v60  ;;  %v1796_v13 = vmul.f32 %v4390_v12, %v1795_v11  ;;  %v1650_v27 = vmul.f32 %v4372_v3, %v4372_v3  ;;  %v2890_v45 = vld [vmem:[%s3133_s10 + $0x60] sm:$0xff] }
 0x1c2   : > { %v4410_v7 = vadd.f32 1e-06, %v697_v53  ;;  %v1181_v48 = vsel %vm538_vm0, %v1145_v15, 0.0  ;;  %v1280_v62 = vsel %vm1279_vm2, %v4346_v20, %v1276_v47  ;;  %v1285_v49 = vsub.f32 1.5, %v1284_v14 }
 0x1c3   : > { %2639 = vmatmul.msk.bf16.gmra.mxu0 %vm538_vm0, %v938_v58  ;;  %2803 = vrsqrt.f32 %v4403_v30  ;;  %1182 = vadd.xlane.f32.xlu2 %v1181_v48  ;;  %v1395_v57 = vmul.f32 %v1280_v62, %v3502_v5  ;;  %v1797_v18 = vmul.f32 0.5, %v1796_v13  ;;  %vm1800_vm1 = vweird.f32 %v4344_v28 }
 0x1c4   : > { %2805 = vrsqrt.f32 %v4410_v7  ;;  %v1286_v20 = vmul.f32 %v4374_v4, %v1285_v49  ;;  %v1690_v22 = vsel %vm538_vm0, %v1650_v27, 0.0  ;;  %v2211_v6 = vmul.f32 %v2177_v40, %v3320_v34  ;;  %v662_v5 = vpop.xlane.xlu1 %661  ;;  %v577_v50 = vpop.xlane.xlu2 %576  ;;  %v2891_v40 = vld [vmem:[%s3133_s10 + $0x68] sm:$0xff] }
 0x1c5   : > { %v1651_v33 = vmul.f32 %v4387_v35, %v4387_v35  ;;  %v1798_v32 = vsub.f32 1.5, %v1797_v18  ;;  %v1411_v63 = vmul.f32 %v3738_v8, %v1395_v57  ;;  %v696_v54 = vmul.f32 %v662_v5, %v3320_v34  ;;  %v580_v55 = vpop.xlane.xlu0 %579 }
 0x1c6   : > { %v606_v1 = vmul.f32 %v3320_v34, %v577_v50  ;;  %v1290_v42 = vsel %vm4423_vm15, %v4374_v4, %v1286_v20  ;;  %vm1801_vm3 = vweird.f32 %v4390_v12  ;;  %v4441_v9 = vadd.f32 1e-06, %v2211_v6 }
 0x1c7   : > { %v607_v2 = vmul.f32 %v3320_v34, %v580_v55  ;;  %v1396_v59 = vmul.f32 %v1290_v42, %v3507_v41  ;;  %1691 = vadd.xlane.f32.xlu1 %v1690_v22  ;;  %v4445_v44 = vadd.f32 1e-06, %v696_v54  ;;  %v1693_v31 = vsel %vm538_vm0, %v1651_v33, 0.0  ;;  %vm4460_vm4 = vmor %vm1800_vm1, %vm1801_vm3  ;;  %v2892_v54 = vld [vmem:[%s3133_s10 + $0x1e8] sm:$0xff] }
 0x1c8   : > { %v1799_v19 = vmul.f32 %v4390_v12, %v1798_v32  ;;  %2807 = vrsqrt.f32 %v4441_v9  ;;  %v4451_v4 = vsub.f32 %v2890_v45, %v606_v1  ;;  %v1427_v11 = vadd.f32 %v3752_v38, %v1411_v63 }
 0x1c9   : > { %v2804_v37 = vpop.eup %2803  ;;  %v4454_v61 = vsub.f32 %v2891_v40, %v607_v2  ;;  %v1412_v60 = vmul.f32 %v3738_v8, %v1396_v59  ;;  %2809 = vrsqrt.f32 %v4445_v44  ;;  %vm1810_vm7 = vweird.f32 %v4403_v30 }
 0x1ca   : > { %v2806_v51 = vpop.eup %2805  ;;  %v1805_v36 = vmul.f32 %v2804_v37, %v4403_v30  ;;  %v638_v28 = vmul.f32 %v4451_v4, %v4451_v4  ;;  %v1803_v14 = vsel %vm4460_vm4, %v4390_v12, %v1799_v19  ;;  %vm1811_vm5 = vweird.f32 %v2804_v37 }
 0x1cb   : > { %v793_v53 = vmul.f32 %v2806_v51, %v4410_v7  ;;  %1694 = vadd.xlane.f32.xlu2 %v1693_v31  ;;  %v1428_v47 = vadd.f32 %v3752_v38, %v1412_v60  ;;  %v639_v48 = vmul.f32 %v4454_v61, %v4454_v61  ;;  %v1900_v6 = vmul.f32 %v1803_v14, %v3521_v39  ;;  %vm1812_vm8 = vmor %vm1810_vm7, %vm1811_vm5 }
 0x1cc   : > { %v1806_v15 = vmul.f32 %v2804_v37, %v1805_v36  ;;  %v2180_v8 = vpop.xlane.xlu1 %2179  ;;  %v2102_v13 = vpop.xlane.xlu2 %2101  ;;  %v678_v12 = vsel %vm538_vm0, %v638_v28, 0.0  ;;  %vm799_vm6 = vweird.f32 %v2806_v51  ;;  %vm798_vm9 = vweird.f32 %v4410_v7  ;;  %v4512_v7 = vld [vmem:[%s5198_s1] ss:$0 sm:$0xff] }
 0x1cd   : > { %v794_v58 = vmul.f32 %v2806_v51, %v793_v53  ;;  %v1441_v62 = vpack.c.bf16 %v1428_v47, %v1427_v11  ;;  %v2212_v49 = vmul.f32 %v2180_v8, %v3320_v34  ;;  %v2122_v38 = vmul.f32 %v2102_v13, %v3320_v34  ;;  %v1171_v57 = vpop.xlane.xlu0 %1170  ;;  %679 = vadd.xlane.f32.xlu0 %v678_v12  ;;  %vm800_vm10 = vmor %vm798_vm9, %vm799_vm6 }
 0x1ce   : > { %v1807_v27 = vmul.f32 0.5, %v1806_v15  ;;  %v4479_v10 = vpop.eup %2807  ;;  %v681_v20 = vsel %vm538_vm0, %v639_v48, 0.0  ;;  %v1205_v22 = vmul.f32 %v1171_v57, %v3320_v34  ;;  %vm2303_vm13 = vweird.f32 %v4441_v9 }
 0x1cf   : > { %v795_v18 = vmul.f32 0.5, %v794_v58  ;;  %v2298_v50 = vmul.f32 %v4479_v10, %v4441_v9  ;;  %2664 = vmatmul.msk.bf16.gmra.mxu1 %vm538_vm0, %v1441_v62  ;;  %v4488_v33 = vadd.f32 1e-06, %v2212_v49  ;;  %v4490_v32 = vpop.eup %2809  ;;  %v4493_v1 = vsub.f32 %v2892_v54, %v2122_v38  ;;  %682 = vadd.xlane.f32.xlu1 %v681_v20  ;;  %v2895_v62 = vld [vmem:[%s3133_s10 + $0xe0] sm:$0xff] }
 0x1d0   : > { %v1808_v5 = vsub.f32 1.5, %v1807_v27  ;;  %v4495_v55 = vadd.f32 1e-06, %v1205_v22  ;;  %v783_v2 = vmul.f32 %v4490_v32, %v4445_v44  ;;  %vm2304_vm11 = vweird.f32 %v4479_v10  ;;  %v4533_v38 = vld [vmem:[%s5199_s2] ss:$0 sm:$0xff] }
 0x1d1   : > { %v796_v63 = vsub.f32 1.5, %v795_v18  ;;  %v2299_v42 = vmul.f32 %v4479_v10, %v2298_v50  ;;  %2811 = vrsqrt.f32 %v4488_v33  ;;  %v2154_v60 = vmul.f32 %v4493_v1, %v4493_v1  ;;  %vm4553_vm15 = vmor %vm2303_vm13, %vm2304_vm11 }
 0x1d2   : > { %v1809_v39 = vmul.f32 %v2804_v37, %v1808_v5  ;;  %v784_v45 = vmul.f32 %v4490_v32, %v783_v2  ;;  %2813 = vrsqrt.f32 %v4495_v55  ;;  %vm789_vm12 = vweird.f32 %v4490_v32  ;;  %v2897_v5 = vld [vmem:[%s3133_s10 + $0xe8] sm:$0xff] }
 0x1d3   : > { %v797_v59 = vmul.f32 %v2806_v51, %v796_v63  ;;  %v2300_v19 = vmul.f32 0.5, %v2299_v42  ;;  %v2196_v28 = vsel %vm538_vm0, %v2154_v60, 0.0  ;;  %vm788_vm14 = vweird.f32 %v4445_v44 }
 0x1d4   : > { %v1813_v31 = vsel %vm1812_vm8, %v2804_v37, %v1809_v39  ;;  %v2099_v41 = vpop.xlane.xlu1 %2098  ;;  %v1093_v36 = vpop.xlane.xlu2 %1092  ;;  %v1916_v37 = vmul.f32 %v4512_v7, %v1900_v6  ;;  %v785_v15 = vmul.f32 0.5, %v784_v45  ;;  %vm790_vm2 = vmor %vm788_vm14, %vm789_vm12  ;;  %vm2313_vm3 = vweird.f32 %v4488_v33 }
 0x1d5   : > { %v1901_v30 = vmul.f32 %v1813_v31, %v3546_v46  ;;  %v801_v40 = vsel %vm800_vm10, %v2806_v51, %v797_v59  ;;  %v2301_v53 = vsub.f32 1.5, %v2300_v19  ;;  %v2121_v46 = vmul.f32 %v2099_v41, %v3320_v34  ;;  %v1096_v51 = vpop.xlane.xlu0 %1095  ;;  %2197 = vadd.xlane.f32.xlu0 %v2196_v28  ;;  %v5269_v31 = vld [vmem:[#allocation4_spill] sm:$0xff] }
 0x1d6   : > { %v889_v11 = vmul.f32 %v801_v40, %v3540_v43  ;;  %v1115_v47 = vmul.f32 %v1093_v36, %v3320_v34  ;;  %v1116_v14 = vmul.f32 %v1096_v51, %v3320_v34  ;;  %v786_v8 = vsub.f32 1.5, %v785_v15  ;;  %v2894_v43 = vld [vmem:[%s3133_s10 + $0x1e0] sm:$0xff] }
 0x1d7   : > { %v1917_v58 = vmul.f32 %v4512_v7, %v1901_v30  ;;  %v4524_v13 = vsub.f32 %v2894_v43, %v2121_v46  ;;  %v2812_v48 = vpop.eup %2811  ;;  %v2302_v27 = vmul.f32 %v4479_v10, %v2301_v53  ;;  %v1932_v57 = vadd.f32 %v4533_v38, %v1916_v37 }
 0x1d8   : > { %v4528_v49 = vsub.f32 %v2895_v62, %v1115_v47  ;;  %v4537_v12 = vpop.eup %2813  ;;  %v787_v20 = vmul.f32 %v4490_v32, %v786_v8  ;;  %v2308_v22 = vmul.f32 %v2812_v48, %v4488_v33  ;;  %v4548_v50 = vsub.f32 %v2897_v5, %v1116_v14  ;;  %v2898_v14 = vld [vmem:[%s3133_s10 + $0x170] sm:$0xff] }
 0x1d9   : > { %v1933_v18 = vadd.f32 %v4533_v38, %v1917_v58  ;;  %v1292_v6 = vmul.f32 %v4537_v12, %v4495_v55  ;;  %v908_v54 = vmul.f32 %v4512_v7, %v889_v11  ;;  %v2153_v42 = vmul.f32 %v4524_v13, %v4524_v13 }
 0x1da   : > { %v791_v44 = vsel %vm790_vm2, %v4490_v32, %v787_v20  ;;  %v2309_v39 = vmul.f32 %v2812_v48, %v2308_v22  ;;  %v1147_v2 = vmul.f32 %v4528_v49, %v4528_v49  ;;  %v2306_v59 = vsel %vm4553_vm15, %v4479_v10, %v2302_v27  ;;  %v5270_v27 = vld [vmem:[#allocation3_spill] sm:$0xff] }
 0x1db   : > { %v1945_v63 = vpack.c.bf16 %v1933_v18, %v1932_v57  ;;  %v888_v19 = vmul.f32 %v791_v44, %v5269_v31  ;;  %vm2314_vm1 = vweird.f32 %v2812_v48  ;;  %v1293_v45 = vmul.f32 %v4537_v12, %v1292_v6 }
 0x1dc   : > { %v1683_v30 = vpop.xlane.xlu2 %1682  ;;  %v1174_v32 = vpop.xlane.xlu1 %1173  ;;  %v2310_v40 = vmul.f32 0.5, %v2309_v39  ;;  %v2193_v60 = vsel %vm538_vm0, %v2153_v42, 0.0  ;;  %v1187_v10 = vsel %vm538_vm0, %v1147_v2, 0.0  ;;  %v1148_v28 = vmul.f32 %v4548_v50, %v4548_v50  ;;  %vm2315_vm4 = vmor %vm2313_vm3, %vm2314_vm1 }
 0x1dd   : > { %2690 = vmatmul.msk.bf16.gmra.mxu2 %vm538_vm0, %v1945_v63  ;;  %v1711_v41 = vmul.f32 %v1683_v30, %v3320_v34  ;;  %v1206_v36 = vmul.f32 %v1174_v32, %v3320_v34  ;;  %v1602_v37 = vpop.xlane.xlu0 %1601  ;;  %v1294_v11 = vmul.f32 0.5, %v1293_v45  ;;  %2194 = vadd.xlane.f32.xlu2 %v2193_v60  ;;  %v907_v15 = vmul.f32 %v4512_v7, %v888_v19  ;;  %v5271_v63 = vld [vmem:[#allocation5_spill] sm:$0xff] }
 0x1de   : > { %v1620_v53 = vmul.f32 %v1602_v37, %v3320_v34  ;;  %v2311_v46 = vsub.f32 1.5, %v2310_v40  ;;  %1188 = vadd.xlane.f32.xlu1 %v1187_v10  ;;  %v927_v43 = vadd.f32 %v4533_v38, %v908_v54  ;;  %v2403_v62 = vmul.f32 %v2306_v59, %v5270_v27 }
 0x1df   : > { %v4574_v51 = vadd.f32 1e-06, %v1711_v41  ;;  %v4576_v47 = vadd.f32 1e-06, %v1206_v36  ;;  %v926_v8 = vadd.f32 %v4533_v38, %v907_v15  ;;  %v1295_v18 = vsub.f32 1.5, %v1294_v11 }
 0x1e0   : > { %v4581_v58 = vsub.f32 %v2898_v14, %v1620_v53  ;;  %v2312_v57 = vmul.f32 %v2812_v48, %v2311_v46  ;;  %v1190_v5 = vsel %vm538_vm0, %v1148_v28, 0.0  ;;  %vm1297_vm5 = vweird.f32 %v4495_v55  ;;  %v5272_v14 = vld [vmem:[#allocation6_spill] sm:$0xff] }
 0x1e1   : > { %2815 = vrsqrt.f32 %v4574_v51  ;;  %v939_v20 = vpack.c.bf16 %v927_v43, %v926_v8  ;;  %v1296_v59 = vmul.f32 %v4537_v12, %v1295_v18  ;;  %vm1298_vm6 = vweird.f32 %v4537_v12 }
 0x1e2   : > { %2817 = vrsqrt.f32 %v4576_v47  ;;  %v1652_v22 = vmul.f32 %v4581_v58, %v4581_v58  ;;  %v2316_v6 = vsel %vm2315_vm4, %v2812_v48, %v2312_v57  ;;  %v2419_v48 = vmul.f32 %v4512_v7, %v2403_v62  ;;  %vm1299_vm7 = vmor %vm1297_vm5, %vm1298_vm6 }
 0x1e3   : > { %v2404_v54 = vmul.f32 %v2316_v6, %v5271_v63  ;;  %2640 = vmatmul.msk.bf16.gmra.mxu0 %vm538_vm0, %v939_v20  ;;  %v1300_v10 = vsel %vm1299_vm7, %v4537_v12, %v1296_v59  ;;  %vm1830_vm9 = vweird.f32 %v4574_v51  ;;  %vm1307_vm11 = vweird.f32 %v4576_v47 }
 0x1e4   : > { %v1680_v9 = vpop.xlane.xlu1 %1679  ;;  %v668_v33 = vpop.xlane.xlu2 %667  ;;  %v1696_v44 = vsel %vm538_vm0, %v1652_v22, 0.0  ;;  %v2435_v11 = vadd.f32 %v4533_v38, %v2419_v48  ;;  %v1397_v8 = vmul.f32 %v1300_v10, %v5272_v14  ;;  %v2899_v22 = vld [vmem:[%s3133_s10 + $0x178] sm:$0xff] }
 0x1e5   : > { %v1710_v39 = vmul.f32 %v1680_v9, %v3320_v34  ;;  %v698_v42 = vmul.f32 %v668_v33, %v3320_v34  ;;  %1697 = vadd.xlane.f32.xlu0 %v1696_v44  ;;  %v671_v2 = vpop.xlane.xlu0 %670  ;;  %1191 = vadd.xlane.f32.xlu2 %v1190_v5  ;;  %v2420_v19 = vmul.f32 %v4512_v7, %v2404_v54  ;;  %v2900_v9 = vld [vmem:[%s3133_s10 + $0x70] sm:$0xff] }
 0x1e6   : > { %v699_v31 = vmul.f32 %v671_v2, %v3320_v34 }
 0x1e7   : > { %v4604_v45 = vpop.eup %2815  ;;  %v4606_v30 = vadd.f32 1e-06, %v1710_v39  ;;  %v4608_v32 = vadd.f32 1e-06, %v698_v42  ;;  %v2436_v60 = vadd.f32 %v4533_v38, %v2420_v19 }
 0x1e8   : > { %v2818_v40 = vpop.eup %2817  ;;  %v1825_v41 = vmul.f32 %v4604_v45, %v4574_v51  ;;  %v4612_v36 = vadd.f32 1e-06, %v699_v31  ;;  %vm1831_vm8 = vweird.f32 %v4604_v45 }
 0x1e9   : > { %v1302_v37 = vmul.f32 %v2818_v40, %v4576_v47  ;;  %2819 = vrsqrt.f32 %v4606_v30  ;;  %v2448_v46 = vpack.c.bf16 %v2436_v60, %v2435_v11  ;;  %vm1308_vm10 = vweird.f32 %v2818_v40  ;;  %vm4641_vm12 = vmor %vm1830_vm9, %vm1831_vm8 }
 0x1ea   : > { %v1826_v53 = vmul.f32 %v4604_v45, %v1825_v41  ;;  %2821 = vrsqrt.f32 %v4608_v32  ;;  %v1413_v47 = vmul.f32 %v4512_v7, %v1397_v8  ;;  %vm1309_vm13 = vmor %vm1307_vm11, %vm1308_vm10  ;;  %vm1820_vm14 = vweird.f32 %v4606_v30 }
 0x1eb   : > { %v1303_v15 = vmul.f32 %v2818_v40, %v1302_v37  ;;  %2823 = vrsqrt.f32 %v4612_v36  ;;  %2715 = vmatmul.msk.bf16.gmra.mxu3 %vm538_vm0, %v2448_v46  ;;  %v5275_v37 = vld [vmem:[#allocation8_spill] sm:$0xff]  ;;  %vm808_vm4 = vweird.f32 %v4608_v32  ;;  %vm818_vm5 = vweird.f32 %v4612_v36 }
 0x1ec   : > { %v1827_v28 = vmul.f32 0.5, %v1826_v53  ;;  %v1605_v55 = vpop.xlane.xlu1 %1604  ;;  %v1429_v14 = vadd.f32 %v4533_v38, %v1413_v47  ;;  %v5277_v47 = vld [vmem:[#allocation10_spill] sm:$0xff] }
 0x1ed   : > { %v1304_v43 = vmul.f32 0.5, %v1303_v15  ;;  %v1621_v27 = vmul.f32 %v1605_v55, %v3320_v34  ;;  %v583_v12 = vpop.xlane.xlu0 %582 }
 0x1ee   : > { %v1828_v62 = vsub.f32 1.5, %v1827_v28  ;;  %v608_v57 = vmul.f32 %v3320_v34, %v583_v12 }
 0x1ef   : > { %v2820_v18 = vpop.eup %2819  ;;  %v1305_v20 = vsub.f32 1.5, %v1304_v43  ;;  %v4631_v6 = vsub.f32 %v2899_v22, %v1621_v27  ;;  %v5276_v27 = vld [vmem:[#allocation7_spill] sm:$0xff] }
 0x1f0   : > { %v2822_v5 = vpop.eup %2821  ;;  %v1829_v63 = vmul.f32 %v4604_v45, %v1828_v62  ;;  %v1815_v54 = vmul.f32 %v2820_v18, %v4606_v30  ;;  %v4637_v33 = vsub.f32 %v2900_v9, %v608_v57  ;;  %vm1821_vm2 = vweird.f32 %v2820_v18 }
 0x1f1   : > { %v2824_v44 = vpop.eup %2823  ;;  %v1306_v39 = vmul.f32 %v2818_v40, %v1305_v20  ;;  %v803_v42 = vmul.f32 %v2822_v5, %v4608_v32  ;;  %v1653_v2 = vmul.f32 %v4631_v6, %v4631_v6  ;;  %vm809_vm15 = vweird.f32 %v2822_v5  ;;  %vm1822_vm3 = vmor %vm1820_vm14, %vm1821_vm2 }
 0x1f2   : > { %v1816_v48 = vmul.f32 %v2820_v18, %v1815_v54  ;;  %v813_v59 = vmul.f32 %v2824_v44, %v4612_v36  ;;  %v1833_v31 = vsel %vm4641_vm12, %v4604_v45, %v1829_v63  ;;  %v640_v46 = vmul.f32 %v4637_v33, %v4637_v33  ;;  %vm810_vm6 = vmor %vm808_vm4, %vm809_vm15 }
 0x1f3   : > { %v1310_v19 = vsel %vm1309_vm13, %v2818_v40, %v1306_v39  ;;  %v804_v41 = vmul.f32 %v2822_v5, %v803_v42  ;;  %v1699_v60 = vsel %vm538_vm0, %v1653_v2, 0.0  ;;  %v1903_v12 = vmul.f32 %v1833_v31, %v5276_v27  ;;  %v5278_v31 = vld [vmem:[#allocation11_spill] sm:$0xff] }
 0x1f4   : > { %v1398_v11 = vmul.f32 %v1310_v19, %v5275_v37  ;;  %v1817_v10 = vmul.f32 0.5, %v1816_v48  ;;  %v814_v53 = vmul.f32 %v2824_v44, %v813_v59  ;;  %v2183_v15 = vpop.xlane.xlu1 %2182  ;;  %1700 = vadd.xlane.f32.xlu1 %v1699_v60  ;;  %v684_v8 = vsel %vm538_vm0, %v640_v46, 0.0  ;;  %v5279_v60 = vld [vmem:[#allocation9_spill] sm:$0xff] }
 0x1f5   : > { %v805_v28 = vmul.f32 0.5, %v804_v41  ;;  %v2213_v55 = vmul.f32 %v2183_v15, %v3320_v34  ;;  %685 = vadd.xlane.f32.xlu2 %v684_v8  ;;  %vm819_vm1 = vweird.f32 %v2824_v44  ;;  %v1919_v32 = vmul.f32 %v4512_v7, %v1903_v12 }
 0x1f6   : > { %v1818_v45 = vsub.f32 1.5, %v1817_v10  ;;  %v815_v40 = vmul.f32 0.5, %v814_v53  ;;  %v1414_v43 = vmul.f32 %v4512_v7, %v1398_v11  ;;  %vm820_vm7 = vmor %vm818_vm5, %vm819_vm1  ;;  %v2901_v10 = vld [vmem:[%s3133_s10 + $0x1f8] sm:$0xff]  ;;  %vm2547_vm14 = vcmask 64512  }
 0x1f7   : > { %v806_v62 = vsub.f32 1.5, %v805_v28  ;;  %v4664_v57 = vadd.f32 1e-06, %v2213_v55  ;;  %v1935_v28 = vadd.f32 %v4533_v38, %v1919_v32 }
 0x1f8   : > { %v1819_v20 = vmul.f32 %v2820_v18, %v1818_v45  ;;  %v816_v22 = vsub.f32 1.5, %v815_v40  ;;  %v1430_v63 = vadd.f32 %v4533_v38, %v1414_v43 }
 0x1f9   : > { %v807_v54 = vmul.f32 %v2822_v5, %v806_v62  ;;  %v2186_v9 = vpop.xlane.xlu2 %2185  ;;  %2825 = vrsqrt.f32 %v4664_v57  ;;  %vm2323_vm9 = vweird.f32 %v4664_v57 }
 0x1fa   : > { %v1823_v51 = vsel %vm1822_vm3, %v2820_v18, %v1819_v20  ;;  %v817_v39 = vmul.f32 %v2824_v44, %v816_v22  ;;  %v2214_v42 = vmul.f32 %v2186_v9, %v3320_v34  ;;  %v1442_v2 = vpack.c.bf16 %v1430_v63, %v1429_v14 }
 0x1fb   : > { %v1902_v48 = vmul.f32 %v1823_v51, %v5277_v47  ;;  %v811_v59 = vsel %vm810_vm6, %v2822_v5, %v807_v54  ;;  %v2108_v30 = vpop.xlane.xlu0 %2107  ;;  %v2902_v51 = vld [vmem:[%s3133_s10 + $0x1f0] sm:$0xff] }
 0x1fc   : > { %v890_v36 = vmul.f32 %v811_v59, %v5278_v31  ;;  %v821_v19 = vsel %vm820_vm7, %v2824_v44, %v817_v39  ;;  %v2230_v41 = vadd.f32 1e-06, %v2214_v42  ;;  %v2124_v18 = vmul.f32 %v2108_v30, %v3320_v34  ;;  %2665 = vmatmul.msk.bf16.gmra.mxu1 %vm538_vm0, %v1442_v2  ;;  %v2903_v2 = vld [vmem:[%s3133_s10 + $0x78] sm:$0xff] }
 0x1fd   : > { %v891_v37 = vmul.f32 %v821_v19, %v5279_v60  ;;  %v1918_v11 = vmul.f32 %v4512_v7, %v1902_v48 }
 0x1fe   : > { %2827 = vrsqrt.f32 %v2230_v41  ;;  %v4683_v5 = vsub.f32 %v2901_v10, %v2124_v18  ;;  %v909_v53 = vmul.f32 %v4512_v7, %v890_v36  ;;  %vm2333_vm11 = vweird.f32 %v2230_v41 }
 0x1ff   : > { %v2826_v15 = vpop.eup %2825  ;;  %v910_v46 = vmul.f32 %v4512_v7, %v891_v37  ;;  %v1934_v44 = vadd.f32 %v4533_v38, %v1918_v11 }
 0x200   : > { %v2318_v55 = vmul.f32 %v2826_v15, %v4664_v57  ;;  %v2156_v14 = vmul.f32 %v4683_v5, %v4683_v5  ;;  %v928_v45 = vadd.f32 %v4533_v38, %v909_v53  ;;  %vm2324_vm8 = vweird.f32 %v2826_v15  ;;  %v5280_v53 = vld [vmem:[#allocation12_spill] sm:$0xff] }
 0x201   : > { %v2105_v40 = vpop.xlane.xlu2 %2104  ;;  %v929_v8 = vadd.f32 %v4533_v38, %v910_v46  ;;  %v1946_v43 = vpack.c.bf16 %v1935_v28, %v1934_v44  ;;  %vm2325_vm10 = vmor %vm2323_vm9, %vm2324_vm8  ;;  %v2904_v44 = vld [vmem:[%s3133_s10 + $0xf0] sm:$0xff] }
 0x202   : > { %v2319_v27 = vmul.f32 %v2826_v15, %v2318_v55  ;;  %v2123_v12 = vmul.f32 %v2105_v40, %v3320_v34  ;;  %v586_v62 = vpop.xlane.xlu1 %585  ;;  %v2202_v20 = vsel %vm538_vm0, %v2156_v14, 0.0 }
 0x203   : > { %v609_v22 = vmul.f32 %v3320_v34, %v586_v62  ;;  %2203 = vadd.xlane.f32.xlu2 %v2202_v20  ;;  %v940_v63 = vpack.c.bf16 %v929_v8, %v928_v45  ;;  %2691 = vmatmul.msk.bf16.gmra.mxu2 %vm538_vm0, %v1946_v43  ;;  %v982_v43 = vpop.f32.mrf.mxu0 }
 0x204   : > { %v2828_v54 = vpop.eup %2827  ;;  %v2320_v9 = vmul.f32 0.5, %v2319_v27  ;;  %v4699_v39 = vsub.f32 %v2902_v51, %v2123_v12  ;;  %v4728_v27 = vld [vmem:[%s5201_s4] ss:$0 sm:$0xff] }
 0x205   : > { %v2328_v42 = vmul.f32 %v2828_v54, %v2230_v41  ;;  %v4702_v47 = vsub.f32 %v2903_v2, %v609_v22  ;;  %2641 = vmatmul.msk.bf16.gmra.mxu0 %vm538_vm0, %v940_v63  ;;  %vm2334_vm12 = vweird.f32 %v2828_v54 }
 0x206   : > { %v2321_v48 = vsub.f32 1.5, %v2320_v9  ;;  %v2155_v59 = vmul.f32 %v4699_v39, %v4699_v39  ;;  %vm2335_vm13 = vmor %vm2333_vm11, %vm2334_vm12  ;;  %v1022_v9 = vadd.f32 %v4728_v27, %v982_v43 }
 0x207   : > { %v2329_v30 = vmul.f32 %v2828_v54, %v2328_v42  ;;  %v641_v32 = vmul.f32 %v4702_v47, %v4702_v47 }
 0x208   : > { %v2322_v31 = vmul.f32 %v2826_v15, %v2321_v48  ;;  %v2199_v36 = vsel %vm538_vm0, %v2155_v59, 0.0 }
 0x209   : > { %v2330_v19 = vmul.f32 0.5, %v2329_v30  ;;  %2200 = vadd.xlane.f32.xlu1 %v2199_v36  ;;  %v1099_v18 = vpop.xlane.xlu0 %1098  ;;  %v687_v60 = vsel %vm538_vm0, %v641_v32, 0.0 }
 0x20a   : > { %v2326_v37 = vsel %vm2325_vm10, %v2826_v15, %v2322_v31  ;;  %v1117_v11 = vmul.f32 %v1099_v18, %v3320_v34  ;;  %688 = vadd.xlane.f32.xlu0 %v687_v60 }
 0x20b   : > { %v2331_v10 = vsub.f32 1.5, %v2330_v19  ;;  %v2405_v46 = vmul.f32 %v2326_v37, %v5280_v53  ;;  %v2905_v37 = vld [vmem:[%s3133_s10 + $0xf8] sm:$0xff] }
 0x20c   : > { %v4715_v57 = vsub.f32 %v2904_v44, %v1117_v11 }
 0x20d   : > { %v2332_v28 = vmul.f32 %v2828_v54, %v2331_v10  ;;  %v2421_v15 = vmul.f32 %v4512_v7, %v2405_v46  ;;  %v984_v10 = vpop.f32.mrf.mxu0 }
 0x20e   : > { %v1149_v55 = vmul.f32 %v4715_v57, %v4715_v57 }
 0x20f   : > { %v2336_v14 = vsel %vm2335_vm13, %v2828_v54, %v2332_v28  ;;  %v1177_v45 = vpop.xlane.xlu1 %1176  ;;  %v2437_v20 = vadd.f32 %v4533_v38, %v2421_v15  ;;  %v1988_v54 = vpop.f32.mrf.mxu2 }
 0x210   : > { %v2406_v40 = vmul.f32 %v2336_v14, %v3893_v16  ;;  %v1207_v41 = vmul.f32 %v1177_v45, %v3320_v34  ;;  %v1193_v8 = vsel %vm538_vm0, %v1149_v55, 0.0  ;;  %v1023_v55 = vadd.f32 %v4728_v27, %v984_v10 }
 0x212   : > { %v1223_v12 = vadd.f32 1e-06, %v1207_v41  ;;  %1194 = vadd.xlane.f32.xlu0 %v1193_v8  ;;  %v2422_v62 = vmul.f32 %v4512_v7, %v2406_v40  ;;  %v2491_v36 = vpop.f32.mrf.mxu3 }
 0x214   : > { %2829 = vrsqrt.f32 %v1223_v12  ;;  %v2438_v16 = vadd.f32 %v4533_v38, %v2422_v62  ;;  %vm1317_vm15 = vweird.f32 %v1223_v12 }
 0x215   : > { %v1689_v22 = vpop.xlane.xlu0 %1688 }
 0x216   : > { %v1713_v63 = vmul.f32 %v1689_v22, %v3320_v34  ;;  %v1180_v51 = vpop.xlane.xlu2 %1179  ;;  %v2449_v42 = vpack.c.bf16 %v2438_v16, %v2437_v20 }
 0x217   : > { %v1208_v2 = vmul.f32 %v1180_v51, %v3320_v34  ;;  %v1102_v30 = vpop.xlane.xlu1 %1101  ;;  %v1990_v22 = vpop.f32.mrf.mxu2 }
 0x218   : > { %v4736_v48 = vadd.f32 1e-06, %v1713_v63  ;;  %v1485_v59 = vpop.f32.mrf.mxu1  ;;  %v1118_v31 = vmul.f32 %v1102_v30, %v3320_v34  ;;  %2716 = vmatmul.msk.bf16.gmra.mxu3 %vm538_vm0, %v2449_v42 }
 0x219   : > { %v1525_v32 = vadd.f32 %v1485_v59, %v1022_v9  ;;  %v4740_v19 = vadd.f32 1e-06, %v1208_v2 }
 0x21a   : > { %2831 = vrsqrt.f32 %v4736_v48  ;;  %v2830_v18 = vpop.eup %2829  ;;  %v4744_v11 = vsub.f32 %v2905_v37, %v1118_v31  ;;  %v2493_v2 = vpop.f32.mrf.mxu3  ;;  %vm1850_vm3 = vweird.f32 %v4736_v48 }
 0x21b   : > { %v2028_v60 = vadd.f32 %v1988_v54, %v1525_v32  ;;  %v1312_v53 = vmul.f32 %v2830_v18, %v1223_v12  ;;  %2833 = vrsqrt.f32 %v4740_v19  ;;  %vm1318_vm2 = vweird.f32 %v2830_v18  ;;  %v987_v31 = vpop.f32.mrf.mxu0 }
 0x21c   : > { %v1150_v44 = vmul.f32 %v4744_v11, %v4744_v11  ;;  %vm1319_vm1 = vmor %vm1317_vm15, %vm1318_vm2  ;;  %vm1327_vm6 = vweird.f32 %v4740_v19 }
 0x21d   : > { %v2531_v46 = vadd.f32 %v2491_v36, %v2028_v60  ;;  %v1313_v28 = vmul.f32 %v2830_v18, %v1312_v53 }
 0x21e   : > { %v1686_v15 = vpop.xlane.xlu2 %1685  ;;  %v1196_v14 = vsel %vm538_vm0, %v1150_v44, 0.0 }
 0x21f   : > { %2548 = vst.msk [vmem:[%s4750_s12] sm:$0xff] %vm2547_vm14, %v2531_v46  ;;  %v1314_v40 = vmul.f32 0.5, %v1313_v28  ;;  %v1712_v41 = vmul.f32 %v1686_v15, %v3320_v34  ;;  %1197 = vadd.xlane.f32.xlu1 %v1196_v14 }
 0x220   : > { %v4758_v45 = vpop.eup %2831  ;;  %v1487_v8 = vpop.f32.mrf.mxu1 }
 0x221   : > { %v1845_v43 = vmul.f32 %v4758_v45, %v4736_v48  ;;  %v1526_v62 = vadd.f32 %v1487_v8, %v1023_v55  ;;  %v2834_v20 = vpop.eup %2833  ;;  %v1315_v16 = vsub.f32 1.5, %v1314_v40  ;;  %v4763_v63 = vadd.f32 1e-06, %v1712_v41 }
 0x222   : > { %v1322_v54 = vmul.f32 %v2834_v20, %v4740_v19  ;;  %vm1851_vm4 = vweird.f32 %v4758_v45  ;;  %vm1328_vm5 = vweird.f32 %v2834_v20 }
 0x223   : > { %v1846_v9 = vmul.f32 %v4758_v45, %v1845_v43  ;;  %v2029_v51 = vadd.f32 %v1990_v22, %v1526_v62  ;;  %v1316_v42 = vmul.f32 %v2830_v18, %v1315_v16  ;;  %2835 = vrsqrt.f32 %v4763_v63  ;;  %vm4781_vm7 = vmor %vm1850_vm3, %vm1851_vm4 }
 0x224   : > { %v1323_v59 = vmul.f32 %v2834_v20, %v1322_v54  ;;  %vm1329_vm8 = vmor %vm1327_vm6, %vm1328_vm5  ;;  %v1024_v43 = vadd.f32 %v4728_v27, %v987_v31  ;;  %v1993_v54 = vpop.f32.mrf.mxu2  ;;  %vm1840_vm10 = vweird.f32 %v4763_v63 }
 0x225   : > { %v1847_v30 = vmul.f32 0.5, %v1846_v9  ;;  %v2532_v32 = vadd.f32 %v2493_v2, %v2029_v51  ;;  %v1320_v36 = vsel %vm1319_vm1, %v2830_v18, %v1316_v42 }
 0x226   : > { %v1324_v60 = vmul.f32 0.5, %v1323_v59  ;;  %v677_v10 = vpop.xlane.xlu2 %676  ;;  %v2189_v53 = vpop.xlane.xlu0 %2188  ;;  %v1399_v55 = vmul.f32 %v1320_v36, %v4044_v29 }
 0x227   : > { %v1848_v37 = vsub.f32 1.5, %v1847_v30  ;;  %2549 = vst.msk [vmem:[%s4750_s12 + $0x8] sm:$0xff] %vm2547_vm14, %v2532_v32  ;;  %v701_v46 = vmul.f32 %v677_v10, %v3320_v34  ;;  %v2215_v12 = vmul.f32 %v2189_v53, %v3320_v34  ;;  %v989_v36 = vpop.f32.mrf.mxu0 }
 0x228   : > { %v1325_v44 = vsub.f32 1.5, %v1324_v60  ;;  %v1415_v51 = vmul.f32 %v4512_v7, %v1399_v55 }
 0x229   : > { %v2836_v28 = vpop.eup %2835  ;;  %v4775_v18 = vadd.f32 1e-06, %v701_v46  ;;  %v4777_v15 = vadd.f32 1e-06, %v2215_v12  ;;  %v1849_v48 = vmul.f32 %v4758_v45, %v1848_v37 }
 0x22a   : > { %v1326_v14 = vmul.f32 %v2834_v20, %v1325_v44  ;;  %v1835_v41 = vmul.f32 %v2836_v28, %v4763_v63  ;;  %v674_v8 = vpop.xlane.xlu1 %673  ;;  %vm1841_vm9 = vweird.f32 %v2836_v28 }
 0x22b   : > { %2837 = vrsqrt.f32 %v4775_v18  ;;  %v700_v19 = vmul.f32 %v674_v8, %v3320_v34  ;;  %v1853_v42 = vsel %vm4781_vm7, %v4758_v45, %v1849_v48  ;;  %v1431_v45 = vadd.f32 %v4533_v38, %v1415_v51  ;;  %vm1842_vm11 = vmor %vm1840_vm10, %vm1841_vm9 }
 0x22c   : > { %v1330_v29 = vsel %vm1329_vm8, %v2834_v20, %v1326_v14  ;;  %v1836_v62 = vmul.f32 %v2836_v28, %v1835_v41  ;;  %2839 = vrsqrt.f32 %v4777_v15  ;;  %v1490_v22 = vpop.f32.mrf.mxu1  ;;  %v2496_v20 = vpop.f32.mrf.mxu3  ;;  %v1905_v60 = vmul.f32 %v1853_v42, %v4117_v21 }
 0x22d   : > { %v1400_v16 = vmul.f32 %v1330_v29, %v4114_v23  ;;  %v1527_v9 = vadd.f32 %v1490_v22, %v1024_v43  ;;  %v4795_v59 = vadd.f32 1e-06, %v700_v19  ;;  %v1025_v21 = vadd.f32 %v4728_v27, %v989_v36 }
 0x22e   : > { %v1837_v2 = vmul.f32 0.5, %v1836_v62  ;;  %vm838_vm12 = vweird.f32 %v4775_v18  ;;  %vm2343_vm2 = vweird.f32 %v4777_v15 }
 0x22f   : > { %v2030_v30 = vadd.f32 %v1993_v54, %v1527_v9  ;;  %v1416_v32 = vmul.f32 %v4512_v7, %v1400_v16  ;;  %2841 = vrsqrt.f32 %v4795_v59  ;;  %v1921_v16 = vmul.f32 %v4512_v7, %v1905_v60 }
 0x230   : > { %v1838_v31 = vsub.f32 1.5, %v1837_v2  ;;  %vm828_vm5 = vweird.f32 %v4795_v59 }
 0x231   : > { %v4799_v23 = vpop.eup %2837  ;;  %v2533_v37 = vadd.f32 %v2496_v20, %v2030_v30  ;;  %v1432_v10 = vadd.f32 %v4533_v38, %v1416_v32  ;;  %v1186_v53 = vpop.xlane.xlu0 %1185 }
 0x232   : > { %v4804_v46 = vpop.eup %2839  ;;  %v1839_v12 = vmul.f32 %v2836_v28, %v1838_v31  ;;  %v833_v44 = vmul.f32 %v4799_v23, %v4775_v18  ;;  %v2192_v55 = vpop.xlane.xlu1 %2191  ;;  %v1210_v14 = vmul.f32 %v1186_v53, %v3320_v34  ;;  %vm839_vm13 = vweird.f32 %v4799_v23 }
 0x233   : > { %v2338_v48 = vmul.f32 %v4804_v46, %v4777_v15  ;;  %2550 = vst.msk [vmem:[%s4750_s12 + $0x10] sm:$0xff] %vm2547_vm14, %v2533_v37  ;;  %v1443_v40 = vpack.c.bf16 %v1432_v10, %v1431_v45  ;;  %v2216_v41 = vmul.f32 %v2192_v55, %v3320_v34  ;;  %vm2344_vm15 = vweird.f32 %v4804_v46  ;;  %vm4836_vm1 = vmor %vm838_vm12, %vm839_vm13 }
 0x234   : > { %v1843_v8 = vsel %vm1842_vm11, %v2836_v28, %v1839_v12  ;;  %v834_v63 = vmul.f32 %v4799_v23, %v833_v44  ;;  %v4819_v43 = vadd.f32 1e-06, %v1210_v14  ;;  %v1492_v22 = vpop.f32.mrf.mxu1  ;;  %v2498_v37 = vpop.f32.mrf.mxu3  ;;  %v1937_v44 = vadd.f32 %v4533_v38, %v1921_v16  ;;  %vm4847_vm3 = vmor %vm2343_vm2, %vm2344_vm15 }
 0x235   : > { %v1904_v29 = vmul.f32 %v1843_v8, %v4199_v0  ;;  %v2339_v62 = vmul.f32 %v4804_v46, %v2338_v48  ;;  %2666 = vmatmul.msk.bf16.gmra.mxu1 %vm538_vm0, %v1443_v40  ;;  %v4824_v19 = vadd.f32 1e-06, %v2216_v41  ;;  %v2842_v9 = vpop.eup %2841  ;;  %v1528_v51 = vadd.f32 %v1492_v22, %v1025_v21  ;;  %v1995_v0 = vpop.f32.mrf.mxu2 }
 0x236   : > { %v1183_v54 = vpop.xlane.xlu2 %1182  ;;  %v835_v28 = vmul.f32 0.5, %v834_v63  ;;  %2843 = vrsqrt.f32 %v4819_v43  ;;  %v823_v2 = vmul.f32 %v2842_v9, %v4795_v59  ;;  %vm829_vm4 = vweird.f32 %v2842_v9 }
 0x237   : > { %v2340_v42 = vmul.f32 0.5, %v2339_v62  ;;  %2845 = vrsqrt.f32 %v4824_v19  ;;  %v2031_v30 = vadd.f32 %v1995_v0, %v1528_v51  ;;  %v1920_v32 = vmul.f32 %v4512_v7, %v1904_v29  ;;  %vm830_vm6 = vmor %vm828_vm5, %vm829_vm4 }
 0x238   : > { %v836_v20 = vsub.f32 1.5, %v835_v28  ;;  %v824_v60 = vmul.f32 %v2842_v9, %v823_v2  ;;  %v1209_v45 = vmul.f32 %v1183_v54, %v3320_v34  ;;  %vm1347_vm7 = vweird.f32 %v4819_v43 }
 0x239   : > { %v2341_v36 = vsub.f32 1.5, %v2340_v42  ;;  %v2534_v53 = vadd.f32 %v2498_v37, %v2031_v30  ;;  %v1936_v12 = vadd.f32 %v4533_v38, %v1920_v32  ;;  %vm2353_vm9 = vweird.f32 %v4824_v19 }
 0x23a   : > { %v837_v10 = vmul.f32 %v4799_v23, %v836_v20  ;;  %v1692_v55 = vpop.xlane.xlu1 %1691  ;;  %v825_v21 = vmul.f32 0.5, %v824_v60  ;;  %v4851_v48 = vadd.f32 1e-06, %v1209_v45 }
 0x23b   : > { %v2342_v18 = vmul.f32 %v4804_v46, %v2341_v36  ;;  %2551 = vst.msk [vmem:[%s4750_s12 + $0x18] sm:$0xff] %vm2547_vm14, %v2534_v53  ;;  %v1947_v8 = vpack.c.bf16 %v1937_v44, %v1936_v12  ;;  %v1714_v63 = vmul.f32 %v1692_v55, %v3320_v34 }
 0x23c   : > { %v2844_v40 = vpop.eup %2843  ;;  %v841_v41 = vsel %vm4836_vm1, %v4799_v23, %v837_v10  ;;  %v826_v62 = vsub.f32 1.5, %v825_v21  ;;  %2847 = vrsqrt.f32 %v4851_v48  ;;  %vm1337_vm12 = vweird.f32 %v4851_v48 }
 0x23d   : > { %v2846_v29 = vpop.eup %2845  ;;  %v1342_v15 = vmul.f32 %v2844_v40, %v4819_v43  ;;  %v893_v16 = vmul.f32 %v841_v41, %v4246_v25  ;;  %v2346_v54 = vsel %vm4847_vm3, %v4804_v46, %v2342_v18  ;;  %2692 = vmatmul.msk.bf16.gmra.mxu2 %vm538_vm0, %v1947_v8  ;;  %v4869_v25 = vadd.f32 1e-06, %v1714_v63 }
 0x23e   : > { %v1695_v22 = vpop.xlane.xlu2 %1694  ;;  %v2348_v28 = vmul.f32 %v2846_v29, %v4824_v19  ;;  %v827_v23 = vmul.f32 %v2842_v9, %v826_v62  ;;  %v2407_v46 = vmul.f32 %v2346_v54, %v4271_v52  ;;  %vm1348_vm8 = vweird.f32 %v2844_v40 }
 0x23f   : > { %v1343_v51 = vmul.f32 %v2844_v40, %v1342_v15  ;;  %v1715_v2 = vmul.f32 %v1695_v22, %v3320_v34  ;;  %2849 = vrsqrt.f32 %v4869_v25  ;;  %v912_v31 = vmul.f32 %v4512_v7, %v893_v16  ;;  %vm4882_vm11 = vmor %vm1347_vm7, %vm1348_vm8 }
 0x240   : > { %v992_v42 = vpop.f32.mrf.mxu0  ;;  %v2349_v0 = vmul.f32 %v2846_v29, %v2348_v28  ;;  %v831_v20 = vsel %vm830_vm6, %v2842_v9, %v827_v23  ;;  %v680_v36 = vpop.xlane.xlu0 %679  ;;  %vm2354_vm10 = vweird.f32 %v2846_v29  ;;  %v2423_v18 = vmul.f32 %v4512_v7, %v2407_v46 }
 0x241   : > { %v1344_v30 = vmul.f32 0.5, %v1343_v51  ;;  %v892_v32 = vmul.f32 %v831_v20, %v4284_v26  ;;  %v4877_v37 = vadd.f32 1e-06, %v1715_v2  ;;  %v702_v10 = vmul.f32 %v680_v36, %v3320_v34  ;;  %vm2355_vm13 = vmor %vm2353_vm9, %vm2354_vm10  ;;  %v1998_v46 = vpop.f32.mrf.mxu2 }
 0x242   : > { %v2350_v59 = vmul.f32 0.5, %v2349_v0  ;;  %v683_v45 = vpop.xlane.xlu1 %682  ;;  %v4888_v12 = vpop.eup %2847  ;;  %v931_v41 = vadd.f32 %v4533_v38, %v912_v31  ;;  %v1026_v63 = vadd.f32 %v4728_v27, %v992_v42  ;;  %vm1860_vm2 = vweird.f32 %v4869_v25 }
 0x243   : > { %v1345_v60 = vsub.f32 1.5, %v1344_v30  ;;  %v911_v9 = vmul.f32 %v4512_v7, %v892_v32  ;;  %v703_v53 = vmul.f32 %v683_v45, %v3320_v34  ;;  %2851 = vrsqrt.f32 %v4877_v37 }
 0x244   : > { %v2351_v52 = vsub.f32 1.5, %v2350_v59  ;;  %v4891_v55 = vadd.f32 1e-06, %v702_v10  ;;  %v1332_v43 = vmul.f32 %v4888_v12, %v4851_v48  ;;  %vm1338_vm15 = vweird.f32 %v4888_v12 }
 0x245   : > { %v1346_v44 = vmul.f32 %v2844_v40, %v1345_v60  ;;  %v930_v21 = vadd.f32 %v4533_v38, %v911_v9  ;;  %v4904_v62 = vadd.f32 1e-06, %v703_v53  ;;  %v4907_v15 = vpop.eup %2849  ;;  %vm1870_vm1 = vweird.f32 %v4877_v37  ;;  %v2501_v9 = vpop.f32.mrf.mxu3  ;;  %vm1339_vm7 = vmor %vm1337_vm12, %vm1338_vm15 }
 0x246   : > { %v2352_v14 = vmul.f32 %v2846_v29, %v2351_v52  ;;  %2853 = vrsqrt.f32 %v4891_v55  ;;  %v1333_v54 = vmul.f32 %v4888_v12, %v1332_v43  ;;  %v1855_v23 = vmul.f32 %v4907_v15, %v4869_v25 }
 0x247   : > { %v1350_v8 = vsel %vm4882_vm11, %v2844_v40, %v1346_v44  ;;  %v941_v28 = vpack.c.bf16 %v931_v41, %v930_v21  ;;  %2855 = vrsqrt.f32 %v4904_v62  ;;  %vm1861_vm3 = vweird.f32 %v4907_v15 }
 0x248   : > { %v2356_v22 = vsel %vm2355_vm13, %v2846_v29, %v2352_v14  ;;  %v1402_v16 = vmul.f32 %v1350_v8, %v4351_v24  ;;  %v994_v40 = vpop.f32.mrf.mxu0  ;;  %v1334_v51 = vmul.f32 0.5, %v1333_v54  ;;  %v2439_v24 = vadd.f32 %v4533_v38, %v2423_v18  ;;  %v2198_v29 = vpop.xlane.xlu0 %2197  ;;  %vm4954_vm8 = vmor %vm1860_vm2, %vm1861_vm3 }
 0x249   : > { %v2408_v19 = vmul.f32 %v2356_v22, %v4329_v56  ;;  %2642 = vmatmul.msk.bf16.gmra.mxu0 %vm538_vm0, %v941_v28  ;;  %v4920_v42 = vpop.eup %2851  ;;  %v1856_v56 = vmul.f32 %v4907_v15, %v1855_v23  ;;  %vm848_vm4 = vweird.f32 %v4891_v55  ;;  %v2218_v2 = vmul.f32 %v2198_v29, %v3320_v34 }
 0x24a   : > { %v1335_v20 = vsub.f32 1.5, %v1334_v51  ;;  %v1865_v30 = vmul.f32 %v4920_v42, %v4877_v37  ;;  %vm858_vm5 = vweird.f32 %v4904_v62  ;;  %v1027_v32 = vadd.f32 %v4728_v27, %v994_v40  ;;  %v4976_v51 = vld [vmem:[%s5198_s1] ss:$0 sm:$0xff] }
 0x24b   : > { %v2424_v0 = vmul.f32 %v4512_v7, %v2408_v19  ;;  %v1418_v31 = vmul.f32 %v4512_v7, %v1402_v16  ;;  %v1857_v60 = vmul.f32 0.5, %v1856_v56  ;;  %v4935_v52 = vadd.f32 1e-06, %v2218_v2 }
 0x24c   : > { %v1495_v59 = vpop.f32.mrf.mxu1  ;;  %v4932_v36 = vpop.eup %2853  ;;  %v1336_v26 = vmul.f32 %v4888_v12, %v1335_v20  ;;  %v1866_v53 = vmul.f32 %v4920_v42, %v1865_v30  ;;  %vm1871_vm6 = vweird.f32 %v4920_v42 }
 0x24d   : > { %v1529_v45 = vadd.f32 %v1495_v59, %v1026_v63  ;;  %v2440_v10 = vadd.f32 %v4533_v38, %v2424_v0  ;;  %v843_v44 = vmul.f32 %v4932_v36, %v4891_v55  ;;  %v4942_v18 = vpop.eup %2855  ;;  %v1858_v7 = vsub.f32 1.5, %v1857_v60  ;;  %vm1872_vm11 = vmor %vm1870_vm1, %vm1871_vm6  ;;  %v4993_v59 = vld [vmem:[%s5199_s2] ss:$0 sm:$0xff] }
 0x24e   : > { %2857 = vrsqrt.f32 %v4935_v52  ;;  %v1340_v21 = vsel %vm1339_vm7, %v4888_v12, %v1336_v26  ;;  %v1867_v8 = vmul.f32 0.5, %v1866_v53  ;;  %v853_v48 = vmul.f32 %v4942_v18, %v4904_v62 }
 0x24f   : > { %v2032_v14 = vadd.f32 %v1998_v46, %v1529_v45  ;;  %v2450_v43 = vpack.c.bf16 %v2440_v10, %v2439_v24  ;;  %v1434_v63 = vadd.f32 %v4533_v38, %v1418_v31  ;;  %v1401_v22 = vmul.f32 %v1340_v21, %v4369_v17  ;;  %v2000_v45 = vpop.f32.mrf.mxu2 }
 0x250   : > { %v1859_v16 = vmul.f32 %v4907_v15, %v1858_v7  ;;  %v844_v12 = vmul.f32 %v4932_v36, %v843_v44  ;;  %v2195_v25 = vpop.xlane.xlu2 %2194  ;;  %v1868_v28 = vsub.f32 1.5, %v1867_v8  ;;  %v854_v19 = vmul.f32 %v4942_v18, %v853_v48  ;;  %v2503_v7 = vpop.f32.mrf.mxu3 }
 0x251   : > { %v2535_v54 = vadd.f32 %v2501_v9, %v2032_v14  ;;  %2717 = vmatmul.msk.bf16.gmra.mxu3 %vm538_vm0, %v2450_v43  ;;  %vm849_vm9 = vweird.f32 %v4932_v36  ;;  %v2217_v23 = vmul.f32 %v2195_v25, %v3320_v34  ;;  %v1189_v40 = vpop.xlane.xlu1 %1188  ;;  %v1417_v24 = vmul.f32 %v4976_v51, %v1401_v22 }
 0x252   : > { %v1863_v17 = vsel %vm4954_vm8, %v4907_v15, %v1859_v16  ;;  %v845_v38 = vmul.f32 0.5, %v844_v12  ;;  %v1211_v29 = vmul.f32 %v1189_v40, %v3320_v34  ;;  %v1869_v56 = vmul.f32 %v4920_v42, %v1868_v28  ;;  %vm5004_vm12 = vmor %vm848_vm4, %vm849_vm9 }
 0x253   : > { %2552 = vst.msk [vmem:[%s4750_s12 + $0x20] sm:$0xff] %vm2547_vm14, %v2535_v54  ;;  %v855_v0 = vmul.f32 0.5, %v854_v19  ;;  %vm859_vm10 = vweird.f32 %v4942_v18  ;;  %v4982_v46 = vadd.f32 1e-06, %v2217_v23  ;;  %v1433_v31 = vadd.f32 %v4993_v59, %v1417_v24 }
 0x254   : > { %v1497_v2 = vpop.f32.mrf.mxu1  ;;  %v4984_v15 = vpop.eup %2857  ;;  %v846_v20 = vsub.f32 1.5, %v845_v38  ;;  %v4996_v60 = vadd.f32 1e-06, %v1211_v29  ;;  %v1906_v10 = vmul.f32 %v1863_v17, %v4372_v3  ;;  %v1873_v26 = vsel %vm1872_vm11, %v4920_v42, %v1869_v56  ;;  %vm5015_vm13 = vmor %vm858_vm5, %vm859_vm10 }
 0x255   : > { %v1530_v30 = vadd.f32 %v1497_v2, %v1027_v32  ;;  %v856_v9 = vsub.f32 1.5, %v855_v0  ;;  %v2368_v32 = vmul.f32 %v4984_v15, %v4935_v52  ;;  %v1907_v53 = vmul.f32 %v1873_v26, %v4387_v35 }
 0x256   : > { %v847_v42 = vmul.f32 %v4932_v36, %v846_v20  ;;  %v1444_v44 = vpack.c.bf16 %v1434_v63, %v1433_v31  ;;  %2859 = vrsqrt.f32 %v4982_v46  ;;  %v1922_v22 = vmul.f32 %v4976_v51, %v1906_v10 }
 0x257   : > { %v2033_v55 = vadd.f32 %v2000_v45, %v1530_v30  ;;  %v857_v14 = vmul.f32 %v4942_v18, %v856_v9  ;;  %v2369_v43 = vmul.f32 %v4984_v15, %v2368_v32  ;;  %2861 = vrsqrt.f32 %v4996_v60 }
 0x258   : > { %v1698_v35 = vpop.xlane.xlu0 %1697  ;;  %v851_v62 = vsel %vm5004_vm12, %v4932_v36, %v847_v42  ;;  %2667 = vmatmul.msk.bf16.gmra.mxu1 %vm538_vm0, %v1444_v44  ;;  %v1192_v41 = vpop.xlane.xlu2 %1191  ;;  %v1923_v36 = vmul.f32 %v4976_v51, %v1907_v53  ;;  %vm2373_vm2 = vweird.f32 %v4935_v52  ;;  %vm2374_vm15 = vweird.f32 %v4984_v15 }
 0x259   : > { %v2536_v21 = vadd.f32 %v2503_v7, %v2033_v55  ;;  %v861_v8 = vsel %vm5015_vm13, %v4942_v18, %v857_v14  ;;  %v894_v48 = vmul.f32 %v851_v62, %v4451_v4  ;;  %v2370_v63 = vmul.f32 0.5, %v2369_v43  ;;  %vm5048_vm1 = vmor %vm2373_vm2, %vm2374_vm15 }
 0x25a   : > { %v895_v16 = vmul.f32 %v861_v8, %v4454_v61  ;;  %v1212_v12 = vmul.f32 %v1192_v41, %v3320_v34  ;;  %v1716_v54 = vmul.f32 %v1698_v35, %v3320_v34  ;;  %v1938_v18 = vadd.f32 %v4993_v59, %v1922_v22 }
 0x25b   : > { %2553 = vst.msk [vmem:[%s4750_s12 + $0x28] sm:$0xff] %vm2547_vm14, %v2536_v21  ;;  %v2371_v25 = vsub.f32 1.5, %v2370_v63  ;;  %v913_v4 = vmul.f32 %v4976_v51, %v894_v48  ;;  %v1939_v28 = vadd.f32 %v4993_v59, %v1923_v36  ;;  %vm1357_vm3 = vweird.f32 %v4996_v60 }
 0x25c   : > { %v1228_v61 = vadd.f32 1e-06, %v1212_v12  ;;  %v5044_v19 = vadd.f32 1e-06, %v1716_v54  ;;  %v2860_v23 = vpop.eup %2859  ;;  %v914_v17 = vmul.f32 %v4976_v51, %v895_v16  ;;  %vm2363_vm6 = vweird.f32 %v4982_v46 }
 0x25d   : > { %v2372_v40 = vmul.f32 %v4984_v15, %v2371_v25  ;;  %v2862_v38 = vpop.eup %2861  ;;  %v2358_v52 = vmul.f32 %v2860_v23, %v4982_v46  ;;  %v1948_v29 = vpack.c.bf16 %v1939_v28, %v1938_v18  ;;  %v932_v0 = vadd.f32 %v4993_v59, %v913_v4 }
 0x25e   : > { %2863 = vrsqrt.f32 %v1228_v61  ;;  %v1352_v56 = vmul.f32 %v2862_v38, %v4996_v60  ;;  %v933_v31 = vadd.f32 %v4993_v59, %v914_v17  ;;  %vm1358_vm4 = vweird.f32 %v2862_v38 }
 0x25f   : > { %v2359_v2 = vmul.f32 %v2860_v23, %v2358_v52  ;;  %2693 = vmatmul.msk.bf16.gmra.mxu2 %vm538_vm0, %v1948_v29  ;;  %2865 = vrsqrt.f32 %v5044_v19  ;;  %v2376_v20 = vsel %vm5048_vm1, %v4984_v15, %v2372_v40  ;;  %vm2364_vm5 = vweird.f32 %v2860_v23  ;;  %vm5067_vm7 = vmor %vm1357_vm3, %vm1358_vm4 }
 0x260   : > { %v1353_v30 = vmul.f32 %v2862_v38, %v1352_v56  ;;  %v942_v26 = vpack.c.bf16 %v933_v31, %v932_v0  ;;  %v2410_v37 = vmul.f32 %v2376_v20, %v4493_v1  ;;  %vm2365_vm8 = vmor %vm2363_vm6, %vm2364_vm5  ;;  %vm1367_vm9 = vweird.f32 %v1228_v61  ;;  %v997_v24 = vpop.f32.mrf.mxu0 }
 0x261   : > { %v2360_v45 = vmul.f32 0.5, %v2359_v2  ;;  %vm1880_vm12 = vweird.f32 %v5044_v19 }
 0x262   : > { %v1354_v10 = vmul.f32 0.5, %v1353_v30  ;;  %2643 = vmatmul.msk.bf16.gmra.mxu0 %vm538_vm0, %v942_v26  ;;  %v2426_v35 = vmul.f32 %v4976_v51, %v2410_v37 }
 0x263   : > { %v2361_v32 = vsub.f32 1.5, %v2360_v45  ;;  %v1028_v45 = vadd.f32 %v4728_v27, %v997_v24 }
 0x264   : > { %v2864_v9 = vpop.eup %2863  ;;  %v1355_v53 = vsub.f32 1.5, %v1354_v10  ;;  %v2442_v4 = vadd.f32 %v4993_v59, %v2426_v35 }
 0x265   : > { %v1362_v3 = vmul.f32 %v2864_v9, %v1228_v61  ;;  %v5064_v42 = vpop.eup %2865  ;;  %v2362_v15 = vmul.f32 %v2860_v23, %v2361_v32  ;;  %vm1368_vm10 = vweird.f32 %v2864_v9  ;;  %v2003_v32 = vpop.f32.mrf.mxu2 }
 0x266   : > { %v1356_v44 = vmul.f32 %v2862_v38, %v1355_v53  ;;  %v1875_v1 = vmul.f32 %v5064_v42, %v5044_v19  ;;  %vm1369_vm11 = vmor %vm1367_vm9, %vm1368_vm10  ;;  %vm1881_vm13 = vweird.f32 %v5064_v42 }
 0x267   : > { %v1701_v60 = vpop.xlane.xlu1 %1700  ;;  %v1363_v7 = vmul.f32 %v2864_v9, %v1362_v3  ;;  %v2366_v14 = vsel %vm2365_vm8, %v2860_v23, %v2362_v15  ;;  %vm5094_vm2 = vmor %vm1880_vm12, %vm1881_vm13 }
 0x268   : > { %v1717_v43 = vmul.f32 %v1701_v60, %v3320_v34  ;;  %v2409_v62 = vmul.f32 %v2366_v14, %v4524_v13  ;;  %v1360_v46 = vsel %vm5067_vm7, %v2862_v38, %v1356_v44  ;;  %v1876_v41 = vmul.f32 %v5064_v42, %v1875_v1  ;;  %v686_v8 = vpop.xlane.xlu2 %685  ;;  %v999_v35 = vpop.f32.mrf.mxu0 }
 0x269   : > { %v1364_v21 = vmul.f32 0.5, %v1363_v7  ;;  %v704_v63 = vmul.f32 %v686_v8, %v3320_v34  ;;  %v1403_v12 = vmul.f32 %v1360_v46, %v4528_v49 }
 0x26a   : > { %v1733_v48 = vadd.f32 1e-06, %v1717_v43  ;;  %v1877_v16 = vmul.f32 0.5, %v1876_v41  ;;  %v2425_v36 = vmul.f32 %v4976_v51, %v2409_v62 }
 0x26b   : > { %v1365_v22 = vsub.f32 1.5, %v1364_v21  ;;  %v5082_v13 = vadd.f32 1e-06, %v704_v63  ;;  %v1419_v40 = vmul.f32 %v4976_v51, %v1403_v12 }
 0x26c   : > { %2867 = vrsqrt.f32 %v1733_v48  ;;  %v2441_v25 = vadd.f32 %v4993_v59, %v2425_v36  ;;  %v1878_v28 = vsub.f32 1.5, %v1877_v16  ;;  %vm1890_vm1 = vweird.f32 %v1733_v48 }
 0x26d   : > { %v1366_v54 = vmul.f32 %v2864_v9, %v1365_v22  ;;  %2869 = vrsqrt.f32 %v5082_v13  ;;  %v1029_v22 = vadd.f32 %v4728_v27, %v999_v35  ;;  %vm868_vm6 = vweird.f32 %v5082_v13 }
 0x26e   : > { %v2451_v61 = vpack.c.bf16 %v2442_v4, %v2441_v25  ;;  %v1879_v38 = vmul.f32 %v5064_v42, %v1878_v28  ;;  %v2005_v4 = vpop.f32.mrf.mxu2 }
 0x26f   : > { %v1370_v18 = vsel %vm1369_vm11, %v2864_v9, %v1366_v54 }
 0x270   : > { %v1404_v23 = vmul.f32 %v1370_v18, %v4548_v50  ;;  %2718 = vmatmul.msk.bf16.gmra.mxu3 %vm538_vm0, %v2451_v61  ;;  %v1435_v50 = vadd.f32 %v4993_v59, %v1419_v40  ;;  %v1883_v31 = vsel %vm5094_vm2, %v5064_v42, %v1879_v38  ;;  %v2506_v42 = vpop.f32.mrf.mxu3 }
 0x271   : > { %v1908_v15 = vmul.f32 %v1883_v31, %v4581_v58 }
 0x272   : > { %v2868_v49 = vpop.eup %2867  ;;  %v1420_v17 = vmul.f32 %v4976_v51, %v1404_v23 }
 0x273   : > { %v1885_v52 = vmul.f32 %v2868_v49, %v1733_v48  ;;  %v5100_v19 = vpop.eup %2869  ;;  %vm1891_vm15 = vweird.f32 %v2868_v49  ;;  %v1924_v41 = vmul.f32 %v4976_v51, %v1908_v15 }
 0x274   : > { %v1436_v56 = vadd.f32 %v4993_v59, %v1420_v17  ;;  %v863_v26 = vmul.f32 %v5100_v19, %v5082_v13  ;;  %vm1892_vm3 = vmor %vm1890_vm1, %vm1891_vm15  ;;  %vm869_vm7 = vweird.f32 %v5100_v19 }
 0x275   : > { %v1886_v0 = vmul.f32 %v2868_v49, %v1885_v52  ;;  %v1940_v25 = vadd.f32 %v4993_v59, %v1924_v41  ;;  %vm5129_vm9 = vmor %vm868_vm6, %vm869_vm7 }
 0x276   : > { %v2204_v2 = vpop.xlane.xlu2 %2203  ;;  %v1445_v30 = vpack.c.bf16 %v1436_v56, %v1435_v50  ;;  %v864_v7 = vmul.f32 %v5100_v19, %v863_v26 }
 0x277   : > { %v2220_v20 = vmul.f32 %v2204_v2, %v3320_v34  ;;  %v1887_v10 = vmul.f32 0.5, %v1886_v0 }
 0x278   : > { %2668 = vmatmul.msk.bf16.gmra.mxu1 %vm538_vm0, %v1445_v30  ;;  %v865_v63 = vmul.f32 0.5, %v864_v7  ;;  %v2508_v27 = vpop.f32.mrf.mxu3 }
 0x279   : > { %v2236_v9 = vadd.f32 1e-06, %v2220_v20  ;;  %v1500_v37 = vpop.f32.mrf.mxu1  ;;  %v1888_v53 = vsub.f32 1.5, %v1887_v10 }
 0x27a   : > { %v1531_v3 = vadd.f32 %v1500_v37, %v1028_v45  ;;  %v866_v28 = vsub.f32 1.5, %v865_v63 }
 0x27b   : > { %2871 = vrsqrt.f32 %v2236_v9  ;;  %v1889_v55 = vmul.f32 %v2868_v49, %v1888_v53  ;;  %vm2393_vm4 = vweird.f32 %v2236_v9 }
 0x27c   : > { %v2201_v60 = vpop.xlane.xlu1 %2200  ;;  %v2034_v44 = vadd.f32 %v2003_v32, %v1531_v3  ;;  %v867_v0 = vmul.f32 %v5100_v19, %v866_v28 }
 0x27d   : > { %v2219_v1 = vmul.f32 %v2201_v60, %v3320_v34  ;;  %v689_v14 = vpop.xlane.xlu0 %688  ;;  %v1893_v43 = vsel %vm1892_vm3, %v2868_v49, %v1889_v55 }
 0x27e   : > { %v705_v62 = vmul.f32 %v689_v14, %v3320_v34  ;;  %v2537_v46 = vadd.f32 %v2506_v42, %v2034_v44  ;;  %v1909_v58 = vmul.f32 %v1893_v43, %v4631_v6  ;;  %v871_v26 = vsel %vm5129_vm9, %v5100_v19, %v867_v0 }
 0x27f   : > { %v2235_v21 = vadd.f32 1e-06, %v2219_v1  ;;  %v896_v15 = vmul.f32 %v871_v26, %v4637_v33 }
 0x280   : > { %v721_v8 = vadd.f32 1e-06, %v705_v62  ;;  %2554 = vst.msk [vmem:[%s4750_s12 + $0x30] sm:$0xff] %vm2547_vm14, %v2537_v46  ;;  %v1925_v36 = vmul.f32 %v4976_v51, %v1909_v58 }
 0x281   : > { %v2872_v48 = vpop.eup %2871  ;;  %2873 = vrsqrt.f32 %v2235_v21  ;;  %v1502_v16 = vpop.f32.mrf.mxu1  ;;  %vm2383_vm10 = vweird.f32 %v2235_v21  ;;  %v915_v33 = vmul.f32 %v4976_v51, %v896_v15 }
 0x282   : > { %v2388_v12 = vmul.f32 %v2872_v48, %v2236_v9  ;;  %2875 = vrsqrt.f32 %v721_v8  ;;  %v1532_v54 = vadd.f32 %v1502_v16, %v1029_v22  ;;  %v1941_v6 = vadd.f32 %v4993_v59, %v1925_v36 }
 0x283   : > { %vm2394_vm5 = vweird.f32 %v2872_v48  ;;  %vm878_vm2 = vweird.f32 %v721_v8 }
 0x284   : > { %v2389_v18 = vmul.f32 %v2872_v48, %v2388_v12  ;;  %v2035_v23 = vadd.f32 %v2005_v4, %v1532_v54  ;;  %v1949_v40 = vpack.c.bf16 %v1941_v6, %v1940_v25  ;;  %vm2395_vm8 = vmor %vm2393_vm4, %vm2394_vm5 }
 0x285   : > { %v1195_v61 = vpop.xlane.xlu0 %1194 }
 0x286   : > { %v2390_v49 = vmul.f32 0.5, %v2389_v18  ;;  %v1213_v17 = vmul.f32 %v1195_v61, %v3320_v34  ;;  %v2538_v24 = vadd.f32 %v2508_v27, %v2035_v23  ;;  %2694 = vmatmul.msk.bf16.gmra.mxu2 %vm538_vm0, %v1949_v40 }
 0x287   : > { %v2874_v38 = vpop.eup %2873 }
 0x288   : > { %v2876_v52 = vpop.eup %2875  ;;  %v2391_v29 = vsub.f32 1.5, %v2390_v49  ;;  %v2378_v50 = vmul.f32 %v2874_v38, %v2235_v21  ;;  %v1229_v56 = vadd.f32 1e-06, %v1213_v17  ;;  %2555 = vst.msk [vmem:[%s4750_s12 + $0x38] sm:$0xff] %vm2547_vm14, %v2538_v24  ;;  %vm2384_vm11 = vweird.f32 %v2874_v38  ;;  %v1002_v49 = vpop.f32.mrf.mxu0 }
 0x289   : > { %v873_v2 = vmul.f32 %v2876_v52, %v721_v8  ;;  %vm879_vm12 = vweird.f32 %v2876_v52  ;;  %vm2385_vm13 = vmor %vm2383_vm10, %vm2384_vm11 }
 0x28a   : > { %v2392_v13 = vmul.f32 %v2872_v48, %v2391_v29  ;;  %v2379_v30 = vmul.f32 %v2874_v38, %v2378_v50  ;;  %2877 = vrsqrt.f32 %v1229_v56  ;;  %vm880_vm15 = vmor %vm878_vm2, %vm879_vm12  ;;  %vm1377_vm1 = vweird.f32 %v1229_v56 }
 0x28b   : > { %v874_v31 = vmul.f32 %v2876_v52, %v873_v2 }
 0x28c   : > { %v2396_v45 = vsel %vm2395_vm8, %v2872_v48, %v2392_v13  ;;  %v2380_v10 = vmul.f32 0.5, %v2379_v30 }
 0x28d   : > { %v875_v9 = vmul.f32 0.5, %v874_v31  ;;  %v2412_v37 = vmul.f32 %v2396_v45, %v4683_v5 }
 0x28e   : > { %v2381_v32 = vsub.f32 1.5, %v2380_v10 }
 0x28f   : > { %v876_v53 = vsub.f32 1.5, %v875_v9  ;;  %v2428_v19 = vmul.f32 %v4976_v51, %v2412_v37 }
 0x290   : > { %v2878_v3 = vpop.eup %2877  ;;  %v2382_v55 = vmul.f32 %v2874_v38, %v2381_v32 }
 0x291   : > { %v877_v42 = vmul.f32 %v2876_v52, %v876_v53  ;;  %v1372_v60 = vmul.f32 %v2878_v3, %v1229_v56  ;;  %v2444_v8 = vadd.f32 %v4993_v59, %v2428_v19  ;;  %vm1378_vm3 = vweird.f32 %v2878_v3  ;;  %v1004_v56 = vpop.f32.mrf.mxu0 }
 0x292   : > { %v2386_v44 = vsel %vm2385_vm13, %v2874_v38, %v2382_v55  ;;  %v1198_v7 = vpop.xlane.xlu1 %1197  ;;  %vm1379_vm4 = vmor %vm1377_vm1, %vm1378_vm3 }
 0x293   : > { %v2411_v5 = vmul.f32 %v2386_v44, %v4699_v39  ;;  %v881_v1 = vsel %vm880_vm15, %v2876_v52, %v877_v42  ;;  %v1373_v14 = vmul.f32 %v2878_v3, %v1372_v60  ;;  %v1214_v43 = vmul.f32 %v1198_v7, %v3320_v34 }
 0x294   : > { %v897_v35 = vmul.f32 %v881_v1, %v4702_v47  ;;  %v934_v39 = vadd.f32 %v4993_v59, %v915_v33 }
 0x295   : > { %v1230_v62 = vadd.f32 1e-06, %v1214_v43  ;;  %v2427_v46 = vmul.f32 %v4976_v51, %v2411_v5  ;;  %v1374_v58 = vmul.f32 0.5, %v1373_v14 }
 0x296   : > { %v916_v21 = vmul.f32 %v4976_v51, %v897_v35 }
 0x297   : > { %2879 = vrsqrt.f32 %v1230_v62  ;;  %v2443_v41 = vadd.f32 %v4993_v59, %v2427_v46  ;;  %v1375_v63 = vsub.f32 1.5, %v1374_v58  ;;  %vm1387_vm6 = vweird.f32 %v1230_v62 }
 0x298   : > { %v935_v48 = vadd.f32 %v4993_v59, %v916_v21 }
 0x299   : > { %v2452_v34 = vpack.c.bf16 %v2444_v8, %v2443_v41  ;;  %v1376_v16 = vmul.f32 %v2878_v3, %v1375_v63 }
 0x29a   : > { %v943_v47 = vpack.c.bf16 %v935_v48, %v934_v39 }
 0x29b   : > { %2719 = vmatmul.msk.bf16.gmra.mxu3 %vm538_vm0, %v2452_v34  ;;  %v1380_v54 = vsel %vm1379_vm4, %v2878_v3, %v1376_v16  ;;  %v2511_v29 = vpop.f32.mrf.mxu3 }
 0x29c   : > { %2644 = vmatmul.msk.bf16.gmra.mxu0 %vm538_vm0, %v943_v47  ;;  %v1405_v4 = vmul.f32 %v1380_v54, %v4715_v57  ;;  %v5160_v57 = vld [vmem:[%s5201_s4] ss:$0 sm:$0xff] }
 0x29d   : > { %v2880_v22 = vpop.eup %2879  ;;  %v1030_v24 = vadd.f32 %v5160_v57, %v1002_v49 }
 0x29e   : > { %v1382_v36 = vmul.f32 %v2880_v22, %v1230_v62  ;;  %vm1388_vm5 = vweird.f32 %v2880_v22  ;;  %v1421_v23 = vmul.f32 %v4976_v51, %v1405_v4 }
 0x29f   : > { %vm1389_vm7 = vmor %vm1387_vm6, %vm1388_vm5 }
 0x2a0   : > { %v1383_v12 = vmul.f32 %v2880_v22, %v1382_v36  ;;  %v1437_v27 = vadd.f32 %v4993_v59, %v1421_v23 }
 0x2a2   : > { %v1384_v25 = vmul.f32 0.5, %v1383_v12 }
 0x2a3   : > { %v2513_v31 = vpop.f32.mrf.mxu3 }
 0x2a4   : > { %v1385_v6 = vsub.f32 1.5, %v1384_v25 }
 0x2a6   : > { %v1386_v18 = vmul.f32 %v2880_v22, %v1385_v6 }
 0x2a8   : > { %v1390_v28 = vsel %vm1389_vm7, %v2880_v22, %v1386_v18 }
 0x2a9   : > { %v1406_v61 = vmul.f32 %v1390_v28, %v4744_v11  ;;  %v2008_v11 = vpop.f32.mrf.mxu2 }
 0x2ab   : > { %v1422_v40 = vmul.f32 %v4976_v51, %v1406_v61 }
 0x2ad   : > { %v1438_v17 = vadd.f32 %v4993_v59, %v1422_v40  ;;  %v1031_v59 = vadd.f32 %v5160_v57, %v1004_v56 }
 0x2af   : > { %v1446_v38 = vpack.c.bf16 %v1438_v17, %v1437_v27 }
 0x2b1   : > { %2669 = vmatmul.msk.bf16.gmra.mxu1 %vm538_vm0, %v1446_v38  ;;  %v2010_v13 = vpop.f32.mrf.mxu2 }
 0x2b2   : > { %v1505_v52 = vpop.f32.mrf.mxu1 }
 0x2b3   : > { %v1533_v51 = vadd.f32 %v1505_v52, %v1030_v24 }
 0x2b5   : > { %v2036_v50 = vadd.f32 %v2008_v11, %v1533_v51 }
 0x2b7   : > { %v2539_v0 = vadd.f32 %v2511_v29, %v2036_v50 }
 0x2b9   : > { %2556 = vst.msk [vmem:[%s4750_s12 + $0x40] sm:$0xff] %vm2547_vm14, %v2539_v0 }
 0x2ba   : > { %v1507_v2 = vpop.f32.mrf.mxu1 }
 0x2bb   : > { %v1534_v20 = vadd.f32 %v1507_v2, %v1031_v59 }
 0x2bd   : > { %v2037_v30 = vadd.f32 %v2010_v13, %v1534_v20 }
 0x2bf   : > { %v2540_v45 = vadd.f32 %v2513_v31, %v2037_v30 }
 0x2c0   : > { %v2013_v9 = vpop.f32.mrf.mxu2 }
 0x2c1   : > { %2557 = vst.msk [vmem:[%s4750_s12 + $0x48] sm:$0xff] %vm2547_vm14, %v2540_v45 }
 0x2c6   : > { %v1007_v10 = vpop.f32.mrf.mxu0 }
 0x2c7   : > { %v1032_v26 = vadd.f32 %v5160_v57, %v1007_v10 }
 0x2c8   : > { %v2015_v7 = vpop.f32.mrf.mxu2 }
 0x2ce   : > { %v1009_v15 = vpop.f32.mrf.mxu0 }
 0x2cf   : > { %v1033_v42 = vadd.f32 %v5160_v57, %v1009_v15 }
 0x2d4   : > { %v2516_v53 = vpop.f32.mrf.mxu3 }
 0x2d5   : > { %v1510_v37 = vpop.f32.mrf.mxu1 }
 0x2d6   : > { %v1535_v32 = vadd.f32 %v1510_v37, %v1032_v26 }
 0x2d8   : > { %v2038_v3 = vadd.f32 %v2013_v9, %v1535_v32 }
 0x2da   : > { %v2541_v55 = vadd.f32 %v2516_v53, %v2038_v3 }
 0x2dc   : > { %2558 = vst.msk [vmem:[%s4750_s12 + $0x50] sm:$0xff] %vm2547_vm14, %v2541_v55  ;;  %v2518_v5 = vpop.f32.mrf.mxu3 }
 0x2dd   : > { %v1512_v60 = vpop.f32.mrf.mxu1 }
 0x2de   : > { %v1536_v44 = vadd.f32 %v1512_v60, %v1033_v42 }
 0x2df   : > { %v1012_v14 = vpop.f32.mrf.mxu0 }
 0x2e0   : > { %v2039_v19 = vadd.f32 %v2015_v7, %v1536_v44  ;;  %v1034_v43 = vadd.f32 %v5160_v57, %v1012_v14 }
 0x2e2   : > { %v2542_v1 = vadd.f32 %v2518_v5, %v2039_v19  ;;  %v2018_v35 = vpop.f32.mrf.mxu2 }
 0x2e4   : > { %2559 = vst.msk [vmem:[%s4750_s12 + $0x58] sm:$0xff] %vm2547_vm14, %v2542_v1 }
 0x2e7   : > { %v1014_v21 = vpop.f32.mrf.mxu0 }
 0x2e8   : > { %v1035_v8 = vadd.f32 %v5160_v57, %v1014_v21 }
 0x2ea   : > { %v2020_v34 = vpop.f32.mrf.mxu2 }
 0x2f3   : > { %v2521_v46 = vpop.f32.mrf.mxu3 }
 0x2f5   : > { %v1515_v33 = vpop.f32.mrf.mxu1 }
 0x2f6   : > { %v1537_v62 = vadd.f32 %v1515_v33, %v1034_v43 }
 0x2f8   : > { %v2040_v58 = vadd.f32 %v2018_v35, %v1537_v62 }
 0x2fa   : > { %v2543_v41 = vadd.f32 %v2521_v46, %v2040_v58 }
 0x2fb   : > { %v2523_v47 = vpop.f32.mrf.mxu3 }
 0x2fc   : > { %2560 = vst.msk [vmem:[%s4750_s12 + $0x60] sm:$0xff] %vm2547_vm14, %v2543_v41 }
 0x2fd   : > { %v1517_v39 = vpop.f32.mrf.mxu1 }
 0x2fe   : > { %v1538_v48 = vadd.f32 %v1517_v39, %v1035_v8 }
 0x300   : > { %v2041_v63 = vadd.f32 %v2020_v34, %v1538_v48 }
 0x302   : > { %v2544_v22 = vadd.f32 %v2523_v47, %v2041_v63 }
 0x304   : > { %2561 = vst.msk [vmem:[%s4750_s12 + $0x68] sm:$0xff] %vm2547_vm14, %v2544_v22 }
 0x309   : > { %v2023_v12 = vpop.f32.mrf.mxu2 }
 0x311   : > { %v2025_v49 = vpop.f32.mrf.mxu2 }
 0x319   : > { %v1017_v16 = vpop.f32.mrf.mxu0 }
 0x31a   : > { %v1036_v36 = vadd.f32 %v5160_v57, %v1017_v16 }
 0x31e   : > { %v2526_v6 = vpop.f32.mrf.mxu3 }
 0x321   : > { %v1019_v18 = vpop.f32.mrf.mxu0 }
 0x322   : > { %v1037_v61 = vadd.f32 %v5160_v57, %v1019_v18 }
 0x326   : > { %v2528_v17 = vpop.f32.mrf.mxu3 }
 0x32e   : > { %v1520_v54 = vpop.f32.mrf.mxu1 }
 0x32f   : > { %v1539_v25 = vadd.f32 %v1520_v54, %v1036_v36 }
 0x331   : > { %v2042_v4 = vadd.f32 %v2023_v12, %v1539_v25 }
 0x333   : > { %v2545_v28 = vadd.f32 %v2526_v6, %v2042_v4 }
 0x335   : > { %2562 = vst.msk [vmem:[%s4750_s12 + $0x70] sm:$0xff] %vm2547_vm14, %v2545_v28 }
 0x336   : > { %v1522_v23 = vpop.f32.mrf.mxu1 }
 0x337   : > { %v1540_v40 = vadd.f32 %v1522_v23, %v1037_v61 }
 0x339   : > { %v2043_v27 = vadd.f32 %v2025_v49, %v1540_v40 }
 0x33b   : > { %v2546_v38 = vadd.f32 %v2528_v17, %v2043_v27 }
 0x33d   : > { %2563 = vst.msk [vmem:[%s4750_s12 + $0x78] sm:$0xff] %vm2547_vm14, %v2546_v38 }
 0x33e PF: > { %p12_p9 = scmp.ge.s32.totalorder %s2981_s22, 6   ;;  %s5303_s18 = smov %s2927_s19 }
 0x33f   : > { %s5304_s19 = smov %s2990_s25  ;;  %s5305_s20 = smov %s2981_s22 }
 0x340   :  { %14 = sbr.rel (!%p12_p9) target bundleno = 2 (0x2), region = 119 }

// kernel: tpu_custom_call.1
= control target key start
LH: loop header
LB: loop body
LE: loop exit
PB: predicated region body
PF: predicated region fallthrough
CT: control target
= control target key end

     0   :  { %s2964_s18 = smov 0   ;;  %s2966_s19 = smov 0   ;;  %s5197_s0 = inlined_call_operand.vmem [shape: f32[4,512,4], index: 0, kind: input, shape index: {}]   ;;  %s5198_s1 = inlined_call_operand.vmem [shape: f32[1,4], index: 1, kind: input, shape index: {}]   ;;  %s5199_s2 = inlined_call_operand.vmem [shape: f32[1,4], index: 2, kind: input, shape index: {}]   ;;  %s5200_s3 = inlined_call_operand.vmem [shape: bf16[4,4,8], index: 3, kind: input, shape index: {}]   ;;  %s5201_s4 = inlined_call_operand.vmem [shape: f32[1,8], index: 4, kind: input, shape index: {}]   ;;  %s5202_s5 = inlined_call_operand.vmem [shape: f32[512,8], index: 5, kind: output, shape index: {}]  }
   0x1   :  { %s2968_s20 = smov 0  }
   0x2 LB: > { %s2626_s21 = sadd.s32 4294967295, %s2931_s20   ;;  %s2981_s22 = sadd.s32 1, %s2931_s20   ;;  %s2931_s20 = sphi %s2968_s20, %s5305_s20   ;;  %s2927_s19 = sphi %s2966_s19, %s5304_s19   ;;  %s2923_s18 = sphi %s2964_s18, %s5303_s18  }
   0x3   : > { %s19_s23 = ssub.s32 %s2931_s20, %s2981_s22  ;;  %s22_s24 = sadd.s32 1, %s2927_s19 }
   0x4   : > { %p20_p0 = scmp.eq.s32.totalorder %s19_s23, 0  ;;  %p29_p1 = scmp.ne.s32.totalorder %s2927_s19, %s2923_s18 }
   0x5   : > { %p30_p2 = scmp.eq.s32.totalorder %s2931_s20, 0  ;;  %p2629_p4 = scmp.ge.s32.totalorder %s2931_s20, 4 }
   0x6   : > { %s2990_s25 = scalar_select %p20_p0, %s2927_s19, %s22_s24  }
   0x7   : > { %p31_p3 = por %p30_p2, %p29_p1  ;;  %177 = sbr.rel (%p2629_p4) target bundleno = 80 (0x50), region = 32 }
   0xc   : > { %180 = sbr.rel (!%p31_p3) target bundleno = 80 (0x50), region = 36  ;;  %s182_s26 = sand.u32 (%p31_p3), 1, %s2927_s19  }
   0xd   : > { %s2722_s27 = sshll.u32 (%p31_p3), %s2931_s20, 7  ;;  %s2630_s28 = sshll.u32 (%p31_p3), %s182_s26, 9 }
   0xe   : > { %s2998_s6 = scalar_lea.vmem (%p31_p3), %s5197_s0, %s2722_s27  ;;  %s3003_s7 = scalar_lea.vmem (%p31_p3), [#allocation2], %s2630_s28 }
   0xf   : > { %v342_v0 = vld [vmem:[%s2998_s6] sm:$0xff] (%p31_p3)  ;;  %v344_v1 = vld [vmem:[%s2998_s6 + $0x8] sm:$0xff] (%p31_p3)  ;;  %v346_v2 = vld [vmem:[%s2998_s6 + $0x10] sm:$0xff] (%p31_p3) }
  0x10   : > { %343 = vst [vmem:[%s3003_s7] sm:$0xff] (%p31_p3), %v342_v0  ;;  %v348_v3 = vld [vmem:[%s2998_s6 + $0x18] sm:$0xff] (%p31_p3)  ;;  %v350_v4 = vld [vmem:[%s2998_s6 + $0x20] sm:$0xff] (%p31_p3)  ;;  %v352_v5 = vld [vmem:[%s2998_s6 + $0x28] sm:$0xff] (%p31_p3) }
  0x11   : > { %345 = vst [vmem:[%s3003_s7 + $0x8] sm:$0xff] %v344_v1  ;;  %v354_v6 = vld [vmem:[%s2998_s6 + $0x30] sm:$0xff]  ;;  %v356_v7 = vld [vmem:[%s2998_s6 + $0x38] sm:$0xff]  ;;  %v358_v8 = vld [vmem:[%s2998_s6 + $0x40] sm:$0xff] }
  0x12   : > { %347 = vst [vmem:[%s3003_s7 + $0x10] sm:$0xff] %v346_v2  ;;  %v360_v9 = vld [vmem:[%s2998_s6 + $0x48] sm:$0xff]  ;;  %v362_v10 = vld [vmem:[%s2998_s6 + $0x50] sm:$0xff]  ;;  %v364_v11 = vld [vmem:[%s2998_s6 + $0x58] sm:$0xff] }
  0x13   : > { %349 = vst [vmem:[%s3003_s7 + $0x18] sm:$0xff] %v348_v3  ;;  %v366_v12 = vld [vmem:[%s2998_s6 + $0x60] sm:$0xff]  ;;  %v368_v13 = vld [vmem:[%s2998_s6 + $0x68] sm:$0xff]  ;;  %v370_v14 = vld [vmem:[%s2998_s6 + $0x70] sm:$0xff] }
  0x14   : > { %351 = vst [vmem:[%s3003_s7 + $0x20] sm:$0xff] %v350_v4  ;;  %v372_v15 = vld [vmem:[%s2998_s6 + $0x78] sm:$0xff]  ;;  %v374_v16 = vld [vmem:[%s2998_s6 + $0x200] sm:$0xff]  ;;  %v376_v17 = vld [vmem:[%s2998_s6 + $0x208] sm:$0xff] }
  0x15   : > { %353 = vst [vmem:[%s3003_s7 + $0x28] sm:$0xff] %v352_v5  ;;  %v378_v18 = vld [vmem:[%s2998_s6 + $0x210] sm:$0xff]  ;;  %v380_v19 = vld [vmem:[%s2998_s6 + $0x218] sm:$0xff]  ;;  %v382_v20 = vld [vmem:[%s2998_s6 + $0x220] sm:$0xff] }
  0x16   : > { %355 = vst [vmem:[%s3003_s7 + $0x30] sm:$0xff] %v354_v6  ;;  %v384_v21 = vld [vmem:[%s2998_s6 + $0x228] sm:$0xff]  ;;  %v386_v22 = vld [vmem:[%s2998_s6 + $0x230] sm:$0xff]  ;;  %v388_v23 = vld [vmem:[%s2998_s6 + $0x238] sm:$0xff] }
  0x17   : > { %357 = vst [vmem:[%s3003_s7 + $0x38] sm:$0xff] %v356_v7  ;;  %v390_v24 = vld [vmem:[%s2998_s6 + $0x240] sm:$0xff]  ;;  %v392_v25 = vld [vmem:[%s2998_s6 + $0x248] sm:$0xff]  ;;  %v394_v26 = vld [vmem:[%s2998_s6 + $0x250] sm:$0xff] }
  0x18   : > { %359 = vst [vmem:[%s3003_s7 + $0x40] sm:$0xff] %v358_v8  ;;  %v396_v27 = vld [vmem:[%s2998_s6 + $0x258] sm:$0xff]  ;;  %v398_v28 = vld [vmem:[%s2998_s6 + $0x260] sm:$0xff]  ;;  %v400_v29 = vld [vmem:[%s2998_s6 + $0x268] sm:$0xff] }
  0x19   : > { %361 = vst [vmem:[%s3003_s7 + $0x48] sm:$0xff] %v360_v9  ;;  %v402_v30 = vld [vmem:[%s2998_s6 + $0x270] sm:$0xff]  ;;  %v404_v31 = vld [vmem:[%s2998_s6 + $0x278] sm:$0xff]  ;;  %v406_v32 = vld [vmem:[%s2998_s6 + $0x400] sm:$0xff] }
  0x1a   : > { %363 = vst [vmem:[%s3003_s7 + $0x50] sm:$0xff] %v362_v10  ;;  %v408_v33 = vld [vmem:[%s2998_s6 + $0x408] sm:$0xff]  ;;  %v410_v34 = vld [vmem:[%s2998_s6 + $0x410] sm:$0xff]  ;;  %v412_v35 = vld [vmem:[%s2998_s6 + $0x418] sm:$0xff] }
  0x1b   : > { %365 = vst [vmem:[%s3003_s7 + $0x58] sm:$0xff] %v364_v11  ;;  %v414_v36 = vld [vmem:[%s2998_s6 + $0x420] sm:$0xff]  ;;  %v416_v37 = vld [vmem:[%s2998_s6 + $0x428] sm:$0xff]  ;;  %v418_v38 = vld [vmem:[%s2998_s6 + $0x430] sm:$0xff] }
  0x1c   : > { %367 = vst [vmem:[%s3003_s7 + $0x60] sm:$0xff] %v366_v12  ;;  %v420_v39 = vld [vmem:[%s2998_s6 + $0x438] sm:$0xff]  ;;  %v422_v40 = vld [vmem:[%s2998_s6 + $0x440] sm:$0xff]  ;;  %v424_v41 = vld [vmem:[%s2998_s6 + $0x448] sm:$0xff] }
  0x1d   : > { %369 = vst [vmem:[%s3003_s7 + $0x68] sm:$0xff] %v368_v13  ;;  %v426_v42 = vld [vmem:[%s2998_s6 + $0x450] sm:$0xff]  ;;  %v428_v43 = vld [vmem:[%s2998_s6 + $0x458] sm:$0xff]  ;;  %v430_v44 = vld [vmem:[%s2998_s6 + $0x460] sm:$0xff] }
  0x1e   : > { %371 = vst [vmem:[%s3003_s7 + $0x70] sm:$0xff] %v370_v14  ;;  %v432_v45 = vld [vmem:[%s2998_s6 + $0x468] sm:$0xff]  ;;  %v434_v46 = vld [vmem:[%s2998_s6 + $0x470] sm:$0xff]  ;;  %v436_v47 = vld [vmem:[%s2998_s6 + $0x478] sm:$0xff] }
  0x1f   : > { %373 = vst [vmem:[%s3003_s7 + $0x78] sm:$0xff] %v372_v15  ;;  %v438_v48 = vld [vmem:[%s2998_s6 + $0x600] sm:$0xff]  ;;  %v440_v49 = vld [vmem:[%s2998_s6 + $0x608] sm:$0xff]  ;;  %v442_v50 = vld [vmem:[%s2998_s6 + $0x610] sm:$0xff] }
  0x20   : > { %375 = vst [vmem:[%s3003_s7 + $0x80] sm:$0xff] %v374_v16  ;;  %v444_v51 = vld [vmem:[%s2998_s6 + $0x618] sm:$0xff]  ;;  %v446_v52 = vld [vmem:[%s2998_s6 + $0x620] sm:$0xff]  ;;  %v448_v53 = vld [vmem:[%s2998_s6 + $0x628] sm:$0xff] }
  0x21   : > { %377 = vst [vmem:[%s3003_s7 + $0x88] sm:$0xff] %v376_v17  ;;  %v450_v54 = vld [vmem:[%s2998_s6 + $0x630] sm:$0xff]  ;;  %v452_v55 = vld [vmem:[%s2998_s6 + $0x638] sm:$0xff]  ;;  %v454_v56 = vld [vmem:[%s2998_s6 + $0x640] sm:$0xff] }
  0x22   : > { %379 = vst [vmem:[%s3003_s7 + $0x90] sm:$0xff] %v378_v18  ;;  %v456_v57 = vld [vmem:[%s2998_s6 + $0x648] sm:$0xff]  ;;  %v458_v58 = vld [vmem:[%s2998_s6 + $0x650] sm:$0xff]  ;;  %v460_v59 = vld [vmem:[%s2998_s6 + $0x658] sm:$0xff] }
  0x23   : > { %381 = vst [vmem:[%s3003_s7 + $0x98] sm:$0xff] %v380_v19  ;;  %v462_v60 = vld [vmem:[%s2998_s6 + $0x660] sm:$0xff]  ;;  %v464_v61 = vld [vmem:[%s2998_s6 + $0x668] sm:$0xff]  ;;  %v466_v62 = vld [vmem:[%s2998_s6 + $0x670] sm:$0xff] }
  0x24   : > { %383 = vst [vmem:[%s3003_s7 + $0xa0] sm:$0xff] %v382_v20  ;;  %v468_v63 = vld [vmem:[%s2998_s6 + $0x678] sm:$0xff] }
  0x25   : > { %385 = vst [vmem:[%s3003_s7 + $0xa8] sm:$0xff] %v384_v21 }
  0x26   : > { %387 = vst [vmem:[%s3003_s7 + $0xb0] sm:$0xff] %v386_v22 }
  0x27   : > { %389 = vst [vmem:[%s3003_s7 + $0xb8] sm:$0xff] %v388_v23 }
  0x28   : > { %391 = vst [vmem:[%s3003_s7 + $0xc0] sm:$0xff] %v390_v24 }
  0x29   : > { %393 = vst [vmem:[%s3003_s7 + $0xc8] sm:$0xff] %v392_v25 }
  0x2a   : > { %395 = vst [vmem:[%s3003_s7 + $0xd0] sm:$0xff] %v394_v26 }
  0x2b   : > { %397 = vst [vmem:[%s3003_s7 + $0xd8] sm:$0xff] %v396_v27 }
  0x2c   : > { %399 = vst [vmem:[%s3003_s7 + $0xe0] sm:$0xff] %v398_v28 }
  0x2d   : > { %401 = vst [vmem:[%s3003_s7 + $0xe8] sm:$0xff] %v400_v29 }
  0x2e   : > { %403 = vst [vmem:[%s3003_s7 + $0xf0] sm:$0xff] %v402_v30 }
  0x2f   : > { %405 = vst [vmem:[%s3003_s7 + $0xf8] sm:$0xff] %v404_v31 }
  0x30   : > { %407 = vst [vmem:[%s3003_s7 + $0x100] sm:$0xff] %v406_v32 }
  0x31   : > { %409 = vst [vmem:[%s3003_s7 + $0x108] sm:$0xff] %v408_v33 }
  0x32   : > { %411 = vst [vmem:[%s3003_s7 + $0x110] sm:$0xff] %v410_v34 }
  0x33   : > { %413 = vst [vmem:[%s3003_s7 + $0x118] sm:$0xff] %v412_v35 }
  0x34   : > { %415 = vst [vmem:[%s3003_s7 + $0x120] sm:$0xff] %v414_v36 }
  0x35   : > { %417 = vst [vmem:[%s3003_s7 + $0x128] sm:$0xff] %v416_v37 }
  0x36   : > { %419 = vst [vmem:[%s3003_s7 + $0x130] sm:$0xff] %v418_v38 }
  0x37   : > { %421 = vst [vmem:[%s3003_s7 + $0x138] sm:$0xff] %v420_v39 }
  0x38   : > { %423 = vst [vmem:[%s3003_s7 + $0x140] sm:$0xff] %v422_v40 }
  0x39   : > { %425 = vst [vmem:[%s3003_s7 + $0x148] sm:$0xff] %v424_v41 }
  0x3a   : > { %427 = vst [vmem:[%s3003_s7 + $0x150] sm:$0xff] %v426_v42 }
  0x3b   : > { %429 = vst [vmem:[%s3003_s7 + $0x158] sm:$0xff] %v428_v43 }
  0x3c   : > { %431 = vst [vmem:[%s3003_s7 + $0x160] sm:$0xff] %v430_v44 }
  0x3d   : > { %433 = vst [vmem:[%s3003_s7 + $0x168] sm:$0xff] %v432_v45 }
  0x3e   : > { %435 = vst [vmem:[%s3003_s7 + $0x170] sm:$0xff] %v434_v46 }
  0x3f   : > { %437 = vst [vmem:[%s3003_s7 + $0x178] sm:$0xff] %v436_v47 }
  0x40   : > { %439 = vst [vmem:[%s3003_s7 + $0x180] sm:$0xff] %v438_v48 }
  0x41   : > { %441 = vst [vmem:[%s3003_s7 + $0x188] sm:$0xff] %v440_v49 }
  0x42   : > { %443 = vst [vmem:[%s3003_s7 + $0x190] sm:$0xff] %v442_v50 }
  0x43   : > { %445 = vst [vmem:[%s3003_s7 + $0x198] sm:$0xff] %v444_v51 }
  0x44   : > { %447 = vst [vmem:[%s3003_s7 + $0x1a0] sm:$0xff] %v446_v52 }
  0x45   : > { %449 = vst [vmem:[%s3003_s7 + $0x1a8] sm:$0xff] %v448_v53 }
  0x46   : > { %451 = vst [vmem:[%s3003_s7 + $0x1b0] sm:$0xff] %v450_v54 }
  0x47   : > { %453 = vst [vmem:[%s3003_s7 + $0x1b8] sm:$0xff] %v452_v55 }
  0x48   : > { %455 = vst [vmem:[%s3003_s7 + $0x1c0] sm:$0xff] %v454_v56 }
  0x49   : > { %457 = vst [vmem:[%s3003_s7 + $0x1c8] sm:$0xff] %v456_v57 }
  0x4a   : > { %459 = vst [vmem:[%s3003_s7 + $0x1d0] sm:$0xff] %v458_v58 }
  0x4b   : > { %461 = vst [vmem:[%s3003_s7 + $0x1d8] sm:$0xff] %v460_v59 }
  0x4c   : > { %463 = vst [vmem:[%s3003_s7 + $0x1e0] sm:$0xff] %v462_v60 }
  0x4d   : > { %465 = vst [vmem:[%s3003_s7 + $0x1e8] sm:$0xff] %v464_v61 }
  0x4e   : > { %467 = vst [vmem:[%s3003_s7 + $0x1f0] sm:$0xff] %v466_v62 }
  0x4f   : > { %469 = vst [vmem:[%s3003_s7 + $0x1f8] sm:$0xff] %v468_v63 }
  0x50 PF: > { %p2633_p5 = scmp.ge.s32.totalorder %s2931_s20, 1  ;;  %p474_p6 = scmp.lt.s32.totalorder %s2931_s20, 5 }
  0x52   : > { %p475_p7 = pnand %p2633_p5, %p474_p6 }
  0x54   : > { %478 = sbr.rel (%p475_p7) target bundleno = 830 (0x33e), region = 74 }
  0x59   : > { %s481_s8 = sand.u32 1, %s2923_s18   ;;  %vm538_vm0 = vcmask 31744   ;;  %vm969_vm2 = vcmask 1041408   ;;  %s2635_s7 = sshll.u32 %s2626_s21, 4 }
  0x5a   : > { %s2634_s9 = sshll.u32 %s481_s8, 9  ;;  %p510_p8 = scmp.lt.s32.totalorder %s2635_s7, 63 }
  0x5b   : > { %s3133_s10 = scalar_lea.vmem [#allocation2], %s2634_s9 }
  0x5c   : > { %v3136_v0 = vld [vmem:[%s3133_s10 + $0x100] sm:$0xff]  ;;  %v3146_v4 = vld [vmem:[%s3133_s10 + $0x10] sm:$0xff]  ;;  %v3151_v6 = vld [vmem:[%s3133_s10 + $0x108] sm:$0xff]  ;;  %s5307_s7 = smov (!%p510_p8, %s2635_s7), 63 }
  0x5d   : > { %v3139_v1 = vld [vmem:[%s3133_s10] sm:$0xff]  ;;  %v1558_v2 = vsel %vm538_vm0, %v3136_v0, 0.0  ;;  %v545_v5 = vsel %vm538_vm0, %v3146_v4, 0.0  ;;  %v3154_v7 = vld [vmem:[%s3133_s10 + $0x8] sm:$0xff]  ;;  %v3157_v8 = vld [vmem:[%s3133_s10 + $0x18] sm:$0xff]  ;;  %v1561_v9 = vsel %vm538_vm0, %v3151_v6, 0.0 }
  0x5e   : > { %v539_v3 = vsel %vm538_vm0, %v3139_v1, 0.0  ;;  %1559 = vadd.xlane.f32.xlu2 %v1558_v2  ;;  %546 = vadd.xlane.f32.xlu1 %v545_v5  ;;  %v542_v10 = vsel %vm538_vm0, %v3154_v7, 0.0  ;;  %v548_v11 = vsel %vm538_vm0, %v3157_v8, 0.0  ;;  %v3166_v12 = vld [vmem:[%s3133_s10 + $0x80] sm:$0xff]  ;;  %v3172_v14 = vld [vmem:[%s3133_s10 + $0x188] sm:$0xff]  ;;  %v3181_v18 = vld [vmem:[%s3133_s10 + $0x118] sm:$0xff] }
  0x5f   : > { %540 = vadd.xlane.f32.xlu0 %v539_v3  ;;  %v3169_v13 = vld [vmem:[%s3133_s10 + $0x180] sm:$0xff]  ;;  %v1055_v15 = vsel %vm538_vm0, %v3166_v12, 0.0  ;;  %v2064_v17 = vsel %vm538_vm0, %v3172_v14, 0.0  ;;  %v3184_v19 = vld [vmem:[%s3133_s10 + $0x88] sm:$0xff]  ;;  %v3187_v20 = vld [vmem:[%s3133_s10 + $0x110] sm:$0xff]  ;;  %v1567_v21 = vsel %vm538_vm0, %v3181_v18, 0.0 }
  0x60   : > { %v2061_v16 = vsel %vm538_vm0, %v3169_v13, 0.0  ;;  %v1058_v22 = vsel %vm538_vm0, %v3184_v19, 0.0  ;;  %v1564_v23 = vsel %vm538_vm0, %v3187_v20, 0.0  ;;  %v3196_v24 = vld [vmem:[%s3133_s10 + $0x190] sm:$0xff]  ;;  %v3202_v26 = vld [vmem:[%s3133_s10 + $0x198] sm:$0xff]  ;;  %v3214_v31 = vld [vmem:[%s3133_s10 + $0x128] sm:$0xff] }
  0x61   : > { %v3199_v25 = vld [vmem:[%s3133_s10 + $0x90] sm:$0xff]  ;;  %v2067_v27 = vsel %vm538_vm0, %v3196_v24, 0.0  ;;  %v2070_v29 = vsel %vm538_vm0, %v3202_v26, 0.0  ;;  %v3211_v30 = vld [vmem:[%s3133_s10 + $0x98] sm:$0xff]  ;;  %v3217_v32 = vld [vmem:[%s3133_s10 + $0x120] sm:$0xff]  ;;  %v1573_v34 = vsel %vm538_vm0, %v3214_v31, 0.0 }
  0x62   : > { %v1061_v28 = vsel %vm538_vm0, %v3199_v25, 0.0  ;;  %v1064_v33 = vsel %vm538_vm0, %v3211_v30, 0.0  ;;  %v1570_v35 = vsel %vm538_vm0, %v3217_v32, 0.0  ;;  %v3226_v36 = vld [vmem:[%s3133_s10 + $0x20] sm:$0xff]  ;;  %v3232_v38 = vld [vmem:[%s3133_s10 + $0x28] sm:$0xff]  ;;  %v3256_v48 = vld [vmem:[%s3133_s10 + $0x138] sm:$0xff] }
  0x63   : > { %v3229_v37 = vld [vmem:[%s3133_s10 + $0x1a0] sm:$0xff]  ;;  %v551_v39 = vsel %vm538_vm0, %v3226_v36, 0.0  ;;  %v554_v41 = vsel %vm538_vm0, %v3232_v38, 0.0  ;;  %v3241_v42 = vld [vmem:[%s3133_s10 + $0x1a8] sm:$0xff]  ;;  %v3259_v49 = vld [vmem:[%s3133_s10 + $0x130] sm:$0xff]  ;;  %v1579_v51 = vsel %vm538_vm0, %v3256_v48, 0.0 }
  0x64   : > { %v2073_v40 = vsel %vm538_vm0, %v3229_v37, 0.0  ;;  %v3244_v43 = vld [vmem:[%s3133_s10 + $0xa8] sm:$0xff]  ;;  %v3247_v44 = vld [vmem:[%s3133_s10 + $0xa0] sm:$0xff]  ;;  %v2076_v45 = vsel %vm538_vm0, %v3241_v42, 0.0  ;;  %v3262_v50 = vld [vmem:[%s3133_s10 + $0x1b0] sm:$0xff]  ;;  %v1576_v52 = vsel %vm538_vm0, %v3259_v49, 0.0 }
  0x65   : > { %v1070_v46 = vsel %vm538_vm0, %v3244_v43, 0.0  ;;  %v1067_v47 = vsel %vm538_vm0, %v3247_v44, 0.0  ;;  %v2079_v53 = vsel %vm538_vm0, %v3262_v50, 0.0  ;;  %v3271_v54 = vld [vmem:[%s3133_s10 + $0x38] sm:$0xff]  ;;  %v3274_v55 = vld [vmem:[%s3133_s10 + $0x30] sm:$0xff]  ;;  %v3291_v62 = vld [vmem:[%s3133_s10 + $0x148] sm:$0xff] }
  0x66   : > { %1562 = vadd.xlane.f32.xlu2 %v1561_v9  ;;  %549 = vadd.xlane.f32.xlu1 %v548_v11  ;;  %v560_v56 = vsel %vm538_vm0, %v3271_v54, 0.0  ;;  %v557_v57 = vsel %vm538_vm0, %v3274_v55, 0.0  ;;  %v3281_v58 = vld [vmem:[%s3133_s10 + $0xb8] sm:$0xff]  ;;  %v3294_v63 = vld [vmem:[%s3133_s10 + $0x140] sm:$0xff]  ;;  %v3297_v2 = vld [vmem:[%s3133_s10 + $0xb0] sm:$0xff]  ;;  %v1585_v3 = vsel %vm538_vm0, %v3291_v62, 0.0 }
  0x67   : > { %543 = vadd.xlane.f32.xlu0 %v542_v10  ;;  %v3284_v59 = vld [vmem:[%s3133_s10 + $0x1b8] sm:$0xff]  ;;  %v1076_v60 = vsel %vm538_vm0, %v3281_v58, 0.0  ;;  %v1582_v5 = vsel %vm538_vm0, %v3294_v63, 0.0  ;;  %v1073_v9 = vsel %vm538_vm0, %v3297_v2, 0.0  ;;  %v2933_v10 = vmov 4.0   ;;  %v3306_v11 = vld [vmem:[%s3133_s10 + $0x48] sm:$0xff] }
  0x68   : > { %v2082_v61 = vsel %vm538_vm0, %v3284_v59, 0.0  ;;  %2751 = vrcp.f32 %v2933_v10  ;;  %s2636_s20 = sshll.u32 %s5307_s7, 3 }
  0x69   : > { %s4750_s12 = scalar_lea.vmem %s5202_s5, %s2636_s20 }
  0x6e   : > { %1056 = vadd.xlane.f32.xlu2 %v1055_v15  ;;  %2065 = vadd.xlane.f32.xlu1 %v2064_v17  ;;  %v3309_v15 = vld [vmem:[%s3133_s10 + $0x40] sm:$0xff]  ;;  %v566_v17 = vsel %vm538_vm0, %v3306_v11, 0.0 }
  0x6f   : > { %2062 = vadd.xlane.f32.xlu0 %v2061_v16  ;;  %v3312_v16 = vld [vmem:[%s3133_s10 + $0x1c0] sm:$0xff] }
  0x76   : > { %1568 = vadd.xlane.f32.xlu2 %v1567_v21  ;;  %1565 = vadd.xlane.f32.xlu1 %v1564_v23  ;;  %v563_v21 = vsel %vm538_vm0, %v3309_v15, 0.0  ;;  %v2752_v23 = vpop.eup %2751 }
  0x77   : > { %1059 = vadd.xlane.f32.xlu0 %v1058_v22  ;;  %v2085_v22 = vsel %vm538_vm0, %v3312_v16, 0.0  ;;  %vm592_vm1 = vweird.f32 %v2752_v23 }
  0x7e   : > { %1062 = vadd.xlane.f32.xlu2 %v1061_v28  ;;  %2071 = vadd.xlane.f32.xlu1 %v2070_v29 }
  0x7f   : > { %2068 = vadd.xlane.f32.xlu0 %v2067_v27  ;;  %v588_v27 = vmul.f32 4.0, %v2752_v23 }
  0x81   : > { %v589_v28 = vsub.f32 1.0, %v588_v27 }
  0x83   : > { %v590_v29 = vmul.f32 %v2752_v23, %v589_v28 }
  0x86   : > { %1574 = vadd.xlane.f32.xlu2 %v1573_v34  ;;  %1571 = vadd.xlane.f32.xlu1 %v1570_v35 }
  0x87   : > { %1065 = vadd.xlane.f32.xlu0 %v1064_v33  ;;  %v591_v33 = vadd.f32 %v2752_v23, %v590_v29 }
  0x89   : > { %v3320_v34 = vsel %vm592_vm1, %v2752_v23, %v591_v33 }
  0x8e   : > { %2074 = vadd.xlane.f32.xlu2 %v2073_v40  ;;  %555 = vadd.xlane.f32.xlu1 %v554_v41 }
  0x8f   : > { %552 = vadd.xlane.f32.xlu0 %v551_v39 }
  0x96   : > { %1071 = vadd.xlane.f32.xlu2 %v1070_v46  ;;  %1068 = vadd.xlane.f32.xlu1 %v1067_v47 }
  0x97   : > { %2077 = vadd.xlane.f32.xlu0 %v2076_v45 }
  0x9e   : > { %1577 = vadd.xlane.f32.xlu2 %v1576_v52  ;;  %2080 = vadd.xlane.f32.xlu1 %v2079_v53 }
  0x9f   : > { %1580 = vadd.xlane.f32.xlu0 %v1579_v51 }
  0xa6   : > { %558 = vadd.xlane.f32.xlu2 %v557_v57  ;;  %1586 = vadd.xlane.f32.xlu1 %v1585_v3 }
  0xa7   : > { %561 = vadd.xlane.f32.xlu0 %v560_v56 }
  0xae   : > { %2083 = vadd.xlane.f32.xlu2 %v2082_v61  ;;  %567 = vadd.xlane.f32.xlu1 %v566_v17 }
  0xaf   : > { %1077 = vadd.xlane.f32.xlu0 %v1076_v60 }
  0xb6   : > { %1074 = vadd.xlane.f32.xlu2 %v1073_v9 }
  0xb7   : > { %1583 = vadd.xlane.f32.xlu0 %v1582_v5 }
  0xbe   : > { %2086 = vadd.xlane.f32.xlu2 %v2085_v22 }
  0xbf   : > { %564 = vadd.xlane.f32.xlu0 %v563_v21 }
  0xd1   : > { %v1560_v35 = vpop.xlane.xlu2 %1559  ;;  %v547_v41 = vpop.xlane.xlu1 %546 }
  0xd2   : > { %v541_v39 = vpop.xlane.xlu0 %540  ;;  %v1606_v40 = vmul.f32 %v1560_v35, %v3320_v34 }
  0xd3   : > { %v594_v60 = vmul.f32 %v3320_v34, %v541_v39 }
  0xd4   : > { %v3324_v45 = vsub.f32 %v3136_v0, %v1606_v40 }
  0xd5   : > { %v3343_v9 = vsub.f32 %v3139_v1, %v594_v60 }
  0xd6   : > { %v1638_v46 = vmul.f32 %v3324_v45, %v3324_v45 }
  0xd7   : > { %v626_v1 = vmul.f32 %v3343_v9, %v3343_v9 }
  0xd8   : > { %v1654_v47 = vsel %vm538_vm0, %v1638_v46, 0.0 }
  0xd9   : > { %v1563_v51 = vpop.xlane.xlu2 %1562  ;;  %1655 = vadd.xlane.f32.xlu0 %v1654_v47  ;;  %v550_v57 = vpop.xlane.xlu1 %549  ;;  %v642_v39 = vsel %vm538_vm0, %v626_v1, 0.0 }
  0xda   : > { %v544_v52 = vpop.xlane.xlu0 %543  ;;  %v1607_v53 = vmul.f32 %v1563_v51, %v3320_v34  ;;  %v597_v60 = vmul.f32 %v3320_v34, %v550_v57 }
  0xdb   : > { %v595_v56 = vmul.f32 %v3320_v34, %v544_v52 }
  0xdc   : > { %v3333_v61 = vsub.f32 %v3151_v6, %v1607_v53  ;;  %v596_v53 = vmul.f32 %v3320_v34, %v547_v41 }
  0xdd   : > { %v3336_v0 = vsub.f32 %v3154_v7, %v595_v56 }
  0xde   : > { %v1639_v3 = vmul.f32 %v3333_v61, %v3333_v61 }
  0xdf   : > { %v627_v5 = vmul.f32 %v3336_v0, %v3336_v0 }
  0xe0   : > { %v1657_v10 = vsel %vm538_vm0, %v1639_v3, 0.0 }
  0xe1   : > { %v645_v17 = vsel %vm538_vm0, %v627_v5, 0.0  ;;  %v1057_v21 = vpop.xlane.xlu2 %1056  ;;  %1658 = vadd.xlane.f32.xlu1 %v1657_v10  ;;  %v2066_v22 = vpop.xlane.xlu1 %2065 }
  0xe2   : > { %646 = vadd.xlane.f32.xlu2 %v645_v17  ;;  %v2063_v6 = vpop.xlane.xlu0 %2062  ;;  %v1103_v23 = vmul.f32 %v1057_v21, %v3320_v34  ;;  %v2110_v27 = vmul.f32 %v2066_v22, %v3320_v34  ;;  %v3384_v21 = vsub.f32 %v3146_v4, %v596_v53 }
  0xe3   : > { %v2109_v7 = vmul.f32 %v2063_v6, %v3320_v34 }
  0xe4   : > { %v3356_v29 = vsub.f32 %v3172_v14, %v2110_v27  ;;  %v3361_v35 = vsub.f32 %v3166_v12, %v1103_v23  ;;  %v628_v4 = vmul.f32 %v3384_v21, %v3384_v21 }
  0xe5   : > { %v3351_v28 = vsub.f32 %v3169_v13, %v2109_v7 }
  0xe6   : > { %v2142_v14 = vmul.f32 %v3356_v29, %v3356_v29  ;;  %v1135_v12 = vmul.f32 %v3361_v35, %v3361_v35 }
  0xe7   : > { %v2141_v33 = vmul.f32 %v3351_v28, %v3351_v28 }
  0xe8   : > { %v2160_v3 = vsel %vm538_vm0, %v2142_v14, 0.0  ;;  %v1151_v17 = vsel %vm538_vm0, %v1135_v12, 0.0 }
  0xe9   : > { %v2157_v40 = vsel %vm538_vm0, %v2141_v33, 0.0  ;;  %v1569_v46 = vpop.xlane.xlu2 %1568  ;;  %643 = vadd.xlane.f32.xlu1 %v642_v39  ;;  %v1566_v51 = vpop.xlane.xlu1 %1565  ;;  %v648_v39 = vsel %vm538_vm0, %v628_v4, 0.0 }
  0xea   : > { %2158 = vadd.xlane.f32.xlu0 %v2157_v40  ;;  %v1060_v13 = vpop.xlane.xlu0 %1059  ;;  %v1609_v47 = vmul.f32 %v1569_v46, %v3320_v34  ;;  %v1608_v6 = vmul.f32 %v1566_v51, %v3320_v34  ;;  %v3414_v51 = vld [vmem:[%s3133_s10 + $0x1c8] sm:$0xff] }
  0xeb   : > { %v1104_v52 = vmul.f32 %v1060_v13, %v3320_v34 }
  0xec   : > { %v3373_v56 = vsub.f32 %v3181_v18, %v1609_v47  ;;  %v3388_v18 = vsub.f32 %v3157_v8, %v597_v60  ;;  %v3399_v23 = vsub.f32 %v3187_v20, %v1608_v6  ;;  %v2088_v60 = vsel %vm538_vm0, %v3414_v51, 0.0  ;;  %v3434_v6 = vld [vmem:[%s3133_s10 + $0xc0] sm:$0xff] }
  0xed   : > { %v3380_v10 = vsub.f32 %v3184_v19, %v1104_v52 }
  0xee   : > { %v1641_v5 = vmul.f32 %v3373_v56, %v3373_v56  ;;  %v629_v8 = vmul.f32 %v3388_v18, %v3388_v18 }
  0xef   : > { %v1136_v19 = vmul.f32 %v3380_v10, %v3380_v10 }
  0xf0   : > { %v1663_v41 = vsel %vm538_vm0, %v1641_v5, 0.0  ;;  %v651_v40 = vsel %vm538_vm0, %v629_v8, 0.0 }
  0xf1   : > { %2161 = vadd.xlane.f32.xlu1 %v2160_v3  ;;  %1664 = vadd.xlane.f32.xlu2 %v1663_v41  ;;  %v2072_v7 = vpop.xlane.xlu1 %2071  ;;  %v1154_v1 = vsel %vm538_vm0, %v1136_v19, 0.0  ;;  %v1063_v33 = vpop.xlane.xlu2 %1062 }
  0xf2   : > { %v2069_v57 = vpop.xlane.xlu0 %2068  ;;  %1152 = vadd.xlane.f32.xlu0 %v1151_v17  ;;  %v2112_v22 = vmul.f32 %v2072_v7, %v3320_v34  ;;  %v1105_v17 = vmul.f32 %v1063_v33, %v3320_v34  ;;  %v1079_v33 = vsel %vm538_vm0, %v3434_v6, 0.0 }
  0xf3   : > { %v2111_v13 = vmul.f32 %v2069_v57, %v3320_v34 }
  0xf4   : > { %v3402_v27 = vsub.f32 %v3202_v26, %v2112_v22  ;;  %v1640_v26 = vmul.f32 %v3399_v23, %v3399_v23  ;;  %v3437_v7 = vsub.f32 %v3199_v25, %v1105_v17 }
  0xf5   : > { %v3417_v14 = vsub.f32 %v3196_v24, %v2111_v13 }
  0xf6   : > { %v2144_v20 = vmul.f32 %v3402_v27, %v3402_v27  ;;  %v1660_v12 = vsel %vm538_vm0, %v1640_v26, 0.0  ;;  %v1137_v25 = vmul.f32 %v3437_v7, %v3437_v7 }
  0xf7   : > { %v2143_v41 = vmul.f32 %v3417_v14, %v3417_v14 }
  0xf8   : > { %v2166_v52 = vsel %vm538_vm0, %v2144_v20, 0.0 }
  0xf9   : > { %649 = vadd.xlane.f32.xlu2 %v648_v39  ;;  %1155 = vadd.xlane.f32.xlu1 %v1154_v1  ;;  %v1572_v3 = vpop.xlane.xlu1 %1571  ;;  %v1575_v5 = vpop.xlane.xlu2 %1574  ;;  %v2163_v22 = vsel %vm538_vm0, %v2143_v41, 0.0 }
  0xfa   : > { %v1066_v46 = vpop.xlane.xlu0 %1065  ;;  %652 = vadd.xlane.f32.xlu0 %v651_v40  ;;  %v1610_v24 = vmul.f32 %v1572_v3, %v3320_v34  ;;  %v1157_v40 = vsel %vm538_vm0, %v1137_v25, 0.0 }
  0xfb   : > { %v1106_v47 = vmul.f32 %v1066_v46, %v3320_v34 }
  0xfc   : > { %v3440_v19 = vsub.f32 %v3217_v32, %v1610_v24 }
  0xfd   : > { %v3422_v53 = vsub.f32 %v3211_v30, %v1106_v47  ;;  %v1611_v30 = vmul.f32 %v1575_v5, %v3320_v34 }
  0xfe   : > { %v1642_v32 = vmul.f32 %v3440_v19, %v3440_v19 }
  0xff   : > { %v1138_v57 = vmul.f32 %v3422_v53, %v3422_v53  ;;  %v3445_v1 = vsub.f32 %v3214_v31, %v1611_v30 }
 0x100   : > { %v1666_v46 = vsel %vm538_vm0, %v1642_v32, 0.0 }
 0x101   : > { %2167 = vadd.xlane.f32.xlu2 %v2166_v52  ;;  %1661 = vadd.xlane.f32.xlu1 %v1660_v12  ;;  %v1160_v4 = vsel %vm538_vm0, %v1138_v57, 0.0  ;;  %v1643_v39 = vmul.f32 %v3445_v1, %v3445_v1  ;;  %v2075_v26 = vpop.xlane.xlu2 %2074  ;;  %v3464_v12 = vld [vmem:[%s3133_s10 + $0xc8] sm:$0xff]  ;;  %v556_v17 = vpop.xlane.xlu1 %555 }
 0x102   : > { %2089 = vadd.xlane.f32.xlu0 %v2088_v60  ;;  %v553_v8 = vpop.xlane.xlu0 %552  ;;  %v2113_v52 = vmul.f32 %v2075_v26, %v3320_v34  ;;  %v3467_v60 = vld [vmem:[%s3133_s10 + $0x158] sm:$0xff]  ;;  %v1082_v24 = vsel %vm538_vm0, %v3464_v12, 0.0 }
 0x103   : > { %v598_v31 = vmul.f32 %v3320_v34, %v553_v8  ;;  %v1669_v13 = vsel %vm538_vm0, %v1643_v39, 0.0  ;;  %v1591_v41 = vsel %vm538_vm0, %v3467_v60, 0.0 }
 0x105   : > { %v3460_v20 = vsub.f32 %v3226_v36, %v598_v31  ;;  %v3473_v36 = vsub.f32 %v3229_v37, %v2113_v52  ;;  %v2705_v52 = vld [vmem:[%s3133_s10 + $0x1d0] sm:$0xff] }
 0x107   : > { %v630_v3 = vmul.f32 %v3460_v20, %v3460_v20  ;;  %v2145_v37 = vmul.f32 %v3473_v36, %v3473_v36 }
 0x109   : > { %2164 = vadd.xlane.f32.xlu1 %v2163_v22  ;;  %1161 = vadd.xlane.f32.xlu2 %v1160_v4  ;;  %v654_v57 = vsel %vm538_vm0, %v630_v3, 0.0  ;;  %v1072_v22 = vpop.xlane.xlu2 %1071  ;;  %v599_v4 = vmul.f32 %v3320_v34, %v556_v17  ;;  %v2169_v39 = vsel %vm538_vm0, %v2145_v37, 0.0 }
 0x10a   : > { %1080 = vadd.xlane.f32.xlu0 %v1079_v33  ;;  %v2078_v47 = vpop.xlane.xlu0 %2077  ;;  %v2680_v33 = vld [vmem:[%s3133_s10 + $0x150] sm:$0xff] }
 0x10b   : > { %v2114_v5 = vmul.f32 %v2078_v47, %v3320_v34  ;;  %v3490_v32 = vsub.f32 %v3232_v38, %v599_v4  ;;  %v1108_v38 = vmul.f32 %v1072_v22, %v3320_v34  ;;  %v533_v47 = vld [vmem:[%s3133_s10 + $0x58] sm:$0xff]  ;;  %v532_v4 = vld [vmem:[%s3133_s10 + $0x50] sm:$0xff] }
 0x10d   : > { %v3481_v30 = vsub.f32 %v3241_v42, %v2114_v5  ;;  %v1588_v42 = vsel %vm538_vm0, %v2680_v33, 0.0 }
 0x10f   : > { %v2146_v25 = vmul.f32 %v3481_v30, %v3481_v30 }
 0x111   : > { %1158 = vadd.xlane.f32.xlu1 %v1157_v40  ;;  %1667 = vadd.xlane.f32.xlu2 %v1666_v46  ;;  %v2172_v31 = vsel %vm538_vm0, %v2146_v25, 0.0  ;;  %v1069_v40 = vpop.xlane.xlu1 %1068  ;;  %v1578_v26 = vpop.xlane.xlu2 %1577 }
 0x112   : > { %1670 = vadd.xlane.f32.xlu0 %v1669_v13  ;;  %v1581_v8 = vpop.xlane.xlu0 %1580  ;;  %v1107_v46 = vmul.f32 %v1069_v40, %v3320_v34  ;;  %v631_v13 = vmul.f32 %v3490_v32, %v3490_v32  ;;  %v2706_v40 = vld [vmem:[%s3133_s10 + $0x1d8] sm:$0xff] }
 0x114   : > { %v3502_v5 = vsub.f32 %v3247_v44, %v1107_v46  ;;  %v657_v17 = vsel %vm538_vm0, %v631_v13, 0.0  ;;  %v1612_v44 = vmul.f32 %v1578_v26, %v3320_v34  ;;  %v2656_v46 = vld [vmem:[%s3133_s10 + $0xd8] sm:$0xff]  ;;  %v2094_v26 = vsel %vm538_vm0, %v2706_v40, 0.0 }
 0x116   : > { %v1139_v22 = vmul.f32 %v3502_v5, %v3502_v5 }
 0x118   : > { %v1163_v25 = vsel %vm538_vm0, %v1139_v22, 0.0  ;;  %v2682_v22 = vld [vmem:[%s3133_s10 + $0x160] sm:$0xff] }
 0x119   : > { %1083 = vadd.xlane.f32.xlu1 %v1082_v24  ;;  %1592 = vadd.xlane.f32.xlu2 %v1591_v41  ;;  %v572_v24 = vsel %vm538_vm0, %v533_v47, 0.0  ;;  %v3507_v41 = vsub.f32 %v3244_v43, %v1108_v38  ;;  %v559_v33 = vpop.xlane.xlu2 %558  ;;  %v569_v43 = vsel %vm538_vm0, %v532_v4, 0.0  ;;  %v1088_v38 = vsel %vm538_vm0, %v2656_v46, 0.0  ;;  %v2683_v4 = vld [vmem:[%s3133_s10 + $0x168] sm:$0xff] }
 0x11a   : > { %655 = vadd.xlane.f32.xlu0 %v654_v57  ;;  %v562_v3 = vpop.xlane.xlu0 %561  ;;  %v2091_v57 = vsel %vm538_vm0, %v2705_v52, 0.0  ;;  %v1597_v40 = vsel %vm538_vm0, %v2683_v4, 0.0 }
 0x11b   : > { %v1140_v37 = vmul.f32 %v3507_v41, %v3507_v41 }
 0x121   : > { %1589 = vadd.xlane.f32.xlu1 %v1588_v42  ;;  %2170 = vadd.xlane.f32.xlu2 %v2169_v39  ;;  %v3521_v39 = vsub.f32 %v3259_v49, %v1612_v44  ;;  %v2084_v47 = vpop.xlane.xlu2 %2083  ;;  %v2081_v49 = vpop.xlane.xlu1 %2080  ;;  %v1613_v44 = vmul.f32 %v1581_v8, %v3320_v34  ;;  %v600_v8 = vmul.f32 %v3320_v34, %v559_v33 }
 0x122   : > { %2173 = vadd.xlane.f32.xlu0 %v2172_v31  ;;  %v3518_v42 = vpop.xlane.xlu0 %1077  ;;  %v1166_v31 = vsel %vm538_vm0, %v1140_v37, 0.0  ;;  %v2115_v37 = vmul.f32 %v2081_v49, %v3320_v34 }
 0x123   : > { %v1644_v13 = vmul.f32 %v3521_v39, %v3521_v39  ;;  %v3546_v46 = vsub.f32 %v3256_v48, %v1613_v44 }
 0x125   : > { %v1672_v52 = vsel %vm538_vm0, %v1644_v13, 0.0  ;;  %v1645_v49 = vmul.f32 %v3546_v46, %v3546_v46 }
 0x127   : > { %v1675_v33 = vsel %vm538_vm0, %v1645_v49, 0.0 }
 0x129   : > { %658 = vadd.xlane.f32.xlu1 %v657_v17  ;;  %573 = vadd.xlane.f32.xlu2 %v572_v24  ;;  %v601_v24 = vmul.f32 %v3320_v34, %v562_v3  ;;  %v1075_v3 = vpop.xlane.xlu2 %1074  ;;  %v1587_v13 = vpop.xlane.xlu1 %1586 }
 0x12a   : > { %2092 = vadd.xlane.f32.xlu0 %v2091_v57  ;;  %v3531_v17 = vpop.xlane.xlu0 %1583  ;;  %v2655_v57 = vld [vmem:[%s3133_s10 + $0xd0] sm:$0xff] }
 0x131   : > { %570 = vadd.xlane.f32.xlu1 %v569_v43  ;;  %1164 = vadd.xlane.f32.xlu2 %v1163_v25  ;;  %v3540_v43 = vsub.f32 %v3271_v54, %v601_v24  ;;  %v1085_v25 = vsel %vm538_vm0, %v2655_v57, 0.0  ;;  %v2116_v57 = vmul.f32 %v2084_v47, %v3320_v34  ;;  %v568_v44 = vpop.xlane.xlu1 %567 }
 0x132   : > { %1167 = vadd.xlane.f32.xlu0 %v1166_v31  ;;  %v1594_v31 = vsel %vm538_vm0, %v2682_v22, 0.0  ;;  %v565_v54 = vpop.xlane.xlu0 %564  ;;  %v2087_v22 = vpop.xlane.xlu2 %2086 }
 0x139   : > { %2095 = vadd.xlane.f32.xlu1 %v2094_v26  ;;  %1089 = vadd.xlane.f32.xlu2 %v1088_v38  ;;  %v3549_v26 = vsub.f32 %v3262_v50, %v2115_v37  ;;  %v633_v38 = vmul.f32 %v3540_v43, %v3540_v43  ;;  %v3559_v50 = vsub.f32 %v3274_v55, %v600_v8  ;;  %v534_v55 = vld [vmem:[%s3133_s10 + $0x60] sm:$0xff] }
 0x13a   : > { %1673 = vadd.xlane.f32.xlu0 %v1672_v52  ;;  %v1109_v37 = vmul.f32 %v1075_v3, %v3320_v34  ;;  %v3572_v8 = vsub.f32 %v3284_v59, %v2116_v57  ;;  %v575_v47 = vsel %vm538_vm0, %v534_v55, 0.0  ;;  %v1615_v57 = vmul.f32 %v1587_v13, %v3320_v34 }
 0x13b   : > { %5213 = vst [vmem:[#allocation3_spill] sm:$0xff] %v3549_v26  ;;  %v2147_v48 = vmul.f32 %v3549_v26, %v3549_v26  ;;  %v663_v52 = vsel %vm538_vm0, %v633_v38, 0.0  ;;  %v632_v4 = vmul.f32 %v3559_v50, %v3559_v50 }
 0x13c   : > { %5214 = vst [vmem:[#allocation4_spill] sm:$0xff] %v3559_v50  ;;  %v3577_v49 = vsub.f32 %v3297_v2, %v1109_v37  ;;  %v2148_v59 = vmul.f32 %v3572_v8, %v3572_v8 }
 0x13d   : > { %v2175_v24 = vsel %vm538_vm0, %v2147_v48, 0.0  ;;  %5215 = vst [vmem:[#allocation5_spill] sm:$0xff] %v3572_v8  ;;  %v660_v38 = vsel %vm538_vm0, %v632_v4, 0.0 }
 0x13e   : > { %5216 = vst [vmem:[#allocation6_spill] sm:$0xff] %v3577_v49  ;;  %v1141_v2 = vmul.f32 %v3577_v49, %v3577_v49  ;;  %v536_v49 = vld [vmem:[%s3133_s10 + $0x70] sm:$0xff] }
 0x141   : > { %1086 = vadd.xlane.f32.xlu1 %v1085_v25  ;;  %1595 = vadd.xlane.f32.xlu2 %v1594_v31  ;;  %v535_v31 = vld [vmem:[%s3133_s10 + $0x68] sm:$0xff] }
 0x142   : > { %1598 = vadd.xlane.f32.xlu0 %v1597_v40  ;;  %v578_v3 = vsel %vm538_vm0, %v535_v31, 0.0  ;;  %v1110_v31 = vmul.f32 %v3518_v42, %v3320_v34  ;;  %v3610_v42 = vsub.f32 %v3291_v62, %v1615_v57  ;;  %v2707_v62 = vld [vmem:[%s3133_s10 + $0x1e0] sm:$0xff] }
 0x144   : > { %5217 = vst [vmem:[#allocation7_spill] sm:$0xff] %v3610_v42 }
 0x149   : > { %1676 = vadd.xlane.f32.xlu1 %v1675_v33  ;;  %664 = vadd.xlane.f32.xlu2 %v663_v52  ;;  %v2686_v52 = vld [vmem:[%s5200_s3 + $0x4] sm:$0x3]  ;;  %v2708_v33 = vld [vmem:[%s3133_s10 + $0x1e8] sm:$0xff] }
 0x14a   : > { %2176 = vadd.xlane.f32.xlu0 %v2175_v24  ;;  %v1977_v24 = vsel %vm969_vm2, %v2686_v52, 0 }
 0x14b   : > { %1986 = vmatpush.bf16.msra.mxu2 %v1977_v24  ;;  %v1169_v24 = vsel %vm538_vm0, %v1141_v2, 0.0 }
 0x14c   : > { %v1656_v25 = vpop.xlane.xlu0 %1655 }
 0x14d   : > { %v1702_v40 = vmul.f32 %v1656_v25, %v3320_v34 }
 0x14f   : > { %v3579_v48 = vadd.f32 1e-06, %v1702_v40  ;;  %v603_v40 = vmul.f32 %v3320_v34, %v568_v44  ;;  %v602_v44 = vmul.f32 %v3320_v34, %v565_v54  ;;  %v2657_v54 = vld [vmem:[%s3133_s10 + $0xe0] sm:$0xff] }
 0x151   : > { %2753 = vrsqrt.f32 %v3579_v48  ;;  %661 = vadd.xlane.f32.xlu1 %v660_v38  ;;  %576 = vadd.xlane.f32.xlu2 %v575_v47  ;;  %v2178_v38 = vsel %vm538_vm0, %v2148_v59, 0.0  ;;  %v2100_v47 = vsel %vm538_vm0, %v2708_v33, 0.0  ;;  %v3617_v33 = vsub.f32 %v3281_v58, %v1110_v31  ;;  %v2658_v31 = vld [vmem:[%s3133_s10 + $0xe8] sm:$0xff] }
 0x152   : > { %579 = vadd.xlane.f32.xlu0 %v578_v3  ;;  %v3620_v2 = vsub.f32 %v3306_v11, %v603_v40  ;;  %v1647_v11 = vmul.f32 %v3610_v42, %v3610_v42  ;;  %v944_v40 = vld [vmem:[%s5200_s3] sm:$0x3]  ;;  %vm1740_vm4 = vweird.f32 %v3579_v48 }
 0x153   : > { %5218 = vst [vmem:[#allocation8_spill] sm:$0xff] %v3617_v33 }
 0x154   : > { %v1659_v4 = vpop.xlane.xlu1 %1658  ;;  %5219 = vst [vmem:[#allocation9_spill] sm:$0xff] %v3620_v2 }
 0x155   : > { %v647_v37 = vpop.xlane.xlu2 %646  ;;  %v1703_v55 = vmul.f32 %v1659_v4, %v3320_v34  ;;  %v1614_v4 = vmul.f32 %v3531_v17, %v3320_v34 }
 0x156   : > { %v691_v25 = vmul.f32 %v647_v37, %v3320_v34  ;;  %v3630_v37 = vsub.f32 %v3309_v15, %v602_v44  ;;  %v971_v15 = vsel %vm969_vm2, %v944_v40, 0  ;;  %v1142_v44 = vmul.f32 %v3617_v33, %v3617_v33 }
 0x157   : > { %v3600_v3 = vpop.eup %2753  ;;  %v3602_v13 = vadd.f32 1e-06, %v1703_v55  ;;  %v3627_v57 = vsub.f32 %v3294_v63, %v1614_v4  ;;  %v1091_v4 = vsel %vm538_vm0, %v2657_v54, 0.0  ;;  %980 = vmatpush.bf16.msra.mxu0 %v971_v15 }
 0x158   : > { %v3604_v52 = vadd.f32 1e-06, %v691_v25  ;;  %v1735_v59 = vmul.f32 %v3600_v3, %v3579_v48  ;;  %5221 = vst [vmem:[#allocation11_spill] sm:$0xff] %v3630_v37  ;;  %v634_v15 = vmul.f32 %v3630_v37, %v3630_v37  ;;  %vm1741_vm3 = vweird.f32 %v3600_v3 }
 0x159   : > { %2755 = vrsqrt.f32 %v3602_v13  ;;  %2179 = vadd.xlane.f32.xlu1 %v2178_v38  ;;  %2101 = vadd.xlane.f32.xlu2 %v2100_v47  ;;  %5220 = vst [vmem:[#allocation10_spill] sm:$0xff] %v3627_v57  ;;  %v2117_v38 = vmul.f32 %v2087_v22, %v3320_v34  ;;  %v1646_v54 = vmul.f32 %v3627_v57, %v3627_v57  ;;  %vm3693_vm5 = vmor %vm1740_vm4, %vm1741_vm3  ;;  %vm1750_vm7 = vweird.f32 %v3602_v13 }
 0x15a   : > { %v1736_v17 = vmul.f32 %v3600_v3, %v1735_v59  ;;  %2757 = vrsqrt.f32 %v3604_v52  ;;  %1170 = vadd.xlane.f32.xlu0 %v1169_v24  ;;  %v2097_v24 = vsel %vm538_vm0, %v2707_v62, 0.0  ;;  %v635_v59 = vmul.f32 %v3620_v2, %v3620_v2 }
 0x15b   : > { %v1172_v2 = vsel %vm538_vm0, %v1142_v44, 0.0  ;;  %vm738_vm9 = vweird.f32 %v3604_v52 }
 0x15c   : > { %v1737_v55 = vmul.f32 0.5, %v1736_v17  ;;  %v644_v25 = vpop.xlane.xlu1 %643  ;;  %v3678_v57 = vsel %vm538_vm0, %v635_v59, 0.0 }
 0x15d   : > { %v2159_v58 = vpop.xlane.xlu0 %2158  ;;  %v690_v47 = vmul.f32 %v644_v25, %v3320_v34 }
 0x15e   : > { %v2205_v63 = vmul.f32 %v2159_v58, %v3320_v34  ;;  %v1738_v22 = vsub.f32 1.5, %v1737_v55  ;;  %v1094_v58 = vsel %vm538_vm0, %v2658_v31, 0.0  ;;  %v3664_v55 = vsub.f32 %v3312_v16, %v2117_v38  ;;  %v2684_v38 = vld [vmem:[%s3133_s10 + $0x170] sm:$0xff] }
 0x15f   : > { %v3648_v17 = vpop.eup %2755  ;;  %v3650_v42 = vadd.f32 1e-06, %v690_v47 }
 0x160   : > { %v3652_v25 = vadd.f32 1e-06, %v2205_v63  ;;  %v3655_v40 = vpop.eup %2757  ;;  %v1745_v62 = vmul.f32 %v3648_v17, %v3602_v13  ;;  %5222 = vst [vmem:[#allocation12_spill] sm:$0xff] %v3664_v55  ;;  %v1681_v63 = vsel %vm538_vm0, %v1647_v11, 0.0  ;;  %v1739_v37 = vmul.f32 %v3600_v3, %v1738_v22 }
 0x161   : > { %v733_v47 = vmul.f32 %v3655_v40, %v3604_v52  ;;  %2759 = vrsqrt.f32 %v3650_v42  ;;  %2098 = vadd.xlane.f32.xlu1 %v2097_v24  ;;  %1092 = vadd.xlane.f32.xlu2 %v1091_v4  ;;  %v3685_v11 = vsel %vm538_vm0, %v634_v15, 0.0  ;;  %v2149_v59 = vmul.f32 %v3664_v55, %v3664_v55 }
 0x162   : > { %v1746_v31 = vmul.f32 %v3648_v17, %v1745_v62  ;;  %2761 = vrsqrt.f32 %v3652_v25  ;;  %1095 = vadd.xlane.f32.xlu0 %v1094_v58  ;;  %v3682_v58 = vsel %vm538_vm0, %v1646_v54, 0.0  ;;  %vm1751_vm6 = vweird.f32 %v3648_v17 }
 0x163   : > { %v734_v16 = vmul.f32 %v3655_v40, %v733_v47  ;;  %vm1752_vm8 = vmor %vm1750_vm7, %vm1751_vm6  ;;  %v3723_v13 = vsel %vm538_vm0, %v2149_v59, 0.0  ;;  %vm739_vm10 = vweird.f32 %v3655_v40  ;;  %vm728_vm11 = vweird.f32 %v3650_v42 }
 0x164   : > { %v1747_v24 = vmul.f32 0.5, %v1746_v31  ;;  %v2162_v4 = vpop.xlane.xlu1 %2161  ;;  %v1665_v62 = vpop.xlane.xlu2 %1664  ;;  %v1600_v31 = vsel %vm538_vm0, %v2684_v38, 0.0  ;;  %vm2243_vm13 = vweird.f32 %v3652_v25  ;;  %vm3760_vm14 = vmor %vm738_vm9, %vm739_vm10 }
 0x165   : > { %v735_v44 = vmul.f32 0.5, %v734_v16  ;;  %v2206_v22 = vmul.f32 %v2162_v4, %v3320_v34  ;;  %v1705_v47 = vmul.f32 %v1665_v62, %v3320_v34  ;;  %v1153_v33 = vpop.xlane.xlu0 %1152  ;;  %v1743_v4 = vsel %vm3693_vm5, %v3600_v3, %v1739_v37 }
 0x166   : > { %v1748_v54 = vsub.f32 1.5, %v1747_v24  ;;  %v1199_v15 = vmul.f32 %v1153_v33, %v3320_v34 }
 0x167   : > { %v3700_v16 = vpop.eup %2759  ;;  %v3706_v62 = vadd.f32 1e-06, %v2206_v22  ;;  %v3708_v55 = vadd.f32 1e-06, %v1705_v47  ;;  %v736_v33 = vsub.f32 1.5, %v735_v44  ;;  %v3729_v22 = vsel %vm538_vm0, %v536_v49, 0.0 }
 0x168   : > { %v3711_v24 = vpop.eup %2761  ;;  %v1749_v8 = vmul.f32 %v3648_v17, %v1748_v54  ;;  %v723_v38 = vmul.f32 %v3700_v16, %v3650_v42  ;;  %v3716_v26 = vadd.f32 1e-06, %v1199_v15  ;;  %v1894_v47 = vmul.f32 %v1743_v4, %v3324_v45 }
 0x169   : > { %v2238_v3 = vmul.f32 %v3711_v24, %v3652_v25  ;;  %2763 = vrsqrt.f32 %v3706_v62  ;;  %1682 = vadd.xlane.f32.xlu2 %v1681_v63  ;;  %1173 = vadd.xlane.f32.xlu1 %v1172_v2  ;;  %vm729_vm12 = vweird.f32 %v3700_v16  ;;  %vm2244_vm15 = vweird.f32 %v3711_v24 }
 0x16a   : > { %v1753_v37 = vsel %vm1752_vm8, %v3648_v17, %v1749_v8  ;;  %v724_v44 = vmul.f32 %v3700_v16, %v723_v38  ;;  %2765 = vrsqrt.f32 %v3708_v55  ;;  %1601 = vadd.xlane.f32.xlu0 %v1600_v31  ;;  %v3738_v8 = vld [vmem:[%s5198_s1] ss:$0 sm:$0xff]  ;;  %v737_v17 = vmul.f32 %v3655_v40, %v736_v33  ;;  %vm3783_vm1 = vmor %vm728_vm11, %vm729_vm12 }
 0x16b   : > { %v1895_v48 = vmul.f32 %v1753_v37, %v3333_v61  ;;  %v2239_v2 = vmul.f32 %v3711_v24, %v2238_v3  ;;  %2767 = vrsqrt.f32 %v3716_v26  ;;  %v3752_v38 = vld [vmem:[%s5199_s2] ss:$0 sm:$0xff]  ;;  %vm2253_vm3 = vweird.f32 %v3706_v62  ;;  %vm3817_vm5 = vmor %vm2243_vm13, %vm2244_vm15 }
 0x16c   : > { %v725_v63 = vmul.f32 0.5, %v724_v44  ;;  %v650_v49 = vpop.xlane.xlu2 %649  ;;  %v1156_v45 = vpop.xlane.xlu1 %1155  ;;  %vm1770_vm4 = vweird.f32 %v3708_v55  ;;  %vm1237_vm7 = vweird.f32 %v3716_v26 }
 0x16d   : > { %v2240_v59 = vmul.f32 0.5, %v2239_v2  ;;  %v692_v61 = vmul.f32 %v650_v49, %v3320_v34  ;;  %v1200_v54 = vmul.f32 %v1156_v45, %v3320_v34  ;;  %v653_v15 = vpop.xlane.xlu0 %652  ;;  %v1911_v31 = vmul.f32 %v3738_v8, %v1895_v48 }
 0x16e   : > { %v726_v4 = vsub.f32 1.5, %v725_v63  ;;  %v693_v33 = vmul.f32 %v653_v15, %v3320_v34  ;;  %v1910_v63 = vmul.f32 %v3738_v8, %v1894_v47  ;;  %v741_v45 = vsel %vm3760_vm14, %v3655_v40, %v737_v17 }
 0x16f   : > { %v3754_v3 = vpop.eup %2763  ;;  %v2241_v44 = vsub.f32 1.5, %v2240_v59  ;;  %v3764_v48 = vadd.f32 1e-06, %v692_v61  ;;  %v3766_v2 = vadd.f32 1e-06, %v1200_v54  ;;  %v2685_v59 = vld [vmem:[%s3133_s10 + $0x178] sm:$0xff]  ;;  %v1927_v17 = vadd.f32 %v3752_v38, %v1911_v31 }
 0x170   : > { %v3769_v49 = vpop.eup %2765  ;;  %v727_v15 = vmul.f32 %v3700_v16, %v726_v4  ;;  %v2248_v52 = vmul.f32 %v3754_v3, %v3706_v62  ;;  %v3790_v40 = vadd.f32 1e-06, %v693_v33  ;;  %v1603_v33 = vsel %vm538_vm0, %v2685_v59, 0.0 }
 0x171   : > { %v1765_v61 = vmul.f32 %v3769_v49, %v3708_v55  ;;  %2769 = vrsqrt.f32 %v3764_v48  ;;  %1679 = vadd.xlane.f32.xlu1 %v3682_v58  ;;  %667 = vadd.xlane.f32.xlu2 %v3685_v11  ;;  %v3795_v54 = vpop.eup %2767  ;;  %v2242_v4 = vmul.f32 %v3711_v24, %v2241_v44  ;;  %v883_v58 = vmul.f32 %v741_v45, %v3336_v0 }
 0x172   : > { %v731_v42 = vsel %vm3783_vm1, %v3700_v16, %v727_v15  ;;  %v2249_v37 = vmul.f32 %v3754_v3, %v2248_v52  ;;  %2771 = vrsqrt.f32 %v3766_v2  ;;  %670 = vadd.xlane.f32.xlu0 %v3678_v57  ;;  %v1232_v31 = vmul.f32 %v3795_v54, %v3716_v26 }
 0x173   : > { %v1766_v11 = vmul.f32 %v3769_v49, %v1765_v61  ;;  %v1926_v16 = vadd.f32 %v3752_v38, %v1910_v63  ;;  %v882_v57 = vmul.f32 %v731_v42, %v3343_v9  ;;  %2773 = vrsqrt.f32 %v3790_v40 }
 0x174   : > { %v2250_v50 = vmul.f32 0.5, %v2249_v37  ;;  %v2168_v44 = vpop.xlane.xlu2 %2167  ;;  %v1662_v15 = vpop.xlane.xlu1 %1661  ;;  %v1233_v52 = vmul.f32 %v3795_v54, %v1232_v31  ;;  %v2246_v63 = vsel %vm3817_vm5, %v3711_v24, %v2242_v4  ;;  %vm2254_vm6 = vweird.f32 %v3754_v3 }
 0x175   : > { %v1767_v45 = vmul.f32 0.5, %v1766_v11  ;;  %v2090_v59 = vpop.xlane.xlu0 %2089  ;;  %v1942_v9 = vpack.c.bf16 %v1927_v17, %v1926_v16  ;;  %v2208_v61 = vmul.f32 %v2168_v44, %v3320_v34  ;;  %v902_v37 = vmul.f32 %v3738_v8, %v883_v58  ;;  %vm3862_vm12 = vmor %vm2253_vm3, %vm2254_vm6 }
 0x176   : > { %v2251_v47 = vsub.f32 1.5, %v2250_v50  ;;  %v1234_v25 = vmul.f32 0.5, %v1233_v52  ;;  %vm1771_vm8 = vweird.f32 %v3769_v49  ;;  %v3841_v17 = vmul.f32 %v2246_v63, %v3351_v28 }
 0x177   : > { %v3827_v42 = vpop.eup %2769  ;;  %v1768_v31 = vsub.f32 1.5, %v1767_v45  ;;  %2687 = vmatmul.msk.bf16.vlgmr.msra.gmra.mxu2 %vm538_vm0, %v1942_v9  ;;  %v3838_v24 = vadd.f32 1e-06, %v2208_v61  ;;  %vm748_vm9 = vweird.f32 %v3764_v48  ;;  %v1704_v16 = vmul.f32 %v1662_v15, %v3320_v34  ;;  %vm3887_vm3 = vmor %vm1770_vm4, %vm1771_vm8 }
 0x178   : > { %v3832_v11 = vpop.eup %2771  ;;  %v743_v50 = vmul.f32 %v3827_v42, %v3764_v48  ;;  %v2252_v4 = vmul.f32 %v3754_v3, %v2251_v47  ;;  %v1235_v44 = vsub.f32 1.5, %v1234_v25  ;;  %v901_v28 = vmul.f32 %v3738_v8, %v882_v57 }
 0x179   : > { %v1242_v58 = vmul.f32 %v3832_v11, %v3766_v2  ;;  %1604 = vadd.xlane.f32.xlu1 %v1603_v33  ;;  %2775 = vrsqrt.f32 %v3838_v24  ;;  %v3852_v45 = vpop.eup %2773  ;;  %vm1238_vm10 = vweird.f32 %v3795_v54  ;;  %vm1247_vm11 = vweird.f32 %v3766_v2  ;;  %v2711_v2 = vld [vmem:[%s5200_s3 + $0x6] sm:$0x3] }
 0x17a   : > { %v744_v0 = vmul.f32 %v3827_v42, %v743_v50  ;;  %582 = vadd.xlane.f32.xlu0 %v3729_v22  ;;  %v2118_v15 = vmul.f32 %v2090_v59, %v3320_v34  ;;  %v1769_v22 = vmul.f32 %v3769_v49, %v1768_v31  ;;  %vm749_vm13 = vweird.f32 %v3827_v42  ;;  %vm3906_vm4 = vmor %vm1237_vm7, %vm1238_vm10 }
 0x17b   : > { %v1243_v52 = vmul.f32 %v3832_v11, %v1242_v58  ;;  %v753_v63 = vmul.f32 %v3852_v45, %v3790_v40  ;;  %v2256_v59 = vsel %vm3862_vm12, %v3754_v3, %v2252_v4  ;;  %vm1248_vm14 = vweird.f32 %v3832_v11  ;;  %vm3921_vm5 = vmor %vm748_vm9, %vm749_vm13 }
 0x17c   : > { %v745_v57 = vmul.f32 0.5, %v744_v0  ;;  %v2165_v47 = vpop.xlane.xlu1 %2164  ;;  %v1162_v9 = vpop.xlane.xlu2 %1161  ;;  %v3874_v62 = vadd.f32 1e-06, %v1704_v16  ;;  %v1236_v31 = vmul.f32 %v3795_v54, %v1235_v44  ;;  %vm758_vm15 = vweird.f32 %v3790_v40  ;;  %vm3939_vm6 = vmor %vm1247_vm11, %vm1248_vm14 }
 0x17d   : > { %v1244_v61 = vmul.f32 0.5, %v1243_v52  ;;  %v3876_v25 = vpop.xlane.xlu0 %1080  ;;  %v754_v58 = vmul.f32 %v3852_v45, %v753_v63  ;;  %vm2273_vm1 = vweird.f32 %v3838_v24  ;;  %v920_v0 = vadd.f32 %v3752_v38, %v901_v28 }
 0x17e   : > { %v746_v50 = vsub.f32 1.5, %v745_v57  ;;  %2777 = vrsqrt.f32 %v3874_v62  ;;  %v3893_v16 = vsub.f32 %v3414_v51, %v2118_v15  ;;  %v921_v44 = vadd.f32 %v3752_v38, %v902_v37 }
 0x17f   : > { %v1245_v4 = vsub.f32 1.5, %v1244_v61  ;;  %v3896_v52 = vpop.eup %2775  ;;  %v755_v33 = vmul.f32 0.5, %v754_v58  ;;  %v2207_v57 = vmul.f32 %v2165_v47, %v3320_v34  ;;  %v1202_v55 = vmul.f32 %v1162_v9, %v3320_v34 }
 0x180   : > { %v747_v28 = vmul.f32 %v3827_v42, %v746_v50  ;;  %v2398_v63 = vmul.f32 %v2256_v59, %v3356_v29  ;;  %v2268_v15 = vmul.f32 %v3896_v52, %v3838_v24  ;;  %v936_v61 = vpack.c.bf16 %v921_v44, %v920_v0 }
 0x181   : > { %v1246_v37 = vmul.f32 %v3832_v11, %v1245_v4  ;;  %2182 = vadd.xlane.f32.xlu1 %v3723_v13  ;;  %v1773_v29 = vsel %vm3887_vm3, %v3769_v49, %v1769_v22  ;;  %v756_v47 = vsub.f32 1.5, %v755_v33  ;;  %v3925_v9 = vadd.f32 1e-06, %v2207_v57 }
 0x182   : > { %v3927_v59 = vadd.f32 1e-06, %v1202_v55  ;;  %v1240_v13 = vsel %vm3906_vm4, %v3795_v54, %v1236_v31  ;;  %v751_v49 = vsel %vm3921_vm5, %v3827_v42, %v747_v28  ;;  %v2269_v22 = vmul.f32 %v3896_v52, %v2268_v15  ;;  %2637 = vmatmul.msk.bf16.vlgmr.msra.gmra.mxu0 %vm538_vm0, %v936_v61  ;;  %v2710_v31 = vld [vmem:[%s3133_s10 + $0x1f8] sm:$0xff] }
 0x183   : > { %v2150_v50 = vmul.f32 %v3893_v16, %v3893_v16  ;;  %v1250_v54 = vsel %vm3939_vm6, %v3832_v11, %v1246_v37  ;;  %v757_v42 = vmul.f32 %v3852_v45, %v756_v47  ;;  %vm759_vm7 = vweird.f32 %v3852_v45 }
 0x184   : > { %2779 = vrsqrt.f32 %v3925_v9  ;;  %v1159_v58 = vpop.xlane.xlu1 %1158  ;;  %v1668_v0 = vpop.xlane.xlu2 %1667  ;;  %v3960_v4 = vmul.f32 %v1773_v29, %v3373_v56  ;;  %v2270_v44 = vmul.f32 0.5, %v2269_v22  ;;  %v3965_v33 = vmul.f32 %v1240_v13, %v3361_v35  ;;  %vm3980_vm9 = vmor %vm758_vm15, %vm759_vm7  ;;  %v2709_v29 = vld [vmem:[%s3133_s10 + $0x1f0] sm:$0xff] }
 0x185   : > { %v3957_v3 = vpop.eup %2777  ;;  %2781 = vrsqrt.f32 %v3927_v59  ;;  %v2184_v11 = vsel %vm538_vm0, %v2150_v50, 0.0  ;;  %v1671_v28 = vpop.xlane.xlu0 %1670  ;;  %v3968_v57 = vmul.f32 %v751_v49, %v3384_v21  ;;  %vm2274_vm8 = vweird.f32 %v3896_v52 }
 0x186   : > { %v1755_v55 = vmul.f32 %v3957_v3, %v3874_v62  ;;  %2185 = vadd.xlane.f32.xlu2 %v2184_v11  ;;  %v3974_v56 = vmul.f32 %v1250_v54, %v3380_v10  ;;  %v2271_v21 = vsub.f32 1.5, %v2270_v44  ;;  %vm1760_vm10 = vweird.f32 %v3874_v62  ;;  %v2661_v10 = vld [vmem:[%s5200_s3 + $0x2] sm:$0x3]  ;;  %vm4003_vm12 = vmor %vm2273_vm1, %vm2274_vm8 }
 0x187   : > { %v2480_v51 = vsel %vm969_vm2, %v2711_v2, 0  ;;  %v2106_v37 = vsel %vm538_vm0, %v2710_v31, 0.0  ;;  %v761_v15 = vsel %vm3980_vm9, %v3852_v45, %v757_v42  ;;  %vm1761_vm11 = vweird.f32 %v3957_v3 }
 0x188   : > { %v1756_v40 = vmul.f32 %v3957_v3, %v1755_v55  ;;  %2489 = vmatpush.bf16.msra.mxu3 %v2480_v51  ;;  %2107 = vadd.xlane.f32.xlu0 %v2106_v37  ;;  %v2413_v61 = vmul.f32 %v3738_v8, %v3841_v17  ;;  %v2272_v26 = vmul.f32 %v3896_v52, %v2271_v21  ;;  %vm1267_vm13 = vweird.f32 %v3927_v59  ;;  %vm4055_vm15 = vmor %vm1760_vm10, %vm1761_vm11 }
 0x189   : > { %v2414_v45 = vmul.f32 %v3738_v8, %v2398_v63  ;;  %v1201_v13 = vmul.f32 %v1159_v58, %v3320_v34  ;;  %v1706_v17 = vmul.f32 %v1668_v0, %v3320_v34  ;;  %vm2263_vm14 = vweird.f32 %v3925_v9  ;;  %v537_v58 = vld [vmem:[%s3133_s10 + $0x78] sm:$0xff] }
 0x18a   : > { %v4011_v49 = vpop.eup %2779  ;;  %v1757_v48 = vmul.f32 0.5, %v1756_v40  ;;  %v1111_v24 = vmul.f32 %v3876_v25, %v3320_v34  ;;  %v1707_v22 = vmul.f32 %v1671_v28, %v3320_v34  ;;  %v1474_v50 = vsel %vm969_vm2, %v2661_v10, 0 }
 0x18b   : > { %v4018_v54 = vpop.eup %2781  ;;  %v2258_v63 = vmul.f32 %v4011_v49, %v3925_v9  ;;  %v2429_v42 = vadd.f32 %v3752_v38, %v2413_v61  ;;  %v2430_v2 = vadd.f32 %v3752_v38, %v2414_v45  ;;  %v2103_v31 = vsel %vm538_vm0, %v2709_v29, 0.0  ;;  %1483 = vmatpush.bf16.msra.mxu1 %v1474_v50 }
 0x18c   : > { %v885_v0 = vmul.f32 %v761_v15, %v3388_v18  ;;  %v2276_v25 = vsel %vm4003_vm12, %v3896_v52, %v2272_v26  ;;  %v1758_v44 = vsub.f32 1.5, %v1757_v48  ;;  %v1262_v11 = vmul.f32 %v4018_v54, %v3927_v59  ;;  %v1084_v28 = vpop.xlane.xlu1 %1083  ;;  %v1593_v55 = vpop.xlane.xlu2 %1592 }
 0x18d   : > { %v2259_v35 = vmul.f32 %v4011_v49, %v2258_v63  ;;  %v2445_v21 = vpack.c.bf16 %v2430_v2, %v2429_v42  ;;  %v4033_v51 = vadd.f32 1e-06, %v1201_v13  ;;  %v4035_v37 = vadd.f32 1e-06, %v1706_v17  ;;  %v656_v10 = vpop.xlane.xlu0 %655 }
 0x18e   : > { %v1759_v18 = vmul.f32 %v3957_v3, %v1758_v44  ;;  %v1263_v15 = vmul.f32 %v4018_v54, %v1262_v11  ;;  %2104 = vadd.xlane.f32.xlu2 %v2103_v31  ;;  %v4039_v52 = vadd.f32 1e-06, %v1707_v22  ;;  %v584_v40 = vsel %vm538_vm0, %v537_v58, 0.0  ;;  %v2659_v22 = vld [vmem:[%s3133_s10 + $0xf0] sm:$0xff] }
 0x18f   : > { %v2260_v61 = vmul.f32 0.5, %v2259_v35  ;;  %vm2264_vm2 = vweird.f32 %v4011_v49  ;;  %v4044_v29 = vsub.f32 %v3434_v6, %v1111_v24  ;;  %2712 = vmatmul.msk.bf16.vlgmr.msra.gmra.mxu3 %vm538_vm0, %v2445_v21  ;;  %2783 = vrsqrt.f32 %v4033_v51  ;;  %585 = vadd.xlane.f32.xlu1 %v584_v40 }
 0x190   : > { %v4049_v26 = vmul.f32 %v2276_v25, %v3402_v27  ;;  %v1264_v45 = vmul.f32 0.5, %v1263_v15  ;;  %vm1268_vm1 = vweird.f32 %v4018_v54  ;;  %2785 = vrsqrt.f32 %v4035_v37  ;;  %vm4078_vm3 = vmor %vm2263_vm14, %vm2264_vm2 }
 0x191   : > { %v1763_v6 = vsel %vm4055_vm15, %v3957_v3, %v1759_v18  ;;  %v2261_v13 = vsub.f32 1.5, %v2260_v61  ;;  %2787 = vrsqrt.f32 %v4039_v52  ;;  %v903_v27 = vmul.f32 %v3738_v8, %v3968_v57  ;;  %vm4092_vm4 = vmor %vm1267_vm13, %vm1268_vm1 }
 0x192   : > { %v1265_v62 = vsub.f32 1.5, %v1264_v45  ;;  %v904_v17 = vmul.f32 %v3738_v8, %v885_v0  ;;  %v1407_v48 = vmul.f32 %v3738_v8, %v3965_v33  ;;  %v1408_v24 = vmul.f32 %v3738_v8, %v3974_v56 }
 0x193   : > { %v2262_v50 = vmul.f32 %v4011_v49, %v2261_v13  ;;  %v922_v57 = vadd.f32 %v3752_v38, %v903_v27  ;;  %v1112_v63 = vmul.f32 %v1084_v28, %v3320_v34  ;;  %v1617_v33 = vmul.f32 %v1593_v55, %v3320_v34 }
 0x194   : > { %v4086_v42 = vmul.f32 %v4018_v54, %v1265_v62  ;;  %vm1780_vm5 = vweird.f32 %v4035_v37  ;;  %v923_v9 = vadd.f32 %v3752_v38, %v904_v17  ;;  %v1424_v2 = vadd.f32 %v3752_v38, %v1408_v24  ;;  %v1590_v31 = vpop.xlane.xlu1 %1589  ;;  %v2171_v58 = vpop.xlane.xlu2 %2170 }
 0x195   : > { %v4099_v0 = vpop.eup %2783  ;;  %v1896_v25 = vmul.f32 %v1763_v6, %v3399_v23  ;;  %v2266_v59 = vsel %vm4078_vm3, %v4011_v49, %v2262_v50  ;;  %vm1790_vm6 = vweird.f32 %v4039_v52  ;;  %v1097_v44 = vsel %vm538_vm0, %v2659_v22, 0.0  ;;  %v2174_v11 = vpop.xlane.xlu0 %2173 }
 0x196   : > { %v4107_v28 = vpop.eup %2785  ;;  %v1252_v55 = vmul.f32 %v4099_v0, %v4033_v51  ;;  %vm1257_vm7 = vweird.f32 %v4033_v51  ;;  %v1423_v35 = vadd.f32 %v3752_v38, %v1407_v48  ;;  %v4114_v23 = vsub.f32 %v3464_v12, %v1112_v63  ;;  %1098 = vadd.xlane.f32.xlu0 %v1097_v44 }
 0x197   : > { %v4117_v21 = vsub.f32 %v3467_v60, %v1617_v33  ;;  %v4119_v49 = vpop.eup %2787  ;;  %v4122_v18 = vmul.f32 %v2266_v59, %v3417_v14  ;;  %v1270_v15 = vsel %vm4092_vm4, %v4018_v54, %v4086_v42  ;;  %v1775_v40 = vmul.f32 %v4107_v28, %v4035_v37 }
 0x198   : > { %v937_v61 = vpack.c.bf16 %v923_v9, %v922_v57  ;;  %v1253_v12 = vmul.f32 %v4099_v0, %v1252_v55  ;;  %vm1258_vm8 = vweird.f32 %v4099_v0  ;;  %v1785_v60 = vmul.f32 %v4119_v49, %v4039_v52 }
 0x199   : > { %v1439_v47 = vpack.c.bf16 %v1424_v2, %v1423_v35  ;;  %v1776_v14 = vmul.f32 %v4107_v28, %v1775_v40  ;;  %v694_v45 = vmul.f32 %v656_v10, %v3320_v34  ;;  %v1143_v54 = vmul.f32 %v4044_v29, %v4044_v29  ;;  %vm4170_vm12 = vmor %vm1257_vm7, %vm1258_vm8  ;;  %v2882_v2 = vld [vmem:[%s3133_s10 + $0x58] sm:$0xff] }
 0x19a   : > { %2638 = vmatmul.msk.bf16.gmra.mxu0 %vm538_vm0, %v937_v61  ;;  %v1912_v6 = vmul.f32 %v3738_v8, %v1896_v25  ;;  %v1254_v13 = vmul.f32 0.5, %v1253_v12  ;;  %vm1781_vm9 = vweird.f32 %v4107_v28  ;;  %v1786_v27 = vmul.f32 %v4119_v49, %v1785_v60 }
 0x19b   : > { %2662 = vmatmul.msk.bf16.vlgmr.msra.gmra.mxu1 %vm538_vm0, %v1439_v47  ;;  %v1913_v62 = vmul.f32 %v3738_v8, %v3960_v4  ;;  %v1777_v17 = vmul.f32 0.5, %v1776_v14  ;;  %v4145_v48 = vadd.f32 1e-06, %v694_v45  ;;  %v1175_v10 = vsel %vm538_vm0, %v1143_v54, 0.0  ;;  %vm4159_vm11 = vmor %vm1780_vm5, %vm1781_vm9 }
 0x19c   : > { %v1928_v24 = vadd.f32 %v3752_v38, %v1912_v6  ;;  %v1255_v22 = vsub.f32 1.5, %v1254_v13  ;;  %v1787_v50 = vmul.f32 0.5, %v1786_v27  ;;  %vm1791_vm10 = vweird.f32 %v4119_v49  ;;  %1176 = vadd.xlane.f32.xlu1 %v1175_v10  ;;  %v659_v57 = vpop.xlane.xlu1 %658  ;;  %v574_v63 = vpop.xlane.xlu2 %573 }
 0x19d   : > { %v1929_v3 = vadd.f32 %v3752_v38, %v1913_v62  ;;  %v1778_v33 = vsub.f32 1.5, %v1777_v17  ;;  %2789 = vrsqrt.f32 %v4145_v48  ;;  %v1616_v4 = vmul.f32 %v1590_v31, %v3320_v34  ;;  %v2093_v56 = vpop.xlane.xlu0 %2092  ;;  %v2660_v31 = vld [vmem:[%s3133_s10 + $0xf8] sm:$0xff]  ;;  %vm4189_vm13 = vmor %vm1790_vm6, %vm1791_vm10 }
 0x19e   : > { %v2209_v42 = vmul.f32 %v2171_v58, %v3320_v34  ;;  %v1256_v9 = vmul.f32 %v4099_v0, %v1255_v22  ;;  %v1788_v25 = vsub.f32 1.5, %v1787_v50  ;;  %v1649_v44 = vmul.f32 %v4117_v21, %v4117_v21 }
 0x19f   : > { %v1943_v59 = vpack.c.bf16 %v1929_v3, %v1928_v24  ;;  %v1779_v37 = vmul.f32 %v4107_v28, %v1778_v33  ;;  %v1144_v35 = vmul.f32 %v4114_v23, %v4114_v23  ;;  %v2210_v40 = vmul.f32 %v2174_v11, %v3320_v34 }
 0x1a0   : > { %v4175_v55 = vadd.f32 1e-06, %v2209_v42  ;;  %v1394_v61 = vmul.f32 %v1270_v15, %v3422_v53  ;;  %v1260_v12 = vsel %vm4170_vm12, %v4099_v0, %v1256_v9  ;;  %v1789_v51 = vmul.f32 %v4119_v49, %v1788_v25  ;;  %v2881_v15 = vld [vmem:[%s3133_s10 + $0x150] sm:$0xff] }
 0x1a1   : > { %2688 = vmatmul.msk.bf16.gmra.mxu2 %vm538_vm0, %v1943_v59  ;;  %v1687_v11 = vsel %vm538_vm0, %v1649_v44, 0.0  ;;  %v1783_v53 = vsel %vm4159_vm11, %v4107_v28, %v1779_v37  ;;  %v4199_v0 = vsub.f32 %v2881_v15, %v1616_v4  ;;  %v1100_v52 = vsel %vm538_vm0, %v2660_v31, 0.0  ;;  %v2883_v15 = vld [vmem:[%s3133_s10 + $0x1d0] sm:$0xff] }
 0x1a2   : > { %2791 = vrsqrt.f32 %v4175_v55  ;;  %1688 = vadd.xlane.f32.xlu0 %v1687_v11  ;;  %v1393_v47 = vmul.f32 %v1260_v12, %v3437_v7  ;;  %vm768_vm14 = vweird.f32 %v4145_v48  ;;  %v1178_v14 = vsel %vm538_vm0, %v1144_v35, 0.0 }
 0x1a3   : > { %v4206_v45 = vadd.f32 1e-06, %v2210_v40  ;;  %v4208_v54 = vpop.eup %2789  ;;  %v1793_v28 = vsel %vm4189_vm13, %v4119_v49, %v1789_v51  ;;  %1179 = vadd.xlane.f32.xlu2 %v1178_v14  ;;  %v2415_v6 = vmul.f32 %v3738_v8, %v4122_v18  ;;  %v2416_v13 = vmul.f32 %v3738_v8, %v4049_v26 }
 0x1a4   : > { %v695_v7 = vmul.f32 %v659_v57, %v3320_v34  ;;  %v1898_v27 = vmul.f32 %v1783_v53, %v3440_v19  ;;  %v763_v62 = vmul.f32 %v4208_v54, %v4145_v48  ;;  %vm2283_vm2 = vweird.f32 %v4175_v55  ;;  %1101 = vadd.xlane.f32.xlu1 %v1100_v52  ;;  %v571_v49 = vpop.xlane.xlu1 %570  ;;  %v1165_v17 = vpop.xlane.xlu2 %1164 }
 0x1a5   : > { %2793 = vrsqrt.f32 %v4206_v45  ;;  %v2431_v10 = vadd.f32 %v3752_v38, %v2415_v6  ;;  %v2432_v18 = vadd.f32 %v3752_v38, %v2416_v13  ;;  %v605_v26 = vmul.f32 %v3320_v34, %v574_v63  ;;  %v4228_v19 = vpop.xlane.xlu0 %1167 }
 0x1a6   : > { %v4225_v24 = vadd.f32 1e-06, %v695_v7  ;;  %v1899_v22 = vmul.f32 %v1793_v28, %v3445_v1  ;;  %v764_v50 = vmul.f32 %v4208_v54, %v763_v62  ;;  %v1648_v3 = vmul.f32 %v4199_v0, %v4199_v0 }
 0x1a7   : > { %v1409_v57 = vmul.f32 %v3738_v8, %v1393_v47  ;;  %vm769_vm15 = vweird.f32 %v4208_v54  ;;  %vm2293_vm1 = vweird.f32 %v4206_v45  ;;  %v2446_v4 = vpack.c.bf16 %v2432_v18, %v2431_v10  ;;  %v2884_v18 = vld [vmem:[%s3133_s10 + $0x50] sm:$0xff] }
 0x1a8   : > { %v4235_v33 = vpop.eup %2791  ;;  %2795 = vrsqrt.f32 %v4225_v24  ;;  %v765_v63 = vmul.f32 0.5, %v764_v50  ;;  %v1684_v42 = vsel %vm538_vm0, %v1648_v3, 0.0  ;;  %v2119_v9 = vmul.f32 %v2093_v56, %v3320_v34  ;;  %vm4266_vm4 = vmor %vm768_vm14, %vm769_vm15 }
 0x1a9   : > { %v2278_v1 = vmul.f32 %v4235_v33, %v4175_v55  ;;  %2713 = vmatmul.msk.bf16.gmra.mxu3 %vm538_vm0, %v2446_v4  ;;  %v4246_v25 = vsub.f32 %v2882_v2, %v605_v26  ;;  %v1410_v59 = vmul.f32 %v3738_v8, %v1394_v61  ;;  %v1425_v44 = vadd.f32 %v3752_v38, %v1409_v57 }
 0x1aa   : > { %v1914_v31 = vmul.f32 %v3738_v8, %v1898_v27  ;;  %v766_v37 = vsub.f32 1.5, %v765_v63  ;;  %v1915_v40 = vmul.f32 %v3738_v8, %v1899_v22  ;;  %v604_v56 = vmul.f32 %v3320_v34, %v571_v49 }
 0x1ab   : > { %v4251_v58 = vpop.eup %2793  ;;  %v2279_v35 = vmul.f32 %v4235_v33, %v2278_v1  ;;  %vm2284_vm3 = vweird.f32 %v4235_v33  ;;  %1685 = vadd.xlane.f32.xlu2 %v1684_v42  ;;  %v1426_v61 = vadd.f32 %v3752_v38, %v1410_v59  ;;  %v4271_v52 = vsub.f32 %v2883_v15, %v2119_v9 }
 0x1ac   : > { %v2288_v12 = vmul.f32 %v4251_v58, %v4206_v45  ;;  %v1930_v51 = vadd.f32 %v3752_v38, %v1914_v31  ;;  %v767_v60 = vmul.f32 %v4208_v54, %v766_v37  ;;  %v1931_v47 = vadd.f32 %v3752_v38, %v1915_v40  ;;  %v2096_v14 = vpop.xlane.xlu1 %2095  ;;  %v1090_v28 = vpop.xlane.xlu2 %1089  ;;  %vm4293_vm6 = vmor %vm2283_vm2, %vm2284_vm3  ;;  %v2885_v40 = vld [vmem:[%s3133_s10 + $0x1d8] sm:$0xff] }
 0x1ad   : > { %v2280_v53 = vmul.f32 0.5, %v2279_v35  ;;  %v1440_v7 = vpack.c.bf16 %v1426_v61, %v1425_v44  ;;  %v1203_v48 = vmul.f32 %v1165_v17, %v3320_v34  ;;  %v637_v27 = vmul.f32 %v4246_v25, %v4246_v25  ;;  %v1674_v62 = vpop.xlane.xlu0 %1673 }
 0x1ae   : > { %v4274_v6 = vpop.eup %2795  ;;  %v2289_v13 = vmul.f32 %v4251_v58, %v2288_v12  ;;  %vm2294_vm5 = vweird.f32 %v4251_v58  ;;  %v4284_v26 = vsub.f32 %v2884_v18, %v604_v56  ;;  %v771_v22 = vsel %vm4266_vm4, %v4208_v54, %v767_v60 }
 0x1af   : > { %v2281_v49 = vsub.f32 1.5, %v2280_v53  ;;  %v773_v10 = vmul.f32 %v4274_v6, %v4225_v24  ;;  %2663 = vmatmul.msk.bf16.gmra.mxu1 %vm538_vm0, %v1440_v7  ;;  %v1944_v3 = vpack.c.bf16 %v1931_v47, %v1930_v51  ;;  %v4298_v57 = vadd.f32 1e-06, %v1203_v48  ;;  %vm4317_vm8 = vmor %vm2293_vm1, %vm2294_vm5 }
 0x1b0   : > { %v2290_v50 = vmul.f32 0.5, %v2289_v13  ;;  %v675_v54 = vsel %vm538_vm0, %v637_v27, 0.0  ;;  %v2151_v1 = vmul.f32 %v4271_v52, %v4271_v52  ;;  %vm779_vm7 = vweird.f32 %v4274_v6 }
 0x1b1   : > { %v2282_v4 = vmul.f32 %v4235_v33, %v2281_v49  ;;  %v774_v63 = vmul.f32 %v4274_v6, %v773_v10  ;;  %2689 = vmatmul.msk.bf16.gmra.mxu2 %vm538_vm0, %v1944_v3  ;;  %2797 = vrsqrt.f32 %v4298_v57  ;;  %v1204_v42 = vmul.f32 %v4228_v19, %v3320_v34 }
 0x1b2   : > { %v2291_v55 = vsub.f32 1.5, %v2290_v50  ;;  %v2187_v44 = vsel %vm538_vm0, %v2151_v1, 0.0  ;;  %v2120_v31 = vmul.f32 %v2096_v14, %v3320_v34  ;;  %v1114_v35 = vmul.f32 %v1090_v28, %v3320_v34  ;;  %v2888_v50 = vld [vmem:[%s3133_s10 + $0x160] sm:$0xff] }
 0x1b3   : > { %v2286_v9 = vsel %vm4293_vm6, %v4235_v33, %v2282_v4  ;;  %v775_v59 = vmul.f32 0.5, %v774_v63  ;;  %676 = vadd.xlane.f32.xlu2 %v675_v54  ;;  %2188 = vadd.xlane.f32.xlu0 %v2187_v44  ;;  %v4325_v33 = vadd.f32 1e-06, %v1204_v42  ;;  %v636_v12 = vmul.f32 %v4284_v26, %v4284_v26 }
 0x1b4   : > { %v2401_v37 = vmul.f32 %v2286_v9, %v3473_v36  ;;  %v2292_v19 = vmul.f32 %v4251_v58, %v2291_v55  ;;  %v4329_v56 = vsub.f32 %v2885_v40, %v2120_v31  ;;  %v1708_v61 = vmul.f32 %v1674_v62, %v3320_v34  ;;  %v1087_v51 = vpop.xlane.xlu1 %1086  ;;  %v1596_v36 = vpop.xlane.xlu2 %1595 }
 0x1b5   : > { %v776_v45 = vsub.f32 1.5, %v775_v59  ;;  %v886_v60 = vmul.f32 %v771_v22, %v3460_v20  ;;  %vm778_vm9 = vweird.f32 %v4225_v24  ;;  %2799 = vrsqrt.f32 %v4325_v33  ;;  %v1599_v53 = vpop.xlane.xlu0 %1598 }
 0x1b6   : > { %v2296_v11 = vsel %vm4317_vm8, %v4251_v58, %v2292_v19  ;;  %vm1277_vm10 = vweird.f32 %v4298_v57  ;;  %v672_v14 = vsel %vm538_vm0, %v636_v12, 0.0  ;;  %v4344_v28 = vadd.f32 1e-06, %v1708_v61  ;;  %vm780_vm11 = vmor %vm778_vm9, %vm779_vm7  ;;  %v2886_v58 = vld [vmem:[%s3133_s10 + $0xd8] sm:$0xff]  ;;  %v2889_v19 = vld [vmem:[%s3133_s10 + $0x168] sm:$0xff] }
 0x1b7   : > { %v2402_v15 = vmul.f32 %v2296_v11, %v3481_v30  ;;  %v777_v47 = vmul.f32 %v4274_v6, %v776_v45  ;;  %v4346_v20 = vpop.eup %2797  ;;  %v4351_v24 = vsub.f32 %v2886_v58, %v1114_v35  ;;  %673 = vadd.xlane.f32.xlu1 %v672_v14  ;;  %v2417_v30 = vmul.f32 %v3738_v8, %v2401_v37 }
 0x1b8   : > { %v1113_v13 = vmul.f32 %v1087_v51, %v3320_v34  ;;  %v1618_v7 = vmul.f32 %v1596_v36, %v3320_v34  ;;  %v1272_v27 = vmul.f32 %v4346_v20, %v4298_v57  ;;  %2801 = vrsqrt.f32 %v4344_v28 }
 0x1b9   : > { %v781_v48 = vsel %vm780_vm11, %v4274_v6, %v777_v47  ;;  %v2152_v62 = vmul.f32 %v4329_v56, %v4329_v56  ;;  %vm1287_vm12 = vweird.f32 %v4325_v33  ;;  %v2418_v10 = vmul.f32 %v3738_v8, %v2402_v15  ;;  %v2887_v6 = vld [vmem:[%s3133_s10 + $0xd0] sm:$0xff] }
 0x1ba   : > { %v887_v49 = vmul.f32 %v781_v48, %v3490_v32  ;;  %v2433_v18 = vadd.f32 %v3752_v38, %v2417_v30  ;;  %v1273_v22 = vmul.f32 %v4346_v20, %v1272_v27  ;;  %vm1278_vm13 = vweird.f32 %v4346_v20 }
 0x1bb   : > { %v4369_v17 = vsub.f32 %v2887_v6, %v1113_v13  ;;  %v4372_v3 = vsub.f32 %v2888_v50, %v1618_v7  ;;  %v4374_v4 = vpop.eup %2799  ;;  %v2434_v32 = vadd.f32 %v3752_v38, %v2418_v10  ;;  %v1146_v63 = vmul.f32 %v4351_v24, %v4351_v24  ;;  %vm1279_vm2 = vmor %vm1277_vm10, %vm1278_vm13 }
 0x1bc   : > { %v1619_v54 = vmul.f32 %v1599_v53, %v3320_v34  ;;  %v905_v1 = vmul.f32 %v3738_v8, %v886_v60  ;;  %v1274_v55 = vmul.f32 0.5, %v1273_v22  ;;  %v1282_v42 = vmul.f32 %v4374_v4, %v4325_v33  ;;  %v1677_v59 = vpop.xlane.xlu1 %1676  ;;  %v665_v44 = vpop.xlane.xlu2 %664 }
 0x1bd   : > { %v2190_v9 = vsel %vm538_vm0, %v2152_v62, 0.0  ;;  %v906_v2 = vmul.f32 %v3738_v8, %v887_v49  ;;  %v2447_v31 = vpack.c.bf16 %v2434_v32, %v2433_v18  ;;  %v1184_v37 = vsel %vm538_vm0, %v1146_v63, 0.0  ;;  %v2177_v40 = vpop.xlane.xlu0 %2176 }
 0x1be   : > { %v4387_v35 = vsub.f32 %v2889_v19, %v1619_v54  ;;  %v924_v45 = vadd.f32 %v3752_v38, %v905_v1  ;;  %v4390_v12 = vpop.eup %2801  ;;  %v1275_v61 = vsub.f32 1.5, %v1274_v55  ;;  %v1283_v51 = vmul.f32 %v4374_v4, %v1282_v42  ;;  %1185 = vadd.xlane.f32.xlu0 %v1184_v37 }
 0x1bf   : > { %v925_v36 = vadd.f32 %v3752_v38, %v906_v2  ;;  %v1709_v60 = vmul.f32 %v1677_v59, %v3320_v34  ;;  %vm1288_vm14 = vweird.f32 %v4374_v4  ;;  %v1795_v11 = vmul.f32 %v4390_v12, %v4344_v28  ;;  %2714 = vmatmul.msk.bf16.gmra.mxu3 %vm538_vm0, %v2447_v31  ;;  %2191 = vadd.xlane.f32.xlu1 %v2190_v9 }
 0x1c0   : > { %v697_v53 = vmul.f32 %v665_v44, %v3320_v34  ;;  %v1145_v15 = vmul.f32 %v4369_v17, %v4369_v17  ;;  %v1276_v47 = vmul.f32 %v4346_v20, %v1275_v61  ;;  %v1284_v14 = vmul.f32 0.5, %v1283_v51  ;;  %vm4423_vm15 = vmor %vm1287_vm12, %vm1288_vm14 }
 0x1c1   : > { %v938_v58 = vpack.c.bf16 %v925_v36, %v924_v45  ;;  %v4403_v30 = vadd.f32 1e-06, %v1709_v60  ;;  %v1796_v13 = vmul.f32 %v4390_v12, %v1795_v11  ;;  %v1650_v27 = vmul.f32 %v4372_v3, %v4372_v3  ;;  %v2890_v45 = vld [vmem:[%s3133_s10 + $0x60] sm:$0xff] }
 0x1c2   : > { %v4410_v7 = vadd.f32 1e-06, %v697_v53  ;;  %v1181_v48 = vsel %vm538_vm0, %v1145_v15, 0.0  ;;  %v1280_v62 = vsel %vm1279_vm2, %v4346_v20, %v1276_v47  ;;  %v1285_v49 = vsub.f32 1.5, %v1284_v14 }
 0x1c3   : > { %2639 = vmatmul.msk.bf16.gmra.mxu0 %vm538_vm0, %v938_v58  ;;  %2803 = vrsqrt.f32 %v4403_v30  ;;  %1182 = vadd.xlane.f32.xlu2 %v1181_v48  ;;  %v1395_v57 = vmul.f32 %v1280_v62, %v3502_v5  ;;  %v1797_v18 = vmul.f32 0.5, %v1796_v13  ;;  %vm1800_vm1 = vweird.f32 %v4344_v28 }
 0x1c4   : > { %2805 = vrsqrt.f32 %v4410_v7  ;;  %v1286_v20 = vmul.f32 %v4374_v4, %v1285_v49  ;;  %v1690_v22 = vsel %vm538_vm0, %v1650_v27, 0.0  ;;  %v2211_v6 = vmul.f32 %v2177_v40, %v3320_v34  ;;  %v662_v5 = vpop.xlane.xlu1 %661  ;;  %v577_v50 = vpop.xlane.xlu2 %576  ;;  %v2891_v40 = vld [vmem:[%s3133_s10 + $0x68] sm:$0xff] }
 0x1c5   : > { %v1651_v33 = vmul.f32 %v4387_v35, %v4387_v35  ;;  %v1798_v32 = vsub.f32 1.5, %v1797_v18  ;;  %v1411_v63 = vmul.f32 %v3738_v8, %v1395_v57  ;;  %v696_v54 = vmul.f32 %v662_v5, %v3320_v34  ;;  %v580_v55 = vpop.xlane.xlu0 %579 }
 0x1c6   : > { %v606_v1 = vmul.f32 %v3320_v34, %v577_v50  ;;  %v1290_v42 = vsel %vm4423_vm15, %v4374_v4, %v1286_v20  ;;  %vm1801_vm3 = vweird.f32 %v4390_v12  ;;  %v4441_v9 = vadd.f32 1e-06, %v2211_v6 }
 0x1c7   : > { %v607_v2 = vmul.f32 %v3320_v34, %v580_v55  ;;  %v1396_v59 = vmul.f32 %v1290_v42, %v3507_v41  ;;  %1691 = vadd.xlane.f32.xlu1 %v1690_v22  ;;  %v4445_v44 = vadd.f32 1e-06, %v696_v54  ;;  %v1693_v31 = vsel %vm538_vm0, %v1651_v33, 0.0  ;;  %vm4460_vm4 = vmor %vm1800_vm1, %vm1801_vm3  ;;  %v2892_v54 = vld [vmem:[%s3133_s10 + $0x1e8] sm:$0xff] }
 0x1c8   : > { %v1799_v19 = vmul.f32 %v4390_v12, %v1798_v32  ;;  %2807 = vrsqrt.f32 %v4441_v9  ;;  %v4451_v4 = vsub.f32 %v2890_v45, %v606_v1  ;;  %v1427_v11 = vadd.f32 %v3752_v38, %v1411_v63 }
 0x1c9   : > { %v2804_v37 = vpop.eup %2803  ;;  %v4454_v61 = vsub.f32 %v2891_v40, %v607_v2  ;;  %v1412_v60 = vmul.f32 %v3738_v8, %v1396_v59  ;;  %2809 = vrsqrt.f32 %v4445_v44  ;;  %vm1810_vm7 = vweird.f32 %v4403_v30 }
 0x1ca   : > { %v2806_v51 = vpop.eup %2805  ;;  %v1805_v36 = vmul.f32 %v2804_v37, %v4403_v30  ;;  %v638_v28 = vmul.f32 %v4451_v4, %v4451_v4  ;;  %v1803_v14 = vsel %vm4460_vm4, %v4390_v12, %v1799_v19  ;;  %vm1811_vm5 = vweird.f32 %v2804_v37 }
 0x1cb   : > { %v793_v53 = vmul.f32 %v2806_v51, %v4410_v7  ;;  %1694 = vadd.xlane.f32.xlu2 %v1693_v31  ;;  %v1428_v47 = vadd.f32 %v3752_v38, %v1412_v60  ;;  %v639_v48 = vmul.f32 %v4454_v61, %v4454_v61  ;;  %v1900_v6 = vmul.f32 %v1803_v14, %v3521_v39  ;;  %vm1812_vm8 = vmor %vm1810_vm7, %vm1811_vm5 }
 0x1cc   : > { %v1806_v15 = vmul.f32 %v2804_v37, %v1805_v36  ;;  %v2180_v8 = vpop.xlane.xlu1 %2179  ;;  %v2102_v13 = vpop.xlane.xlu2 %2101  ;;  %v678_v12 = vsel %vm538_vm0, %v638_v28, 0.0  ;;  %vm799_vm6 = vweird.f32 %v2806_v51  ;;  %vm798_vm9 = vweird.f32 %v4410_v7  ;;  %v4512_v7 = vld [vmem:[%s5198_s1] ss:$0 sm:$0xff] }
 0x1cd   : > { %v794_v58 = vmul.f32 %v2806_v51, %v793_v53  ;;  %v1441_v62 = vpack.c.bf16 %v1428_v47, %v1427_v11  ;;  %v2212_v49 = vmul.f32 %v2180_v8, %v3320_v34  ;;  %v2122_v38 = vmul.f32 %v2102_v13, %v3320_v34  ;;  %v1171_v57 = vpop.xlane.xlu0 %1170  ;;  %679 = vadd.xlane.f32.xlu0 %v678_v12  ;;  %vm800_vm10 = vmor %vm798_vm9, %vm799_vm6 }
 0x1ce   : > { %v1807_v27 = vmul.f32 0.5, %v1806_v15  ;;  %v4479_v10 = vpop.eup %2807  ;;  %v681_v20 = vsel %vm538_vm0, %v639_v48, 0.0  ;;  %v1205_v22 = vmul.f32 %v1171_v57, %v3320_v34  ;;  %vm2303_vm13 = vweird.f32 %v4441_v9 }
 0x1cf   : > { %v795_v18 = vmul.f32 0.5, %v794_v58  ;;  %v2298_v50 = vmul.f32 %v4479_v10, %v4441_v9  ;;  %2664 = vmatmul.msk.bf16.gmra.mxu1 %vm538_vm0, %v1441_v62  ;;  %v4488_v33 = vadd.f32 1e-06, %v2212_v49  ;;  %v4490_v32 = vpop.eup %2809  ;;  %v4493_v1 = vsub.f32 %v2892_v54, %v2122_v38  ;;  %682 = vadd.xlane.f32.xlu1 %v681_v20  ;;  %v2895_v62 = vld [vmem:[%s3133_s10 + $0xe0] sm:$0xff] }
 0x1d0   : > { %v1808_v5 = vsub.f32 1.5, %v1807_v27  ;;  %v4495_v55 = vadd.f32 1e-06, %v1205_v22  ;;  %v783_v2 = vmul.f32 %v4490_v32, %v4445_v44  ;;  %vm2304_vm11 = vweird.f32 %v4479_v10  ;;  %v4533_v38 = vld [vmem:[%s5199_s2] ss:$0 sm:$0xff] }
 0x1d1   : > { %v796_v63 = vsub.f32 1.5, %v795_v18  ;;  %v2299_v42 = vmul.f32 %v4479_v10, %v2298_v50  ;;  %2811 = vrsqrt.f32 %v4488_v33  ;;  %v2154_v60 = vmul.f32 %v4493_v1, %v4493_v1  ;;  %vm4553_vm15 = vmor %vm2303_vm13, %vm2304_vm11 }
 0x1d2   : > { %v1809_v39 = vmul.f32 %v2804_v37, %v1808_v5  ;;  %v784_v45 = vmul.f32 %v4490_v32, %v783_v2  ;;  %2813 = vrsqrt.f32 %v4495_v55  ;;  %vm789_vm12 = vweird.f32 %v4490_v32  ;;  %v2897_v5 = vld [vmem:[%s3133_s10 + $0xe8] sm:$0xff] }
 0x1d3   : > { %v797_v59 = vmul.f32 %v2806_v51, %v796_v63  ;;  %v2300_v19 = vmul.f32 0.5, %v2299_v42  ;;  %v2196_v28 = vsel %vm538_vm0, %v2154_v60, 0.0  ;;  %vm788_vm14 = vweird.f32 %v4445_v44 }
 0x1d4   : > { %v1813_v31 = vsel %vm1812_vm8, %v2804_v37, %v1809_v39  ;;  %v2099_v41 = vpop.xlane.xlu1 %2098  ;;  %v1093_v36 = vpop.xlane.xlu2 %1092  ;;  %v1916_v37 = vmul.f32 %v4512_v7, %v1900_v6  ;;  %v785_v15 = vmul.f32 0.5, %v784_v45  ;;  %vm790_vm2 = vmor %vm788_vm14, %vm789_vm12  ;;  %vm2313_vm3 = vweird.f32 %v4488_v33 }
 0x1d5   : > { %v1901_v30 = vmul.f32 %v1813_v31, %v3546_v46  ;;  %v801_v40 = vsel %vm800_vm10, %v2806_v51, %v797_v59  ;;  %v2301_v53 = vsub.f32 1.5, %v2300_v19  ;;  %v2121_v46 = vmul.f32 %v2099_v41, %v3320_v34  ;;  %v1096_v51 = vpop.xlane.xlu0 %1095  ;;  %2197 = vadd.xlane.f32.xlu0 %v2196_v28  ;;  %v5269_v31 = vld [vmem:[#allocation4_spill] sm:$0xff] }
 0x1d6   : > { %v889_v11 = vmul.f32 %v801_v40, %v3540_v43  ;;  %v1115_v47 = vmul.f32 %v1093_v36, %v3320_v34  ;;  %v1116_v14 = vmul.f32 %v1096_v51, %v3320_v34  ;;  %v786_v8 = vsub.f32 1.5, %v785_v15  ;;  %v2894_v43 = vld [vmem:[%s3133_s10 + $0x1e0] sm:$0xff] }
 0x1d7   : > { %v1917_v58 = vmul.f32 %v4512_v7, %v1901_v30  ;;  %v4524_v13 = vsub.f32 %v2894_v43, %v2121_v46  ;;  %v2812_v48 = vpop.eup %2811  ;;  %v2302_v27 = vmul.f32 %v4479_v10, %v2301_v53  ;;  %v1932_v57 = vadd.f32 %v4533_v38, %v1916_v37 }
 0x1d8   : > { %v4528_v49 = vsub.f32 %v2895_v62, %v1115_v47  ;;  %v4537_v12 = vpop.eup %2813  ;;  %v787_v20 = vmul.f32 %v4490_v32, %v786_v8  ;;  %v2308_v22 = vmul.f32 %v2812_v48, %v4488_v33  ;;  %v4548_v50 = vsub.f32 %v2897_v5, %v1116_v14  ;;  %v2898_v14 = vld [vmem:[%s3133_s10 + $0x170] sm:$0xff] }
 0x1d9   : > { %v1933_v18 = vadd.f32 %v4533_v38, %v1917_v58  ;;  %v1292_v6 = vmul.f32 %v4537_v12, %v4495_v55  ;;  %v908_v54 = vmul.f32 %v4512_v7, %v889_v11  ;;  %v2153_v42 = vmul.f32 %v4524_v13, %v4524_v13 }
 0x1da   : > { %v791_v44 = vsel %vm790_vm2, %v4490_v32, %v787_v20  ;;  %v2309_v39 = vmul.f32 %v2812_v48, %v2308_v22  ;;  %v1147_v2 = vmul.f32 %v4528_v49, %v4528_v49  ;;  %v2306_v59 = vsel %vm4553_vm15, %v4479_v10, %v2302_v27  ;;  %v5270_v27 = vld [vmem:[#allocation3_spill] sm:$0xff] }
 0x1db   : > { %v1945_v63 = vpack.c.bf16 %v1933_v18, %v1932_v57  ;;  %v888_v19 = vmul.f32 %v791_v44, %v5269_v31  ;;  %vm2314_vm1 = vweird.f32 %v2812_v48  ;;  %v1293_v45 = vmul.f32 %v4537_v12, %v1292_v6 }
 0x1dc   : > { %v1683_v30 = vpop.xlane.xlu2 %1682  ;;  %v1174_v32 = vpop.xlane.xlu1 %1173  ;;  %v2310_v40 = vmul.f32 0.5, %v2309_v39  ;;  %v2193_v60 = vsel %vm538_vm0, %v2153_v42, 0.0  ;;  %v1187_v10 = vsel %vm538_vm0, %v1147_v2, 0.0  ;;  %v1148_v28 = vmul.f32 %v4548_v50, %v4548_v50  ;;  %vm2315_vm4 = vmor %vm2313_vm3, %vm2314_vm1 }
 0x1dd   : > { %2690 = vmatmul.msk.bf16.gmra.mxu2 %vm538_vm0, %v1945_v63  ;;  %v1711_v41 = vmul.f32 %v1683_v30, %v3320_v34  ;;  %v1206_v36 = vmul.f32 %v1174_v32, %v3320_v34  ;;  %v1602_v37 = vpop.xlane.xlu0 %1601  ;;  %v1294_v11 = vmul.f32 0.5, %v1293_v45  ;;  %2194 = vadd.xlane.f32.xlu2 %v2193_v60  ;;  %v907_v15 = vmul.f32 %v4512_v7, %v888_v19  ;;  %v5271_v63 = vld [vmem:[#allocation5_spill] sm:$0xff] }
 0x1de   : > { %v1620_v53 = vmul.f32 %v1602_v37, %v3320_v34  ;;  %v2311_v46 = vsub.f32 1.5, %v2310_v40  ;;  %1188 = vadd.xlane.f32.xlu1 %v1187_v10  ;;  %v927_v43 = vadd.f32 %v4533_v38, %v908_v54  ;;  %v2403_v62 = vmul.f32 %v2306_v59, %v5270_v27 }
 0x1df   : > { %v4574_v51 = vadd.f32 1e-06, %v1711_v41  ;;  %v4576_v47 = vadd.f32 1e-06, %v1206_v36  ;;  %v926_v8 = vadd.f32 %v4533_v38, %v907_v15  ;;  %v1295_v18 = vsub.f32 1.5, %v1294_v11 }
 0x1e0   : > { %v4581_v58 = vsub.f32 %v2898_v14, %v1620_v53  ;;  %v2312_v57 = vmul.f32 %v2812_v48, %v2311_v46  ;;  %v1190_v5 = vsel %vm538_vm0, %v1148_v28, 0.0  ;;  %vm1297_vm5 = vweird.f32 %v4495_v55  ;;  %v5272_v14 = vld [vmem:[#allocation6_spill] sm:$0xff] }
 0x1e1   : > { %2815 = vrsqrt.f32 %v4574_v51  ;;  %v939_v20 = vpack.c.bf16 %v927_v43, %v926_v8  ;;  %v1296_v59 = vmul.f32 %v4537_v12, %v1295_v18  ;;  %vm1298_vm6 = vweird.f32 %v4537_v12 }
 0x1e2   : > { %2817 = vrsqrt.f32 %v4576_v47  ;;  %v1652_v22 = vmul.f32 %v4581_v58, %v4581_v58  ;;  %v2316_v6 = vsel %vm2315_vm4, %v2812_v48, %v2312_v57  ;;  %v2419_v48 = vmul.f32 %v4512_v7, %v2403_v62  ;;  %vm1299_vm7 = vmor %vm1297_vm5, %vm1298_vm6 }
 0x1e3   : > { %v2404_v54 = vmul.f32 %v2316_v6, %v5271_v63  ;;  %2640 = vmatmul.msk.bf16.gmra.mxu0 %vm538_vm0, %v939_v20  ;;  %v1300_v10 = vsel %vm1299_vm7, %v4537_v12, %v1296_v59  ;;  %vm1830_vm9 = vweird.f32 %v4574_v51  ;;  %vm1307_vm11 = vweird.f32 %v4576_v47 }
 0x1e4   : > { %v1680_v9 = vpop.xlane.xlu1 %1679  ;;  %v668_v33 = vpop.xlane.xlu2 %667  ;;  %v1696_v44 = vsel %vm538_vm0, %v1652_v22, 0.0  ;;  %v2435_v11 = vadd.f32 %v4533_v38, %v2419_v48  ;;  %v1397_v8 = vmul.f32 %v1300_v10, %v5272_v14  ;;  %v2899_v22 = vld [vmem:[%s3133_s10 + $0x178] sm:$0xff] }
 0x1e5   : > { %v1710_v39 = vmul.f32 %v1680_v9, %v3320_v34  ;;  %v698_v42 = vmul.f32 %v668_v33, %v3320_v34  ;;  %1697 = vadd.xlane.f32.xlu0 %v1696_v44  ;;  %v671_v2 = vpop.xlane.xlu0 %670  ;;  %1191 = vadd.xlane.f32.xlu2 %v1190_v5  ;;  %v2420_v19 = vmul.f32 %v4512_v7, %v2404_v54  ;;  %v2900_v9 = vld [vmem:[%s3133_s10 + $0x70] sm:$0xff] }
 0x1e6   : > { %v699_v31 = vmul.f32 %v671_v2, %v3320_v34 }
 0x1e7   : > { %v4604_v45 = vpop.eup %2815  ;;  %v4606_v30 = vadd.f32 1e-06, %v1710_v39  ;;  %v4608_v32 = vadd.f32 1e-06, %v698_v42  ;;  %v2436_v60 = vadd.f32 %v4533_v38, %v2420_v19 }
 0x1e8   : > { %v2818_v40 = vpop.eup %2817  ;;  %v1825_v41 = vmul.f32 %v4604_v45, %v4574_v51  ;;  %v4612_v36 = vadd.f32 1e-06, %v699_v31  ;;  %vm1831_vm8 = vweird.f32 %v4604_v45 }
 0x1e9   : > { %v1302_v37 = vmul.f32 %v2818_v40, %v4576_v47  ;;  %2819 = vrsqrt.f32 %v4606_v30  ;;  %v2448_v46 = vpack.c.bf16 %v2436_v60, %v2435_v11  ;;  %vm1308_vm10 = vweird.f32 %v2818_v40  ;;  %vm4641_vm12 = vmor %vm1830_vm9, %vm1831_vm8 }
 0x1ea   : > { %v1826_v53 = vmul.f32 %v4604_v45, %v1825_v41  ;;  %2821 = vrsqrt.f32 %v4608_v32  ;;  %v1413_v47 = vmul.f32 %v4512_v7, %v1397_v8  ;;  %vm1309_vm13 = vmor %vm1307_vm11, %vm1308_vm10  ;;  %vm1820_vm14 = vweird.f32 %v4606_v30 }
 0x1eb   : > { %v1303_v15 = vmul.f32 %v2818_v40, %v1302_v37  ;;  %2823 = vrsqrt.f32 %v4612_v36  ;;  %2715 = vmatmul.msk.bf16.gmra.mxu3 %vm538_vm0, %v2448_v46  ;;  %v5275_v37 = vld [vmem:[#allocation8_spill] sm:$0xff]  ;;  %vm808_vm4 = vweird.f32 %v4608_v32  ;;  %vm818_vm5 = vweird.f32 %v4612_v36 }
 0x1ec   : > { %v1827_v28 = vmul.f32 0.5, %v1826_v53  ;;  %v1605_v55 = vpop.xlane.xlu1 %1604  ;;  %v1429_v14 = vadd.f32 %v4533_v38, %v1413_v47  ;;  %v5277_v47 = vld [vmem:[#allocation10_spill] sm:$0xff] }
 0x1ed   : > { %v1304_v43 = vmul.f32 0.5, %v1303_v15  ;;  %v1621_v27 = vmul.f32 %v1605_v55, %v3320_v34  ;;  %v583_v12 = vpop.xlane.xlu0 %582 }
 0x1ee   : > { %v1828_v62 = vsub.f32 1.5, %v1827_v28  ;;  %v608_v57 = vmul.f32 %v3320_v34, %v583_v12 }
 0x1ef   : > { %v2820_v18 = vpop.eup %2819  ;;  %v1305_v20 = vsub.f32 1.5, %v1304_v43  ;;  %v4631_v6 = vsub.f32 %v2899_v22, %v1621_v27  ;;  %v5276_v27 = vld [vmem:[#allocation7_spill] sm:$0xff] }
 0x1f0   : > { %v2822_v5 = vpop.eup %2821  ;;  %v1829_v63 = vmul.f32 %v4604_v45, %v1828_v62  ;;  %v1815_v54 = vmul.f32 %v2820_v18, %v4606_v30  ;;  %v4637_v33 = vsub.f32 %v2900_v9, %v608_v57  ;;  %vm1821_vm2 = vweird.f32 %v2820_v18 }
 0x1f1   : > { %v2824_v44 = vpop.eup %2823  ;;  %v1306_v39 = vmul.f32 %v2818_v40, %v1305_v20  ;;  %v803_v42 = vmul.f32 %v2822_v5, %v4608_v32  ;;  %v1653_v2 = vmul.f32 %v4631_v6, %v4631_v6  ;;  %vm809_vm15 = vweird.f32 %v2822_v5  ;;  %vm1822_vm3 = vmor %vm1820_vm14, %vm1821_vm2 }
 0x1f2   : > { %v1816_v48 = vmul.f32 %v2820_v18, %v1815_v54  ;;  %v813_v59 = vmul.f32 %v2824_v44, %v4612_v36  ;;  %v1833_v31 = vsel %vm4641_vm12, %v4604_v45, %v1829_v63  ;;  %v640_v46 = vmul.f32 %v4637_v33, %v4637_v33  ;;  %vm810_vm6 = vmor %vm808_vm4, %vm809_vm15 }
 0x1f3   : > { %v1310_v19 = vsel %vm1309_vm13, %v2818_v40, %v1306_v39  ;;  %v804_v41 = vmul.f32 %v2822_v5, %v803_v42  ;;  %v1699_v60 = vsel %vm538_vm0, %v1653_v2, 0.0  ;;  %v1903_v12 = vmul.f32 %v1833_v31, %v5276_v27  ;;  %v5278_v31 = vld [vmem:[#allocation11_spill] sm:$0xff] }
 0x1f4   : > { %v1398_v11 = vmul.f32 %v1310_v19, %v5275_v37  ;;  %v1817_v10 = vmul.f32 0.5, %v1816_v48  ;;  %v814_v53 = vmul.f32 %v2824_v44, %v813_v59  ;;  %v2183_v15 = vpop.xlane.xlu1 %2182  ;;  %1700 = vadd.xlane.f32.xlu1 %v1699_v60  ;;  %v684_v8 = vsel %vm538_vm0, %v640_v46, 0.0  ;;  %v5279_v60 = vld [vmem:[#allocation9_spill] sm:$0xff] }
 0x1f5   : > { %v805_v28 = vmul.f32 0.5, %v804_v41  ;;  %v2213_v55 = vmul.f32 %v2183_v15, %v3320_v34  ;;  %685 = vadd.xlane.f32.xlu2 %v684_v8  ;;  %vm819_vm1 = vweird.f32 %v2824_v44  ;;  %v1919_v32 = vmul.f32 %v4512_v7, %v1903_v12 }
 0x1f6   : > { %v1818_v45 = vsub.f32 1.5, %v1817_v10  ;;  %v815_v40 = vmul.f32 0.5, %v814_v53  ;;  %v1414_v43 = vmul.f32 %v4512_v7, %v1398_v11  ;;  %vm820_vm7 = vmor %vm818_vm5, %vm819_vm1  ;;  %v2901_v10 = vld [vmem:[%s3133_s10 + $0x1f8] sm:$0xff]  ;;  %vm2547_vm14 = vcmask 64512  }
 0x1f7   : > { %v806_v62 = vsub.f32 1.5, %v805_v28  ;;  %v4664_v57 = vadd.f32 1e-06, %v2213_v55  ;;  %v1935_v28 = vadd.f32 %v4533_v38, %v1919_v32 }
 0x1f8   : > { %v1819_v20 = vmul.f32 %v2820_v18, %v1818_v45  ;;  %v816_v22 = vsub.f32 1.5, %v815_v40  ;;  %v1430_v63 = vadd.f32 %v4533_v38, %v1414_v43 }
 0x1f9   : > { %v807_v54 = vmul.f32 %v2822_v5, %v806_v62  ;;  %v2186_v9 = vpop.xlane.xlu2 %2185  ;;  %2825 = vrsqrt.f32 %v4664_v57  ;;  %vm2323_vm9 = vweird.f32 %v4664_v57 }
 0x1fa   : > { %v1823_v51 = vsel %vm1822_vm3, %v2820_v18, %v1819_v20  ;;  %v817_v39 = vmul.f32 %v2824_v44, %v816_v22  ;;  %v2214_v42 = vmul.f32 %v2186_v9, %v3320_v34  ;;  %v1442_v2 = vpack.c.bf16 %v1430_v63, %v1429_v14 }
 0x1fb   : > { %v1902_v48 = vmul.f32 %v1823_v51, %v5277_v47  ;;  %v811_v59 = vsel %vm810_vm6, %v2822_v5, %v807_v54  ;;  %v2108_v30 = vpop.xlane.xlu0 %2107  ;;  %v2902_v51 = vld [vmem:[%s3133_s10 + $0x1f0] sm:$0xff] }
 0x1fc   : > { %v890_v36 = vmul.f32 %v811_v59, %v5278_v31  ;;  %v821_v19 = vsel %vm820_vm7, %v2824_v44, %v817_v39  ;;  %v2230_v41 = vadd.f32 1e-06, %v2214_v42  ;;  %v2124_v18 = vmul.f32 %v2108_v30, %v3320_v34  ;;  %2665 = vmatmul.msk.bf16.gmra.mxu1 %vm538_vm0, %v1442_v2  ;;  %v2903_v2 = vld [vmem:[%s3133_s10 + $0x78] sm:$0xff] }
 0x1fd   : > { %v891_v37 = vmul.f32 %v821_v19, %v5279_v60  ;;  %v1918_v11 = vmul.f32 %v4512_v7, %v1902_v48 }
 0x1fe   : > { %2827 = vrsqrt.f32 %v2230_v41  ;;  %v4683_v5 = vsub.f32 %v2901_v10, %v2124_v18  ;;  %v909_v53 = vmul.f32 %v4512_v7, %v890_v36  ;;  %vm2333_vm11 = vweird.f32 %v2230_v41 }
 0x1ff   : > { %v2826_v15 = vpop.eup %2825  ;;  %v910_v46 = vmul.f32 %v4512_v7, %v891_v37  ;;  %v1934_v44 = vadd.f32 %v4533_v38, %v1918_v11 }
 0x200   : > { %v2318_v55 = vmul.f32 %v2826_v15, %v4664_v57  ;;  %v2156_v14 = vmul.f32 %v4683_v5, %v4683_v5  ;;  %v928_v45 = vadd.f32 %v4533_v38, %v909_v53  ;;  %vm2324_vm8 = vweird.f32 %v2826_v15  ;;  %v5280_v53 = vld [vmem:[#allocation12_spill] sm:$0xff] }
 0x201   : > { %v2105_v40 = vpop.xlane.xlu2 %2104  ;;  %v929_v8 = vadd.f32 %v4533_v38, %v910_v46  ;;  %v1946_v43 = vpack.c.bf16 %v1935_v28, %v1934_v44  ;;  %vm2325_vm10 = vmor %vm2323_vm9, %vm2324_vm8  ;;  %v2904_v44 = vld [vmem:[%s3133_s10 + $0xf0] sm:$0xff] }
 0x202   : > { %v2319_v27 = vmul.f32 %v2826_v15, %v2318_v55  ;;  %v2123_v12 = vmul.f32 %v2105_v40, %v3320_v34  ;;  %v586_v62 = vpop.xlane.xlu1 %585  ;;  %v2202_v20 = vsel %vm538_vm0, %v2156_v14, 0.0 }
 0x203   : > { %v609_v22 = vmul.f32 %v3320_v34, %v586_v62  ;;  %2203 = vadd.xlane.f32.xlu2 %v2202_v20  ;;  %v940_v63 = vpack.c.bf16 %v929_v8, %v928_v45  ;;  %2691 = vmatmul.msk.bf16.gmra.mxu2 %vm538_vm0, %v1946_v43  ;;  %v982_v43 = vpop.f32.mrf.mxu0 }
 0x204   : > { %v2828_v54 = vpop.eup %2827  ;;  %v2320_v9 = vmul.f32 0.5, %v2319_v27  ;;  %v4699_v39 = vsub.f32 %v2902_v51, %v2123_v12  ;;  %v4728_v27 = vld [vmem:[%s5201_s4] ss:$0 sm:$0xff] }
 0x205   : > { %v2328_v42 = vmul.f32 %v2828_v54, %v2230_v41  ;;  %v4702_v47 = vsub.f32 %v2903_v2, %v609_v22  ;;  %2641 = vmatmul.msk.bf16.gmra.mxu0 %vm538_vm0, %v940_v63  ;;  %vm2334_vm12 = vweird.f32 %v2828_v54 }
 0x206   : > { %v2321_v48 = vsub.f32 1.5, %v2320_v9  ;;  %v2155_v59 = vmul.f32 %v4699_v39, %v4699_v39  ;;  %vm2335_vm13 = vmor %vm2333_vm11, %vm2334_vm12  ;;  %v1022_v9 = vadd.f32 %v4728_v27, %v982_v43 }
 0x207   : > { %v2329_v30 = vmul.f32 %v2828_v54, %v2328_v42  ;;  %v641_v32 = vmul.f32 %v4702_v47, %v4702_v47 }
 0x208   : > { %v2322_v31 = vmul.f32 %v2826_v15, %v2321_v48  ;;  %v2199_v36 = vsel %vm538_vm0, %v2155_v59, 0.0 }
 0x209   : > { %v2330_v19 = vmul.f32 0.5, %v2329_v30  ;;  %2200 = vadd.xlane.f32.xlu1 %v2199_v36  ;;  %v1099_v18 = vpop.xlane.xlu0 %1098  ;;  %v687_v60 = vsel %vm538_vm0, %v641_v32, 0.0 }
 0x20a   : > { %v2326_v37 = vsel %vm2325_vm10, %v2826_v15, %v2322_v31  ;;  %v1117_v11 = vmul.f32 %v1099_v18, %v3320_v34  ;;  %688 = vadd.xlane.f32.xlu0 %v687_v60 }
 0x20b   : > { %v2331_v10 = vsub.f32 1.5, %v2330_v19  ;;  %v2405_v46 = vmul.f32 %v2326_v37, %v5280_v53  ;;  %v2905_v37 = vld [vmem:[%s3133_s10 + $0xf8] sm:$0xff] }
 0x20c   : > { %v4715_v57 = vsub.f32 %v2904_v44, %v1117_v11 }
 0x20d   : > { %v2332_v28 = vmul.f32 %v2828_v54, %v2331_v10  ;;  %v2421_v15 = vmul.f32 %v4512_v7, %v2405_v46  ;;  %v984_v10 = vpop.f32.mrf.mxu0 }
 0x20e   : > { %v1149_v55 = vmul.f32 %v4715_v57, %v4715_v57 }
 0x20f   : > { %v2336_v14 = vsel %vm2335_vm13, %v2828_v54, %v2332_v28  ;;  %v1177_v45 = vpop.xlane.xlu1 %1176  ;;  %v2437_v20 = vadd.f32 %v4533_v38, %v2421_v15  ;;  %v1988_v54 = vpop.f32.mrf.mxu2 }
 0x210   : > { %v2406_v40 = vmul.f32 %v2336_v14, %v3893_v16  ;;  %v1207_v41 = vmul.f32 %v1177_v45, %v3320_v34  ;;  %v1193_v8 = vsel %vm538_vm0, %v1149_v55, 0.0  ;;  %v1023_v55 = vadd.f32 %v4728_v27, %v984_v10 }
 0x212   : > { %v1223_v12 = vadd.f32 1e-06, %v1207_v41  ;;  %1194 = vadd.xlane.f32.xlu0 %v1193_v8  ;;  %v2422_v62 = vmul.f32 %v4512_v7, %v2406_v40  ;;  %v2491_v36 = vpop.f32.mrf.mxu3 }
 0x214   : > { %2829 = vrsqrt.f32 %v1223_v12  ;;  %v2438_v16 = vadd.f32 %v4533_v38, %v2422_v62  ;;  %vm1317_vm15 = vweird.f32 %v1223_v12 }
 0x215   : > { %v1689_v22 = vpop.xlane.xlu0 %1688 }
 0x216   : > { %v1713_v63 = vmul.f32 %v1689_v22, %v3320_v34  ;;  %v1180_v51 = vpop.xlane.xlu2 %1179  ;;  %v2449_v42 = vpack.c.bf16 %v2438_v16, %v2437_v20 }
 0x217   : > { %v1208_v2 = vmul.f32 %v1180_v51, %v3320_v34  ;;  %v1102_v30 = vpop.xlane.xlu1 %1101  ;;  %v1990_v22 = vpop.f32.mrf.mxu2 }
 0x218   : > { %v4736_v48 = vadd.f32 1e-06, %v1713_v63  ;;  %v1485_v59 = vpop.f32.mrf.mxu1  ;;  %v1118_v31 = vmul.f32 %v1102_v30, %v3320_v34  ;;  %2716 = vmatmul.msk.bf16.gmra.mxu3 %vm538_vm0, %v2449_v42 }
 0x219   : > { %v1525_v32 = vadd.f32 %v1485_v59, %v1022_v9  ;;  %v4740_v19 = vadd.f32 1e-06, %v1208_v2 }
 0x21a   : > { %2831 = vrsqrt.f32 %v4736_v48  ;;  %v2830_v18 = vpop.eup %2829  ;;  %v4744_v11 = vsub.f32 %v2905_v37, %v1118_v31  ;;  %v2493_v2 = vpop.f32.mrf.mxu3  ;;  %vm1850_vm3 = vweird.f32 %v4736_v48 }
 0x21b   : > { %v2028_v60 = vadd.f32 %v1988_v54, %v1525_v32  ;;  %v1312_v53 = vmul.f32 %v2830_v18, %v1223_v12  ;;  %2833 = vrsqrt.f32 %v4740_v19  ;;  %vm1318_vm2 = vweird.f32 %v2830_v18  ;;  %v987_v31 = vpop.f32.mrf.mxu0 }
 0x21c   : > { %v1150_v44 = vmul.f32 %v4744_v11, %v4744_v11  ;;  %vm1319_vm1 = vmor %vm1317_vm15, %vm1318_vm2  ;;  %vm1327_vm6 = vweird.f32 %v4740_v19 }
 0x21d   : > { %v2531_v46 = vadd.f32 %v2491_v36, %v2028_v60  ;;  %v1313_v28 = vmul.f32 %v2830_v18, %v1312_v53 }
 0x21e   : > { %v1686_v15 = vpop.xlane.xlu2 %1685  ;;  %v1196_v14 = vsel %vm538_vm0, %v1150_v44, 0.0 }
 0x21f   : > { %2548 = vst.msk [vmem:[%s4750_s12] sm:$0xff] %vm2547_vm14, %v2531_v46  ;;  %v1314_v40 = vmul.f32 0.5, %v1313_v28  ;;  %v1712_v41 = vmul.f32 %v1686_v15, %v3320_v34  ;;  %1197 = vadd.xlane.f32.xlu1 %v1196_v14 }
 0x220   : > { %v4758_v45 = vpop.eup %2831  ;;  %v1487_v8 = vpop.f32.mrf.mxu1 }
 0x221   : > { %v1845_v43 = vmul.f32 %v4758_v45, %v4736_v48  ;;  %v1526_v62 = vadd.f32 %v1487_v8, %v1023_v55  ;;  %v2834_v20 = vpop.eup %2833  ;;  %v1315_v16 = vsub.f32 1.5, %v1314_v40  ;;  %v4763_v63 = vadd.f32 1e-06, %v1712_v41 }
 0x222   : > { %v1322_v54 = vmul.f32 %v2834_v20, %v4740_v19  ;;  %vm1851_vm4 = vweird.f32 %v4758_v45  ;;  %vm1328_vm5 = vweird.f32 %v2834_v20 }
 0x223   : > { %v1846_v9 = vmul.f32 %v4758_v45, %v1845_v43  ;;  %v2029_v51 = vadd.f32 %v1990_v22, %v1526_v62  ;;  %v1316_v42 = vmul.f32 %v2830_v18, %v1315_v16  ;;  %2835 = vrsqrt.f32 %v4763_v63  ;;  %vm4781_vm7 = vmor %vm1850_vm3, %vm1851_vm4 }
 0x224   : > { %v1323_v59 = vmul.f32 %v2834_v20, %v1322_v54  ;;  %vm1329_vm8 = vmor %vm1327_vm6, %vm1328_vm5  ;;  %v1024_v43 = vadd.f32 %v4728_v27, %v987_v31  ;;  %v1993_v54 = vpop.f32.mrf.mxu2  ;;  %vm1840_vm10 = vweird.f32 %v4763_v63 }
 0x225   : > { %v1847_v30 = vmul.f32 0.5, %v1846_v9  ;;  %v2532_v32 = vadd.f32 %v2493_v2, %v2029_v51  ;;  %v1320_v36 = vsel %vm1319_vm1, %v2830_v18, %v1316_v42 }
 0x226   : > { %v1324_v60 = vmul.f32 0.5, %v1323_v59  ;;  %v677_v10 = vpop.xlane.xlu2 %676  ;;  %v2189_v53 = vpop.xlane.xlu0 %2188  ;;  %v1399_v55 = vmul.f32 %v1320_v36, %v4044_v29 }
 0x227   : > { %v1848_v37 = vsub.f32 1.5, %v1847_v30  ;;  %2549 = vst.msk [vmem:[%s4750_s12 + $0x8] sm:$0xff] %vm2547_vm14, %v2532_v32  ;;  %v701_v46 = vmul.f32 %v677_v10, %v3320_v34  ;;  %v2215_v12 = vmul.f32 %v2189_v53, %v3320_v34  ;;  %v989_v36 = vpop.f32.mrf.mxu0 }
 0x228   : > { %v1325_v44 = vsub.f32 1.5, %v1324_v60  ;;  %v1415_v51 = vmul.f32 %v4512_v7, %v1399_v55 }
 0x229   : > { %v2836_v28 = vpop.eup %2835  ;;  %v4775_v18 = vadd.f32 1e-06, %v701_v46  ;;  %v4777_v15 = vadd.f32 1e-06, %v2215_v12  ;;  %v1849_v48 = vmul.f32 %v4758_v45, %v1848_v37 }
 0x22a   : > { %v1326_v14 = vmul.f32 %v2834_v20, %v1325_v44  ;;  %v1835_v41 = vmul.f32 %v2836_v28, %v4763_v63  ;;  %v674_v8 = vpop.xlane.xlu1 %673  ;;  %vm1841_vm9 = vweird.f32 %v2836_v28 }
 0x22b   : > { %2837 = vrsqrt.f32 %v4775_v18  ;;  %v700_v19 = vmul.f32 %v674_v8, %v3320_v34  ;;  %v1853_v42 = vsel %vm4781_vm7, %v4758_v45, %v1849_v48  ;;  %v1431_v45 = vadd.f32 %v4533_v38, %v1415_v51  ;;  %vm1842_vm11 = vmor %vm1840_vm10, %vm1841_vm9 }
 0x22c   : > { %v1330_v29 = vsel %vm1329_vm8, %v2834_v20, %v1326_v14  ;;  %v1836_v62 = vmul.f32 %v2836_v28, %v1835_v41  ;;  %2839 = vrsqrt.f32 %v4777_v15  ;;  %v1490_v22 = vpop.f32.mrf.mxu1  ;;  %v2496_v20 = vpop.f32.mrf.mxu3  ;;  %v1905_v60 = vmul.f32 %v1853_v42, %v4117_v21 }
 0x22d   : > { %v1400_v16 = vmul.f32 %v1330_v29, %v4114_v23  ;;  %v1527_v9 = vadd.f32 %v1490_v22, %v1024_v43  ;;  %v4795_v59 = vadd.f32 1e-06, %v700_v19  ;;  %v1025_v21 = vadd.f32 %v4728_v27, %v989_v36 }
 0x22e   : > { %v1837_v2 = vmul.f32 0.5, %v1836_v62  ;;  %vm838_vm12 = vweird.f32 %v4775_v18  ;;  %vm2343_vm2 = vweird.f32 %v4777_v15 }
 0x22f   : > { %v2030_v30 = vadd.f32 %v1993_v54, %v1527_v9  ;;  %v1416_v32 = vmul.f32 %v4512_v7, %v1400_v16  ;;  %2841 = vrsqrt.f32 %v4795_v59  ;;  %v1921_v16 = vmul.f32 %v4512_v7, %v1905_v60 }
 0x230   : > { %v1838_v31 = vsub.f32 1.5, %v1837_v2  ;;  %vm828_vm5 = vweird.f32 %v4795_v59 }
 0x231   : > { %v4799_v23 = vpop.eup %2837  ;;  %v2533_v37 = vadd.f32 %v2496_v20, %v2030_v30  ;;  %v1432_v10 = vadd.f32 %v4533_v38, %v1416_v32  ;;  %v1186_v53 = vpop.xlane.xlu0 %1185 }
 0x232   : > { %v4804_v46 = vpop.eup %2839  ;;  %v1839_v12 = vmul.f32 %v2836_v28, %v1838_v31  ;;  %v833_v44 = vmul.f32 %v4799_v23, %v4775_v18  ;;  %v2192_v55 = vpop.xlane.xlu1 %2191  ;;  %v1210_v14 = vmul.f32 %v1186_v53, %v3320_v34  ;;  %vm839_vm13 = vweird.f32 %v4799_v23 }
 0x233   : > { %v2338_v48 = vmul.f32 %v4804_v46, %v4777_v15  ;;  %2550 = vst.msk [vmem:[%s4750_s12 + $0x10] sm:$0xff] %vm2547_vm14, %v2533_v37  ;;  %v1443_v40 = vpack.c.bf16 %v1432_v10, %v1431_v45  ;;  %v2216_v41 = vmul.f32 %v2192_v55, %v3320_v34  ;;  %vm2344_vm15 = vweird.f32 %v4804_v46  ;;  %vm4836_vm1 = vmor %vm838_vm12, %vm839_vm13 }
 0x234   : > { %v1843_v8 = vsel %vm1842_vm11, %v2836_v28, %v1839_v12  ;;  %v834_v63 = vmul.f32 %v4799_v23, %v833_v44  ;;  %v4819_v43 = vadd.f32 1e-06, %v1210_v14  ;;  %v1492_v22 = vpop.f32.mrf.mxu1  ;;  %v2498_v37 = vpop.f32.mrf.mxu3  ;;  %v1937_v44 = vadd.f32 %v4533_v38, %v1921_v16  ;;  %vm4847_vm3 = vmor %vm2343_vm2, %vm2344_vm15 }
 0x235   : > { %v1904_v29 = vmul.f32 %v1843_v8, %v4199_v0  ;;  %v2339_v62 = vmul.f32 %v4804_v46, %v2338_v48  ;;  %2666 = vmatmul.msk.bf16.gmra.mxu1 %vm538_vm0, %v1443_v40  ;;  %v4824_v19 = vadd.f32 1e-06, %v2216_v41  ;;  %v2842_v9 = vpop.eup %2841  ;;  %v1528_v51 = vadd.f32 %v1492_v22, %v1025_v21  ;;  %v1995_v0 = vpop.f32.mrf.mxu2 }
 0x236   : > { %v1183_v54 = vpop.xlane.xlu2 %1182  ;;  %v835_v28 = vmul.f32 0.5, %v834_v63  ;;  %2843 = vrsqrt.f32 %v4819_v43  ;;  %v823_v2 = vmul.f32 %v2842_v9, %v4795_v59  ;;  %vm829_vm4 = vweird.f32 %v2842_v9 }
 0x237   : > { %v2340_v42 = vmul.f32 0.5, %v2339_v62  ;;  %2845 = vrsqrt.f32 %v4824_v19  ;;  %v2031_v30 = vadd.f32 %v1995_v0, %v1528_v51  ;;  %v1920_v32 = vmul.f32 %v4512_v7, %v1904_v29  ;;  %vm830_vm6 = vmor %vm828_vm5, %vm829_vm4 }
 0x238   : > { %v836_v20 = vsub.f32 1.5, %v835_v28  ;;  %v824_v60 = vmul.f32 %v2842_v9, %v823_v2  ;;  %v1209_v45 = vmul.f32 %v1183_v54, %v3320_v34  ;;  %vm1347_vm7 = vweird.f32 %v4819_v43 }
 0x239   : > { %v2341_v36 = vsub.f32 1.5, %v2340_v42  ;;  %v2534_v53 = vadd.f32 %v2498_v37, %v2031_v30  ;;  %v1936_v12 = vadd.f32 %v4533_v38, %v1920_v32  ;;  %vm2353_vm9 = vweird.f32 %v4824_v19 }
 0x23a   : > { %v837_v10 = vmul.f32 %v4799_v23, %v836_v20  ;;  %v1692_v55 = vpop.xlane.xlu1 %1691  ;;  %v825_v21 = vmul.f32 0.5, %v824_v60  ;;  %v4851_v48 = vadd.f32 1e-06, %v1209_v45 }
 0x23b   : > { %v2342_v18 = vmul.f32 %v4804_v46, %v2341_v36  ;;  %2551 = vst.msk [vmem:[%s4750_s12 + $0x18] sm:$0xff] %vm2547_vm14, %v2534_v53  ;;  %v1947_v8 = vpack.c.bf16 %v1937_v44, %v1936_v12  ;;  %v1714_v63 = vmul.f32 %v1692_v55, %v3320_v34 }
 0x23c   : > { %v2844_v40 = vpop.eup %2843  ;;  %v841_v41 = vsel %vm4836_vm1, %v4799_v23, %v837_v10  ;;  %v826_v62 = vsub.f32 1.5, %v825_v21  ;;  %2847 = vrsqrt.f32 %v4851_v48  ;;  %vm1337_vm12 = vweird.f32 %v4851_v48 }
 0x23d   : > { %v2846_v29 = vpop.eup %2845  ;;  %v1342_v15 = vmul.f32 %v2844_v40, %v4819_v43  ;;  %v893_v16 = vmul.f32 %v841_v41, %v4246_v25  ;;  %v2346_v54 = vsel %vm4847_vm3, %v4804_v46, %v2342_v18  ;;  %2692 = vmatmul.msk.bf16.gmra.mxu2 %vm538_vm0, %v1947_v8  ;;  %v4869_v25 = vadd.f32 1e-06, %v1714_v63 }
 0x23e   : > { %v1695_v22 = vpop.xlane.xlu2 %1694  ;;  %v2348_v28 = vmul.f32 %v2846_v29, %v4824_v19  ;;  %v827_v23 = vmul.f32 %v2842_v9, %v826_v62  ;;  %v2407_v46 = vmul.f32 %v2346_v54, %v4271_v52  ;;  %vm1348_vm8 = vweird.f32 %v2844_v40 }
 0x23f   : > { %v1343_v51 = vmul.f32 %v2844_v40, %v1342_v15  ;;  %v1715_v2 = vmul.f32 %v1695_v22, %v3320_v34  ;;  %2849 = vrsqrt.f32 %v4869_v25  ;;  %v912_v31 = vmul.f32 %v4512_v7, %v893_v16  ;;  %vm4882_vm11 = vmor %vm1347_vm7, %vm1348_vm8 }
 0x240   : > { %v992_v42 = vpop.f32.mrf.mxu0  ;;  %v2349_v0 = vmul.f32 %v2846_v29, %v2348_v28  ;;  %v831_v20 = vsel %vm830_vm6, %v2842_v9, %v827_v23  ;;  %v680_v36 = vpop.xlane.xlu0 %679  ;;  %vm2354_vm10 = vweird.f32 %v2846_v29  ;;  %v2423_v18 = vmul.f32 %v4512_v7, %v2407_v46 }
 0x241   : > { %v1344_v30 = vmul.f32 0.5, %v1343_v51  ;;  %v892_v32 = vmul.f32 %v831_v20, %v4284_v26  ;;  %v4877_v37 = vadd.f32 1e-06, %v1715_v2  ;;  %v702_v10 = vmul.f32 %v680_v36, %v3320_v34  ;;  %vm2355_vm13 = vmor %vm2353_vm9, %vm2354_vm10  ;;  %v1998_v46 = vpop.f32.mrf.mxu2 }
 0x242   : > { %v2350_v59 = vmul.f32 0.5, %v2349_v0  ;;  %v683_v45 = vpop.xlane.xlu1 %682  ;;  %v4888_v12 = vpop.eup %2847  ;;  %v931_v41 = vadd.f32 %v4533_v38, %v912_v31  ;;  %v1026_v63 = vadd.f32 %v4728_v27, %v992_v42  ;;  %vm1860_vm2 = vweird.f32 %v4869_v25 }
 0x243   : > { %v1345_v60 = vsub.f32 1.5, %v1344_v30  ;;  %v911_v9 = vmul.f32 %v4512_v7, %v892_v32  ;;  %v703_v53 = vmul.f32 %v683_v45, %v3320_v34  ;;  %2851 = vrsqrt.f32 %v4877_v37 }
 0x244   : > { %v2351_v52 = vsub.f32 1.5, %v2350_v59  ;;  %v4891_v55 = vadd.f32 1e-06, %v702_v10  ;;  %v1332_v43 = vmul.f32 %v4888_v12, %v4851_v48  ;;  %vm1338_vm15 = vweird.f32 %v4888_v12 }
 0x245   : > { %v1346_v44 = vmul.f32 %v2844_v40, %v1345_v60  ;;  %v930_v21 = vadd.f32 %v4533_v38, %v911_v9  ;;  %v4904_v62 = vadd.f32 1e-06, %v703_v53  ;;  %v4907_v15 = vpop.eup %2849  ;;  %vm1870_vm1 = vweird.f32 %v4877_v37  ;;  %v2501_v9 = vpop.f32.mrf.mxu3  ;;  %vm1339_vm7 = vmor %vm1337_vm12, %vm1338_vm15 }
 0x246   : > { %v2352_v14 = vmul.f32 %v2846_v29, %v2351_v52  ;;  %2853 = vrsqrt.f32 %v4891_v55  ;;  %v1333_v54 = vmul.f32 %v4888_v12, %v1332_v43  ;;  %v1855_v23 = vmul.f32 %v4907_v15, %v4869_v25 }
 0x247   : > { %v1350_v8 = vsel %vm4882_vm11, %v2844_v40, %v1346_v44  ;;  %v941_v28 = vpack.c.bf16 %v931_v41, %v930_v21  ;;  %2855 = vrsqrt.f32 %v4904_v62  ;;  %vm1861_vm3 = vweird.f32 %v4907_v15 }
 0x248   : > { %v2356_v22 = vsel %vm2355_vm13, %v2846_v29, %v2352_v14  ;;  %v1402_v16 = vmul.f32 %v1350_v8, %v4351_v24  ;;  %v994_v40 = vpop.f32.mrf.mxu0  ;;  %v1334_v51 = vmul.f32 0.5, %v1333_v54  ;;  %v2439_v24 = vadd.f32 %v4533_v38, %v2423_v18  ;;  %v2198_v29 = vpop.xlane.xlu0 %2197  ;;  %vm4954_vm8 = vmor %vm1860_vm2, %vm1861_vm3 }
 0x249   : > { %v2408_v19 = vmul.f32 %v2356_v22, %v4329_v56  ;;  %2642 = vmatmul.msk.bf16.gmra.mxu0 %vm538_vm0, %v941_v28  ;;  %v4920_v42 = vpop.eup %2851  ;;  %v1856_v56 = vmul.f32 %v4907_v15, %v1855_v23  ;;  %vm848_vm4 = vweird.f32 %v4891_v55  ;;  %v2218_v2 = vmul.f32 %v2198_v29, %v3320_v34 }
 0x24a   : > { %v1335_v20 = vsub.f32 1.5, %v1334_v51  ;;  %v1865_v30 = vmul.f32 %v4920_v42, %v4877_v37  ;;  %vm858_vm5 = vweird.f32 %v4904_v62  ;;  %v1027_v32 = vadd.f32 %v4728_v27, %v994_v40  ;;  %v4976_v51 = vld [vmem:[%s5198_s1] ss:$0 sm:$0xff] }
 0x24b   : > { %v2424_v0 = vmul.f32 %v4512_v7, %v2408_v19  ;;  %v1418_v31 = vmul.f32 %v4512_v7, %v1402_v16  ;;  %v1857_v60 = vmul.f32 0.5, %v1856_v56  ;;  %v4935_v52 = vadd.f32 1e-06, %v2218_v2 }
 0x24c   : > { %v1495_v59 = vpop.f32.mrf.mxu1  ;;  %v4932_v36 = vpop.eup %2853  ;;  %v1336_v26 = vmul.f32 %v4888_v12, %v1335_v20  ;;  %v1866_v53 = vmul.f32 %v4920_v42, %v1865_v30  ;;  %vm1871_vm6 = vweird.f32 %v4920_v42 }
 0x24d   : > { %v1529_v45 = vadd.f32 %v1495_v59, %v1026_v63  ;;  %v2440_v10 = vadd.f32 %v4533_v38, %v2424_v0  ;;  %v843_v44 = vmul.f32 %v4932_v36, %v4891_v55  ;;  %v4942_v18 = vpop.eup %2855  ;;  %v1858_v7 = vsub.f32 1.5, %v1857_v60  ;;  %vm1872_vm11 = vmor %vm1870_vm1, %vm1871_vm6  ;;  %v4993_v59 = vld [vmem:[%s5199_s2] ss:$0 sm:$0xff] }
 0x24e   : > { %2857 = vrsqrt.f32 %v4935_v52  ;;  %v1340_v21 = vsel %vm1339_vm7, %v4888_v12, %v1336_v26  ;;  %v1867_v8 = vmul.f32 0.5, %v1866_v53  ;;  %v853_v48 = vmul.f32 %v4942_v18, %v4904_v62 }
 0x24f   : > { %v2032_v14 = vadd.f32 %v1998_v46, %v1529_v45  ;;  %v2450_v43 = vpack.c.bf16 %v2440_v10, %v2439_v24  ;;  %v1434_v63 = vadd.f32 %v4533_v38, %v1418_v31  ;;  %v1401_v22 = vmul.f32 %v1340_v21, %v4369_v17  ;;  %v2000_v45 = vpop.f32.mrf.mxu2 }
 0x250   : > { %v1859_v16 = vmul.f32 %v4907_v15, %v1858_v7  ;;  %v844_v12 = vmul.f32 %v4932_v36, %v843_v44  ;;  %v2195_v25 = vpop.xlane.xlu2 %2194  ;;  %v1868_v28 = vsub.f32 1.5, %v1867_v8  ;;  %v854_v19 = vmul.f32 %v4942_v18, %v853_v48  ;;  %v2503_v7 = vpop.f32.mrf.mxu3 }
 0x251   : > { %v2535_v54 = vadd.f32 %v2501_v9, %v2032_v14  ;;  %2717 = vmatmul.msk.bf16.gmra.mxu3 %vm538_vm0, %v2450_v43  ;;  %vm849_vm9 = vweird.f32 %v4932_v36  ;;  %v2217_v23 = vmul.f32 %v2195_v25, %v3320_v34  ;;  %v1189_v40 = vpop.xlane.xlu1 %1188  ;;  %v1417_v24 = vmul.f32 %v4976_v51, %v1401_v22 }
 0x252   : > { %v1863_v17 = vsel %vm4954_vm8, %v4907_v15, %v1859_v16  ;;  %v845_v38 = vmul.f32 0.5, %v844_v12  ;;  %v1211_v29 = vmul.f32 %v1189_v40, %v3320_v34  ;;  %v1869_v56 = vmul.f32 %v4920_v42, %v1868_v28  ;;  %vm5004_vm12 = vmor %vm848_vm4, %vm849_vm9 }
 0x253   : > { %2552 = vst.msk [vmem:[%s4750_s12 + $0x20] sm:$0xff] %vm2547_vm14, %v2535_v54  ;;  %v855_v0 = vmul.f32 0.5, %v854_v19  ;;  %vm859_vm10 = vweird.f32 %v4942_v18  ;;  %v4982_v46 = vadd.f32 1e-06, %v2217_v23  ;;  %v1433_v31 = vadd.f32 %v4993_v59, %v1417_v24 }
 0x254   : > { %v1497_v2 = vpop.f32.mrf.mxu1  ;;  %v4984_v15 = vpop.eup %2857  ;;  %v846_v20 = vsub.f32 1.5, %v845_v38  ;;  %v4996_v60 = vadd.f32 1e-06, %v1211_v29  ;;  %v1906_v10 = vmul.f32 %v1863_v17, %v4372_v3  ;;  %v1873_v26 = vsel %vm1872_vm11, %v4920_v42, %v1869_v56  ;;  %vm5015_vm13 = vmor %vm858_vm5, %vm859_vm10 }
 0x255   : > { %v1530_v30 = vadd.f32 %v1497_v2, %v1027_v32  ;;  %v856_v9 = vsub.f32 1.5, %v855_v0  ;;  %v2368_v32 = vmul.f32 %v4984_v15, %v4935_v52  ;;  %v1907_v53 = vmul.f32 %v1873_v26, %v4387_v35 }
 0x256   : > { %v847_v42 = vmul.f32 %v4932_v36, %v846_v20  ;;  %v1444_v44 = vpack.c.bf16 %v1434_v63, %v1433_v31  ;;  %2859 = vrsqrt.f32 %v4982_v46  ;;  %v1922_v22 = vmul.f32 %v4976_v51, %v1906_v10 }
 0x257   : > { %v2033_v55 = vadd.f32 %v2000_v45, %v1530_v30  ;;  %v857_v14 = vmul.f32 %v4942_v18, %v856_v9  ;;  %v2369_v43 = vmul.f32 %v4984_v15, %v2368_v32  ;;  %2861 = vrsqrt.f32 %v4996_v60 }
 0x258   : > { %v1698_v35 = vpop.xlane.xlu0 %1697  ;;  %v851_v62 = vsel %vm5004_vm12, %v4932_v36, %v847_v42  ;;  %2667 = vmatmul.msk.bf16.gmra.mxu1 %vm538_vm0, %v1444_v44  ;;  %v1192_v41 = vpop.xlane.xlu2 %1191  ;;  %v1923_v36 = vmul.f32 %v4976_v51, %v1907_v53  ;;  %vm2373_vm2 = vweird.f32 %v4935_v52  ;;  %vm2374_vm15 = vweird.f32 %v4984_v15 }
 0x259   : > { %v2536_v21 = vadd.f32 %v2503_v7, %v2033_v55  ;;  %v861_v8 = vsel %vm5015_vm13, %v4942_v18, %v857_v14  ;;  %v894_v48 = vmul.f32 %v851_v62, %v4451_v4  ;;  %v2370_v63 = vmul.f32 0.5, %v2369_v43  ;;  %vm5048_vm1 = vmor %vm2373_vm2, %vm2374_vm15 }
 0x25a   : > { %v895_v16 = vmul.f32 %v861_v8, %v4454_v61  ;;  %v1212_v12 = vmul.f32 %v1192_v41, %v3320_v34  ;;  %v1716_v54 = vmul.f32 %v1698_v35, %v3320_v34  ;;  %v1938_v18 = vadd.f32 %v4993_v59, %v1922_v22 }
 0x25b   : > { %2553 = vst.msk [vmem:[%s4750_s12 + $0x28] sm:$0xff] %vm2547_vm14, %v2536_v21  ;;  %v2371_v25 = vsub.f32 1.5, %v2370_v63  ;;  %v913_v4 = vmul.f32 %v4976_v51, %v894_v48  ;;  %v1939_v28 = vadd.f32 %v4993_v59, %v1923_v36  ;;  %vm1357_vm3 = vweird.f32 %v4996_v60 }
 0x25c   : > { %v1228_v61 = vadd.f32 1e-06, %v1212_v12  ;;  %v5044_v19 = vadd.f32 1e-06, %v1716_v54  ;;  %v2860_v23 = vpop.eup %2859  ;;  %v914_v17 = vmul.f32 %v4976_v51, %v895_v16  ;;  %vm2363_vm6 = vweird.f32 %v4982_v46 }
 0x25d   : > { %v2372_v40 = vmul.f32 %v4984_v15, %v2371_v25  ;;  %v2862_v38 = vpop.eup %2861  ;;  %v2358_v52 = vmul.f32 %v2860_v23, %v4982_v46  ;;  %v1948_v29 = vpack.c.bf16 %v1939_v28, %v1938_v18  ;;  %v932_v0 = vadd.f32 %v4993_v59, %v913_v4 }
 0x25e   : > { %2863 = vrsqrt.f32 %v1228_v61  ;;  %v1352_v56 = vmul.f32 %v2862_v38, %v4996_v60  ;;  %v933_v31 = vadd.f32 %v4993_v59, %v914_v17  ;;  %vm1358_vm4 = vweird.f32 %v2862_v38 }
 0x25f   : > { %v2359_v2 = vmul.f32 %v2860_v23, %v2358_v52  ;;  %2693 = vmatmul.msk.bf16.gmra.mxu2 %vm538_vm0, %v1948_v29  ;;  %2865 = vrsqrt.f32 %v5044_v19  ;;  %v2376_v20 = vsel %vm5048_vm1, %v4984_v15, %v2372_v40  ;;  %vm2364_vm5 = vweird.f32 %v2860_v23  ;;  %vm5067_vm7 = vmor %vm1357_vm3, %vm1358_vm4 }
 0x260   : > { %v1353_v30 = vmul.f32 %v2862_v38, %v1352_v56  ;;  %v942_v26 = vpack.c.bf16 %v933_v31, %v932_v0  ;;  %v2410_v37 = vmul.f32 %v2376_v20, %v4493_v1  ;;  %vm2365_vm8 = vmor %vm2363_vm6, %vm2364_vm5  ;;  %vm1367_vm9 = vweird.f32 %v1228_v61  ;;  %v997_v24 = vpop.f32.mrf.mxu0 }
 0x261   : > { %v2360_v45 = vmul.f32 0.5, %v2359_v2  ;;  %vm1880_vm12 = vweird.f32 %v5044_v19 }
 0x262   : > { %v1354_v10 = vmul.f32 0.5, %v1353_v30  ;;  %2643 = vmatmul.msk.bf16.gmra.mxu0 %vm538_vm0, %v942_v26  ;;  %v2426_v35 = vmul.f32 %v4976_v51, %v2410_v37 }
 0x263   : > { %v2361_v32 = vsub.f32 1.5, %v2360_v45  ;;  %v1028_v45 = vadd.f32 %v4728_v27, %v997_v24 }
 0x264   : > { %v2864_v9 = vpop.eup %2863  ;;  %v1355_v53 = vsub.f32 1.5, %v1354_v10  ;;  %v2442_v4 = vadd.f32 %v4993_v59, %v2426_v35 }
 0x265   : > { %v1362_v3 = vmul.f32 %v2864_v9, %v1228_v61  ;;  %v5064_v42 = vpop.eup %2865  ;;  %v2362_v15 = vmul.f32 %v2860_v23, %v2361_v32  ;;  %vm1368_vm10 = vweird.f32 %v2864_v9  ;;  %v2003_v32 = vpop.f32.mrf.mxu2 }
 0x266   : > { %v1356_v44 = vmul.f32 %v2862_v38, %v1355_v53  ;;  %v1875_v1 = vmul.f32 %v5064_v42, %v5044_v19  ;;  %vm1369_vm11 = vmor %vm1367_vm9, %vm1368_vm10  ;;  %vm1881_vm13 = vweird.f32 %v5064_v42 }
 0x267   : > { %v1701_v60 = vpop.xlane.xlu1 %1700  ;;  %v1363_v7 = vmul.f32 %v2864_v9, %v1362_v3  ;;  %v2366_v14 = vsel %vm2365_vm8, %v2860_v23, %v2362_v15  ;;  %vm5094_vm2 = vmor %vm1880_vm12, %vm1881_vm13 }
 0x268   : > { %v1717_v43 = vmul.f32 %v1701_v60, %v3320_v34  ;;  %v2409_v62 = vmul.f32 %v2366_v14, %v4524_v13  ;;  %v1360_v46 = vsel %vm5067_vm7, %v2862_v38, %v1356_v44  ;;  %v1876_v41 = vmul.f32 %v5064_v42, %v1875_v1  ;;  %v686_v8 = vpop.xlane.xlu2 %685  ;;  %v999_v35 = vpop.f32.mrf.mxu0 }
 0x269   : > { %v1364_v21 = vmul.f32 0.5, %v1363_v7  ;;  %v704_v63 = vmul.f32 %v686_v8, %v3320_v34  ;;  %v1403_v12 = vmul.f32 %v1360_v46, %v4528_v49 }
 0x26a   : > { %v1733_v48 = vadd.f32 1e-06, %v1717_v43  ;;  %v1877_v16 = vmul.f32 0.5, %v1876_v41  ;;  %v2425_v36 = vmul.f32 %v4976_v51, %v2409_v62 }
 0x26b   : > { %v1365_v22 = vsub.f32 1.5, %v1364_v21  ;;  %v5082_v13 = vadd.f32 1e-06, %v704_v63  ;;  %v1419_v40 = vmul.f32 %v4976_v51, %v1403_v12 }
 0x26c   : > { %2867 = vrsqrt.f32 %v1733_v48  ;;  %v2441_v25 = vadd.f32 %v4993_v59, %v2425_v36  ;;  %v1878_v28 = vsub.f32 1.5, %v1877_v16  ;;  %vm1890_vm1 = vweird.f32 %v1733_v48 }
 0x26d   : > { %v1366_v54 = vmul.f32 %v2864_v9, %v1365_v22  ;;  %2869 = vrsqrt.f32 %v5082_v13  ;;  %v1029_v22 = vadd.f32 %v4728_v27, %v999_v35  ;;  %vm868_vm6 = vweird.f32 %v5082_v13 }
 0x26e   : > { %v2451_v61 = vpack.c.bf16 %v2442_v4, %v2441_v25  ;;  %v1879_v38 = vmul.f32 %v5064_v42, %v1878_v28  ;;  %v2005_v4 = vpop.f32.mrf.mxu2 }
 0x26f   : > { %v1370_v18 = vsel %vm1369_vm11, %v2864_v9, %v1366_v54 }
 0x270   : > { %v1404_v23 = vmul.f32 %v1370_v18, %v4548_v50  ;;  %2718 = vmatmul.msk.bf16.gmra.mxu3 %vm538_vm0, %v2451_v61  ;;  %v1435_v50 = vadd.f32 %v4993_v59, %v1419_v40  ;;  %v1883_v31 = vsel %vm5094_vm2, %v5064_v42, %v1879_v38  ;;  %v2506_v42 = vpop.f32.mrf.mxu3 }
 0x271   : > { %v1908_v15 = vmul.f32 %v1883_v31, %v4581_v58 }
 0x272   : > { %v2868_v49 = vpop.eup %2867  ;;  %v1420_v17 = vmul.f32 %v4976_v51, %v1404_v23 }
 0x273   : > { %v1885_v52 = vmul.f32 %v2868_v49, %v1733_v48  ;;  %v5100_v19 = vpop.eup %2869  ;;  %vm1891_vm15 = vweird.f32 %v2868_v49  ;;  %v1924_v41 = vmul.f32 %v4976_v51, %v1908_v15 }
 0x274   : > { %v1436_v56 = vadd.f32 %v4993_v59, %v1420_v17  ;;  %v863_v26 = vmul.f32 %v5100_v19, %v5082_v13  ;;  %vm1892_vm3 = vmor %vm1890_vm1, %vm1891_vm15  ;;  %vm869_vm7 = vweird.f32 %v5100_v19 }
 0x275   : > { %v1886_v0 = vmul.f32 %v2868_v49, %v1885_v52  ;;  %v1940_v25 = vadd.f32 %v4993_v59, %v1924_v41  ;;  %vm5129_vm9 = vmor %vm868_vm6, %vm869_vm7 }
 0x276   : > { %v2204_v2 = vpop.xlane.xlu2 %2203  ;;  %v1445_v30 = vpack.c.bf16 %v1436_v56, %v1435_v50  ;;  %v864_v7 = vmul.f32 %v5100_v19, %v863_v26 }
 0x277   : > { %v2220_v20 = vmul.f32 %v2204_v2, %v3320_v34  ;;  %v1887_v10 = vmul.f32 0.5, %v1886_v0 }
 0x278   : > { %2668 = vmatmul.msk.bf16.gmra.mxu1 %vm538_vm0, %v1445_v30  ;;  %v865_v63 = vmul.f32 0.5, %v864_v7  ;;  %v2508_v27 = vpop.f32.mrf.mxu3 }
 0x279   : > { %v2236_v9 = vadd.f32 1e-06, %v2220_v20  ;;  %v1500_v37 = vpop.f32.mrf.mxu1  ;;  %v1888_v53 = vsub.f32 1.5, %v1887_v10 }
 0x27a   : > { %v1531_v3 = vadd.f32 %v1500_v37, %v1028_v45  ;;  %v866_v28 = vsub.f32 1.5, %v865_v63 }
 0x27b   : > { %2871 = vrsqrt.f32 %v2236_v9  ;;  %v1889_v55 = vmul.f32 %v2868_v49, %v1888_v53  ;;  %vm2393_vm4 = vweird.f32 %v2236_v9 }
 0x27c   : > { %v2201_v60 = vpop.xlane.xlu1 %2200  ;;  %v2034_v44 = vadd.f32 %v2003_v32, %v1531_v3  ;;  %v867_v0 = vmul.f32 %v5100_v19, %v866_v28 }
 0x27d   : > { %v2219_v1 = vmul.f32 %v2201_v60, %v3320_v34  ;;  %v689_v14 = vpop.xlane.xlu0 %688  ;;  %v1893_v43 = vsel %vm1892_vm3, %v2868_v49, %v1889_v55 }
 0x27e   : > { %v705_v62 = vmul.f32 %v689_v14, %v3320_v34  ;;  %v2537_v46 = vadd.f32 %v2506_v42, %v2034_v44  ;;  %v1909_v58 = vmul.f32 %v1893_v43, %v4631_v6  ;;  %v871_v26 = vsel %vm5129_vm9, %v5100_v19, %v867_v0 }
 0x27f   : > { %v2235_v21 = vadd.f32 1e-06, %v2219_v1  ;;  %v896_v15 = vmul.f32 %v871_v26, %v4637_v33 }
 0x280   : > { %v721_v8 = vadd.f32 1e-06, %v705_v62  ;;  %2554 = vst.msk [vmem:[%s4750_s12 + $0x30] sm:$0xff] %vm2547_vm14, %v2537_v46  ;;  %v1925_v36 = vmul.f32 %v4976_v51, %v1909_v58 }
 0x281   : > { %v2872_v48 = vpop.eup %2871  ;;  %2873 = vrsqrt.f32 %v2235_v21  ;;  %v1502_v16 = vpop.f32.mrf.mxu1  ;;  %vm2383_vm10 = vweird.f32 %v2235_v21  ;;  %v915_v33 = vmul.f32 %v4976_v51, %v896_v15 }
 0x282   : > { %v2388_v12 = vmul.f32 %v2872_v48, %v2236_v9  ;;  %2875 = vrsqrt.f32 %v721_v8  ;;  %v1532_v54 = vadd.f32 %v1502_v16, %v1029_v22  ;;  %v1941_v6 = vadd.f32 %v4993_v59, %v1925_v36 }
 0x283   : > { %vm2394_vm5 = vweird.f32 %v2872_v48  ;;  %vm878_vm2 = vweird.f32 %v721_v8 }
 0x284   : > { %v2389_v18 = vmul.f32 %v2872_v48, %v2388_v12  ;;  %v2035_v23 = vadd.f32 %v2005_v4, %v1532_v54  ;;  %v1949_v40 = vpack.c.bf16 %v1941_v6, %v1940_v25  ;;  %vm2395_vm8 = vmor %vm2393_vm4, %vm2394_vm5 }
 0x285   : > { %v1195_v61 = vpop.xlane.xlu0 %1194 }
 0x286   : > { %v2390_v49 = vmul.f32 0.5, %v2389_v18  ;;  %v1213_v17 = vmul.f32 %v1195_v61, %v3320_v34  ;;  %v2538_v24 = vadd.f32 %v2508_v27, %v2035_v23  ;;  %2694 = vmatmul.msk.bf16.gmra.mxu2 %vm538_vm0, %v1949_v40 }
 0x287   : > { %v2874_v38 = vpop.eup %2873 }
 0x288   : > { %v2876_v52 = vpop.eup %2875  ;;  %v2391_v29 = vsub.f32 1.5, %v2390_v49  ;;  %v2378_v50 = vmul.f32 %v2874_v38, %v2235_v21  ;;  %v1229_v56 = vadd.f32 1e-06, %v1213_v17  ;;  %2555 = vst.msk [vmem:[%s4750_s12 + $0x38] sm:$0xff] %vm2547_vm14, %v2538_v24  ;;  %vm2384_vm11 = vweird.f32 %v2874_v38  ;;  %v1002_v49 = vpop.f32.mrf.mxu0 }
 0x289   : > { %v873_v2 = vmul.f32 %v2876_v52, %v721_v8  ;;  %vm879_vm12 = vweird.f32 %v2876_v52  ;;  %vm2385_vm13 = vmor %vm2383_vm10, %vm2384_vm11 }
 0x28a   : > { %v2392_v13 = vmul.f32 %v2872_v48, %v2391_v29  ;;  %v2379_v30 = vmul.f32 %v2874_v38, %v2378_v50  ;;  %2877 = vrsqrt.f32 %v1229_v56  ;;  %vm880_vm15 = vmor %vm878_vm2, %vm879_vm12  ;;  %vm1377_vm1 = vweird.f32 %v1229_v56 }
 0x28b   : > { %v874_v31 = vmul.f32 %v2876_v52, %v873_v2 }
 0x28c   : > { %v2396_v45 = vsel %vm2395_vm8, %v2872_v48, %v2392_v13  ;;  %v2380_v10 = vmul.f32 0.5, %v2379_v30 }
 0x28d   : > { %v875_v9 = vmul.f32 0.5, %v874_v31  ;;  %v2412_v37 = vmul.f32 %v2396_v45, %v4683_v5 }
 0x28e   : > { %v2381_v32 = vsub.f32 1.5, %v2380_v10 }
 0x28f   : > { %v876_v53 = vsub.f32 1.5, %v875_v9  ;;  %v2428_v19 = vmul.f32 %v4976_v51, %v2412_v37 }
 0x290   : > { %v2878_v3 = vpop.eup %2877  ;;  %v2382_v55 = vmul.f32 %v2874_v38, %v2381_v32 }
 0x291   : > { %v877_v42 = vmul.f32 %v2876_v52, %v876_v53  ;;  %v1372_v60 = vmul.f32 %v2878_v3, %v1229_v56  ;;  %v2444_v8 = vadd.f32 %v4993_v59, %v2428_v19  ;;  %vm1378_vm3 = vweird.f32 %v2878_v3  ;;  %v1004_v56 = vpop.f32.mrf.mxu0 }
 0x292   : > { %v2386_v44 = vsel %vm2385_vm13, %v2874_v38, %v2382_v55  ;;  %v1198_v7 = vpop.xlane.xlu1 %1197  ;;  %vm1379_vm4 = vmor %vm1377_vm1, %vm1378_vm3 }
 0x293   : > { %v2411_v5 = vmul.f32 %v2386_v44, %v4699_v39  ;;  %v881_v1 = vsel %vm880_vm15, %v2876_v52, %v877_v42  ;;  %v1373_v14 = vmul.f32 %v2878_v3, %v1372_v60  ;;  %v1214_v43 = vmul.f32 %v1198_v7, %v3320_v34 }
 0x294   : > { %v897_v35 = vmul.f32 %v881_v1, %v4702_v47  ;;  %v934_v39 = vadd.f32 %v4993_v59, %v915_v33 }
 0x295   : > { %v1230_v62 = vadd.f32 1e-06, %v1214_v43  ;;  %v2427_v46 = vmul.f32 %v4976_v51, %v2411_v5  ;;  %v1374_v58 = vmul.f32 0.5, %v1373_v14 }
 0x296   : > { %v916_v21 = vmul.f32 %v4976_v51, %v897_v35 }
 0x297   : > { %2879 = vrsqrt.f32 %v1230_v62  ;;  %v2443_v41 = vadd.f32 %v4993_v59, %v2427_v46  ;;  %v1375_v63 = vsub.f32 1.5, %v1374_v58  ;;  %vm1387_vm6 = vweird.f32 %v1230_v62 }
 0x298   : > { %v935_v48 = vadd.f32 %v4993_v59, %v916_v21 }
 0x299   : > { %v2452_v34 = vpack.c.bf16 %v2444_v8, %v2443_v41  ;;  %v1376_v16 = vmul.f32 %v2878_v3, %v1375_v63 }
 0x29a   : > { %v943_v47 = vpack.c.bf16 %v935_v48, %v934_v39 }
 0x29b   : > { %2719 = vmatmul.msk.bf16.gmra.mxu3 %vm538_vm0, %v2452_v34  ;;  %v1380_v54 = vsel %vm1379_vm4, %v2878_v3, %v1376_v16  ;;  %v2511_v29 = vpop.f32.mrf.mxu3 }
 0x29c   : > { %2644 = vmatmul.msk.bf16.gmra.mxu0 %vm538_vm0, %v943_v47  ;;  %v1405_v4 = vmul.f32 %v1380_v54, %v4715_v57  ;;  %v5160_v57 = vld [vmem:[%s5201_s4] ss:$0 sm:$0xff] }
 0x29d   : > { %v2880_v22 = vpop.eup %2879  ;;  %v1030_v24 = vadd.f32 %v5160_v57, %v1002_v49 }
 0x29e   : > { %v1382_v36 = vmul.f32 %v2880_v22, %v1230_v62  ;;  %vm1388_vm5 = vweird.f32 %v2880_v22  ;;  %v1421_v23 = vmul.f32 %v4976_v51, %v1405_v4 }
 0x29f   : > { %vm1389_vm7 = vmor %vm1387_vm6, %vm1388_vm5 }
 0x2a0   : > { %v1383_v12 = vmul.f32 %v2880_v22, %v1382_v36  ;;  %v1437_v27 = vadd.f32 %v4993_v59, %v1421_v23 }
 0x2a2   : > { %v1384_v25 = vmul.f32 0.5, %v1383_v12 }
 0x2a3   : > { %v2513_v31 = vpop.f32.mrf.mxu3 }
 0x2a4   : > { %v1385_v6 = vsub.f32 1.5, %v1384_v25 }
 0x2a6   : > { %v1386_v18 = vmul.f32 %v2880_v22, %v1385_v6 }
 0x2a8   : > { %v1390_v28 = vsel %vm1389_vm7, %v2880_v22, %v1386_v18 }
 0x2a9   : > { %v1406_v61 = vmul.f32 %v1390_v28, %v4744_v11  ;;  %v2008_v11 = vpop.f32.mrf.mxu2 }
 0x2ab   : > { %v1422_v40 = vmul.f32 %v4976_v51, %v1406_v61 }
 0x2ad   : > { %v1438_v17 = vadd.f32 %v4993_v59, %v1422_v40  ;;  %v1031_v59 = vadd.f32 %v5160_v57, %v1004_v56 }
 0x2af   : > { %v1446_v38 = vpack.c.bf16 %v1438_v17, %v1437_v27 }
 0x2b1   : > { %2669 = vmatmul.msk.bf16.gmra.mxu1 %vm538_vm0, %v1446_v38  ;;  %v2010_v13 = vpop.f32.mrf.mxu2 }
 0x2b2   : > { %v1505_v52 = vpop.f32.mrf.mxu1 }
 0x2b3   : > { %v1533_v51 = vadd.f32 %v1505_v52, %v1030_v24 }
 0x2b5   : > { %v2036_v50 = vadd.f32 %v2008_v11, %v1533_v51 }
 0x2b7   : > { %v2539_v0 = vadd.f32 %v2511_v29, %v2036_v50 }
 0x2b9   : > { %2556 = vst.msk [vmem:[%s4750_s12 + $0x40] sm:$0xff] %vm2547_vm14, %v2539_v0 }
 0x2ba   : > { %v1507_v2 = vpop.f32.mrf.mxu1 }
 0x2bb   : > { %v1534_v20 = vadd.f32 %v1507_v2, %v1031_v59 }
 0x2bd   : > { %v2037_v30 = vadd.f32 %v2010_v13, %v1534_v20 }
 0x2bf   : > { %v2540_v45 = vadd.f32 %v2513_v31, %v2037_v30 }
 0x2c0   : > { %v2013_v9 = vpop.f32.mrf.mxu2 }
 0x2c1   : > { %2557 = vst.msk [vmem:[%s4750_s12 + $0x48] sm:$0xff] %vm2547_vm14, %v2540_v45 }
 0x2c6   : > { %v1007_v10 = vpop.f32.mrf.mxu0 }
 0x2c7   : > { %v1032_v26 = vadd.f32 %v5160_v57, %v1007_v10 }
 0x2c8   : > { %v2015_v7 = vpop.f32.mrf.mxu2 }
 0x2ce   : > { %v1009_v15 = vpop.f32.mrf.mxu0 }
 0x2cf   : > { %v1033_v42 = vadd.f32 %v5160_v57, %v1009_v15 }
 0x2d4   : > { %v2516_v53 = vpop.f32.mrf.mxu3 }
 0x2d5   : > { %v1510_v37 = vpop.f32.mrf.mxu1 }
 0x2d6   : > { %v1535_v32 = vadd.f32 %v1510_v37, %v1032_v26 }
 0x2d8   : > { %v2038_v3 = vadd.f32 %v2013_v9, %v1535_v32 }
 0x2da   : > { %v2541_v55 = vadd.f32 %v2516_v53, %v2038_v3 }
 0x2dc   : > { %2558 = vst.msk [vmem:[%s4750_s12 + $0x50] sm:$0xff] %vm2547_vm14, %v2541_v55  ;;  %v2518_v5 = vpop.f32.mrf.mxu3 }
 0x2dd   : > { %v1512_v60 = vpop.f32.mrf.mxu1 }
 0x2de   : > { %v1536_v44 = vadd.f32 %v1512_v60, %v1033_v42 }
 0x2df   : > { %v1012_v14 = vpop.f32.mrf.mxu0 }
 0x2e0   : > { %v2039_v19 = vadd.f32 %v2015_v7, %v1536_v44  ;;  %v1034_v43 = vadd.f32 %v5160_v57, %v1012_v14 }
 0x2e2   : > { %v2542_v1 = vadd.f32 %v2518_v5, %v2039_v19  ;;  %v2018_v35 = vpop.f32.mrf.mxu2 }
 0x2e4   : > { %2559 = vst.msk [vmem:[%s4750_s12 + $0x58] sm:$0xff] %vm2547_vm14, %v2542_v1 }
 0x2e7   : > { %v1014_v21 = vpop.f32.mrf.mxu0 }
 0x2e8   : > { %v1035_v8 = vadd.f32 %v5160_v57, %v1014_v21 }
 0x2ea   : > { %v2020_v34 = vpop.f32.mrf.mxu2 }
 0x2f3   : > { %v2521_v46 = vpop.f32.mrf.mxu3 }
 0x2f5   : > { %v1515_v33 = vpop.f32.mrf.mxu1 }
 0x2f6   : > { %v1537_v62 = vadd.f32 %v1515_v33, %v1034_v43 }
 0x2f8   : > { %v2040_v58 = vadd.f32 %v2018_v35, %v1537_v62 }
 0x2fa   : > { %v2543_v41 = vadd.f32 %v2521_v46, %v2040_v58 }
 0x2fb   : > { %v2523_v47 = vpop.f32.mrf.mxu3 }
 0x2fc   : > { %2560 = vst.msk [vmem:[%s4750_s12 + $0x60] sm:$0xff] %vm2547_vm14, %v2543_v41 }
 0x2fd   : > { %v1517_v39 = vpop.f32.mrf.mxu1 }
 0x2fe   : > { %v1538_v48 = vadd.f32 %v1517_v39, %v1035_v8 }
 0x300   : > { %v2041_v63 = vadd.f32 %v2020_v34, %v1538_v48 }
 0x302   : > { %v2544_v22 = vadd.f32 %v2523_v47, %v2041_v63 }
 0x304   : > { %2561 = vst.msk [vmem:[%s4750_s12 + $0x68] sm:$0xff] %vm2547_vm14, %v2544_v22 }
 0x309   : > { %v2023_v12 = vpop.f32.mrf.mxu2 }
 0x311   : > { %v2025_v49 = vpop.f32.mrf.mxu2 }
 0x319   : > { %v1017_v16 = vpop.f32.mrf.mxu0 }
 0x31a   : > { %v1036_v36 = vadd.f32 %v5160_v57, %v1017_v16 }
 0x31e   : > { %v2526_v6 = vpop.f32.mrf.mxu3 }
 0x321   : > { %v1019_v18 = vpop.f32.mrf.mxu0 }
 0x322   : > { %v1037_v61 = vadd.f32 %v5160_v57, %v1019_v18 }
 0x326   : > { %v2528_v17 = vpop.f32.mrf.mxu3 }
 0x32e   : > { %v1520_v54 = vpop.f32.mrf.mxu1 }
 0x32f   : > { %v1539_v25 = vadd.f32 %v1520_v54, %v1036_v36 }
 0x331   : > { %v2042_v4 = vadd.f32 %v2023_v12, %v1539_v25 }
 0x333   : > { %v2545_v28 = vadd.f32 %v2526_v6, %v2042_v4 }
 0x335   : > { %2562 = vst.msk [vmem:[%s4750_s12 + $0x70] sm:$0xff] %vm2547_vm14, %v2545_v28 }
 0x336   : > { %v1522_v23 = vpop.f32.mrf.mxu1 }
 0x337   : > { %v1540_v40 = vadd.f32 %v1522_v23, %v1037_v61 }
 0x339   : > { %v2043_v27 = vadd.f32 %v2025_v49, %v1540_v40 }
 0x33b   : > { %v2546_v38 = vadd.f32 %v2528_v17, %v2043_v27 }
 0x33d   : > { %2563 = vst.msk [vmem:[%s4750_s12 + $0x78] sm:$0xff] %vm2547_vm14, %v2546_v38 }
 0x33e PF: > { %p12_p9 = scmp.ge.s32.totalorder %s2981_s22, 6   ;;  %s5303_s18 = smov %s2927_s19 }
 0x33f   : > { %s5304_s19 = smov %s2990_s25  ;;  %s5305_s20 = smov %s2981_s22 }
 0x340   :  { %14 = sbr.rel (!%p12_p9) target bundleno = 2 (0x2), region = 119 }

</bundles_post_ra>
